<compile_context>
chip_gen: v7x
topology: tpu7x:2x2x1
jax: 0.10.0
libtpu: 0.0.40
codegen_flags: <defaults>
</compile_context>

<pallas_src>
import functools

import jax
import jax.numpy as jnp
from jax.experimental import pallas as pl
from jax.experimental.pallas import tpu as pltpu


# ============================================================================
# Kernel 1: fused conv/pool stack (one batch sample per grid step)
# ============================================================================
def _conv_stack_kernel(img_ref,
                       w1, b1, w2, b2, w3, b3, w4, b4,
                       sh1, tw1, sh2, tw2, sh3, tw3,
                       o_ref, *, p, cins, couts):
    """conv1..conv4 (+ReLU) with the three 2x2 max-pools, fully in VMEM.

    Activations use a 2-D (H, W*C) layout so every step is either a plain
    2-D MXU matmul, an elementwise max, or a static slice.
    """

    def conv_relu(x, wbd_ref, btile_ref, cin, cout):
        h, wc = x.shape
        w = wc // cin
        ho, wo = h - p + 1, w - p + 1
        # Init accumulator with the broadcast bias tile (fuses the bias add).
        acc = jnp.broadcast_to(btile_ref[...], (ho, wo * cout))
        k = 0
        for di in range(p):
            for dj in range(p):
                xs = x[di:di + ho, dj * cin: dj * cin + wo * cin]
                acc = acc + jnp.dot(xs, wbd_ref[k],
                                    preferred_element_type=jnp.float32)
                k += 1
        return jnp.maximum(acc, 0.0)

    def max_pool_2x2(x, sh_ref, tw_ref, c):
        # rows: max of adjacent rows, then a 0/1 selection matmul keeps the
        # even rows (exact; selection matrices have a single 1 per row/col).
        mh = jnp.maximum(x[:-1, :], x[1:, :])
        ph = jnp.dot(sh_ref[...], mh, preferred_element_type=jnp.float32)
        # cols: max of adjacent width positions (stride C in merged lanes),
        # then a 0/1 selection matmul keeps the even width positions.
        mw = jnp.maximum(ph[:, :-c], ph[:, c:])
        return jnp.dot(mw, tw_ref[...], preferred_element_type=jnp.float32)

    x = img_ref[0]                                                # (H, W*Cin)
    x = max_pool_2x2(conv_relu(x, w1, b1, cins[0], couts[0]), sh1, tw1, couts[0])
    x = max_pool_2x2(conv_relu(x, w2, b2, cins[1], couts[1]), sh2, tw2, couts[1])
    x = max_pool_2x2(conv_relu(x, w3, b3, cins[2], couts[2]), sh3, tw3, couts[2])
    x = conv_relu(x, w4, b4, cins[3], couts[3])                   # (Ho4, Wo4)
    o_ref[0, :, :] = x


# ============================================================================
# Kernel 2: fused FC part (fc*, liner*, concat, liner_ME*)
# ============================================================================
def _fc_stack_kernel(x1_ref, x2_ref, *refs):
    (fc1w, fc1b, fc2w, fc2b, fc3w, fc3b, fc4w, fc4b,
     l1w, l1b, l2w, l2b, l3w, l3b, lo_w, lo_b,
     me1wa, me1wb, me1b, me2w, me2b, me3w, me3b, me4w, me4b,
     o_ref) = refs

    def dense(x, w_ref, b_ref, relu=True):
        y = jnp.dot(x, w_ref[...],
                    preferred_element_type=jnp.float32) + b_ref[...]
        return jnp.maximum(y, 0.0) if relu else y

    a = x1_ref[...]
    for w, b in ((fc1w, fc1b), (fc2w, fc2b), (fc3w, fc3b), (fc4w, fc4b)):
        a = dense(a, w, b)                        # (B, 1) after fc4
    t = x2_ref[...]
    for w, b in ((l1w, l1b), (l2w, l2b), (l3w, l3b), (lo_w, lo_b)):
        t = dense(t, w, b)                        # (B, 90) after liner_out
    # torch.cat((x1, x2), 1) @ W_ME1[:91]  ==  x1 * W_ME1[0] + x2 @ W_ME1[1:91]
    # (x1 is a single feature, so its contribution is a broadcast multiply).
    m = (a * me1wa[...]
         + jnp.dot(t, me1wb[...], preferred_element_type=jnp.float32)
         + me1b[...])
    m = jnp.maximum(m, 0.0)
    m = dense(m, me2w, me2b)
    m = dense(m, me3w, me3b)
    m = dense(m, me4w, me4b, relu=False)          # (B, 10)
    o_ref[...] = m


# ============================================================================
# One-time parameter preprocessing (outside the jitted forward)
# ============================================================================
def _conv_geometry(image_h, image_w, patch_size):
    """Per conv layer: (H_in, W_in, H_out, W_out); pools follow layers 0..2."""
    geo = []
    h, w = image_h, image_w
    for li in range(4):
        ho, wo = h - patch_size + 1, w - patch_size + 1
        geo.append((h, w, ho, wo))
        h, w = (ho // 2, wo // 2) if li < 3 else (ho, wo)
    return tuple(geo)


def preprocess_params(params, *, patch_size, patch_embedding_dim, ic,
                      image_h, image_w):
    """Convert PyTorch-layout params into kernel-ready arrays (done once).

    - conv weights (Cout,Cin,p,p) -> per-(di,dj) block-diagonal matrices of
      shape (Wo*Cin, Wo*Cout) for the merged (H, W*C) layout; biases tiled.
    - 0/1 selection matrices implement the stride-2 picks of the 2x2 pools.
    - Linear weights stay (in, out); biases become (1, out) rows.
    - liner_ME1 is split into row 0 (fc4 feature) and rows 1..90 (liner_out
      features); rows 91..99 only ever saw zero padding, so dropping them is
      numerically identical to the previous zero-pad-to-100.
    """
    p = patch_size
    D = patch_embedding_dim
    cins = (ic, D, D, D)
    couts = (D, D, D, 1)
    geo = _conv_geometry(image_h, image_w, p)

    conv_args = []
    for li, name in enumerate(("conv1", "conv2", "conv3", "conv4")):
        w, b = params[name]                       # (Cout, Cin, p, p)
        wo = geo[li][3]
        cin, cout = cins[li], couts[li]
        wk = jnp.transpose(w, (2, 3, 1, 0))       # (p, p, Cin, Cout)
        eye = jnp.eye(wo, dtype=jnp.float32)
        wbd = jnp.einsum("jk,abcd->abjckd", eye, wk)
        wbd = wbd.reshape(p * p, wo * cin, wo * cout)
        btile = jnp.tile(b, wo).reshape(1, wo * cout)
        conv_args += [wbd, btile]
    for li in range(3):                           # pools follow conv1..conv3
        ho, wo = geo[li][2], geo[li][3]
        c = couts[li]
        hp, wp = ho // 2, wo // 2
        sh = (jnp.arange(ho - 1)[None, :]
              == 2 * jnp.arange(hp)[:, None]).astype(jnp.float32)
        q = jnp.arange(wp * c)
        r = jnp.arange((wo - 1) * c)
        tw = (r[:, None]
              == (2 * (q // c) * c + (q % c))[None, :]).astype(jnp.float32)
        conv_args += [sh, tw]

    def lin(name):
        w, b = params[name]
        return [w, b.reshape(1, -1)]

    fc_args = []
    for name in ("fc1", "fc2", "fc3", "fc4",
                 "liner1", "liner2", "liner3", "liner_out"):
        fc_args += lin(name)
    me1w, me1b = params["liner_ME1"]
    # TODO(synk): the original PyTorch forward is shape-inconsistent here --
    # cat((x1, x2)) has 91 features but liner_ME1 expects 100 and would raise;
    # we keep the zero-pad-to-100 semantics, i.e. only rows 0..90 are used.
    fc_args += [me1w[0:1, :], me1w[1:91, :], me1b.reshape(1, -1)]
    for name in ("liner_ME2", "liner_ME3", "liner_ME4"):
        fc_args += lin(name)
    return tuple(conv_args), tuple(fc_args)


def _const_index(*_, ndim):
    return (0,) * ndim


# ============================================================================
# Forward pass (mirrors ML.forward) -- exactly two pallas_calls
# ============================================================================
def ml_forward(conv_args, fc_args, image, tabular, *,
               patch_size, patch_embedding_dim, ic, image_h, image_w):
    """image: (B, ic, H, W) NCHW (PyTorch convention); tabular: (B, 20)."""
    B = image.shape[0]
    D = patch_embedding_dim
    cins = (ic, D, D, D)
    couts = (D, D, D, 1)
    geo = _conv_geometry(image_h, image_w, patch_size)
    ho4, wo4 = geo[3][2], geo[3][3]

    # NCHW -> NHWC -> merged (B, H, W*Cin): the only XLA glue on the
    # activation path besides the tiny (B, Ho4*Wo4) flatten below.
    x = jnp.transpose(image, (0, 2, 3, 1)).reshape(B, image_h, image_w * ic)

    in_specs = [pl.BlockSpec((1, image_h, image_w * ic), lambda b: (b, 0, 0))]
    for a in conv_args:
        in_specs.append(
            pl.BlockSpec(a.shape, functools.partial(_const_index, ndim=a.ndim)))

    feats = pl.pallas_call(
        functools.partial(_conv_stack_kernel, p=patch_size,
                          cins=cins, couts=couts),
        out_shape=jax.ShapeDtypeStruct((B, ho4, wo4), jnp.float32),
        grid=(B,),
        in_specs=in_specs,
        out_specs=pl.BlockSpec((1, ho4, wo4), lambda b: (b, 0, 0)),
        compiler_params=pltpu.CompilerParams(
            dimension_semantics=("parallel",)),   # use both TCs on v7x
    )(x, *conv_args)

    # x1 = x1.view(B, -1): conv4 has one output channel, so the PyTorch NCHW
    # flatten is exactly the row-major (Ho, Wo) flatten of kernel 1's output.
    x1 = feats.reshape(B, ho4 * wo4)
    x2 = tabular.reshape(tabular.shape[0], -1)

    vmem = pl.BlockSpec(memory_space=pltpu.MemorySpace.VMEM)
    out = pl.pallas_call(
        _fc_stack_kernel,
        out_shape=jax.ShapeDtypeStruct((B, 10), jnp.float32),
        in_specs=[vmem] * (2 + len(fc_args)),
        out_specs=vmem,
    )(x1, x2, *fc_args)
    return out


# ============================================================================
# Parameter construction (deterministic, PyTorch-default-style uniform init)
# ============================================================================
def _init_linear(key, in_dim, out_dim):
    kw, kb = jax.random.split(key)
    s = 1.0 / jnp.sqrt(jnp.float32(in_dim))
    w = jax.random.uniform(kw, (in_dim, out_dim), jnp.float32, -s, s)
    b = jax.random.uniform(kb, (out_dim,), jnp.float32, -s, s)
    return w, b


def _init_conv(key, cin, cout, p):
    kw, kb = jax.random.split(key)
    s = 1.0 / jnp.sqrt(jnp.float32(cin * p * p))
    w = jax.random.uniform(kw, (cout, cin, p, p), jnp.float32, -s, s)
    b = jax.random.uniform(kb, (cout,), jnp.float32, -s, s)
    return w, b


def make_params(key, patch_size, patch_embedding_dim, ic, image_h, image_w):
    pool = 2
    conv2int = ((((image_h - patch_size + 1) // pool - patch_size + 1) // pool
                 - patch_size + 1) // pool - patch_size + 1) ** 2
    keys = jax.random.split(key, 16)
    D = patch_embedding_dim
    params = {
        "conv1": _init_conv(keys[0], ic, D, patch_size),
        "conv2": _init_conv(keys[1], D, D, patch_size),
        "conv3": _init_conv(keys[2], D, D, patch_size),
        "conv4": _init_conv(keys[3], D, 1, patch_size),
        "fc1": _init_linear(keys[4], conv2int, 128 * 4 * ic),
        "fc2": _init_linear(keys[5], 128 * 4 * ic, 128 * 2 * ic),
        "fc3": _init_linear(keys[6], 128 * 2 * ic, 128 * ic),
        "fc4": _init_linear(keys[7], 128 * ic, 1),
        "liner1": _init_linear(keys[8], 20, 512),
        "liner2": _init_linear(keys[9], 512, 256),
        "liner3": _init_linear(keys[10], 256, 128),
        "liner_out": _init_linear(keys[11], 128, 90),
        "liner_ME1": _init_linear(keys[12], 100, 64),
        "liner_ME2": _init_linear(keys[13], 64, 32),
        "liner_ME3": _init_linear(keys[14], 32, 16),
        "liner_ME4": _init_linear(keys[15], 16, 10),
    }
    return params, conv2int


# ============================================================================
# Pure-JAX (XLA) reference for a one-shot numerical cross-check
# ============================================================================
def _reference_forward(params, image, tabular):
    hi = jax.lax.Precision.HIGHEST

    def conv_relu(x, w, b):
        cout, cin, p, _ = w.shape
        bsz, h, wd, _ = x.shape
        ho, wo = h - p + 1, wd - p + 1
        cols = [x[:, di:di + ho, dj:dj + wo, :]
                for di in range(p) for dj in range(p)]
        patches = jnp.stack(cols, axis=3).reshape(bsz, ho, wo, p * p * cin)
        w2 = jnp.transpose(w, (2, 3, 1, 0)).reshape(p * p * cin, cout)
        y = jnp.einsum("bhwk,kn->bhwn", patches, w2, precision=hi) + b
        return jnp.maximum(y, 0.0)

    def pool(x):
        bsz, h, wd, c = x.shape
        hp, wp = h // 2, wd // 2
        x = x[:, :2 * hp, :2 * wp, :].reshape(bsz, hp, 2, wp, 2, c)
        return jnp.max(jnp.max(x, axis=4), axis=2)

    def dense(x, w, b, relu=True):
        y = jnp.dot(x, w, precision=hi) + b
        return jnp.maximum(y, 0.0) if relu else y

    bsz = image.shape[0]
    x = jnp.transpose(image, (0, 2, 3, 1))
    x = pool(conv_relu(x, *params["conv1"]))
    x = pool(conv_relu(x, *params["conv2"]))
    x = pool(conv_relu(x, *params["conv3"]))
    x = conv_relu(x, *params["conv4"])
    x1 = jnp.transpose(x, (0, 3, 1, 2)).reshape(bsz, -1)
    for n in ("fc1", "fc2", "fc3", "fc4"):
        x1 = dense(x1, *params[n])
    x2 = tabular.reshape(bsz, -1)
    for n in ("liner1", "liner2", "liner3", "liner_out"):
        x2 = dense(x2, *params[n])
    xc = jnp.concatenate([x1, x2], axis=1)
    xc = jnp.pad(xc, ((0, 0), (0, 100 - xc.shape[1])))
    xc = dense(xc, *params["liner_ME1"])
    xc = dense(xc, *params["liner_ME2"])
    xc = dense(xc, *params["liner_ME3"])
    xc = dense(xc, *params["liner_ME4"], relu=False)
    return xc


# ============================================================================
if __name__ == "__main__":
    patch_size = 3
    patch_embedding_dim = 8
    ic = 1
    image_h = image_w = 48   # image_h == image_w so conv2int is consistent
    batch = 2

    key = jax.random.PRNGKey(0)
    kp, ki, kt = jax.random.split(key, 3)
    params, conv2int = make_params(kp, patch_size, patch_embedding_dim,
                                   ic, image_h, image_w)
    geo = _conv_geometry(image_h, image_w, patch_size)
    assert conv2int == geo[3][2] * geo[3][3], (conv2int, geo)

    conv_args, fc_args = preprocess_params(
        params, patch_size=patch_size,
        patch_embedding_dim=patch_embedding_dim, ic=ic,
        image_h=image_h, image_w=image_w)

    image = jax.random.normal(ki, (batch, ic, image_h, image_w), jnp.float32)
    tabular = jax.random.normal(kt, (batch, 20), jnp.float32)

    fwd = jax.jit(functools.partial(
        ml_forward, patch_size=patch_size,
        patch_embedding_dim=patch_embedding_dim, ic=ic,
        image_h=image_h, image_w=image_w))
    out = jax.block_until_ready(fwd(conv_args, fc_args, image, tabular))
    assert out.shape == (batch, 10), out.shape

    ref = _reference_forward(params, image, tabular)
    assert bool(jnp.allclose(out, ref, rtol=5e-2, atol=5e-2)), (
        float(jnp.max(jnp.abs(out - ref))))

    print("KERNEL_OK")
</pallas_src>

<mosaic_0001>
module attributes {stable_mosaic.version = 11 : i64} {
  func.func @_conv_stack_kernel(%arg0: i32, %arg1: memref<1x48x48xf32, #tpu.memory_space<vmem>>, %arg2: memref<9x46x368xf32, #tpu.memory_space<vmem>>, %arg3: memref<1x368xf32, #tpu.memory_space<vmem>>, %arg4: memref<9x168x168xf32, #tpu.memory_space<vmem>>, %arg5: memref<1x168xf32, #tpu.memory_space<vmem>>, %arg6: memref<9x64x64xf32, #tpu.memory_space<vmem>>, %arg7: memref<1x64xf32, #tpu.memory_space<vmem>>, %arg8: memref<9x16x2xf32, #tpu.memory_space<vmem>>, %arg9: memref<1x2xf32, #tpu.memory_space<vmem>>, %arg10: memref<23x45xf32, #tpu.memory_space<vmem>>, %arg11: memref<360x184xf32, #tpu.memory_space<vmem>>, %arg12: memref<10x20xf32, #tpu.memory_space<vmem>>, %arg13: memref<160x80xf32, #tpu.memory_space<vmem>>, %arg14: memref<4x7xf32, #tpu.memory_space<vmem>>, %arg15: memref<56x32xf32, #tpu.memory_space<vmem>>, %arg16: memref<1x2x2xf32, #tpu.memory_space<vmem>>) attributes {dimension_semantics = [#tpu.dimension_semantics<parallel>], iteration_bounds = array<i64: 2>, scalar_prefetch = 0 : i64, scratch_operands = 0 : i64, tpu.core_type = #tpu.core_type<tc>, window_params = [{transform_indices = @transform_0, window_bounds = array<i64: 1, 48, 48>}, {pipeline_mode = #tpu.pipeline_mode<synchronous>, transform_indices = @transform_1, window_bounds = array<i64: 9, 46, 368>}, {pipeline_mode = #tpu.pipeline_mode<synchronous>, transform_indices = @transform_2, window_bounds = array<i64: 1, 368>}, {pipeline_mode = #tpu.pipeline_mode<synchronous>, transform_indices = @transform_3, window_bounds = array<i64: 9, 168, 168>}, {pipeline_mode = #tpu.pipeline_mode<synchronous>, transform_indices = @transform_4, window_bounds = array<i64: 1, 168>}, {pipeline_mode = #tpu.pipeline_mode<synchronous>, transform_indices = @transform_5, window_bounds = array<i64: 9, 64, 64>}, {pipeline_mode = #tpu.pipeline_mode<synchronous>, transform_indices = @transform_6, window_bounds = array<i64: 1, 64>}, {pipeline_mode = #tpu.pipeline_mode<synchronous>, transform_indices = @transform_7, window_bounds = array<i64: 9, 16, 2>}, {pipeline_mode = #tpu.pipeline_mode<synchronous>, transform_indices = @transform_8, window_bounds = array<i64: 1, 2>}, {pipeline_mode = #tpu.pipeline_mode<synchronous>, transform_indices = @transform_9, window_bounds = array<i64: 23, 45>}, {pipeline_mode = #tpu.pipeline_mode<synchronous>, transform_indices = @transform_10, window_bounds = array<i64: 360, 184>}, {pipeline_mode = #tpu.pipeline_mode<synchronous>, transform_indices = @transform_11, window_bounds = array<i64: 10, 20>}, {pipeline_mode = #tpu.pipeline_mode<synchronous>, transform_indices = @transform_12, window_bounds = array<i64: 160, 80>}, {pipeline_mode = #tpu.pipeline_mode<synchronous>, transform_indices = @transform_13, window_bounds = array<i64: 4, 7>}, {pipeline_mode = #tpu.pipeline_mode<synchronous>, transform_indices = @transform_14, window_bounds = array<i64: 56, 32>}, {transform_indices = @transform_15, window_bounds = array<i64: 1, 2, 2>}]} {
    %c0 = arith.constant 0 : index
    %c0_0 = arith.constant 0 : index
    %c0_1 = arith.constant 0 : index
    %0 = vector.load %arg1[%c0, %c0_0, %c0_1] : memref<1x48x48xf32, #tpu.memory_space<vmem>>, vector<1x48x48xf32>
    %1 = vector.shape_cast %0 : vector<1x48x48xf32> to vector<48x48xf32>
    %c0_2 = arith.constant 0 : index
    %c0_3 = arith.constant 0 : index
    %2 = vector.load %arg3[%c0_2, %c0_3] : memref<1x368xf32, #tpu.memory_space<vmem>>, vector<1x368xf32>
    %3 = vector.shape_cast %2 : vector<1x368xf32> to vector<1x368xf32>
    %4 = vector.broadcast %3 : vector<1x368xf32> to vector<46x368xf32>
    %5 = vector.extract_strided_slice %1 {offsets = [0, 0], sizes = [46, 46], strides = [1, 1]} : vector<48x48xf32> to vector<46x46xf32>
    %c0_4 = arith.constant 0 : index
    %c0_5 = arith.constant 0 : index
    %c0_6 = arith.constant 0 : index
    %6 = vector.load %arg2[%c0_4, %c0_5, %c0_6] : memref<9x46x368xf32, #tpu.memory_space<vmem>>, vector<1x46x368xf32>
    %7 = vector.shape_cast %6 : vector<1x46x368xf32> to vector<46x368xf32>
    %cst = arith.constant dense<0.000000e+00> : vector<46x368xf32>
    %8 = tpu.matmul %5, %7, %cst {dimension_numbers = #tpu.dot_dimension_numbers<[1], [0], [0], [1], [0, 0, 1, 1], [], []>} : vector<46x46xf32>, vector<46x368xf32>, vector<46x368xf32> -> vector<46x368xf32>
    %9 = arith.addf %4, %8 : vector<46x368xf32>
    %10 = vector.extract_strided_slice %1 {offsets = [0, 1], sizes = [46, 46], strides = [1, 1]} : vector<48x48xf32> to vector<46x46xf32>
    %c1 = arith.constant 1 : index
    %c0_7 = arith.constant 0 : index
    %c0_8 = arith.constant 0 : index
    %11 = vector.load %arg2[%c1, %c0_7, %c0_8] : memref<9x46x368xf32, #tpu.memory_space<vmem>>, vector<1x46x368xf32>
    %12 = vector.shape_cast %11 : vector<1x46x368xf32> to vector<46x368xf32>
    %cst_9 = arith.constant dense<0.000000e+00> : vector<46x368xf32>
    %13 = tpu.matmul %10, %12, %cst_9 {dimension_numbers = #tpu.dot_dimension_numbers<[1], [0], [0], [1], [0, 0, 1, 1], [], []>} : vector<46x46xf32>, vector<46x368xf32>, vector<46x368xf32> -> vector<46x368xf32>
    %14 = arith.addf %9, %13 : vector<46x368xf32>
    %15 = vector.extract_strided_slice %1 {offsets = [0, 2], sizes = [46, 46], strides = [1, 1]} : vector<48x48xf32> to vector<46x46xf32>
    %c2 = arith.constant 2 : index
    %c0_10 = arith.constant 0 : index
    %c0_11 = arith.constant 0 : index
    %16 = vector.load %arg2[%c2, %c0_10, %c0_11] : memref<9x46x368xf32, #tpu.memory_space<vmem>>, vector<1x46x368xf32>
    %17 = vector.shape_cast %16 : vector<1x46x368xf32> to vector<46x368xf32>
    %cst_12 = arith.constant dense<0.000000e+00> : vector<46x368xf32>
    %18 = tpu.matmul %15, %17, %cst_12 {dimension_numbers = #tpu.dot_dimension_numbers<[1], [0], [0], [1], [0, 0, 1, 1], [], []>} : vector<46x46xf32>, vector<46x368xf32>, vector<46x368xf32> -> vector<46x368xf32>
    %19 = arith.addf %14, %18 : vector<46x368xf32>
    %20 = vector.extract_strided_slice %1 {offsets = [1, 0], sizes = [46, 46], strides = [1, 1]} : vector<48x48xf32> to vector<46x46xf32>
    %c3 = arith.constant 3 : index
    %c0_13 = arith.constant 0 : index
    %c0_14 = arith.constant 0 : index
    %21 = vector.load %arg2[%c3, %c0_13, %c0_14] : memref<9x46x368xf32, #tpu.memory_space<vmem>>, vector<1x46x368xf32>
    %22 = vector.shape_cast %21 : vector<1x46x368xf32> to vector<46x368xf32>
    %cst_15 = arith.constant dense<0.000000e+00> : vector<46x368xf32>
    %23 = tpu.matmul %20, %22, %cst_15 {dimension_numbers = #tpu.dot_dimension_numbers<[1], [0], [0], [1], [0, 0, 1, 1], [], []>} : vector<46x46xf32>, vector<46x368xf32>, vector<46x368xf32> -> vector<46x368xf32>
    %24 = arith.addf %19, %23 : vector<46x368xf32>
    %25 = vector.extract_strided_slice %1 {offsets = [1, 1], sizes = [46, 46], strides = [1, 1]} : vector<48x48xf32> to vector<46x46xf32>
    %c4 = arith.constant 4 : index
    %c0_16 = arith.constant 0 : index
    %c0_17 = arith.constant 0 : index
    %26 = vector.load %arg2[%c4, %c0_16, %c0_17] : memref<9x46x368xf32, #tpu.memory_space<vmem>>, vector<1x46x368xf32>
    %27 = vector.shape_cast %26 : vector<1x46x368xf32> to vector<46x368xf32>
    %cst_18 = arith.constant dense<0.000000e+00> : vector<46x368xf32>
    %28 = tpu.matmul %25, %27, %cst_18 {dimension_numbers = #tpu.dot_dimension_numbers<[1], [0], [0], [1], [0, 0, 1, 1], [], []>} : vector<46x46xf32>, vector<46x368xf32>, vector<46x368xf32> -> vector<46x368xf32>
    %29 = arith.addf %24, %28 : vector<46x368xf32>
    %30 = vector.extract_strided_slice %1 {offsets = [1, 2], sizes = [46, 46], strides = [1, 1]} : vector<48x48xf32> to vector<46x46xf32>
    %c5 = arith.constant 5 : index
    %c0_19 = arith.constant 0 : index
    %c0_20 = arith.constant 0 : index
    %31 = vector.load %arg2[%c5, %c0_19, %c0_20] : memref<9x46x368xf32, #tpu.memory_space<vmem>>, vector<1x46x368xf32>
    %32 = vector.shape_cast %31 : vector<1x46x368xf32> to vector<46x368xf32>
    %cst_21 = arith.constant dense<0.000000e+00> : vector<46x368xf32>
    %33 = tpu.matmul %30, %32, %cst_21 {dimension_numbers = #tpu.dot_dimension_numbers<[1], [0], [0], [1], [0, 0, 1, 1], [], []>} : vector<46x46xf32>, vector<46x368xf32>, vector<46x368xf32> -> vector<46x368xf32>
    %34 = arith.addf %29, %33 : vector<46x368xf32>
    %35 = vector.extract_strided_slice %1 {offsets = [2, 0], sizes = [46, 46], strides = [1, 1]} : vector<48x48xf32> to vector<46x46xf32>
    %c6 = arith.constant 6 : index
    %c0_22 = arith.constant 0 : index
    %c0_23 = arith.constant 0 : index
    %36 = vector.load %arg2[%c6, %c0_22, %c0_23] : memref<9x46x368xf32, #tpu.memory_space<vmem>>, vector<1x46x368xf32>
    %37 = vector.shape_cast %36 : vector<1x46x368xf32> to vector<46x368xf32>
    %cst_24 = arith.constant dense<0.000000e+00> : vector<46x368xf32>
    %38 = tpu.matmul %35, %37, %cst_24 {dimension_numbers = #tpu.dot_dimension_numbers<[1], [0], [0], [1], [0, 0, 1, 1], [], []>} : vector<46x46xf32>, vector<46x368xf32>, vector<46x368xf32> -> vector<46x368xf32>
    %39 = arith.addf %34, %38 : vector<46x368xf32>
    %40 = vector.extract_strided_slice %1 {offsets = [2, 1], sizes = [46, 46], strides = [1, 1]} : vector<48x48xf32> to vector<46x46xf32>
    %c7 = arith.constant 7 : index
    %c0_25 = arith.constant 0 : index
    %c0_26 = arith.constant 0 : index
    %41 = vector.load %arg2[%c7, %c0_25, %c0_26] : memref<9x46x368xf32, #tpu.memory_space<vmem>>, vector<1x46x368xf32>
    %42 = vector.shape_cast %41 : vector<1x46x368xf32> to vector<46x368xf32>
    %cst_27 = arith.constant dense<0.000000e+00> : vector<46x368xf32>
    %43 = tpu.matmul %40, %42, %cst_27 {dimension_numbers = #tpu.dot_dimension_numbers<[1], [0], [0], [1], [0, 0, 1, 1], [], []>} : vector<46x46xf32>, vector<46x368xf32>, vector<46x368xf32> -> vector<46x368xf32>
    %44 = arith.addf %39, %43 : vector<46x368xf32>
    %45 = vector.extract_strided_slice %1 {offsets = [2, 2], sizes = [46, 46], strides = [1, 1]} : vector<48x48xf32> to vector<46x46xf32>
    %c8 = arith.constant 8 : index
    %c0_28 = arith.constant 0 : index
    %c0_29 = arith.constant 0 : index
    %46 = vector.load %arg2[%c8, %c0_28, %c0_29] : memref<9x46x368xf32, #tpu.memory_space<vmem>>, vector<1x46x368xf32>
    %47 = vector.shape_cast %46 : vector<1x46x368xf32> to vector<46x368xf32>
    %cst_30 = arith.constant dense<0.000000e+00> : vector<46x368xf32>
    %48 = tpu.matmul %45, %47, %cst_30 {dimension_numbers = #tpu.dot_dimension_numbers<[1], [0], [0], [1], [0, 0, 1, 1], [], []>} : vector<46x46xf32>, vector<46x368xf32>, vector<46x368xf32> -> vector<46x368xf32>
    %49 = arith.addf %44, %48 : vector<46x368xf32>
    %cst_31 = arith.constant 0.000000e+00 : f32
    %50 = vector.broadcast %cst_31 : f32 to vector<46x368xf32>
    %51 = arith.maximumf %49, %50 : vector<46x368xf32>
    %52 = vector.extract_strided_slice %51 {offsets = [0, 0], sizes = [45, 368], strides = [1, 1]} : vector<46x368xf32> to vector<45x368xf32>
    %53 = vector.extract_strided_slice %51 {offsets = [1, 0], sizes = [45, 368], strides = [1, 1]} : vector<46x368xf32> to vector<45x368xf32>
    %54 = arith.maximumf %52, %53 : vector<45x368xf32>
    %c0_32 = arith.constant 0 : index
    %c0_33 = arith.constant 0 : index
    %55 = vector.load %arg10[%c0_32, %c0_33] : memref<23x45xf32, #tpu.memory_space<vmem>>, vector<23x45xf32>
    %cst_34 = arith.constant dense<0.000000e+00> : vector<23x368xf32>
    %56 = tpu.matmul %55, %54, %cst_34 {dimension_numbers = #tpu.dot_dimension_numbers<[1], [0], [0], [1], [0, 0, 1, 1], [], []>} : vector<23x45xf32>, vector<45x368xf32>, vector<23x368xf32> -> vector<23x368xf32>
    %57 = vector.extract_strided_slice %56 {offsets = [0, 0], sizes = [23, 360], strides = [1, 1]} : vector<23x368xf32> to vector<23x360xf32>
    %58 = vector.extract_strided_slice %56 {offsets = [0, 8], sizes = [23, 360], strides = [1, 1]} : vector<23x368xf32> to vector<23x360xf32>
    %59 = arith.maximumf %57, %58 : vector<23x360xf32>
    %c0_35 = arith.constant 0 : index
    %c0_36 = arith.constant 0 : index
    %60 = vector.load %arg11[%c0_35, %c0_36] : memref<360x184xf32, #tpu.memory_space<vmem>>, vector<360x184xf32>
    %cst_37 = arith.constant dense<0.000000e+00> : vector<23x184xf32>
    %61 = tpu.matmul %59, %60, %cst_37 {dimension_numbers = #tpu.dot_dimension_numbers<[1], [0], [0], [1], [0, 0, 1, 1], [], []>} : vector<23x360xf32>, vector<360x184xf32>, vector<23x184xf32> -> vector<23x184xf32>
    %c0_38 = arith.constant 0 : index
    %c0_39 = arith.constant 0 : index
    %62 = vector.load %arg5[%c0_38, %c0_39] : memref<1x168xf32, #tpu.memory_space<vmem>>, vector<1x168xf32>
    %63 = vector.shape_cast %62 : vector<1x168xf32> to vector<1x168xf32>
    %64 = vector.broadcast %63 : vector<1x168xf32> to vector<21x168xf32>
    %65 = vector.extract_strided_slice %61 {offsets = [0, 0], sizes = [21, 168], strides = [1, 1]} : vector<23x184xf32> to vector<21x168xf32>
    %c0_40 = arith.constant 0 : index
    %c0_41 = arith.constant 0 : index
    %c0_42 = arith.constant 0 : index
    %66 = vector.load %arg4[%c0_40, %c0_41, %c0_42] : memref<9x168x168xf32, #tpu.memory_space<vmem>>, vector<1x168x168xf32>
    %67 = vector.shape_cast %66 : vector<1x168x168xf32> to vector<168x168xf32>
    %cst_43 = arith.constant dense<0.000000e+00> : vector<21x168xf32>
    %68 = tpu.matmul %65, %67, %cst_43 {dimension_numbers = #tpu.dot_dimension_numbers<[1], [0], [0], [1], [0, 0, 1, 1], [], []>} : vector<21x168xf32>, vector<168x168xf32>, vector<21x168xf32> -> vector<21x168xf32>
    %69 = arith.addf %64, %68 : vector<21x168xf32>
    %70 = vector.extract_strided_slice %61 {offsets = [0, 8], sizes = [21, 168], strides = [1, 1]} : vector<23x184xf32> to vector<21x168xf32>
    %c1_44 = arith.constant 1 : index
    %c0_45 = arith.constant 0 : index
    %c0_46 = arith.constant 0 : index
    %71 = vector.load %arg4[%c1_44, %c0_45, %c0_46] : memref<9x168x168xf32, #tpu.memory_space<vmem>>, vector<1x168x168xf32>
    %72 = vector.shape_cast %71 : vector<1x168x168xf32> to vector<168x168xf32>
    %cst_47 = arith.constant dense<0.000000e+00> : vector<21x168xf32>
    %73 = tpu.matmul %70, %72, %cst_47 {dimension_numbers = #tpu.dot_dimension_numbers<[1], [0], [0], [1], [0, 0, 1, 1], [], []>} : vector<21x168xf32>, vector<168x168xf32>, vector<21x168xf32> -> vector<21x168xf32>
    %74 = arith.addf %69, %73 : vector<21x168xf32>
    %75 = vector.extract_strided_slice %61 {offsets = [0, 16], sizes = [21, 168], strides = [1, 1]} : vector<23x184xf32> to vector<21x168xf32>
    %c2_48 = arith.constant 2 : index
    %c0_49 = arith.constant 0 : index
    %c0_50 = arith.constant 0 : index
    %76 = vector.load %arg4[%c2_48, %c0_49, %c0_50] : memref<9x168x168xf32, #tpu.memory_space<vmem>>, vector<1x168x168xf32>
    %77 = vector.shape_cast %76 : vector<1x168x168xf32> to vector<168x168xf32>
    %cst_51 = arith.constant dense<0.000000e+00> : vector<21x168xf32>
    %78 = tpu.matmul %75, %77, %cst_51 {dimension_numbers = #tpu.dot_dimension_numbers<[1], [0], [0], [1], [0, 0, 1, 1], [], []>} : vector<21x168xf32>, vector<168x168xf32>, vector<21x168xf32> -> vector<21x168xf32>
    %79 = arith.addf %74, %78 : vector<21x168xf32>
    %80 = vector.extract_strided_slice %61 {offsets = [1, 0], sizes = [21, 168], strides = [1, 1]} : vector<23x184xf32> to vector<21x168xf32>
    %c3_52 = arith.constant 3 : index
    %c0_53 = arith.constant 0 : index
    %c0_54 = arith.constant 0 : index
    %81 = vector.load %arg4[%c3_52, %c0_53, %c0_54] : memref<9x168x168xf32, #tpu.memory_space<vmem>>, vector<1x168x168xf32>
    %82 = vector.shape_cast %81 : vector<1x168x168xf32> to vector<168x168xf32>
    %cst_55 = arith.constant dense<0.000000e+00> : vector<21x168xf32>
    %83 = tpu.matmul %80, %82, %cst_55 {dimension_numbers = #tpu.dot_dimension_numbers<[1], [0], [0], [1], [0, 0, 1, 1], [], []>} : vector<21x168xf32>, vector<168x168xf32>, vector<21x168xf32> -> vector<21x168xf32>
    %84 = arith.addf %79, %83 : vector<21x168xf32>
    %85 = vector.extract_strided_slice %61 {offsets = [1, 8], sizes = [21, 168], strides = [1, 1]} : vector<23x184xf32> to vector<21x168xf32>
    %c4_56 = arith.constant 4 : index
    %c0_57 = arith.constant 0 : index
    %c0_58 = arith.constant 0 : index
    %86 = vector.load %arg4[%c4_56, %c0_57, %c0_58] : memref<9x168x168xf32, #tpu.memory_space<vmem>>, vector<1x168x168xf32>
    %87 = vector.shape_cast %86 : vector<1x168x168xf32> to vector<168x168xf32>
    %cst_59 = arith.constant dense<0.000000e+00> : vector<21x168xf32>
    %88 = tpu.matmul %85, %87, %cst_59 {dimension_numbers = #tpu.dot_dimension_numbers<[1], [0], [0], [1], [0, 0, 1, 1], [], []>} : vector<21x168xf32>, vector<168x168xf32>, vector<21x168xf32> -> vector<21x168xf32>
    %89 = arith.addf %84, %88 : vector<21x168xf32>
    %90 = vector.extract_strided_slice %61 {offsets = [1, 16], sizes = [21, 168], strides = [1, 1]} : vector<23x184xf32> to vector<21x168xf32>
    %c5_60 = arith.constant 5 : index
    %c0_61 = arith.constant 0 : index
    %c0_62 = arith.constant 0 : index
    %91 = vector.load %arg4[%c5_60, %c0_61, %c0_62] : memref<9x168x168xf32, #tpu.memory_space<vmem>>, vector<1x168x168xf32>
    %92 = vector.shape_cast %91 : vector<1x168x168xf32> to vector<168x168xf32>
    %cst_63 = arith.constant dense<0.000000e+00> : vector<21x168xf32>
    %93 = tpu.matmul %90, %92, %cst_63 {dimension_numbers = #tpu.dot_dimension_numbers<[1], [0], [0], [1], [0, 0, 1, 1], [], []>} : vector<21x168xf32>, vector<168x168xf32>, vector<21x168xf32> -> vector<21x168xf32>
    %94 = arith.addf %89, %93 : vector<21x168xf32>
    %95 = vector.extract_strided_slice %61 {offsets = [2, 0], sizes = [21, 168], strides = [1, 1]} : vector<23x184xf32> to vector<21x168xf32>
    %c6_64 = arith.constant 6 : index
    %c0_65 = arith.constant 0 : index
    %c0_66 = arith.constant 0 : index
    %96 = vector.load %arg4[%c6_64, %c0_65, %c0_66] : memref<9x168x168xf32, #tpu.memory_space<vmem>>, vector<1x168x168xf32>
    %97 = vector.shape_cast %96 : vector<1x168x168xf32> to vector<168x168xf32>
    %cst_67 = arith.constant dense<0.000000e+00> : vector<21x168xf32>
    %98 = tpu.matmul %95, %97, %cst_67 {dimension_numbers = #tpu.dot_dimension_numbers<[1], [0], [0], [1], [0, 0, 1, 1], [], []>} : vector<21x168xf32>, vector<168x168xf32>, vector<21x168xf32> -> vector<21x168xf32>
    %99 = arith.addf %94, %98 : vector<21x168xf32>
    %100 = vector.extract_strided_slice %61 {offsets = [2, 8], sizes = [21, 168], strides = [1, 1]} : vector<23x184xf32> to vector<21x168xf32>
    %c7_68 = arith.constant 7 : index
    %c0_69 = arith.constant 0 : index
    %c0_70 = arith.constant 0 : index
    %101 = vector.load %arg4[%c7_68, %c0_69, %c0_70] : memref<9x168x168xf32, #tpu.memory_space<vmem>>, vector<1x168x168xf32>
    %102 = vector.shape_cast %101 : vector<1x168x168xf32> to vector<168x168xf32>
    %cst_71 = arith.constant dense<0.000000e+00> : vector<21x168xf32>
    %103 = tpu.matmul %100, %102, %cst_71 {dimension_numbers = #tpu.dot_dimension_numbers<[1], [0], [0], [1], [0, 0, 1, 1], [], []>} : vector<21x168xf32>, vector<168x168xf32>, vector<21x168xf32> -> vector<21x168xf32>
    %104 = arith.addf %99, %103 : vector<21x168xf32>
    %105 = vector.extract_strided_slice %61 {offsets = [2, 16], sizes = [21, 168], strides = [1, 1]} : vector<23x184xf32> to vector<21x168xf32>
    %c8_72 = arith.constant 8 : index
    %c0_73 = arith.constant 0 : index
    %c0_74 = arith.constant 0 : index
    %106 = vector.load %arg4[%c8_72, %c0_73, %c0_74] : memref<9x168x168xf32, #tpu.memory_space<vmem>>, vector<1x168x168xf32>
    %107 = vector.shape_cast %106 : vector<1x168x168xf32> to vector<168x168xf32>
    %cst_75 = arith.constant dense<0.000000e+00> : vector<21x168xf32>
    %108 = tpu.matmul %105, %107, %cst_75 {dimension_numbers = #tpu.dot_dimension_numbers<[1], [0], [0], [1], [0, 0, 1, 1], [], []>} : vector<21x168xf32>, vector<168x168xf32>, vector<21x168xf32> -> vector<21x168xf32>
    %109 = arith.addf %104, %108 : vector<21x168xf32>
    %cst_76 = arith.constant 0.000000e+00 : f32
    %110 = vector.broadcast %cst_76 : f32 to vector<21x168xf32>
    %111 = arith.maximumf %109, %110 : vector<21x168xf32>
    %112 = vector.extract_strided_slice %111 {offsets = [0, 0], sizes = [20, 168], strides = [1, 1]} : vector<21x168xf32> to vector<20x168xf32>
    %113 = vector.extract_strided_slice %111 {offsets = [1, 0], sizes = [20, 168], strides = [1, 1]} : vector<21x168xf32> to vector<20x168xf32>
    %114 = arith.maximumf %112, %113 : vector<20x168xf32>
    %c0_77 = arith.constant 0 : index
    %c0_78 = arith.constant 0 : index
    %115 = vector.load %arg12[%c0_77, %c0_78] : memref<10x20xf32, #tpu.memory_space<vmem>>, vector<10x20xf32>
    %cst_79 = arith.constant dense<0.000000e+00> : vector<10x168xf32>
    %116 = tpu.matmul %115, %114, %cst_79 {dimension_numbers = #tpu.dot_dimension_numbers<[1], [0], [0], [1], [0, 0, 1, 1], [], []>} : vector<10x20xf32>, vector<20x168xf32>, vector<10x168xf32> -> vector<10x168xf32>
    %117 = vector.extract_strided_slice %116 {offsets = [0, 0], sizes = [10, 160], strides = [1, 1]} : vector<10x168xf32> to vector<10x160xf32>
    %118 = vector.extract_strided_slice %116 {offsets = [0, 8], sizes = [10, 160], strides = [1, 1]} : vector<10x168xf32> to vector<10x160xf32>
    %119 = arith.maximumf %117, %118 : vector<10x160xf32>
    %c0_80 = arith.constant 0 : index
    %c0_81 = arith.constant 0 : index
    %120 = vector.load %arg13[%c0_80, %c0_81] : memref<160x80xf32, #tpu.memory_space<vmem>>, vector<160x80xf32>
    %cst_82 = arith.constant dense<0.000000e+00> : vector<10x80xf32>
    %121 = tpu.matmul %119, %120, %cst_82 {dimension_numbers = #tpu.dot_dimension_numbers<[1], [0], [0], [1], [0, 0, 1, 1], [], []>} : vector<10x160xf32>, vector<160x80xf32>, vector<10x80xf32> -> vector<10x80xf32>
    %c0_83 = arith.constant 0 : index
    %c0_84 = arith.constant 0 : index
    %122 = vector.load %arg7[%c0_83, %c0_84] : memref<1x64xf32, #tpu.memory_space<vmem>>, vector<1x64xf32>
    %123 = vector.shape_cast %122 : vector<1x64xf32> to vector<1x64xf32>
    %124 = vector.broadcast %123 : vector<1x64xf32> to vector<8x64xf32>
    %125 = vector.extract_strided_slice %121 {offsets = [0, 0], sizes = [8, 64], strides = [1, 1]} : vector<10x80xf32> to vector<8x64xf32>
    %c0_85 = arith.constant 0 : index
    %c0_86 = arith.constant 0 : index
    %c0_87 = arith.constant 0 : index
    %126 = vector.load %arg6[%c0_85, %c0_86, %c0_87] : memref<9x64x64xf32, #tpu.memory_space<vmem>>, vector<1x64x64xf32>
    %127 = vector.shape_cast %126 : vector<1x64x64xf32> to vector<64x64xf32>
    %cst_88 = arith.constant dense<0.000000e+00> : vector<8x64xf32>
    %128 = tpu.matmul %125, %127, %cst_88 {dimension_numbers = #tpu.dot_dimension_numbers<[1], [0], [0], [1], [0, 0, 1, 1], [], []>} : vector<8x64xf32>, vector<64x64xf32>, vector<8x64xf32> -> vector<8x64xf32>
    %129 = arith.addf %124, %128 : vector<8x64xf32>
    %130 = vector.extract_strided_slice %121 {offsets = [0, 8], sizes = [8, 64], strides = [1, 1]} : vector<10x80xf32> to vector<8x64xf32>
    %c1_89 = arith.constant 1 : index
    %c0_90 = arith.constant 0 : index
    %c0_91 = arith.constant 0 : index
    %131 = vector.load %arg6[%c1_89, %c0_90, %c0_91] : memref<9x64x64xf32, #tpu.memory_space<vmem>>, vector<1x64x64xf32>
    %132 = vector.shape_cast %131 : vector<1x64x64xf32> to vector<64x64xf32>
    %cst_92 = arith.constant dense<0.000000e+00> : vector<8x64xf32>
    %133 = tpu.matmul %130, %132, %cst_92 {dimension_numbers = #tpu.dot_dimension_numbers<[1], [0], [0], [1], [0, 0, 1, 1], [], []>} : vector<8x64xf32>, vector<64x64xf32>, vector<8x64xf32> -> vector<8x64xf32>
    %134 = arith.addf %129, %133 : vector<8x64xf32>
    %135 = vector.extract_strided_slice %121 {offsets = [0, 16], sizes = [8, 64], strides = [1, 1]} : vector<10x80xf32> to vector<8x64xf32>
    %c2_93 = arith.constant 2 : index
    %c0_94 = arith.constant 0 : index
    %c0_95 = arith.constant 0 : index
    %136 = vector.load %arg6[%c2_93, %c0_94, %c0_95] : memref<9x64x64xf32, #tpu.memory_space<vmem>>, vector<1x64x64xf32>
    %137 = vector.shape_cast %136 : vector<1x64x64xf32> to vector<64x64xf32>
    %cst_96 = arith.constant dense<0.000000e+00> : vector<8x64xf32>
    %138 = tpu.matmul %135, %137, %cst_96 {dimension_numbers = #tpu.dot_dimension_numbers<[1], [0], [0], [1], [0, 0, 1, 1], [], []>} : vector<8x64xf32>, vector<64x64xf32>, vector<8x64xf32> -> vector<8x64xf32>
    %139 = arith.addf %134, %138 : vector<8x64xf32>
    %140 = vector.extract_strided_slice %121 {offsets = [1, 0], sizes = [8, 64], strides = [1, 1]} : vector<10x80xf32> to vector<8x64xf32>
    %c3_97 = arith.constant 3 : index
    %c0_98 = arith.constant 0 : index
    %c0_99 = arith.constant 0 : index
    %141 = vector.load %arg6[%c3_97, %c0_98, %c0_99] : memref<9x64x64xf32, #tpu.memory_space<vmem>>, vector<1x64x64xf32>
    %142 = vector.shape_cast %141 : vector<1x64x64xf32> to vector<64x64xf32>
    %cst_100 = arith.constant dense<0.000000e+00> : vector<8x64xf32>
    %143 = tpu.matmul %140, %142, %cst_100 {dimension_numbers = #tpu.dot_dimension_numbers<[1], [0], [0], [1], [0, 0, 1, 1], [], []>} : vector<8x64xf32>, vector<64x64xf32>, vector<8x64xf32> -> vector<8x64xf32>
    %144 = arith.addf %139, %143 : vector<8x64xf32>
    %145 = vector.extract_strided_slice %121 {offsets = [1, 8], sizes = [8, 64], strides = [1, 1]} : vector<10x80xf32> to vector<8x64xf32>
    %c4_101 = arith.constant 4 : index
    %c0_102 = arith.constant 0 : index
    %c0_103 = arith.constant 0 : index
    %146 = vector.load %arg6[%c4_101, %c0_102, %c0_103] : memref<9x64x64xf32, #tpu.memory_space<vmem>>, vector<1x64x64xf32>
    %147 = vector.shape_cast %146 : vector<1x64x64xf32> to vector<64x64xf32>
    %cst_104 = arith.constant dense<0.000000e+00> : vector<8x64xf32>
    %148 = tpu.matmul %145, %147, %cst_104 {dimension_numbers = #tpu.dot_dimension_numbers<[1], [0], [0], [1], [0, 0, 1, 1], [], []>} : vector<8x64xf32>, vector<64x64xf32>, vector<8x64xf32> -> vector<8x64xf32>
    %149 = arith.addf %144, %148 : vector<8x64xf32>
    %150 = vector.extract_strided_slice %121 {offsets = [1, 16], sizes = [8, 64], strides = [1, 1]} : vector<10x80xf32> to vector<8x64xf32>
    %c5_105 = arith.constant 5 : index
    %c0_106 = arith.constant 0 : index
    %c0_107 = arith.constant 0 : index
    %151 = vector.load %arg6[%c5_105, %c0_106, %c0_107] : memref<9x64x64xf32, #tpu.memory_space<vmem>>, vector<1x64x64xf32>
    %152 = vector.shape_cast %151 : vector<1x64x64xf32> to vector<64x64xf32>
    %cst_108 = arith.constant dense<0.000000e+00> : vector<8x64xf32>
    %153 = tpu.matmul %150, %152, %cst_108 {dimension_numbers = #tpu.dot_dimension_numbers<[1], [0], [0], [1], [0, 0, 1, 1], [], []>} : vector<8x64xf32>, vector<64x64xf32>, vector<8x64xf32> -> vector<8x64xf32>
    %154 = arith.addf %149, %153 : vector<8x64xf32>
    %155 = vector.extract_strided_slice %121 {offsets = [2, 0], sizes = [8, 64], strides = [1, 1]} : vector<10x80xf32> to vector<8x64xf32>
    %c6_109 = arith.constant 6 : index
    %c0_110 = arith.constant 0 : index
    %c0_111 = arith.constant 0 : index
    %156 = vector.load %arg6[%c6_109, %c0_110, %c0_111] : memref<9x64x64xf32, #tpu.memory_space<vmem>>, vector<1x64x64xf32>
    %157 = vector.shape_cast %156 : vector<1x64x64xf32> to vector<64x64xf32>
    %cst_112 = arith.constant dense<0.000000e+00> : vector<8x64xf32>
    %158 = tpu.matmul %155, %157, %cst_112 {dimension_numbers = #tpu.dot_dimension_numbers<[1], [0], [0], [1], [0, 0, 1, 1], [], []>} : vector<8x64xf32>, vector<64x64xf32>, vector<8x64xf32> -> vector<8x64xf32>
    %159 = arith.addf %154, %158 : vector<8x64xf32>
    %160 = vector.extract_strided_slice %121 {offsets = [2, 8], sizes = [8, 64], strides = [1, 1]} : vector<10x80xf32> to vector<8x64xf32>
    %c7_113 = arith.constant 7 : index
    %c0_114 = arith.constant 0 : index
    %c0_115 = arith.constant 0 : index
    %161 = vector.load %arg6[%c7_113, %c0_114, %c0_115] : memref<9x64x64xf32, #tpu.memory_space<vmem>>, vector<1x64x64xf32>
    %162 = vector.shape_cast %161 : vector<1x64x64xf32> to vector<64x64xf32>
    %cst_116 = arith.constant dense<0.000000e+00> : vector<8x64xf32>
    %163 = tpu.matmul %160, %162, %cst_116 {dimension_numbers = #tpu.dot_dimension_numbers<[1], [0], [0], [1], [0, 0, 1, 1], [], []>} : vector<8x64xf32>, vector<64x64xf32>, vector<8x64xf32> -> vector<8x64xf32>
    %164 = arith.addf %159, %163 : vector<8x64xf32>
    %165 = vector.extract_strided_slice %121 {offsets = [2, 16], sizes = [8, 64], strides = [1, 1]} : vector<10x80xf32> to vector<8x64xf32>
    %c8_117 = arith.constant 8 : index
    %c0_118 = arith.constant 0 : index
    %c0_119 = arith.constant 0 : index
    %166 = vector.load %arg6[%c8_117, %c0_118, %c0_119] : memref<9x64x64xf32, #tpu.memory_space<vmem>>, vector<1x64x64xf32>
    %167 = vector.shape_cast %166 : vector<1x64x64xf32> to vector<64x64xf32>
    %cst_120 = arith.constant dense<0.000000e+00> : vector<8x64xf32>
    %168 = tpu.matmul %165, %167, %cst_120 {dimension_numbers = #tpu.dot_dimension_numbers<[1], [0], [0], [1], [0, 0, 1, 1], [], []>} : vector<8x64xf32>, vector<64x64xf32>, vector<8x64xf32> -> vector<8x64xf32>
    %169 = arith.addf %164, %168 : vector<8x64xf32>
    %cst_121 = arith.constant 0.000000e+00 : f32
    %170 = vector.broadcast %cst_121 : f32 to vector<8x64xf32>
    %171 = arith.maximumf %169, %170 : vector<8x64xf32>
    %172 = vector.extract_strided_slice %171 {offsets = [0, 0], sizes = [7, 64], strides = [1, 1]} : vector<8x64xf32> to vector<7x64xf32>
    %173 = vector.extract_strided_slice %171 {offsets = [1, 0], sizes = [7, 64], strides = [1, 1]} : vector<8x64xf32> to vector<7x64xf32>
    %174 = arith.maximumf %172, %173 : vector<7x64xf32>
    %c0_122 = arith.constant 0 : index
    %c0_123 = arith.constant 0 : index
    %175 = vector.load %arg14[%c0_122, %c0_123] : memref<4x7xf32, #tpu.memory_space<vmem>>, vector<4x7xf32>
    %cst_124 = arith.constant dense<0.000000e+00> : vector<4x64xf32>
    %176 = tpu.matmul %175, %174, %cst_124 {dimension_numbers = #tpu.dot_dimension_numbers<[1], [0], [0], [1], [0, 0, 1, 1], [], []>} : vector<4x7xf32>, vector<7x64xf32>, vector<4x64xf32> -> vector<4x64xf32>
    %177 = vector.extract_strided_slice %176 {offsets = [0, 0], sizes = [4, 56], strides = [1, 1]} : vector<4x64xf32> to vector<4x56xf32>
    %178 = vector.extract_strided_slice %176 {offsets = [0, 8], sizes = [4, 56], strides = [1, 1]} : vector<4x64xf32> to vector<4x56xf32>
    %179 = arith.maximumf %177, %178 : vector<4x56xf32>
    %c0_125 = arith.constant 0 : index
    %c0_126 = arith.constant 0 : index
    %180 = vector.load %arg15[%c0_125, %c0_126] : memref<56x32xf32, #tpu.memory_space<vmem>>, vector<56x32xf32>
    %cst_127 = arith.constant dense<0.000000e+00> : vector<4x32xf32>
    %181 = tpu.matmul %179, %180, %cst_127 {dimension_numbers = #tpu.dot_dimension_numbers<[1], [0], [0], [1], [0, 0, 1, 1], [], []>} : vector<4x56xf32>, vector<56x32xf32>, vector<4x32xf32> -> vector<4x32xf32>
    %c0_128 = arith.constant 0 : index
    %c0_129 = arith.constant 0 : index
    %182 = vector.load %arg9[%c0_128, %c0_129] : memref<1x2xf32, #tpu.memory_space<vmem>>, vector<1x2xf32>
    %183 = vector.shape_cast %182 : vector<1x2xf32> to vector<1x2xf32>
    %184 = vector.broadcast %183 : vector<1x2xf32> to vector<2x2xf32>
    %185 = vector.extract_strided_slice %181 {offsets = [0, 0], sizes = [2, 16], strides = [1, 1]} : vector<4x32xf32> to vector<2x16xf32>
    %c0_130 = arith.constant 0 : index
    %c0_131 = arith.constant 0 : index
    %c0_132 = arith.constant 0 : index
    %186 = vector.load %arg8[%c0_130, %c0_131, %c0_132] : memref<9x16x2xf32, #tpu.memory_space<vmem>>, vector<1x16x2xf32>
    %187 = vector.shape_cast %186 : vector<1x16x2xf32> to vector<16x2xf32>
    %cst_133 = arith.constant dense<0.000000e+00> : vector<2x2xf32>
    %188 = tpu.matmul %185, %187, %cst_133 {dimension_numbers = #tpu.dot_dimension_numbers<[1], [0], [0], [1], [0, 0, 1, 1], [], []>} : vector<2x16xf32>, vector<16x2xf32>, vector<2x2xf32> -> vector<2x2xf32>
    %189 = arith.addf %184, %188 : vector<2x2xf32>
    %190 = vector.extract_strided_slice %181 {offsets = [0, 8], sizes = [2, 16], strides = [1, 1]} : vector<4x32xf32> to vector<2x16xf32>
    %c1_134 = arith.constant 1 : index
    %c0_135 = arith.constant 0 : index
    %c0_136 = arith.constant 0 : index
    %191 = vector.load %arg8[%c1_134, %c0_135, %c0_136] : memref<9x16x2xf32, #tpu.memory_space<vmem>>, vector<1x16x2xf32>
    %192 = vector.shape_cast %191 : vector<1x16x2xf32> to vector<16x2xf32>
    %cst_137 = arith.constant dense<0.000000e+00> : vector<2x2xf32>
    %193 = tpu.matmul %190, %192, %cst_137 {dimension_numbers = #tpu.dot_dimension_numbers<[1], [0], [0], [1], [0, 0, 1, 1], [], []>} : vector<2x16xf32>, vector<16x2xf32>, vector<2x2xf32> -> vector<2x2xf32>
    %194 = arith.addf %189, %193 : vector<2x2xf32>
    %195 = vector.extract_strided_slice %181 {offsets = [0, 16], sizes = [2, 16], strides = [1, 1]} : vector<4x32xf32> to vector<2x16xf32>
    %c2_138 = arith.constant 2 : index
    %c0_139 = arith.constant 0 : index
    %c0_140 = arith.constant 0 : index
    %196 = vector.load %arg8[%c2_138, %c0_139, %c0_140] : memref<9x16x2xf32, #tpu.memory_space<vmem>>, vector<1x16x2xf32>
    %197 = vector.shape_cast %196 : vector<1x16x2xf32> to vector<16x2xf32>
    %cst_141 = arith.constant dense<0.000000e+00> : vector<2x2xf32>
    %198 = tpu.matmul %195, %197, %cst_141 {dimension_numbers = #tpu.dot_dimension_numbers<[1], [0], [0], [1], [0, 0, 1, 1], [], []>} : vector<2x16xf32>, vector<16x2xf32>, vector<2x2xf32> -> vector<2x2xf32>
    %199 = arith.addf %194, %198 : vector<2x2xf32>
    %200 = vector.extract_strided_slice %181 {offsets = [1, 0], sizes = [2, 16], strides = [1, 1]} : vector<4x32xf32> to vector<2x16xf32>
    %c3_142 = arith.constant 3 : index
    %c0_143 = arith.constant 0 : index
    %c0_144 = arith.constant 0 : index
    %201 = vector.load %arg8[%c3_142, %c0_143, %c0_144] : memref<9x16x2xf32, #tpu.memory_space<vmem>>, vector<1x16x2xf32>
    %202 = vector.shape_cast %201 : vector<1x16x2xf32> to vector<16x2xf32>
    %cst_145 = arith.constant dense<0.000000e+00> : vector<2x2xf32>
    %203 = tpu.matmul %200, %202, %cst_145 {dimension_numbers = #tpu.dot_dimension_numbers<[1], [0], [0], [1], [0, 0, 1, 1], [], []>} : vector<2x16xf32>, vector<16x2xf32>, vector<2x2xf32> -> vector<2x2xf32>
    %204 = arith.addf %199, %203 : vector<2x2xf32>
    %205 = vector.extract_strided_slice %181 {offsets = [1, 8], sizes = [2, 16], strides = [1, 1]} : vector<4x32xf32> to vector<2x16xf32>
    %c4_146 = arith.constant 4 : index
    %c0_147 = arith.constant 0 : index
    %c0_148 = arith.constant 0 : index
    %206 = vector.load %arg8[%c4_146, %c0_147, %c0_148] : memref<9x16x2xf32, #tpu.memory_space<vmem>>, vector<1x16x2xf32>
    %207 = vector.shape_cast %206 : vector<1x16x2xf32> to vector<16x2xf32>
    %cst_149 = arith.constant dense<0.000000e+00> : vector<2x2xf32>
    %208 = tpu.matmul %205, %207, %cst_149 {dimension_numbers = #tpu.dot_dimension_numbers<[1], [0], [0], [1], [0, 0, 1, 1], [], []>} : vector<2x16xf32>, vector<16x2xf32>, vector<2x2xf32> -> vector<2x2xf32>
    %209 = arith.addf %204, %208 : vector<2x2xf32>
    %210 = vector.extract_strided_slice %181 {offsets = [1, 16], sizes = [2, 16], strides = [1, 1]} : vector<4x32xf32> to vector<2x16xf32>
    %c5_150 = arith.constant 5 : index
    %c0_151 = arith.constant 0 : index
    %c0_152 = arith.constant 0 : index
    %211 = vector.load %arg8[%c5_150, %c0_151, %c0_152] : memref<9x16x2xf32, #tpu.memory_space<vmem>>, vector<1x16x2xf32>
    %212 = vector.shape_cast %211 : vector<1x16x2xf32> to vector<16x2xf32>
    %cst_153 = arith.constant dense<0.000000e+00> : vector<2x2xf32>
    %213 = tpu.matmul %210, %212, %cst_153 {dimension_numbers = #tpu.dot_dimension_numbers<[1], [0], [0], [1], [0, 0, 1, 1], [], []>} : vector<2x16xf32>, vector<16x2xf32>, vector<2x2xf32> -> vector<2x2xf32>
    %214 = arith.addf %209, %213 : vector<2x2xf32>
    %215 = vector.extract_strided_slice %181 {offsets = [2, 0], sizes = [2, 16], strides = [1, 1]} : vector<4x32xf32> to vector<2x16xf32>
    %c6_154 = arith.constant 6 : index
    %c0_155 = arith.constant 0 : index
    %c0_156 = arith.constant 0 : index
    %216 = vector.load %arg8[%c6_154, %c0_155, %c0_156] : memref<9x16x2xf32, #tpu.memory_space<vmem>>, vector<1x16x2xf32>
    %217 = vector.shape_cast %216 : vector<1x16x2xf32> to vector<16x2xf32>
    %cst_157 = arith.constant dense<0.000000e+00> : vector<2x2xf32>
    %218 = tpu.matmul %215, %217, %cst_157 {dimension_numbers = #tpu.dot_dimension_numbers<[1], [0], [0], [1], [0, 0, 1, 1], [], []>} : vector<2x16xf32>, vector<16x2xf32>, vector<2x2xf32> -> vector<2x2xf32>
    %219 = arith.addf %214, %218 : vector<2x2xf32>
    %220 = vector.extract_strided_slice %181 {offsets = [2, 8], sizes = [2, 16], strides = [1, 1]} : vector<4x32xf32> to vector<2x16xf32>
    %c7_158 = arith.constant 7 : index
    %c0_159 = arith.constant 0 : index
    %c0_160 = arith.constant 0 : index
    %221 = vector.load %arg8[%c7_158, %c0_159, %c0_160] : memref<9x16x2xf32, #tpu.memory_space<vmem>>, vector<1x16x2xf32>
    %222 = vector.shape_cast %221 : vector<1x16x2xf32> to vector<16x2xf32>
    %cst_161 = arith.constant dense<0.000000e+00> : vector<2x2xf32>
    %223 = tpu.matmul %220, %222, %cst_161 {dimension_numbers = #tpu.dot_dimension_numbers<[1], [0], [0], [1], [0, 0, 1, 1], [], []>} : vector<2x16xf32>, vector<16x2xf32>, vector<2x2xf32> -> vector<2x2xf32>
    %224 = arith.addf %219, %223 : vector<2x2xf32>
    %225 = vector.extract_strided_slice %181 {offsets = [2, 16], sizes = [2, 16], strides = [1, 1]} : vector<4x32xf32> to vector<2x16xf32>
    %c8_162 = arith.constant 8 : index
    %c0_163 = arith.constant 0 : index
    %c0_164 = arith.constant 0 : index
    %226 = vector.load %arg8[%c8_162, %c0_163, %c0_164] : memref<9x16x2xf32, #tpu.memory_space<vmem>>, vector<1x16x2xf32>
    %227 = vector.shape_cast %226 : vector<1x16x2xf32> to vector<16x2xf32>
    %cst_165 = arith.constant dense<0.000000e+00> : vector<2x2xf32>
    %228 = tpu.matmul %225, %227, %cst_165 {dimension_numbers = #tpu.dot_dimension_numbers<[1], [0], [0], [1], [0, 0, 1, 1], [], []>} : vector<2x16xf32>, vector<16x2xf32>, vector<2x2xf32> -> vector<2x2xf32>
    %229 = arith.addf %224, %228 : vector<2x2xf32>
    %cst_166 = arith.constant 0.000000e+00 : f32
    %230 = vector.broadcast %cst_166 : f32 to vector<2x2xf32>
    %231 = arith.maximumf %229, %230 : vector<2x2xf32>
    %c0_167 = arith.constant 0 : index
    %c0_168 = arith.constant 0 : index
    %c0_169 = arith.constant 0 : index
    %232 = vector.load %arg16[%c0_167, %c0_168, %c0_169] : memref<1x2x2xf32, #tpu.memory_space<vmem>>, vector<1x2x2xf32>
    %233 = vector.shape_cast %232 : vector<1x2x2xf32> to vector<2x2xf32>
    %234 = vector.shape_cast %231 : vector<2x2xf32> to vector<1x2x2xf32>
    tpu.vector_store %arg16[%c0_167, %c0_168, %c0_169], %234 {strides = array<i32>} : memref<1x2x2xf32, #tpu.memory_space<vmem>>, vector<1x2x2xf32>,
    return
  }
  func.func @transform_0(%arg0: i32) -> (i32, i32, i32) {
    %c0_i32 = arith.constant 0 : i32
    %c0_i32_0 = arith.constant 0 : i32
    %c0_i32_1 = arith.constant 0 : i32
    return %arg0, %c0_i32, %c0_i32_0 : i32, i32, i32
  }
  func.func @transform_1(%arg0: i32) -> (i32, i32, i32) {
    %c0_i32 = arith.constant 0 : i32
    %c0_i32_0 = arith.constant 0 : i32
    %c0_i32_1 = arith.constant 0 : i32
    %c0_i32_2 = arith.constant 0 : i32
    return %c0_i32, %c0_i32_0, %c0_i32_1 : i32, i32, i32
  }
  func.func @transform_2(%arg0: i32) -> (i32, i32) {
    %c0_i32 = arith.constant 0 : i32
    %c0_i32_0 = arith.constant 0 : i32
    %c0_i32_1 = arith.constant 0 : i32
    return %c0_i32, %c0_i32_0 : i32, i32
  }
  func.func @transform_3(%arg0: i32) -> (i32, i32, i32) {
    %c0_i32 = arith.constant 0 : i32
    %c0_i32_0 = arith.constant 0 : i32
    %c0_i32_1 = arith.constant 0 : i32
    %c0_i32_2 = arith.constant 0 : i32
    return %c0_i32, %c0_i32_0, %c0_i32_1 : i32, i32, i32
  }
  func.func @transform_4(%arg0: i32) -> (i32, i32) {
    %c0_i32 = arith.constant 0 : i32
    %c0_i32_0 = arith.constant 0 : i32
    %c0_i32_1 = arith.constant 0 : i32
    return %c0_i32, %c0_i32_0 : i32, i32
  }
  func.func @transform_5(%arg0: i32) -> (i32, i32, i32) {
    %c0_i32 = arith.constant 0 : i32
    %c0_i32_0 = arith.constant 0 : i32
    %c0_i32_1 = arith.constant 0 : i32
    %c0_i32_2 = arith.constant 0 : i32
    return %c0_i32, %c0_i32_0, %c0_i32_1 : i32, i32, i32
  }
  func.func @transform_6(%arg0: i32) -> (i32, i32) {
    %c0_i32 = arith.constant 0 : i32
    %c0_i32_0 = arith.constant 0 : i32
    %c0_i32_1 = arith.constant 0 : i32
    return %c0_i32, %c0_i32_0 : i32, i32
  }
  func.func @transform_7(%arg0: i32) -> (i32, i32, i32) {
    %c0_i32 = arith.constant 0 : i32
    %c0_i32_0 = arith.constant 0 : i32
    %c0_i32_1 = arith.constant 0 : i32
    %c0_i32_2 = arith.constant 0 : i32
    return %c0_i32, %c0_i32_0, %c0_i32_1 : i32, i32, i32
  }
  func.func @transform_8(%arg0: i32) -> (i32, i32) {
    %c0_i32 = arith.constant 0 : i32
    %c0_i32_0 = arith.constant 0 : i32
    %c0_i32_1 = arith.constant 0 : i32
    return %c0_i32, %c0_i32_0 : i32, i32
  }
  func.func @transform_9(%arg0: i32) -> (i32, i32) {
    %c0_i32 = arith.constant 0 : i32
    %c0_i32_0 = arith.constant 0 : i32
    %c0_i32_1 = arith.constant 0 : i32
    return %c0_i32, %c0_i32_0 : i32, i32
  }
  func.func @transform_10(%arg0: i32) -> (i32, i32) {
    %c0_i32 = arith.constant 0 : i32
    %c0_i32_0 = arith.constant 0 : i32
    %c0_i32_1 = arith.constant 0 : i32
    return %c0_i32, %c0_i32_0 : i32, i32
  }
  func.func @transform_11(%arg0: i32) -> (i32, i32) {
    %c0_i32 = arith.constant 0 : i32
    %c0_i32_0 = arith.constant 0 : i32
    %c0_i32_1 = arith.constant 0 : i32
    return %c0_i32, %c0_i32_0 : i32, i32
  }
  func.func @transform_12(%arg0: i32) -> (i32, i32) {
    %c0_i32 = arith.constant 0 : i32
    %c0_i32_0 = arith.constant 0 : i32
    %c0_i32_1 = arith.constant 0 : i32
    return %c0_i32, %c0_i32_0 : i32, i32
  }
  func.func @transform_13(%arg0: i32) -> (i32, i32) {
    %c0_i32 = arith.constant 0 : i32
    %c0_i32_0 = arith.constant 0 : i32
    %c0_i32_1 = arith.constant 0 : i32
    return %c0_i32, %c0_i32_0 : i32, i32
  }
  func.func @transform_14(%arg0: i32) -> (i32, i32) {
    %c0_i32 = arith.constant 0 : i32
    %c0_i32_0 = arith.constant 0 : i32
    %c0_i32_1 = arith.constant 0 : i32
    return %c0_i32, %c0_i32_0 : i32, i32
  }
  func.func @transform_15(%arg0: i32) -> (i32, i32, i32) {
    %c0_i32 = arith.constant 0 : i32
    %c0_i32_0 = arith.constant 0 : i32
    %c0_i32_1 = arith.constant 0 : i32
    return %arg0, %c0_i32, %c0_i32_0 : i32, i32, i32
  }
}

module attributes {stable_mosaic.version = 11 : i64} {
  func.func @_fc_stack_kernel(%arg0: memref<2x4xf32, #tpu.memory_space<vmem>>, %arg1: memref<2x20xf32, #tpu.memory_space<vmem>>, %arg2: memref<4x512xf32, #tpu.memory_space<vmem>>, %arg3: memref<1x512xf32, #tpu.memory_space<vmem>>, %arg4: memref<512x256xf32, #tpu.memory_space<vmem>>, %arg5: memref<1x256xf32, #tpu.memory_space<vmem>>, %arg6: memref<256x128xf32, #tpu.memory_space<vmem>>, %arg7: memref<1x128xf32, #tpu.memory_space<vmem>>, %arg8: memref<128x1xf32, #tpu.memory_space<vmem>>, %arg9: memref<1x1xf32, #tpu.memory_space<vmem>>, %arg10: memref<20x512xf32, #tpu.memory_space<vmem>>, %arg11: memref<1x512xf32, #tpu.memory_space<vmem>>, %arg12: memref<512x256xf32, #tpu.memory_space<vmem>>, %arg13: memref<1x256xf32, #tpu.memory_space<vmem>>, %arg14: memref<256x128xf32, #tpu.memory_space<vmem>>, %arg15: memref<1x128xf32, #tpu.memory_space<vmem>>, %arg16: memref<128x90xf32, #tpu.memory_space<vmem>>, %arg17: memref<1x90xf32, #tpu.memory_space<vmem>>, %arg18: memref<1x64xf32, #tpu.memory_space<vmem>>, %arg19: memref<90x64xf32, #tpu.memory_space<vmem>>, %arg20: memref<1x64xf32, #tpu.memory_space<vmem>>, %arg21: memref<64x32xf32, #tpu.memory_space<vmem>>, %arg22: memref<1x32xf32, #tpu.memory_space<vmem>>, %arg23: memref<32x16xf32, #tpu.memory_space<vmem>>, %arg24: memref<1x16xf32, #tpu.memory_space<vmem>>, %arg25: memref<16x10xf32, #tpu.memory_space<vmem>>, %arg26: memref<1x10xf32, #tpu.memory_space<vmem>>, %arg27: memref<2x10xf32, #tpu.memory_space<vmem>>) attributes {dimension_semantics = [], scalar_prefetch = 0 : i64, scratch_operands = 0 : i64, tpu.core_type = #tpu.core_type<tc>} {
    %c0 = arith.constant 0 : index
    %c0_0 = arith.constant 0 : index
    %0 = vector.load %arg0[%c0, %c0_0] : memref<2x4xf32, #tpu.memory_space<vmem>>, vector<2x4xf32>
    %c0_1 = arith.constant 0 : index
    %c0_2 = arith.constant 0 : index
    %1 = vector.load %arg2[%c0_1, %c0_2] : memref<4x512xf32, #tpu.memory_space<vmem>>, vector<4x512xf32>
    %cst = arith.constant dense<0.000000e+00> : vector<2x512xf32>
    %2 = tpu.matmul %0, %1, %cst {dimension_numbers = #tpu.dot_dimension_numbers<[1], [0], [0], [1], [0, 0, 1, 1], [], []>} : vector<2x4xf32>, vector<4x512xf32>, vector<2x512xf32> -> vector<2x512xf32>
    %c0_3 = arith.constant 0 : index
    %c0_4 = arith.constant 0 : index
    %3 = vector.load %arg3[%c0_3, %c0_4] : memref<1x512xf32, #tpu.memory_space<vmem>>, vector<1x512xf32>
    %4 = vector.broadcast %3 : vector<1x512xf32> to vector<2x512xf32>
    %5 = arith.addf %2, %4 : vector<2x512xf32>
    %cst_5 = arith.constant 0.000000e+00 : f32
    %6 = vector.broadcast %cst_5 : f32 to vector<2x512xf32>
    %7 = arith.maximumf %5, %6 : vector<2x512xf32>
    %c0_6 = arith.constant 0 : index
    %c0_7 = arith.constant 0 : index
    %8 = vector.load %arg4[%c0_6, %c0_7] : memref<512x256xf32, #tpu.memory_space<vmem>>, vector<512x256xf32>
    %cst_8 = arith.constant dense<0.000000e+00> : vector<2x256xf32>
    %9 = tpu.matmul %7, %8, %cst_8 {dimension_numbers = #tpu.dot_dimension_numbers<[1], [0], [0], [1], [0, 0, 1, 1], [], []>} : vector<2x512xf32>, vector<512x256xf32>, vector<2x256xf32> -> vector<2x256xf32>
    %c0_9 = arith.constant 0 : index
    %c0_10 = arith.constant 0 : index
    %10 = vector.load %arg5[%c0_9, %c0_10] : memref<1x256xf32, #tpu.memory_space<vmem>>, vector<1x256xf32>
    %11 = vector.broadcast %10 : vector<1x256xf32> to vector<2x256xf32>
    %12 = arith.addf %9, %11 : vector<2x256xf32>
    %cst_11 = arith.constant 0.000000e+00 : f32
    %13 = vector.broadcast %cst_11 : f32 to vector<2x256xf32>
    %14 = arith.maximumf %12, %13 : vector<2x256xf32>
    %c0_12 = arith.constant 0 : index
    %c0_13 = arith.constant 0 : index
    %15 = vector.load %arg6[%c0_12, %c0_13] : memref<256x128xf32, #tpu.memory_space<vmem>>, vector<256x128xf32>
    %cst_14 = arith.constant dense<0.000000e+00> : vector<2x128xf32>
    %16 = tpu.matmul %14, %15, %cst_14 {dimension_numbers = #tpu.dot_dimension_numbers<[1], [0], [0], [1], [0, 0, 1, 1], [], []>} : vector<2x256xf32>, vector<256x128xf32>, vector<2x128xf32> -> vector<2x128xf32>
    %c0_15 = arith.constant 0 : index
    %c0_16 = arith.constant 0 : index
    %17 = vector.load %arg7[%c0_15, %c0_16] : memref<1x128xf32, #tpu.memory_space<vmem>>, vector<1x128xf32>
    %18 = vector.broadcast %17 : vector<1x128xf32> to vector<2x128xf32>
    %19 = arith.addf %16, %18 : vector<2x128xf32>
    %cst_17 = arith.constant 0.000000e+00 : f32
    %20 = vector.broadcast %cst_17 : f32 to vector<2x128xf32>
    %21 = arith.maximumf %19, %20 : vector<2x128xf32>
    %c0_18 = arith.constant 0 : index
    %c0_19 = arith.constant 0 : index
    %22 = vector.load %arg8[%c0_18, %c0_19] : memref<128x1xf32, #tpu.memory_space<vmem>>, vector<128x1xf32>
    %cst_20 = arith.constant dense<0.000000e+00> : vector<2x1xf32>
    %23 = tpu.matmul %21, %22, %cst_20 {dimension_numbers = #tpu.dot_dimension_numbers<[1], [0], [0], [1], [0, 0, 1, 1], [], []>} : vector<2x128xf32>, vector<128x1xf32>, vector<2x1xf32> -> vector<2x1xf32>
    %c0_21 = arith.constant 0 : index
    %c0_22 = arith.constant 0 : index
    %24 = vector.load %arg9[%c0_21, %c0_22] : memref<1x1xf32, #tpu.memory_space<vmem>>, vector<1x1xf32>
    %25 = vector.broadcast %24 : vector<1x1xf32> to vector<2x1xf32>
    %26 = arith.addf %23, %25 : vector<2x1xf32>
    %cst_23 = arith.constant 0.000000e+00 : f32
    %27 = vector.broadcast %cst_23 : f32 to vector<2x1xf32>
    %28 = arith.maximumf %26, %27 : vector<2x1xf32>
    %c0_24 = arith.constant 0 : index
    %c0_25 = arith.constant 0 : index
    %29 = vector.load %arg1[%c0_24, %c0_25] : memref<2x20xf32, #tpu.memory_space<vmem>>, vector<2x20xf32>
    %c0_26 = arith.constant 0 : index
    %c0_27 = arith.constant 0 : index
    %30 = vector.load %arg10[%c0_26, %c0_27] : memref<20x512xf32, #tpu.memory_space<vmem>>, vector<20x512xf32>
    %cst_28 = arith.constant dense<0.000000e+00> : vector<2x512xf32>
    %31 = tpu.matmul %29, %30, %cst_28 {dimension_numbers = #tpu.dot_dimension_numbers<[1], [0], [0], [1], [0, 0, 1, 1], [], []>} : vector<2x20xf32>, vector<20x512xf32>, vector<2x512xf32> -> vector<2x512xf32>
    %c0_29 = arith.constant 0 : index
    %c0_30 = arith.constant 0 : index
    %32 = vector.load %arg11[%c0_29, %c0_30] : memref<1x512xf32, #tpu.memory_space<vmem>>, vector<1x512xf32>
    %33 = vector.broadcast %32 : vector<1x512xf32> to vector<2x512xf32>
    %34 = arith.addf %31, %33 : vector<2x512xf32>
    %cst_31 = arith.constant 0.000000e+00 : f32
    %35 = vector.broadcast %cst_31 : f32 to vector<2x512xf32>
    %36 = arith.maximumf %34, %35 : vector<2x512xf32>
    %c0_32 = arith.constant 0 : index
    %c0_33 = arith.constant 0 : index
    %37 = vector.load %arg12[%c0_32, %c0_33] : memref<512x256xf32, #tpu.memory_space<vmem>>, vector<512x256xf32>
    %cst_34 = arith.constant dense<0.000000e+00> : vector<2x256xf32>
    %38 = tpu.matmul %36, %37, %cst_34 {dimension_numbers = #tpu.dot_dimension_numbers<[1], [0], [0], [1], [0, 0, 1, 1], [], []>} : vector<2x512xf32>, vector<512x256xf32>, vector<2x256xf32> -> vector<2x256xf32>
    %c0_35 = arith.constant 0 : index
    %c0_36 = arith.constant 0 : index
    %39 = vector.load %arg13[%c0_35, %c0_36] : memref<1x256xf32, #tpu.memory_space<vmem>>, vector<1x256xf32>
    %40 = vector.broadcast %39 : vector<1x256xf32> to vector<2x256xf32>
    %41 = arith.addf %38, %40 : vector<2x256xf32>
    %cst_37 = arith.constant 0.000000e+00 : f32
    %42 = vector.broadcast %cst_37 : f32 to vector<2x256xf32>
    %43 = arith.maximumf %41, %42 : vector<2x256xf32>
    %c0_38 = arith.constant 0 : index
    %c0_39 = arith.constant 0 : index
    %44 = vector.load %arg14[%c0_38, %c0_39] : memref<256x128xf32, #tpu.memory_space<vmem>>, vector<256x128xf32>
    %cst_40 = arith.constant dense<0.000000e+00> : vector<2x128xf32>
    %45 = tpu.matmul %43, %44, %cst_40 {dimension_numbers = #tpu.dot_dimension_numbers<[1], [0], [0], [1], [0, 0, 1, 1], [], []>} : vector<2x256xf32>, vector<256x128xf32>, vector<2x128xf32> -> vector<2x128xf32>
    %c0_41 = arith.constant 0 : index
    %c0_42 = arith.constant 0 : index
    %46 = vector.load %arg15[%c0_41, %c0_42] : memref<1x128xf32, #tpu.memory_space<vmem>>, vector<1x128xf32>
    %47 = vector.broadcast %46 : vector<1x128xf32> to vector<2x128xf32>
    %48 = arith.addf %45, %47 : vector<2x128xf32>
    %cst_43 = arith.constant 0.000000e+00 : f32
    %49 = vector.broadcast %cst_43 : f32 to vector<2x128xf32>
    %50 = arith.maximumf %48, %49 : vector<2x128xf32>
    %c0_44 = arith.constant 0 : index
    %c0_45 = arith.constant 0 : index
    %51 = vector.load %arg16[%c0_44, %c0_45] : memref<128x90xf32, #tpu.memory_space<vmem>>, vector<128x90xf32>
    %cst_46 = arith.constant dense<0.000000e+00> : vector<2x90xf32>
    %52 = tpu.matmul %50, %51, %cst_46 {dimension_numbers = #tpu.dot_dimension_numbers<[1], [0], [0], [1], [0, 0, 1, 1], [], []>} : vector<2x128xf32>, vector<128x90xf32>, vector<2x90xf32> -> vector<2x90xf32>
    %c0_47 = arith.constant 0 : index
    %c0_48 = arith.constant 0 : index
    %53 = vector.load %arg17[%c0_47, %c0_48] : memref<1x90xf32, #tpu.memory_space<vmem>>, vector<1x90xf32>
    %54 = vector.broadcast %53 : vector<1x90xf32> to vector<2x90xf32>
    %55 = arith.addf %52, %54 : vector<2x90xf32>
    %cst_49 = arith.constant 0.000000e+00 : f32
    %56 = vector.broadcast %cst_49 : f32 to vector<2x90xf32>
    %57 = arith.maximumf %55, %56 : vector<2x90xf32>
    %c0_50 = arith.constant 0 : index
    %c0_51 = arith.constant 0 : index
    %58 = vector.load %arg18[%c0_50, %c0_51] : memref<1x64xf32, #tpu.memory_space<vmem>>, vector<1x64xf32>
    %59 = vector.broadcast %28 : vector<2x1xf32> to vector<2x64xf32>
    %60 = vector.broadcast %58 : vector<1x64xf32> to vector<2x64xf32>
    %61 = arith.mulf %59, %60 : vector<2x64xf32>
    %c0_52 = arith.constant 0 : index
    %c0_53 = arith.constant 0 : index
    %62 = vector.load %arg19[%c0_52, %c0_53] : memref<90x64xf32, #tpu.memory_space<vmem>>, vector<90x64xf32>
    %cst_54 = arith.constant dense<0.000000e+00> : vector<2x64xf32>
    %63 = tpu.matmul %57, %62, %cst_54 {dimension_numbers = #tpu.dot_dimension_numbers<[1], [0], [0], [1], [0, 0, 1, 1], [], []>} : vector<2x90xf32>, vector<90x64xf32>, vector<2x64xf32> -> vector<2x64xf32>
    %64 = arith.addf %61, %63 : vector<2x64xf32>
    %c0_55 = arith.constant 0 : index
    %c0_56 = arith.constant 0 : index
    %65 = vector.load %arg20[%c0_55, %c0_56] : memref<1x64xf32, #tpu.memory_space<vmem>>, vector<1x64xf32>
    %66 = vector.broadcast %65 : vector<1x64xf32> to vector<2x64xf32>
    %67 = arith.addf %64, %66 : vector<2x64xf32>
    %cst_57 = arith.constant 0.000000e+00 : f32
    %68 = vector.broadcast %cst_57 : f32 to vector<2x64xf32>
    %69 = arith.maximumf %67, %68 : vector<2x64xf32>
    %c0_58 = arith.constant 0 : index
    %c0_59 = arith.constant 0 : index
    %70 = vector.load %arg21[%c0_58, %c0_59] : memref<64x32xf32, #tpu.memory_space<vmem>>, vector<64x32xf32>
    %cst_60 = arith.constant dense<0.000000e+00> : vector<2x32xf32>
    %71 = tpu.matmul %69, %70, %cst_60 {dimension_numbers = #tpu.dot_dimension_numbers<[1], [0], [0], [1], [0, 0, 1, 1], [], []>} : vector<2x64xf32>, vector<64x32xf32>, vector<2x32xf32> -> vector<2x32xf32>
    %c0_61 = arith.constant 0 : index
    %c0_62 = arith.constant 0 : index
    %72 = vector.load %arg22[%c0_61, %c0_62] : memref<1x32xf32, #tpu.memory_space<vmem>>, vector<1x32xf32>
    %73 = vector.broadcast %72 : vector<1x32xf32> to vector<2x32xf32>
    %74 = arith.addf %71, %73 : vector<2x32xf32>
    %cst_63 = arith.constant 0.000000e+00 : f32
    %75 = vector.broadcast %cst_63 : f32 to vector<2x32xf32>
    %76 = arith.maximumf %74, %75 : vector<2x32xf32>
    %c0_64 = arith.constant 0 : index
    %c0_65 = arith.constant 0 : index
    %77 = vector.load %arg23[%c0_64, %c0_65] : memref<32x16xf32, #tpu.memory_space<vmem>>, vector<32x16xf32>
    %cst_66 = arith.constant dense<0.000000e+00> : vector<2x16xf32>
    %78 = tpu.matmul %76, %77, %cst_66 {dimension_numbers = #tpu.dot_dimension_numbers<[1], [0], [0], [1], [0, 0, 1, 1], [], []>} : vector<2x32xf32>, vector<32x16xf32>, vector<2x16xf32> -> vector<2x16xf32>
    %c0_67 = arith.constant 0 : index
    %c0_68 = arith.constant 0 : index
    %79 = vector.load %arg24[%c0_67, %c0_68] : memref<1x16xf32, #tpu.memory_space<vmem>>, vector<1x16xf32>
    %80 = vector.broadcast %79 : vector<1x16xf32> to vector<2x16xf32>
    %81 = arith.addf %78, %80 : vector<2x16xf32>
    %cst_69 = arith.constant 0.000000e+00 : f32
    %82 = vector.broadcast %cst_69 : f32 to vector<2x16xf32>
    %83 = arith.maximumf %81, %82 : vector<2x16xf32>
    %c0_70 = arith.constant 0 : index
    %c0_71 = arith.constant 0 : index
    %84 = vector.load %arg25[%c0_70, %c0_71] : memref<16x10xf32, #tpu.memory_space<vmem>>, vector<16x10xf32>
    %cst_72 = arith.constant dense<0.000000e+00> : vector<2x10xf32>
    %85 = tpu.matmul %83, %84, %cst_72 {dimension_numbers = #tpu.dot_dimension_numbers<[1], [0], [0], [1], [0, 0, 1, 1], [], []>} : vector<2x16xf32>, vector<16x10xf32>, vector<2x10xf32> -> vector<2x10xf32>
    %c0_73 = arith.constant 0 : index
    %c0_74 = arith.constant 0 : index
    %86 = vector.load %arg26[%c0_73, %c0_74] : memref<1x10xf32, #tpu.memory_space<vmem>>, vector<1x10xf32>
    %87 = vector.broadcast %86 : vector<1x10xf32> to vector<2x10xf32>
    %88 = arith.addf %85, %87 : vector<2x10xf32>
    %c0_75 = arith.constant 0 : index
    %c0_76 = arith.constant 0 : index
    %89 = vector.load %arg27[%c0_75, %c0_76] : memref<2x10xf32, #tpu.memory_space<vmem>>, vector<2x10xf32>
    tpu.vector_store %arg27[%c0_75, %c0_76], %88 {strides = array<i32>} : memref<2x10xf32, #tpu.memory_space<vmem>>, vector<2x10xf32>,
    return
  }
}

</mosaic_0001>

<bundles_post_ra>
// kernel: ml_forward.3
= control target key start
LH: loop header
LB: loop body
LE: loop exit
PB: predicated region body
PF: predicated region fallthrough
CT: control target
= control target key end

     0   :  { %s4063_s0 = inlined_call_operand.vmem [shape: f32[2,4], index: 0, kind: input, shape index: {}]   ;;  %s4064_s1 = inlined_call_operand.vmem [shape: f32[2,20], index: 1, kind: input, shape index: {}]   ;;  %s4065_s2 = inlined_call_operand.vmem [shape: f32[4,512], index: 2, kind: input, shape index: {}]   ;;  %s4066_s3 = inlined_call_operand.vmem [shape: f32[1,512], index: 3, kind: input, shape index: {}]   ;;  %s4067_s4 = inlined_call_operand.vmem [shape: f32[512,256], index: 4, kind: input, shape index: {}]   ;;  %s4068_s5 = inlined_call_operand.vmem [shape: f32[1,256], index: 5, kind: input, shape index: {}]   ;;  %s4069_s6 = inlined_call_operand.vmem [shape: f32[256,128], index: 6, kind: input, shape index: {}]   ;;  %s4070_s7 = inlined_call_operand.vmem [shape: f32[1,128], index: 7, kind: input, shape index: {}]   ;;  %s4071_s8 = inlined_call_operand.vmem [shape: f32[128,1], index: 8, kind: input, shape index: {}]   ;;  %s4072_s9 = inlined_call_operand.<no memory space> [shape: f32[1,1], index: 9, kind: input, shape index: {}]   ;;  %s4073_s10 = inlined_call_operand.vmem [shape: f32[20,512], index: 10, kind: input, shape index: {}]   ;;  %s4074_s11 = inlined_call_operand.vmem [shape: f32[1,512], index: 11, kind: input, shape index: {}]   ;;  %s4075_s12 = inlined_call_operand.vmem [shape: f32[512,256], index: 12, kind: input, shape index: {}]   ;;  %s4076_s13 = inlined_call_operand.vmem [shape: f32[1,256], index: 13, kind: input, shape index: {}]   ;;  %s4077_s14 = inlined_call_operand.vmem [shape: f32[256,128], index: 14, kind: input, shape index: {}]   ;;  %s4078_s15 = inlined_call_operand.vmem [shape: f32[1,128], index: 15, kind: input, shape index: {}]   ;;  %s4079_s16 = inlined_call_operand.vmem [shape: f32[128,90], index: 16, kind: input, shape index: {}]   ;;  %s4080_s17 = inlined_call_operand.vmem [shape: f32[1,90], index: 17, kind: input, shape index: {}]   ;;  %s4081_s18 = inlined_call_operand.vmem [shape: f32[1,64], index: 18, kind: input, shape index: {}]   ;;  %s4082_s19 = inlined_call_operand.vmem [shape: f32[90,64], index: 19, kind: input, shape index: {}]   ;;  %s4083_s20 = inlined_call_operand.vmem [shape: f32[1,64], index: 20, kind: input, shape index: {}]   ;;  %s4084_s21 = inlined_call_operand.vmem [shape: f32[64,32], index: 21, kind: input, shape index: {}]   ;;  %s4085_s22 = inlined_call_operand.vmem [shape: f32[1,32], index: 22, kind: input, shape index: {}]   ;;  %s4086_s23 = inlined_call_operand.vmem [shape: f32[32,16], index: 23, kind: input, shape index: {}]   ;;  %s4087_s24 = inlined_call_operand.vmem [shape: f32[1,16], index: 24, kind: input, shape index: {}]   ;;  %s4088_s25 = inlined_call_operand.vmem [shape: f32[16,10], index: 25, kind: input, shape index: {}]   ;;  %s4089_s26 = inlined_call_operand.vmem [shape: f32[1,10], index: 26, kind: input, shape index: {}]   ;;  %s4090_s27 = inlined_call_operand.hbm [shape: f32[2,10], index: 27, kind: output, shape index: {}]  }
   0x1   :  { %4096 = sst [smem:[#allocation6_spill]] %s4063_s0 }
   0x2   :  { %4097 = sst [smem:[#allocation7_spill]] %s4064_s1 }
   0x3   :  { %4098 = sst [smem:[#allocation8_spill]] %s4065_s2 }
   0x4   :  { %4099 = sst [smem:[#allocation9_spill]] %s4066_s3 }
   0x5   :  { %4100 = sst [smem:[#allocation10_spill]] %s4067_s4 }
   0x6   :  { %4101 = sst [smem:[#allocation11_spill]] %s4068_s5 }
   0x7   :  { %4102 = sst [smem:[#allocation12_spill]] %s4069_s6 }
   0x8   :  { %4103 = sst [smem:[#allocation13_spill]] %s4070_s7 }
   0x9   :  { %4104 = sst [smem:[#allocation14_spill]] %s4071_s8 }
   0xa   :  { %4105 = sst [smem:[#allocation15_spill]] %s4072_s9 }
   0xb   :  { %4106 = sst [smem:[#allocation16_spill]] %s4073_s10  ;;  %s4108_s8 = sld [smem:[#allocation15_spill]] }
   0xc   :  { %4107 = sst [smem:[#allocation17_spill]] %s4074_s11 }
  0x11   :  { %v32_v0 = vstv %s4108_s8 }
  0x12   :  { %33 = vst [vmem:[#allocation2] sm:$0x1] %v32_v0 }
  0x13   :  { %s4109_s5 = sld [smem:[#allocation8_spill]]  ;;  %vm122_vm0 = vcmask 1043456   ;;  %s4110_s10 = sld [smem:[#allocation6_spill]]  ;;  %v2589_v4 = vmov 0.0   ;;  %vm118_vm1 = vcmask 31744  }
  0x14   :  { %195 = vmatprep.mubr.f32.mxu0 %v2589_v4  ;;  %266 = vmatprep.mubr.f32.mxu1 %v2589_v4  ;;  %s4111_s2 = sld [smem:[#allocation10_spill]] }
  0x19   :  { %v90_v1 = vld [vmem:[%s4109_s5] sm:$0xff]  ;;  %v91_v5 = vld [vmem:[%s4109_s5 + $0x8] sm:$0xff] }
  0x1a   :  { %v89_v2 = vld [vmem:[%s4110_s10] sm:$0x3]  ;;  %v116_v3 = vcombine.high %v90_v1, %v90_v1  ;;  %v278_v6 = vld [vmem:[%s4111_s2 + $0x8] sm:$0xff]  ;;  %v280_v7 = vld [vmem:[%s4111_s2 + $0x18] sm:$0xff]  ;;  %v117_v8 = vcombine.high %v91_v5, %v91_v5 }
  0x1b   :  { %v2132_v9 = vpack.c.bf16 %v280_v7, %v278_v6  ;;  %v277_v10 = vld [vmem:[%s4111_s2] sm:$0xff]  ;;  %v279_v11 = vld [vmem:[%s4111_s2 + $0x10] sm:$0xff]  ;;  %v282_v12 = vld [vmem:[%s4111_s2 + $0x28] sm:$0xff] }
  0x1c   :  { %1838 = vmatprep.subr.msk.mxu0 %vm122_vm0, %v116_v3  ;;  %v2134_v13 = vpack.c.bf16 %v279_v11, %v277_v10  ;;  %v284_v14 = vld [vmem:[%s4111_s2 + $0x38] sm:$0xff]  ;;  %1841 = vmatprep.subr.msk.mxu1 %vm122_vm0, %v117_v8  ;;  %v281_v16 = vld [vmem:[%s4111_s2 + $0x20] sm:$0xff]  ;;  %v283_v17 = vld [vmem:[%s4111_s2 + $0x30] sm:$0xff] }
  0x1d   :  { %1839 = vmatpush1.msk.msra.mxu0 %vm122_vm0, %v90_v1  ;;  %v2136_v15 = vpack.c.bf16 %v284_v14, %v282_v12  ;;  %1842 = vmatpush1.msk.msra.mxu1 %vm122_vm0, %v91_v5  ;;  %v286_v18 = vld [vmem:[%s4111_s2 + $0x48] sm:$0xff]  ;;  %v288_v19 = vld [vmem:[%s4111_s2 + $0x58] sm:$0xff]  ;;  %v2138_v20 = vpack.c.bf16 %v283_v17, %v281_v16  ;;  %v285_v22 = vld [vmem:[%s4111_s2 + $0x40] sm:$0xff] }
  0x1e   :  { %1840 = vmatmul.mubr.msk.f32.vlgmr.msra.gmra.mrb[0].mxu0 %vm118_vm1, %v89_v2  ;;  %1843 = vmatmul.mubr.msk.f32.vlgmr.msra.gmra.mrb[0].mxu1 %vm118_vm1, %v89_v2  ;;  %v2140_v21 = vpack.c.bf16 %v288_v19, %v286_v18  ;;  %v287_v23 = vld [vmem:[%s4111_s2 + $0x50] sm:$0xff]  ;;  %v290_v24 = vld [vmem:[%s4111_s2 + $0x68] sm:$0xff]  ;;  %v292_v25 = vld [vmem:[%s4111_s2 + $0x78] sm:$0xff] }
  0x1f   :  { %2133 = vmatprep.subr.bf16.mxu0 %v2132_v9  ;;  %v2142_v26 = vpack.c.bf16 %v287_v23, %v285_v22  ;;  %v2144_v27 = vpack.c.bf16 %v292_v25, %v290_v24  ;;  %v289_v28 = vld [vmem:[%s4111_s2 + $0x60] sm:$0xff]  ;;  %v291_v29 = vld [vmem:[%s4111_s2 + $0x70] sm:$0xff]  ;;  %v294_v30 = vld [vmem:[%s4111_s2 + $0x88] sm:$0xff] }
  0x20   :  { %2135 = vmatpush1.bf16.msra.mxu0 %v2134_v13  ;;  %v296_v31 = vld [vmem:[%s4111_s2 + $0x98] sm:$0xff]  ;;  %v2146_v32 = vpack.c.bf16 %v291_v29, %v289_v28  ;;  %v293_v34 = vld [vmem:[%s4111_s2 + $0x80] sm:$0xff]  ;;  %v295_v35 = vld [vmem:[%s4111_s2 + $0x90] sm:$0xff] }
  0x21   :  { %2137 = vmatprep.subr.bf16.mxu0 %v2136_v15  ;;  %v2148_v33 = vpack.c.bf16 %v296_v31, %v294_v30  ;;  %v298_v36 = vld [vmem:[%s4111_s2 + $0xa8] sm:$0xff]  ;;  %v300_v37 = vld [vmem:[%s4111_s2 + $0xb8] sm:$0xff]  ;;  %v2150_v38 = vpack.c.bf16 %v295_v35, %v293_v34  ;;  %v297_v40 = vld [vmem:[%s4111_s2 + $0xa0] sm:$0xff] }
  0x22   :  { %v2152_v39 = vpack.c.bf16 %v300_v37, %v298_v36  ;;  %v299_v41 = vld [vmem:[%s4111_s2 + $0xb0] sm:$0xff]  ;;  %v302_v42 = vld [vmem:[%s4111_s2 + $0xc8] sm:$0xff]  ;;  %v304_v43 = vld [vmem:[%s4111_s2 + $0xd8] sm:$0xff] }
  0x24   :  { %2139 = vmatpush1.bf16.msra.mxu0 %v2138_v20 }
  0x25   :  { %2141 = vmatprep.subr.bf16.mxu0 %v2140_v21 }
  0x28   :  { %2143 = vmatpush1.bf16.msra.mxu0 %v2142_v26 }
  0x29   :  { %2145 = vmatprep.subr.bf16.mxu0 %v2144_v27 }
  0x2c   :  { %2147 = vmatpush1.bf16.msra.mxu0 %v2146_v32 }
  0x2d   :  { %2149 = vmatprep.subr.bf16.mxu0 %v2148_v33 }
  0x2e   :  { %34 = vsyncpa [#allocation4], 0  ;;  %v2154_v44 = vpack.c.bf16 %v299_v41, %v297_v40  ;;  %v2156_v45 = vpack.c.bf16 %v304_v43, %v302_v42  ;;  %v301_v46 = vld [vmem:[%s4111_s2 + $0xc0] sm:$0xff]  ;;  %v303_v47 = vld [vmem:[%s4111_s2 + $0xd0] sm:$0xff]  ;;  %s4112_s5 = sld [smem:[#allocation12_spill]]  ;;  %s4113_s28 = sld [smem:[#allocation9_spill]] }
  0x2f   :  { %v306_v48 = vld [vmem:[%s4111_s2 + $0xe8] sm:$0xff]  ;;  %v308_v49 = vld [vmem:[%s4111_s2 + $0xf8] sm:$0xff]  ;;  %v2158_v50 = vpack.c.bf16 %v303_v47, %v301_v46  ;;  %v305_v52 = vld [vmem:[%s4111_s2 + $0xe0] sm:$0xff]  ;;  %s4114_s7 = sld [smem:[#allocation11_spill]]  ;;  %s4116_s0 = sld [smem:[#allocation16_spill]]  ;;  %vm2591_vm2 = vmmov 0  }
  0x30   :  { %2151 = vmatpush1.bf16.msra.mxu0 %v2150_v38  ;;  %v2160_v51 = vpack.c.bf16 %v308_v49, %v306_v48  ;;  %v307_v53 = vld [vmem:[%s4111_s2 + $0xf0] sm:$0xff]  ;;  %v310_v54 = vld [vmem:[%s4111_s2 + $0x108] sm:$0xff]  ;;  %v312_v55 = vld [vmem:[%s4111_s2 + $0x118] sm:$0xff]  ;;  %s4118_s8 = sld [smem:[#allocation7_spill]]  ;;  %vm800_vm3 = vcmask 162816   ;;  %s4119_s10 = sld [smem:[#allocation17_spill]] }
  0x31   :  { %2153 = vmatprep.subr.bf16.mxu0 %v2152_v39  ;;  %v2162_v56 = vpack.c.bf16 %v307_v53, %v305_v52  ;;  %v2164_v57 = vpack.c.bf16 %v312_v55, %v310_v54  ;;  %v309_v58 = vld [vmem:[%s4111_s2 + $0x100] sm:$0xff]  ;;  %v311_v59 = vld [vmem:[%s4111_s2 + $0x110] sm:$0xff]  ;;  %v314_v60 = vld [vmem:[%s4111_s2 + $0x128] sm:$0xff]  ;;  %vm1479_vm4 = vcmask 1041408   ;;  %vm2593_vm5 = vmmov 1  }
  0x32   :  { %v316_v61 = vld [vmem:[%s4111_s2 + $0x138] sm:$0xff]  ;;  %v2166_v62 = vpack.c.bf16 %v311_v59, %v309_v58  ;;  %v313_v0 = vld [vmem:[%s4111_s2 + $0x120] sm:$0xff]  ;;  %v315_v1 = vld [vmem:[%s4111_s2 + $0x130] sm:$0xff]  ;;  %vm1475_vm7 = vcmask 736256   ;;  %vm1578_vm8 = vcmask 523264   ;;  %vm1664_vm9 = vcmask 261120  }
  0x33   :  { %v2168_v63 = vpack.c.bf16 %v316_v61, %v314_v60  ;;  %v318_v2 = vld [vmem:[%s4111_s2 + $0x148] sm:$0xff]  ;;  %v320_v3 = vld [vmem:[%s4111_s2 + $0x158] sm:$0xff]  ;;  %v2170_v5 = vpack.c.bf16 %v315_v1, %v313_v0  ;;  %v317_v7 = vld [vmem:[%s4111_s2 + $0x140] sm:$0xff]  ;;  %vm1748_vm10 = vcmask 130048   ;;  %vm1822_vm11 = vcmask 74752  }
  0x34   :  { %2155 = vmatpush1.bf16.msra.mxu0 %v2154_v44  ;;  %v2172_v6 = vpack.c.bf16 %v320_v3, %v318_v2  ;;  %v319_v8 = vld [vmem:[%s4111_s2 + $0x150] sm:$0xff]  ;;  %v322_v9 = vld [vmem:[%s4111_s2 + $0x168] sm:$0xff]  ;;  %v324_v10 = vld [vmem:[%s4111_s2 + $0x178] sm:$0xff] }
  0x35   :  { %2157 = vmatprep.subr.bf16.mxu0 %v2156_v45  ;;  %v2174_v11 = vpack.c.bf16 %v319_v8, %v317_v7  ;;  %v2176_v12 = vpack.c.bf16 %v324_v10, %v322_v9  ;;  %v321_v13 = vld [vmem:[%s4111_s2 + $0x160] sm:$0xff]  ;;  %v323_v14 = vld [vmem:[%s4111_s2 + $0x170] sm:$0xff]  ;;  %v326_v15 = vld [vmem:[%s4111_s2 + $0x188] sm:$0xff] }
  0x36   :  { %v328_v16 = vld [vmem:[%s4111_s2 + $0x198] sm:$0xff]  ;;  %v2178_v17 = vpack.c.bf16 %v323_v14, %v321_v13  ;;  %v325_v19 = vld [vmem:[%s4111_s2 + $0x180] sm:$0xff]  ;;  %v327_v20 = vld [vmem:[%s4111_s2 + $0x190] sm:$0xff] }
  0x37   :  { %v2180_v18 = vpack.c.bf16 %v328_v16, %v326_v15  ;;  %v330_v21 = vld [vmem:[%s4111_s2 + $0x1a8] sm:$0xff]  ;;  %v332_v22 = vld [vmem:[%s4111_s2 + $0x1b8] sm:$0xff]  ;;  %v2182_v23 = vpack.c.bf16 %v327_v20, %v325_v19  ;;  %v329_v25 = vld [vmem:[%s4111_s2 + $0x1a0] sm:$0xff]  ;;  %v94_v19 = vlaneseq }
  0x38   :  { %2159 = vmatpush1.bf16.msra.mxu0 %v2158_v50  ;;  %v2184_v24 = vpack.c.bf16 %v332_v22, %v330_v21  ;;  %v331_v26 = vld [vmem:[%s4111_s2 + $0x1b0] sm:$0xff]  ;;  %v334_v27 = vld [vmem:[%s4111_s2 + $0x1c8] sm:$0xff]  ;;  %v336_v28 = vld [vmem:[%s4111_s2 + $0x1d8] sm:$0xff] }
  0x39   :  { %2161 = vmatprep.subr.bf16.mxu0 %v2160_v51  ;;  %v2186_v29 = vpack.c.bf16 %v331_v26, %v329_v25  ;;  %v2188_v30 = vpack.c.bf16 %v336_v28, %v334_v27  ;;  %v333_v31 = vld [vmem:[%s4111_s2 + $0x1c0] sm:$0xff]  ;;  %v335_v32 = vld [vmem:[%s4111_s2 + $0x1d0] sm:$0xff]  ;;  %v338_v34 = vld [vmem:[%s4111_s2 + $0x1e8] sm:$0xff]  ;;  %v3031_v20 = vshrl.u32 %v94_v19, 7 }
  0x3a   :  { %v2190_v33 = vpack.c.bf16 %v335_v32, %v333_v31  ;;  %v340_v35 = vld [vmem:[%s4111_s2 + $0x1f8] sm:$0xff]  ;;  %v337_v37 = vld [vmem:[%s4111_s2 + $0x1e0] sm:$0xff]  ;;  %v339_v38 = vld [vmem:[%s4111_s2 + $0x1f0] sm:$0xff] }
  0x3b   :  { %v2192_v36 = vpack.c.bf16 %v340_v35, %v338_v34  ;;  %v2194_v39 = vpack.c.bf16 %v339_v38, %v337_v37  ;;  %v342_v40 = vld [vmem:[%s4111_s2 + $0x208] sm:$0xff]  ;;  %v344_v41 = vld [vmem:[%s4111_s2 + $0x218] sm:$0xff]  ;;  %v577_v43 = vld [vmem:[%s4112_s5 + $0x80] sm:$0xff]  ;;  %v3034_v21 = vsub.s32 0, %v3031_v20 }
  0x3c   :  { %2163 = vmatpush1.bf16.msra.mxu0 %v2162_v56  ;;  %v2196_v42 = vpack.c.bf16 %v344_v41, %v342_v40  ;;  %v578_v44 = vld [vmem:[%s4112_s5 + $0x88] sm:$0xff]  ;;  %v561_v45 = vld [vmem:[%s4112_s5] sm:$0xff]  ;;  %v579_v48 = vld [vmem:[%s4112_s5 + $0x90] sm:$0xff] }
  0x3d   :  { %2165 = vmatprep.subr.bf16.mxu0 %v2164_v57  ;;  %v2260_v46 = vpack.c.bf16 %v578_v44, %v577_v43  ;;  %v562_v47 = vld [vmem:[%s4112_s5 + $0x8] sm:$0xff]  ;;  %v580_v49 = vld [vmem:[%s4112_s5 + $0x98] sm:$0xff]  ;;  %v563_v52 = vld [vmem:[%s4112_s5 + $0x10] sm:$0xff] }
  0x3e   :  { %v2262_v50 = vpack.c.bf16 %v562_v47, %v561_v45  ;;  %v2264_v51 = vpack.c.bf16 %v580_v49, %v579_v48  ;;  %v564_v53 = vld [vmem:[%s4112_s5 + $0x18] sm:$0xff]  ;;  %v581_v54 = vld [vmem:[%s4112_s5 + $0xa0] sm:$0xff]  ;;  %v582_v55 = vld [vmem:[%s4112_s5 + $0xa8] sm:$0xff] }
  0x3f   :  { %2261 = vmatprep.subr.bf16.mxu1 %v2260_v46  ;;  %v2266_v56 = vpack.c.bf16 %v564_v53, %v563_v52  ;;  %v2268_v57 = vpack.c.bf16 %v582_v55, %v581_v54  ;;  %v565_v58 = vld [vmem:[%s4112_s5 + $0x20] sm:$0xff]  ;;  %v566_v59 = vld [vmem:[%s4112_s5 + $0x28] sm:$0xff]  ;;  %v583_v60 = vld [vmem:[%s4112_s5 + $0xb0] sm:$0xff] }
  0x40   :  { %2167 = vmatpush1.bf16.msra.mxu0 %v2166_v62  ;;  %2263 = vmatpush3.bf16.msra.mxu1 %v2262_v50  ;;  %v584_v61 = vld [vmem:[%s4112_s5 + $0xb8] sm:$0xff]  ;;  %v2270_v62 = vpack.c.bf16 %v566_v59, %v565_v58  ;;  %v567_v0 = vld [vmem:[%s4112_s5 + $0x30] sm:$0xff]  ;;  %v585_v2 = vld [vmem:[%s4112_s5 + $0xc0] sm:$0xff] }
  0x41   :  { %2169 = vmatprep.subr.bf16.mxu0 %v2168_v63  ;;  %2265 = vmatprep.subr.bf16.mxu1 %v2264_v51  ;;  %v2272_v63 = vpack.c.bf16 %v584_v61, %v583_v60  ;;  %v568_v1 = vld [vmem:[%s4112_s5 + $0x38] sm:$0xff]  ;;  %v586_v3 = vld [vmem:[%s4112_s5 + $0xc8] sm:$0xff]  ;;  %v569_v7 = vld [vmem:[%s4112_s5 + $0x40] sm:$0xff] }
  0x42   :  { %v570_v8 = vld [vmem:[%s4112_s5 + $0x48] sm:$0xff]  ;;  %v587_v9 = vld [vmem:[%s4112_s5 + $0xd0] sm:$0xff]  ;;  %v588_v10 = vld [vmem:[%s4112_s5 + $0xd8] sm:$0xff] }
  0x43   :  { %v571_v13 = vld [vmem:[%s4112_s5 + $0x50] sm:$0xff]  ;;  %v572_v14 = vld [vmem:[%s4112_s5 + $0x58] sm:$0xff]  ;;  %v589_v15 = vld [vmem:[%s4112_s5 + $0xe0] sm:$0xff] }
  0x44   :  { %2171 = vmatpush1.bf16.msra.mxu0 %v2170_v5  ;;  %2267 = vmatpush3.bf16.msra.mxu1 %v2266_v56  ;;  %v2274_v5 = vpack.c.bf16 %v568_v1, %v567_v0  ;;  %v590_v16 = vld [vmem:[%s4112_s5 + $0xe8] sm:$0xff]  ;;  %v3039_v22 = vld [vmem:[%s4113_s28] sm:$0xf]  ;;  %v343_v32 = vld [vmem:[%s4111_s2 + $0x210] sm:$0xff] }
  0x45   :  { %2173 = vmatprep.subr.bf16.mxu0 %v2172_v6  ;;  %2269 = vmatprep.subr.bf16.mxu1 %v2268_v57  ;;  %v2276_v6 = vpack.c.bf16 %v586_v3, %v585_v2  ;;  %v97_v25 = vrot.slane %v3039_v22, %v3034_v21  ;;  %v341_v31 = vld [vmem:[%s4111_s2 + $0x200] sm:$0xff]  ;;  %v346_v35 = vld [vmem:[%s4111_s2 + $0x228] sm:$0xff]  ;;  %v347_v44 = vld [vmem:[%s4111_s2 + $0x230] sm:$0xff] }
  0x46   :  { %v2198_v40 = vpack.c.bf16 %v343_v32, %v341_v31  ;;  %v345_v43 = vld [vmem:[%s4111_s2 + $0x220] sm:$0xff]  ;;  %v350_v46 = vld [vmem:[%s4111_s2 + $0x248] sm:$0xff]  ;;  %v352_v47 = vld [vmem:[%s4111_s2 + $0x258] sm:$0xff] }
  0x47   :  { %v2202_v48 = vpack.c.bf16 %v347_v44, %v345_v43  ;;  %v2204_v49 = vpack.c.bf16 %v352_v47, %v350_v46  ;;  %v349_v50 = vld [vmem:[%s4111_s2 + $0x240] sm:$0xff]  ;;  %v351_v51 = vld [vmem:[%s4111_s2 + $0x250] sm:$0xff]  ;;  %v354_v52 = vld [vmem:[%s4111_s2 + $0x268] sm:$0xff] }
  0x48   :  { %2175 = vmatpush1.bf16.msra.mxu0 %v2174_v11  ;;  %2271 = vmatpush3.bf16.msra.mxu1 %v2270_v62  ;;  %v2278_v11 = vpack.c.bf16 %v570_v8, %v569_v7  ;;  %v356_v53 = vld [vmem:[%s4111_s2 + $0x278] sm:$0xff]  ;;  %v2206_v54 = vpack.c.bf16 %v351_v51, %v349_v50  ;;  %v353_v56 = vld [vmem:[%s4111_s2 + $0x260] sm:$0xff]  ;;  %v355_v57 = vld [vmem:[%s4111_s2 + $0x270] sm:$0xff] }
  0x49   :  { %2177 = vmatprep.subr.bf16.mxu0 %v2176_v12  ;;  %2273 = vmatprep.subr.bf16.mxu1 %v2272_v63  ;;  %v2280_v12 = vpack.c.bf16 %v588_v10, %v587_v9  ;;  %v2208_v55 = vpack.c.bf16 %v356_v53, %v354_v52  ;;  %v358_v58 = vld [vmem:[%s4111_s2 + $0x288] sm:$0xff]  ;;  %v360_v59 = vld [vmem:[%s4111_s2 + $0x298] sm:$0xff]  ;;  %v2210_v60 = vpack.c.bf16 %v355_v57, %v353_v56  ;;  %v357_v62 = vld [vmem:[%s4111_s2 + $0x280] sm:$0xff] }
  0x4a   :  { %v2212_v61 = vpack.c.bf16 %v360_v59, %v358_v58  ;;  %v359_v63 = vld [vmem:[%s4111_s2 + $0x290] sm:$0xff]  ;;  %v362_v0 = vld [vmem:[%s4111_s2 + $0x2a8] sm:$0xff]  ;;  %v364_v1 = vld [vmem:[%s4111_s2 + $0x2b8] sm:$0xff] }
  0x4b   :  { %v2214_v2 = vpack.c.bf16 %v359_v63, %v357_v62  ;;  %v2216_v3 = vpack.c.bf16 %v364_v1, %v362_v0  ;;  %v366_v7 = vld [vmem:[%s4111_s2 + $0x2c8] sm:$0xff]  ;;  %v368_v8 = vld [vmem:[%s4111_s2 + $0x2d8] sm:$0xff]  ;;  %v385_v47 = vld [vmem:[%s4111_s2 + $0x360] sm:$0xff]  ;;  %v104_v0 = vsub.s32 2, %v3031_v20 }
  0x4c   :  { %2179 = vmatpush1.bf16.msra.mxu0 %v2178_v17  ;;  %2275 = vmatpush3.bf16.msra.mxu1 %v2274_v5  ;;  %v2282_v17 = vpack.c.bf16 %v572_v14, %v571_v13  ;;  %v361_v5 = vld [vmem:[%s4111_s2 + $0x2a0] sm:$0xff]  ;;  %v2220_v10 = vpack.c.bf16 %v368_v8, %v366_v7  ;;  %v370_v13 = vld [vmem:[%s4111_s2 + $0x2e8] sm:$0xff]  ;;  %v372_v14 = vld [vmem:[%s4111_s2 + $0x2f8] sm:$0xff] }
  0x4d   :  { %2181 = vmatprep.subr.bf16.mxu0 %v2180_v18  ;;  %2277 = vmatprep.subr.bf16.mxu1 %v2276_v6  ;;  %v2284_v18 = vpack.c.bf16 %v590_v16, %v589_v15  ;;  %v363_v6 = vld [vmem:[%s4111_s2 + $0x2b0] sm:$0xff]  ;;  %v2224_v16 = vpack.c.bf16 %v372_v14, %v370_v13  ;;  %v374_v19 = vld [vmem:[%s4111_s2 + $0x308] sm:$0xff]  ;;  %v380_v31 = vld [vmem:[%s4111_s2 + $0x338] sm:$0xff]  ;;  %v105_v8 = vrot.slane %v3039_v22, %v104_v0 }
  0x4e   :  { %v2218_v9 = vpack.c.bf16 %v363_v6, %v361_v5  ;;  %v386_v43 = vld [vmem:[%s4111_s2 + $0x368] sm:$0xff]  ;;  %v388_v44 = vld [vmem:[%s4111_s2 + $0x378] sm:$0xff]  ;;  %v389_v53 = vld [vmem:[%s4111_s2 + $0x380] sm:$0xff] }
  0x4f   :  { %v2240_v46 = vpack.c.bf16 %v388_v44, %v386_v43  ;;  %v392_v50 = vld [vmem:[%s4111_s2 + $0x398] sm:$0xff]  ;;  %v393_v59 = vld [vmem:[%s4111_s2 + $0x3a0] sm:$0xff]  ;;  %v402_v5 = vld [vmem:[%s4111_s2 + $0x3e8] sm:$0xff] }
  0x50   :  { %2183 = vmatpush1.bf16.msra.mxu0 %v2182_v23  ;;  %2279 = vmatpush3.bf16.msra.mxu1 %v2278_v11  ;;  %v3042_v23 = vsub.s32 1, %v3031_v20  ;;  %v365_v11 = vld [vmem:[%s4111_s2 + $0x2c0] sm:$0xff]  ;;  %v396_v56 = vld [vmem:[%s4111_s2 + $0x3b8] sm:$0xff]  ;;  %vm2525_vm6 = vmpackc.low %vm1479_vm4, %vm2593_vm5 }
  0x51   :  { %2185 = vmatprep.subr.bf16.mxu0 %v2184_v24  ;;  %2281 = vmatprep.subr.bf16.mxu1 %v2280_v12  ;;  %v108_v24 = vsub.s32 3, %v3031_v20  ;;  %v367_v12 = vld [vmem:[%s4111_s2 + $0x2d0] sm:$0xff]  ;;  %v400_v62 = vld [vmem:[%s4111_s2 + $0x3d8] sm:$0xff] }
  0x52   :  { %v101_v26 = vrot.slane %v3039_v22, %v3042_v23  ;;  %v2222_v15 = vpack.c.bf16 %v367_v12, %v365_v11  ;;  %v404_v6 = vld [vmem:[%s4111_s2 + $0x3f8] sm:$0xff]  ;;  %v403_v11 = vld [vmem:[%s4111_s2 + $0x3f0] sm:$0xff] }
  0x53   :  { %v109_v27 = vrot.slane %v3039_v22, %v108_v24  ;;  %v573_v22 = vld [vmem:[%s4112_s5 + $0x60] sm:$0xff]  ;;  %v1032_v20 = vld [vmem:[%s4075_s12 + $0x230] sm:$0xff] }
  0x54   :  { %2187 = vmatpush1.bf16.msra.mxu0 %v2186_v29  ;;  %2283 = vmatpush3.bf16.msra.mxu1 %v2282_v17  ;;  %v369_v17 = vld [vmem:[%s4111_s2 + $0x2e0] sm:$0xff] }
  0x55   :  { %2189 = vmatprep.subr.bf16.mxu0 %v2188_v30  ;;  %2285 = vmatprep.subr.bf16.mxu1 %v2284_v18  ;;  %v371_v18 = vld [vmem:[%s4111_s2 + $0x2f0] sm:$0xff] }
  0x58   :  { %2191 = vmatpush1.bf16.msra.mxu0 %v2190_v33 }
  0x59   :  { %2193 = vmatprep.subr.bf16.mxu0 %v2192_v36  ;;  %v348_v36 = vld [vmem:[%s4111_s2 + $0x238] sm:$0xff] }
  0x5c   :  { %2195 = vmatpush1.bf16.msra.mxu0 %v2194_v39 }
  0x5d   :  { %2197 = vmatprep.subr.bf16.mxu0 %v2196_v42  ;;  %v2200_v42 = vpack.c.bf16 %v348_v36, %v346_v35  ;;  %v377_v35 = vld [vmem:[%s4111_s2 + $0x320] sm:$0xff]  ;;  %v379_v36 = vld [vmem:[%s4111_s2 + $0x330] sm:$0xff] }
  0xf1   :  { %v197_v28 = vpop.f32.mrb[0].mxu0  ;;  %v3058_v33 = vpop.f32.mrb[0].mxu1 }
  0xf2   :  { %v198_v29 = vadd.f32 %v197_v28, %v97_v25  ;;  %v199_v30 = vpop.f32.mrb[1].mxu0  ;;  %v270_v37 = vpop.f32.mrb[1].mxu1  ;;  %v376_v25 = vld [vmem:[%s4111_s2 + $0x318] sm:$0xff]  ;;  %v373_v28 = vld [vmem:[%s4111_s2 + $0x300] sm:$0xff]  ;;  %v269_v13 = vadd.f32 %v3058_v33, %v105_v8 }
  0xf3   :  { %v200_v34 = vadd.f32 %v199_v30, %v101_v26  ;;  %v271_v38 = vadd.f32 %v270_v37, %v109_v27  ;;  %v2226_v26 = vpack.c.bf16 %v371_v18, %v369_v17  ;;  %v2228_v27 = vpack.c.bf16 %v376_v25, %v374_v19  ;;  %v378_v30 = vld [vmem:[%s4111_s2 + $0x328] sm:$0xff]  ;;  %v591_v17 = vld [vmem:[%s4112_s5 + $0xf0] sm:$0xff]  ;;  %v592_v33 = vld [vmem:[%s4112_s5 + $0xf8] sm:$0xff] }
  0xf4   :  { %v273_v41 = vmax.f32 %v198_v29, 0.0  ;;  %v375_v29 = vld [vmem:[%s4111_s2 + $0x310] sm:$0xff]  ;;  %v382_v37 = vld [vmem:[%s4111_s2 + $0x348] sm:$0xff]  ;;  %v275_v14 = vmax.f32 %v269_v13, 0.0  ;;  %v2288_v18 = vpack.c.bf16 %v592_v33, %v591_v17  ;;  %v576_v25 = vld [vmem:[%s4112_s5 + $0x78] sm:$0xff] }
  0xf5   :  { %v274_v39 = vmax.f32 %v200_v34, 0.0  ;;  %v276_v45 = vmax.f32 %v271_v38, 0.0  ;;  %v2230_v32 = vpack.c.bf16 %v375_v29, %v373_v28  ;;  %v2232_v34 = vpack.c.bf16 %v380_v31, %v378_v30  ;;  %v384_v38 = vld [vmem:[%s4111_s2 + $0x358] sm:$0xff]  ;;  %v575_v19 = vld [vmem:[%s4112_s5 + $0x70] sm:$0xff]  ;;  %v405_v28 = vld [vmem:[%s4114_s7] sm:$0x3] }
  0xf6   :  { %v410_v29 = vrot.slane %v405_v28, %v3034_v21  ;;  %v414_v30 = vrot.slane %v405_v28, %v3042_v23  ;;  %v770_v8 = vld [vmem:[%s4116_s0 + $0x20] sm:$0xff]  ;;  %v769_v13 = vld [vmem:[%s4116_s0 + $0x18] sm:$0xff] }
  0xf7   :  { %481 = vmatprep.mubr.f32.mxu0 %v274_v39  ;;  %v2234_v39 = vpack.c.bf16 %v379_v36, %v377_v35  ;;  %v765_v33 = vld [vmem:[%s4118_s8] sm:$0x3] }
  0xf8   :  { %482 = vmatmul.mubr.f32.vlgmr.msra.gmra.mrb[2].mxu0 %v273_v41  ;;  %v381_v41 = vld [vmem:[%s4111_s2 + $0x340] sm:$0xff] }
  0xf9   :  { %2199 = vmatpush1.bf16.msra.mxu0 %v2198_v40  ;;  %552 = vmatprep.mubr.f32.mxu0 %v276_v45  ;;  %v2236_v40 = vpack.c.bf16 %v384_v38, %v382_v37  ;;  %v962_v28 = vld [vmem:[%s4075_s12] sm:$0xff] }
  0xfa   :  { %2201 = vmatprep.subr.bf16.mxu0 %v2200_v42  ;;  %v383_v42 = vld [vmem:[%s4111_s2 + $0x350] sm:$0xff] }
  0xfb   :  { %v2238_v45 = vpack.c.bf16 %v383_v42, %v381_v41 }
  0xfd   :  { %2203 = vmatpush1.bf16.msra.mxu0 %v2202_v48  ;;  %v387_v48 = vld [vmem:[%s4111_s2 + $0x370] sm:$0xff] }
  0xfe   :  { %2205 = vmatprep.subr.bf16.mxu0 %v2204_v49  ;;  %v390_v49 = vld [vmem:[%s4111_s2 + $0x388] sm:$0xff]  ;;  %v2242_v51 = vpack.c.bf16 %v387_v48, %v385_v47 }
  0xff   :  { %v2244_v52 = vpack.c.bf16 %v392_v50, %v390_v49 }
 0x101   :  { %2207 = vmatpush1.bf16.msra.mxu0 %v2206_v54  ;;  %v391_v54 = vld [vmem:[%s4111_s2 + $0x390] sm:$0xff] }
 0x102   :  { %2209 = vmatprep.subr.bf16.mxu0 %v2208_v55  ;;  %v394_v55 = vld [vmem:[%s4111_s2 + $0x3a8] sm:$0xff]  ;;  %v2246_v57 = vpack.c.bf16 %v391_v54, %v389_v53 }
 0x103   :  { %v2248_v58 = vpack.c.bf16 %v396_v56, %v394_v55 }
 0x105   :  { %2211 = vmatpush1.bf16.msra.mxu0 %v2210_v60  ;;  %v395_v60 = vld [vmem:[%s4111_s2 + $0x3b0] sm:$0xff] }
 0x106   :  { %2213 = vmatprep.subr.bf16.mxu0 %v2212_v61  ;;  %v398_v61 = vld [vmem:[%s4111_s2 + $0x3c8] sm:$0xff]  ;;  %v2250_v63 = vpack.c.bf16 %v395_v60, %v393_v59 }
 0x107   :  { %v2252_v1 = vpack.c.bf16 %v400_v62, %v398_v61  ;;  %v767_v62 = vld [vmem:[%s4116_s0 + $0x8] sm:$0xff] }
 0x109   :  { %2215 = vmatpush1.bf16.msra.mxu0 %v2214_v2  ;;  %v397_v2 = vld [vmem:[%s4111_s2 + $0x3c0] sm:$0xff] }
 0x10a   :  { %2217 = vmatprep.subr.bf16.mxu0 %v2216_v3  ;;  %v399_v3 = vld [vmem:[%s4111_s2 + $0x3d0] sm:$0xff] }
 0x10b   :  { %v2254_v7 = vpack.c.bf16 %v399_v3, %v397_v2 }
 0x10d   :  { %2219 = vmatpush1.bf16.msra.mxu0 %v2218_v9  ;;  %v2256_v9 = vpack.c.bf16 %v404_v6, %v402_v5 }
 0x10e   :  { %2221 = vmatprep.subr.bf16.mxu0 %v2220_v10  ;;  %v401_v10 = vld [vmem:[%s4111_s2 + $0x3e0] sm:$0xff] }
 0x10f   :  { %v2258_v12 = vpack.c.bf16 %v403_v11, %v401_v10 }
 0x111   :  { %2223 = vmatpush1.bf16.msra.mxu0 %v2222_v15  ;;  %v574_v15 = vld [vmem:[%s4112_s5 + $0x68] sm:$0xff]  ;;  %s4115_s5 = sld [smem:[#allocation14_spill]] }
 0x112   :  { %2225 = vmatprep.subr.bf16.mxu0 %v2224_v16  ;;  %v2286_v16 = vpack.c.bf16 %v574_v15, %v573_v22  ;;  %v768_v22 = vld [vmem:[%s4116_s0 + $0x10] sm:$0xff] }
 0x113   :  { %v772_v15 = vld [vmem:[%s4116_s0 + $0x30] sm:$0xff] }
 0x114   :  { %2287 = vmatpush3.bf16.msra.mxu1 %v2286_v16  ;;  %v774_v16 = vld [vmem:[%s4116_s0 + $0x40] sm:$0xf] }
 0x115   :  { %2227 = vmatpush1.bf16.msra.mxu0 %v2226_v26  ;;  %v2290_v26 = vpack.c.bf16 %v576_v25, %v575_v19  ;;  %2289 = vmatprep.subr.bf16.mxu1 %v2288_v18  ;;  %v2322_v18 = vpack.c.bf16 %v772_v15, %v768_v22  ;;  %v777_v19 = vld [vmem:[%s4116_s0 + $0x58] sm:$0xf]  ;;  %v963_v25 = vld [vmem:[%s4075_s12 + $0x8] sm:$0xff] }
 0x116   :  { %2229 = vmatprep.subr.bf16.mxu0 %v2228_v27  ;;  %v2590_v27 = vmov 0.0|0.0  }
 0x117   :  { %v671_v35 = vld [vmem:[%s4115_s5] sm:$0xff]  ;;  %v672_v36 = vld [vmem:[%s4115_s5 + $0x8] sm:$0xff]  ;;  %v673_v41 = vld [vmem:[%s4115_s5 + $0x10] sm:$0xff] }
 0x118   :  { %2291 = vmatpush3.bf16.msra.mxu1 %v2290_v26  ;;  %v674_v42 = vld [vmem:[%s4115_s5 + $0x18] sm:$0xff]  ;;  %v675_v44 = vld [vmem:[%s4115_s5 + $0x20] sm:$0xff]  ;;  %v677_v47 = vld [vmem:[%s4115_s5 + $0x30] sm:$0xff] }
 0x119   :  { %2231 = vmatpush1.bf16.msra.mxu0 %v2230_v32  ;;  %2292 = vmatprep.subr.bf16.mxu1 %v2590_v27  ;;  %v2296_v43 = vpack.c.bf16 %v674_v42, %v673_v41  ;;  %v678_v48 = vld [vmem:[%s4115_s5 + $0x38] sm:$0xff]  ;;  %v679_v50 = vld [vmem:[%s4115_s5 + $0x40] sm:$0xff]  ;;  %v681_v53 = vld [vmem:[%s4115_s5 + $0x50] sm:$0xff] }
 0x11a   :  { %2233 = vmatprep.subr.bf16.mxu0 %v2232_v34  ;;  %v2302_v49 = vpack.c.bf16 %v678_v48, %v677_v47  ;;  %v682_v54 = vld [vmem:[%s4115_s5 + $0x58] sm:$0xff]  ;;  %v683_v56 = vld [vmem:[%s4115_s5 + $0x60] sm:$0xff]  ;;  %v685_v59 = vld [vmem:[%s4115_s5 + $0x70] sm:$0xff] }
 0x11b   :  { %v2308_v55 = vpack.c.bf16 %v682_v54, %v681_v53  ;;  %v686_v60 = vld [vmem:[%s4115_s5 + $0x78] sm:$0xff] }
 0x11c   :  { %v2314_v61 = vpack.c.bf16 %v686_v60, %v685_v59  ;;  %v965_v26 = vld [vmem:[%s4075_s12 + $0x18] sm:$0xff] }
 0x11d   :  { %2235 = vmatpush1.bf16.msra.mxu0 %v2234_v39  ;;  %v2293_v39 = vpack.c.bf16 %v672_v36, %v671_v35 }
 0x11e   :  { %2237 = vmatprep.subr.bf16.mxu0 %v2236_v40 }
 0x121   :  { %2239 = vmatpush1.bf16.msra.mxu0 %v2238_v45  ;;  %v676_v45 = vld [vmem:[%s4115_s5 + $0x28] sm:$0xff] }
 0x122   :  { %2241 = vmatprep.subr.bf16.mxu0 %v2240_v46  ;;  %v2299_v46 = vpack.c.bf16 %v676_v45, %v675_v44  ;;  %v972_v44 = vld [vmem:[%s4075_s12 + $0x50] sm:$0xff]  ;;  %v975_v45 = vld [vmem:[%s4075_s12 + $0x68] sm:$0xff] }
 0x125   :  { %2243 = vmatpush1.bf16.msra.mxu0 %v2242_v51  ;;  %v680_v51 = vld [vmem:[%s4115_s5 + $0x48] sm:$0xff] }
 0x126   :  { %2245 = vmatprep.subr.bf16.mxu0 %v2244_v52  ;;  %v2305_v52 = vpack.c.bf16 %v680_v51, %v679_v50  ;;  %v976_v50 = vld [vmem:[%s4075_s12 + $0x70] sm:$0xff]  ;;  %v979_v51 = vld [vmem:[%s4075_s12 + $0x88] sm:$0xff] }
 0x129   :  { %2247 = vmatpush1.bf16.msra.mxu0 %v2246_v57  ;;  %v684_v57 = vld [vmem:[%s4115_s5 + $0x68] sm:$0xff]  ;;  %s4117_s5 = sld [smem:[#allocation13_spill]] }
 0x12a   :  { %2249 = vmatprep.subr.bf16.mxu0 %v2248_v58  ;;  %v2311_v58 = vpack.c.bf16 %v684_v57, %v683_v56  ;;  %v980_v56 = vld [vmem:[%s4075_s12 + $0x90] sm:$0xff]  ;;  %v983_v57 = vld [vmem:[%s4075_s12 + $0xa8] sm:$0xff] }
 0x12d   :  { %2251 = vmatpush1.bf16.msra.mxu0 %v2250_v63  ;;  %v771_v63 = vld [vmem:[%s4116_s0 + $0x28] sm:$0xff] }
 0x12e   :  { %2253 = vmatprep.subr.bf16.mxu0 %v2252_v1  ;;  %v2316_v1 = vpack.c.bf16 %v771_v63, %v767_v62  ;;  %v984_v62 = vld [vmem:[%s4075_s12 + $0xb0] sm:$0xff]  ;;  %v987_v63 = vld [vmem:[%s4075_s12 + $0xc8] sm:$0xff] }
 0x12f   :  { %v1844_v3 = vld [vmem:[%s4117_s5] ss:$0 sm:$0xff]  ;;  %s2594_s5 = smov [#allocation3]  }
 0x131   :  { %2255 = vmatpush1.bf16.msra.mxu0 %v2254_v7  ;;  %v766_v7 = vld [vmem:[%s4116_s0] sm:$0xff] }
 0x132   :  { %2257 = vmatprep.subr.bf16.mxu0 %v2256_v9  ;;  %v2318_v10 = vpack.c.bf16 %v770_v8, %v766_v7  ;;  %v991_v7 = vld [vmem:[%s4075_s12 + $0xe8] sm:$0xff]  ;;  %v993_v8 = vld [vmem:[%s4075_s12 + $0xf8] sm:$0xff] }
 0x135   :  { %2259 = vmatpush1.bf16.msra.mxu0 %v2258_v12  ;;  %v775_v12 = vld [vmem:[%s4116_s0 + $0x48] sm:$0xf] }
 0x138   :  { %553 = vmatmul.mubr.f32.vlgmr.msra.gmra.mrb[2].mxu0 %v275_v14  ;;  %v773_v14 = vld [vmem:[%s4116_s0 + $0x38] sm:$0xff] }
 0x139   :  { %v2320_v17 = vpack.c.bf16 %v773_v14, %v769_v13  ;;  %v995_v13 = vld [vmem:[%s4075_s12 + $0x108] sm:$0xff]  ;;  %v997_v14 = vld [vmem:[%s4075_s12 + $0x118] sm:$0xff] }
 0x13a   :  { %v2356_v15 = vpack.c.bf16 %v997_v14, %v995_v13 }
 0x20b   :  { %v554_v31 = vpop.f32.mrb[2].mxu0 }
 0x20c   :  { %v2548_v32 = vadd.f32 %v554_v31, %v410_v29  ;;  %v556_v34 = vpop.f32.mrb[3].mxu0  ;;  %v964_v29 = vld [vmem:[%s4075_s12 + $0x10] sm:$0xff]  ;;  %v969_v31 = vld [vmem:[%s4075_s12 + $0x38] sm:$0xff] }
 0x20d   :  { %v2549_v37 = vadd.f32 %v556_v34, %v414_v30  ;;  %v967_v30 = vld [vmem:[%s4075_s12 + $0x28] sm:$0xff]  ;;  %v2324_v34 = vpack.c.bf16 %v965_v26, %v963_v25  ;;  %v2326_v35 = vpack.c.bf16 %v964_v29, %v962_v28  ;;  %v998_v26 = vld [vmem:[%s4075_s12 + $0x120] sm:$0xff]  ;;  %v1000_v28 = vld [vmem:[%s4075_s12 + $0x130] sm:$0xff] }
 0x20e   :  { %v559_v40 = vmax.f32 %v2548_v32, 0.0  ;;  %v776_v32 = vld [vmem:[%s4116_s0 + $0x50] sm:$0xf]  ;;  %v2328_v36 = vpack.c.bf16 %v969_v31, %v967_v30  ;;  %v1003_v29 = vld [vmem:[%s4075_s12 + $0x148] sm:$0xff]  ;;  %v1005_v30 = vld [vmem:[%s4075_s12 + $0x158] sm:$0xff]  ;;  %v2362_v31 = vpack.c.bf16 %v1000_v28, %v998_v26 }
 0x20f   :  { %v560_v38 = vmax.f32 %v2549_v37, 0.0  ;;  %v966_v37 = vld [vmem:[%s4075_s12 + $0x20] sm:$0xff]  ;;  %v1247_v28 = vld [vmem:[%s4077_s14 + $0x8] sm:$0xff] }
 0x211   :  { %664 = vmatprep.mubr.f32.mxu1 %v560_v38  ;;  %v968_v38 = vld [vmem:[%s4075_s12 + $0x30] sm:$0xff] }
 0x212   :  { %665 = vmatmul.mubr.f32.vlgmr.msra.gmra.mrb[2].mxu1 %v559_v40  ;;  %v973_v40 = vld [vmem:[%s4075_s12 + $0x58] sm:$0xff]  ;;  %v2330_v41 = vpack.c.bf16 %v968_v38, %v966_v37 }
 0x213   :  { %2294 = vmatpush3.bf16.msra.mxu1 %v2293_v39  ;;  %2030 = vmatprep.mubr.msk.f32.mxu1 %vm2591_vm2, %v2589_v4  ;;  %v971_v39 = vld [vmem:[%s4075_s12 + $0x48] sm:$0xff]  ;;  %v1009_v37 = vld [vmem:[%s4075_s12 + $0x178] sm:$0xff] }
 0x214   :  { %2295 = vmatprep.subr.bf16.mxu1 %v2590_v27  ;;  %v2332_v42 = vpack.c.bf16 %v973_v40, %v971_v39  ;;  %v1006_v40 = vld [vmem:[%s4075_s12 + $0x160] sm:$0xff] }
 0x217   :  { %2297 = vmatpush3.bf16.msra.mxu1 %v2296_v43  ;;  %v970_v43 = vld [vmem:[%s4075_s12 + $0x40] sm:$0xff] }
 0x218   :  { %2298 = vmatprep.subr.bf16.mxu1 %v2590_v27  ;;  %v2334_v47 = vpack.c.bf16 %v972_v44, %v970_v43  ;;  %v1013_v43 = vld [vmem:[%s4075_s12 + $0x198] sm:$0xff] }
 0x21b   :  { %2300 = vmatpush3.bf16.msra.mxu1 %v2299_v46  ;;  %v977_v46 = vld [vmem:[%s4075_s12 + $0x78] sm:$0xff] }
 0x21c   :  { %2301 = vmatprep.subr.bf16.mxu1 %v2590_v27  ;;  %v2336_v48 = vpack.c.bf16 %v977_v46, %v975_v45  ;;  %v1010_v46 = vld [vmem:[%s4075_s12 + $0x180] sm:$0xff] }
 0x21f   :  { %2303 = vmatpush3.bf16.msra.mxu1 %v2302_v49  ;;  %v974_v49 = vld [vmem:[%s4075_s12 + $0x60] sm:$0xff] }
 0x220   :  { %2304 = vmatprep.subr.bf16.mxu1 %v2590_v27  ;;  %v2338_v53 = vpack.c.bf16 %v976_v50, %v974_v49  ;;  %v1017_v49 = vld [vmem:[%s4075_s12 + $0x1b8] sm:$0xff] }
 0x223   :  { %2306 = vmatpush3.bf16.msra.mxu1 %v2305_v52  ;;  %v981_v52 = vld [vmem:[%s4075_s12 + $0x98] sm:$0xff] }
 0x224   :  { %2307 = vmatprep.subr.bf16.mxu1 %v2590_v27  ;;  %v2340_v54 = vpack.c.bf16 %v981_v52, %v979_v51  ;;  %v1014_v52 = vld [vmem:[%s4075_s12 + $0x1a0] sm:$0xff] }
 0x227   :  { %2309 = vmatpush3.bf16.msra.mxu1 %v2308_v55  ;;  %v978_v55 = vld [vmem:[%s4075_s12 + $0x80] sm:$0xff] }
 0x228   :  { %2310 = vmatprep.subr.bf16.mxu1 %v2590_v27  ;;  %v2342_v59 = vpack.c.bf16 %v980_v56, %v978_v55  ;;  %v1019_v55 = vld [vmem:[%s4075_s12 + $0x1c8] sm:$0xff]  ;;  %v1021_v56 = vld [vmem:[%s4075_s12 + $0x1d8] sm:$0xff] }
 0x22b   :  { %2312 = vmatpush3.bf16.msra.mxu1 %v2311_v58  ;;  %v985_v58 = vld [vmem:[%s4075_s12 + $0xb8] sm:$0xff] }
 0x22c   :  { %2313 = vmatprep.subr.bf16.mxu1 %v2590_v27  ;;  %v2344_v60 = vpack.c.bf16 %v985_v58, %v983_v57  ;;  %v2380_v57 = vpack.c.bf16 %v1021_v56, %v1019_v55  ;;  %v1018_v58 = vld [vmem:[%s4075_s12 + $0x1c0] sm:$0xff]  ;;  %v1268_v55 = vld [vmem:[%s4077_s14 + $0xb0] sm:$0xff]  ;;  %v1269_v56 = vld [vmem:[%s4077_s14 + $0xb8] sm:$0xff] }
 0x22f   :  { %2315 = vmatpush3.bf16.msra.mxu1 %v2314_v61  ;;  %v982_v61 = vld [vmem:[%s4075_s12 + $0xa0] sm:$0xff] }
 0x230   :  { %2317 = vmatprep.subr.bf16.mxu1 %v2316_v1  ;;  %v989_v1 = vld [vmem:[%s4075_s12 + $0xd8] sm:$0xff] }
 0x2e5   :  { %v1896_v2 = vpop.f32.mrb[2].mxu1 }
 0x2e6   :  { %v1897_v5 = vpop.f32.mrb[3].mxu1 }
 0x2e7   :  { %v1898_v6 = vadd.f32 %v1897_v5, %v1896_v2  ;;  %v2346_v2 = vpack.c.bf16 %v984_v62, %v982_v61  ;;  %v986_v5 = vld [vmem:[%s4075_s12 + $0xc0] sm:$0xff]  ;;  %v2592_v61 = vmov 0   ;;  %v1023_v62 = vld [vmem:[%s4075_s12 + $0x1e8] sm:$0xff] }
 0x2e8   :  { %2562 = vset.pattern.permute.xlu0 %v2592_v61  ;;  %v1034_v61 = vld [vmem:[%s4075_s12 + $0x240] sm:$0xff] }
 0x2e9   :  { %v667_v9 = vadd.f32 %v1898_v6, %v1844_v3  ;;  %v2348_v3 = vpack.c.bf16 %v989_v1, %v987_v63  ;;  %v988_v6 = vld [vmem:[%s4075_s12 + $0xd0] sm:$0xff]  ;;  %v1025_v63 = vld [vmem:[%s4075_s12 + $0x1f8] sm:$0xff] }
 0x2ea   :  { %v2384_v1 = vpack.c.bf16 %v1025_v63, %v1023_v62  ;;  %v1252_v63 = vld [vmem:[%s4077_s14 + $0x30] sm:$0xff] }
 0x2eb   :  { %v670_v11 = vmax.f32 %v667_v9, 0.0  ;;  %v2350_v9 = vpack.c.bf16 %v988_v6, %v986_v5  ;;  %v1027_v6 = vld [vmem:[%s4075_s12 + $0x208] sm:$0xff] }
 0x2ed   :  { %2031 = vmatmul.mubr.f32.vlgmr.msra.gmra.mrb[4].mxu1 %v670_v11  ;;  %v990_v11 = vld [vmem:[%s4075_s12 + $0xe0] sm:$0xff] }
 0x2ee   :  { %2319 = vmatpush1.bf16.msra.mxu1 %v2318_v10  ;;  %880 = vmatprep.mubr.f32.mxu1 %v2589_v4  ;;  %v2352_v10 = vpack.c.bf16 %v993_v8, %v991_v7  ;;  %v1029_v7 = vld [vmem:[%s4075_s12 + $0x218] sm:$0xff] }
 0x2ef   :  { %1846 = vmatprep.subr.msk.mxu1 %vm122_vm0, %v775_v12  ;;  %v992_v12 = vld [vmem:[%s4075_s12 + $0xf0] sm:$0xff]  ;;  %v2388_v8 = vpack.c.bf16 %v1029_v7, %v1027_v6  ;;  %v1270_v6 = vld [vmem:[%s4077_s14 + $0xc0] sm:$0xff]  ;;  %v1271_v7 = vld [vmem:[%s4077_s14 + $0xc8] sm:$0xff] }
 0x2f0   :  { %v2354_v22 = vpack.c.bf16 %v992_v12, %v990_v11  ;;  %v778_v11 = vld [vmem:[%s4119_s10] sm:$0xf] }
 0x2f2   :  { %1847 = vmatpush1.msk.msra.mxu1 %vm122_vm0, %v774_v16  ;;  %v994_v16 = vld [vmem:[%s4075_s12 + $0x100] sm:$0xff] }
 0x2f3   :  { %1848 = vmatmul.mubr.msk.f32.vlgmr.msra.gmra.mrb[6].mxu1 %vm800_vm3, %v765_v33  ;;  %2321 = vmatprep.subr.bf16.mxu1 %v2320_v17  ;;  %v996_v17 = vld [vmem:[%s4075_s12 + $0x110] sm:$0xff] }
 0x2f4   :  { %2323 = vmatpush1.bf16.msra.mxu1 %v2322_v18  ;;  %951 = vmatprep.mubr.f32.mxu1 %v2589_v4  ;;  %v1001_v18 = vld [vmem:[%s4075_s12 + $0x138] sm:$0xff] }
 0x2f5   :  { %1849 = vmatprep.subr.msk.mxu1 %vm122_vm0, %v777_v19  ;;  %v2358_v19 = vpack.c.bf16 %v996_v17, %v994_v16  ;;  %v1026_v16 = vld [vmem:[%s4075_s12 + $0x200] sm:$0xff]  ;;  %v1028_v17 = vld [vmem:[%s4075_s12 + $0x210] sm:$0xff] }
 0x2f8   :  { %1850 = vmatpush1.msk.msra.mxu1 %vm122_vm0, %v776_v32  ;;  %v2364_v32 = vpack.c.bf16 %v1005_v30, %v1003_v29  ;;  %v1264_v29 = vld [vmem:[%s4077_s14 + $0x90] sm:$0xff]  ;;  %v1265_v30 = vld [vmem:[%s4077_s14 + $0x98] sm:$0xff] }
 0x2f9   :  { %1851 = vmatmul.mubr.msk.f32.vlgmr.msra.gmra.mrb[8].mxu1 %vm800_vm3, %v765_v33  ;;  %2325 = vmatprep.subr.bf16.mxu1 %v2324_v34  ;;  %v999_v33 = vld [vmem:[%s4075_s12 + $0x128] sm:$0xff]  ;;  %v1002_v34 = vld [vmem:[%s4075_s12 + $0x140] sm:$0xff] }
 0x2fa   :  { %2327 = vmatpush1.bf16.msra.mxu1 %v2326_v35  ;;  %v2360_v25 = vpack.c.bf16 %v1001_v18, %v999_v33  ;;  %v1004_v35 = vld [vmem:[%s4075_s12 + $0x150] sm:$0xff]  ;;  %v1262_v33 = vld [vmem:[%s4077_s14 + $0x80] sm:$0xff]  ;;  %v1263_v18 = vld [vmem:[%s4077_s14 + $0x88] sm:$0xff] }
 0x2fb   :  { %2329 = vmatprep.subr.bf16.mxu1 %v2328_v36  ;;  %v1007_v36 = vld [vmem:[%s4075_s12 + $0x168] sm:$0xff]  ;;  %v2366_v38 = vpack.c.bf16 %v1004_v35, %v1002_v34  ;;  %v2452_v26 = vpack.c.bf16 %v1263_v18, %v1262_v33  ;;  %v2456_v35 = vpack.c.bf16 %v1265_v30, %v1264_v29  ;;  %v1272_v33 = vld [vmem:[%s4077_s14 + $0xd0] sm:$0xff]  ;;  %v1273_v18 = vld [vmem:[%s4077_s14 + $0xd8] sm:$0xff] }
 0x2fc   :  { %v2368_v39 = vpack.c.bf16 %v1009_v37, %v1007_v36  ;;  %v1248_v36 = vld [vmem:[%s4077_s14 + $0x10] sm:$0xff]  ;;  %v1249_v37 = vld [vmem:[%s4077_s14 + $0x18] sm:$0xff]  ;;  %v1042_v29 = vld [vmem:[%s4075_s12 + $0x280] sm:$0xff]  ;;  %v2472_v30 = vpack.c.bf16 %v1273_v18, %v1272_v33 }
 0x2fd   :  { %2453 = vmatprep.subr.bf16.mxu0 %v2452_v26  ;;  %v1077_v33 = vld [vmem:[%s4075_s12 + $0x398] sm:$0xff] }
 0x2fe   :  { %2331 = vmatpush1.bf16.msra.mxu1 %v2330_v41  ;;  %v1008_v41 = vld [vmem:[%s4075_s12 + $0x170] sm:$0xff] }
 0x2ff   :  { %2333 = vmatprep.subr.bf16.mxu1 %v2332_v42  ;;  %v1011_v42 = vld [vmem:[%s4075_s12 + $0x188] sm:$0xff]  ;;  %v2370_v44 = vpack.c.bf16 %v1008_v41, %v1006_v40  ;;  %v1033_v41 = vld [vmem:[%s4075_s12 + $0x238] sm:$0xff] }
 0x300   :  { %v2372_v45 = vpack.c.bf16 %v1013_v43, %v1011_v42  ;;  %v1031_v40 = vld [vmem:[%s4075_s12 + $0x228] sm:$0xff]  ;;  %v791_v43 = vrot.slane %v778_v11, %v104_v0  ;;  %v1030_v0 = vld [vmem:[%s4075_s12 + $0x220] sm:$0xff] }
 0x301   :  { %v1267_v42 = vld [vmem:[%s4077_s14 + $0xa8] sm:$0xff] }
 0x302   :  { %2335 = vmatpush1.bf16.msra.mxu1 %v2334_v47  ;;  %v1012_v47 = vld [vmem:[%s4075_s12 + $0x190] sm:$0xff] }
 0x303   :  { %2337 = vmatprep.subr.bf16.mxu1 %v2336_v48  ;;  %v1015_v48 = vld [vmem:[%s4075_s12 + $0x1a8] sm:$0xff]  ;;  %v2374_v50 = vpack.c.bf16 %v1012_v47, %v1010_v46  ;;  %v2390_v46 = vpack.c.bf16 %v1028_v17, %v1026_v16  ;;  %v795_v47 = vrot.slane %v778_v11, %v108_v24  ;;  %v1040_v17 = vld [vmem:[%s4075_s12 + $0x270] sm:$0xff] }
 0x304   :  { %v2376_v51 = vpack.c.bf16 %v1017_v49, %v1015_v48  ;;  %v1250_v49 = vld [vmem:[%s4077_s14 + $0x20] sm:$0xff]  ;;  %v1035_v24 = vld [vmem:[%s4075_s12 + $0x248] sm:$0xff] }
 0x306   :  { %2339 = vmatpush1.bf16.msra.mxu1 %v2338_v53  ;;  %v1016_v53 = vld [vmem:[%s4075_s12 + $0x1b0] sm:$0xff] }
 0x307   :  { %2341 = vmatprep.subr.bf16.mxu1 %v2340_v54  ;;  %v2378_v54 = vpack.c.bf16 %v1016_v53, %v1014_v52  ;;  %v2392_v52 = vpack.c.bf16 %v1033_v41, %v1031_v40  ;;  %v1037_v53 = vld [vmem:[%s4075_s12 + $0x258] sm:$0xff] }
 0x30a   :  { %2343 = vmatpush1.bf16.msra.mxu1 %v2342_v59  ;;  %v1020_v59 = vld [vmem:[%s4075_s12 + $0x1d0] sm:$0xff] }
 0x30b   :  { %2345 = vmatprep.subr.bf16.mxu1 %v2344_v60  ;;  %v2382_v60 = vpack.c.bf16 %v1020_v59, %v1018_v58 }
 0x30e   :  { %2347 = vmatpush1.bf16.msra.mxu1 %v2346_v2  ;;  %v1022_v2 = vld [vmem:[%s4075_s12 + $0x1e0] sm:$0xff] }
 0x30f   :  { %2349 = vmatprep.subr.bf16.mxu1 %v2348_v3  ;;  %v1024_v3 = vld [vmem:[%s4075_s12 + $0x1f0] sm:$0xff] }
 0x310   :  { %v2386_v5 = vpack.c.bf16 %v1024_v3, %v1022_v2  ;;  %v2396_v2 = vpack.c.bf16 %v1037_v53, %v1035_v24  ;;  %v1036_v3 = vld [vmem:[%s4075_s12 + $0x250] sm:$0xff]  ;;  %v1054_v53 = vld [vmem:[%s4075_s12 + $0x2e0] sm:$0xff] }
 0x312   :  { %2351 = vmatpush1.bf16.msra.mxu1 %v2350_v9  ;;  %v1845_v9 = vld [vmem:[#allocation2] ss:$0 sm:$0xff] }
 0x313   :  { %2353 = vmatprep.subr.bf16.mxu1 %v2352_v10 }
 0x316   :  { %2355 = vmatpush1.bf16.msra.mxu1 %v2354_v22  ;;  %v783_v22 = vrot.slane %v778_v11, %v3034_v21 }
 0x317   :  { %2357 = vmatprep.subr.bf16.mxu1 %v2356_v15  ;;  %v787_v15 = vrot.slane %v778_v11, %v3042_v23 }
 0x31a   :  { %2359 = vmatpush1.bf16.msra.mxu1 %v2358_v19  ;;  %v1246_v19 = vld [vmem:[%s4077_s14] sm:$0xff] }
 0x31b   :  { %2361 = vmatprep.subr.bf16.mxu1 %v2360_v25  ;;  %v2454_v34 = vpack.c.bf16 %v1247_v28, %v1246_v19  ;;  %v1043_v19 = vld [vmem:[%s4075_s12 + $0x288] sm:$0xff] }
 0x31d   :  { %2455 = vmatpush3.bf16.msra.mxu0 %v2454_v34 }
 0x31e   :  { %2363 = vmatpush1.bf16.msra.mxu1 %v2362_v31  ;;  %2457 = vmatprep.subr.bf16.mxu0 %v2456_v35  ;;  %v1044_v35 = vld [vmem:[%s4075_s12 + $0x290] sm:$0xff] }
 0x31f   :  { %2365 = vmatprep.subr.bf16.mxu1 %v2364_v32  ;;  %v2406_v41 = vpack.c.bf16 %v1044_v35, %v1042_v29  ;;  %v1081_v29 = vld [vmem:[%s4075_s12 + $0x3b8] sm:$0xff]  ;;  %v1083_v35 = vld [vmem:[%s4075_s12 + $0x3c8] sm:$0xff] }
 0x322   :  { %2367 = vmatpush1.bf16.msra.mxu1 %v2366_v38  ;;  %v1266_v38 = vld [vmem:[%s4077_s14 + $0xa0] sm:$0xff] }
 0x323   :  { %2369 = vmatprep.subr.bf16.mxu1 %v2368_v39  ;;  %v2460_v48 = vpack.c.bf16 %v1267_v42, %v1266_v38  ;;  %v1047_v38 = vld [vmem:[%s4075_s12 + $0x2a8] sm:$0xff] }
 0x326   :  { %2371 = vmatpush1.bf16.msra.mxu1 %v2370_v44  ;;  %v2458_v44 = vpack.c.bf16 %v1249_v37, %v1248_v36  ;;  %v1274_v36 = vld [vmem:[%s4077_s14 + $0xe0] sm:$0xff]  ;;  %v1275_v37 = vld [vmem:[%s4077_s14 + $0xe8] sm:$0xff] }
 0x327   :  { %2373 = vmatprep.subr.bf16.mxu1 %v2372_v45  ;;  %v2476_v42 = vpack.c.bf16 %v1275_v37, %v1274_v36  ;;  %v1085_v36 = vld [vmem:[%s4075_s12 + $0x3d8] sm:$0xff] }
 0x328   :  { %2459 = vmatpush3.bf16.msra.mxu0 %v2458_v44  ;;  %v1046_v44 = vld [vmem:[%s4075_s12 + $0x2a0] sm:$0xff] }
 0x329   :  { %2461 = vmatprep.subr.bf16.mxu0 %v2460_v48 }
 0x32a   :  { %2375 = vmatpush1.bf16.msra.mxu1 %v2374_v50  ;;  %v1251_v50 = vld [vmem:[%s4077_s14 + $0x28] sm:$0xff] }
 0x32b   :  { %2377 = vmatprep.subr.bf16.mxu1 %v2376_v51  ;;  %v2462_v59 = vpack.c.bf16 %v1251_v50, %v1250_v49  ;;  %v1050_v50 = vld [vmem:[%s4075_s12 + $0x2c0] sm:$0xff] }
 0x32d   :  { %2463 = vmatpush3.bf16.msra.mxu0 %v2462_v59 }
 0x32e   :  { %2379 = vmatpush1.bf16.msra.mxu1 %v2378_v54 }
 0x32f   :  { %2381 = vmatprep.subr.bf16.mxu1 %v2380_v57 }
 0x332   :  { %2383 = vmatpush1.bf16.msra.mxu1 %v2382_v60  ;;  %v2394_v60 = vpack.c.bf16 %v1032_v20, %v1030_v0  ;;  %v1057_v0 = vld [vmem:[%s4075_s12 + $0x2f8] sm:$0xff] }
 0x333   :  { %2385 = vmatprep.subr.bf16.mxu1 %v2384_v1  ;;  %v1253_v1 = vld [vmem:[%s4077_s14 + $0x38] sm:$0xff] }
 0x334   :  { %v2466_v11 = vpack.c.bf16 %v1253_v1, %v1252_v63  ;;  %v1065_v63 = vld [vmem:[%s4075_s12 + $0x338] sm:$0xff] }
 0x336   :  { %2387 = vmatpush1.bf16.msra.mxu1 %v2386_v5  ;;  %v2464_v5 = vpack.c.bf16 %v1269_v56, %v1268_v55  ;;  %v1059_v55 = vld [vmem:[%s4075_s12 + $0x308] sm:$0xff]  ;;  %v1061_v56 = vld [vmem:[%s4075_s12 + $0x318] sm:$0xff] }
 0x337   :  { %2389 = vmatprep.subr.bf16.mxu1 %v2388_v8  ;;  %v1039_v8 = vld [vmem:[%s4075_s12 + $0x268] sm:$0xff]  ;;  %v2420_v59 = vpack.c.bf16 %v1061_v56, %v1059_v55 }
 0x338   :  { %2465 = vmatprep.subr.bf16.mxu0 %v2464_v5  ;;  %v1064_v5 = vld [vmem:[%s4075_s12 + $0x330] sm:$0xff] }
 0x339   :  { %2467 = vmatpush3.bf16.msra.mxu0 %v2466_v11  ;;  %v1068_v11 = vld [vmem:[%s4075_s12 + $0x350] sm:$0xff] }
 0x3c0   :  { %v760_v10 = vpop.f32.mrb[4].mxu1 }
 0x3c1   :  { %v761_v12 = vadd.f32 %v1845_v9, %v760_v10  ;;  %v2032_v13 = vpop.f32.mrb[5].mxu1  ;;  %v1041_v9 = vld [vmem:[%s4075_s12 + $0x278] sm:$0xff] }
 0x3c2   :  { %v1038_v13 = vld [vmem:[%s4075_s12 + $0x260] sm:$0xff]  ;;  %v2400_v16 = vpack.c.bf16 %v1041_v9, %v1039_v8 }
 0x3c3   :  { %v764_v14 = vmax.f32 %v761_v12, 0.0  ;;  %v2398_v12 = vpack.c.bf16 %v1036_v3, %v1034_v61  ;;  %v2402_v28 = vpack.c.bf16 %v1040_v17, %v1038_v13  ;;  %v1060_v61 = vld [vmem:[%s4075_s12 + $0x310] sm:$0xff]  ;;  %v1062_v3 = vld [vmem:[%s4075_s12 + $0x320] sm:$0xff]  ;;  %v1073_v13 = vld [vmem:[%s4075_s12 + $0x378] sm:$0xff] }
 0x3c4   :  { %v2426_v8 = vpack.c.bf16 %v1064_v5, %v1062_v3  ;;  %v1075_v17 = vld [vmem:[%s4075_s12 + $0x388] sm:$0xff] }
 0x3c5   :  { %1453 = vperm.xlu0 %2562, %v764_v14   ;;  %v2468_v14 = vpack.c.bf16 %v1271_v7, %v1270_v6  ;;  %v1067_v6 = vld [vmem:[%s4075_s12 + $0x348] sm:$0xff]  ;;  %v1069_v7 = vld [vmem:[%s4075_s12 + $0x358] sm:$0xff] }
 0x3c6   :  { %v882_v25 = vpop.f32.mrb[6].mxu1  ;;  %v2428_v9 = vpack.c.bf16 %v1069_v7, %v1067_v6  ;;  %v1360_v6 = vld [vmem:[%s4079_s16 + $0x20] sm:$0xff]  ;;  %v1361_v7 = vld [vmem:[%s4079_s16 + $0x28] sm:$0xff] }
 0x3c7   :  { %v883_v31 = vadd.f32 %v882_v25, %v783_v22  ;;  %v884_v32 = vpop.f32.mrb[7].mxu1  ;;  %v1254_v22 = vld [vmem:[%s4077_s14 + $0x40] sm:$0xff]  ;;  %v1045_v25 = vld [vmem:[%s4075_s12 + $0x298] sm:$0xff]  ;;  %2469 = vmatprep.subr.bf16.mxu0 %v2468_v14 }
 0x3c8   :  { %v885_v39 = vadd.f32 %v884_v32, %v787_v15  ;;  %v1255_v15 = vld [vmem:[%s4077_s14 + $0x48] sm:$0xff]  ;;  %v1257_v32 = vld [vmem:[%s4077_s14 + $0x58] sm:$0xff]  ;;  %v2404_v34 = vpack.c.bf16 %v1045_v25, %v1043_v19  ;;  %v2436_v19 = vpack.c.bf16 %v1077_v33, %v1075_v17  ;;  %v1074_v25 = vld [vmem:[%s4075_s12 + $0x380] sm:$0xff] }
 0x3c9   :  { %v958_v51 = vmax.f32 %v883_v31, 0.0  ;;  %v2470_v26 = vpack.c.bf16 %v1255_v15, %v1254_v22  ;;  %v1256_v31 = vld [vmem:[%s4077_s14 + $0x50] sm:$0xff]  ;;  %v1070_v15 = vld [vmem:[%s4075_s12 + $0x360] sm:$0xff]  ;;  %v1369_v33 = vld [vmem:[%s4079_s16 + $0x68] sm:$0xff] }
 0x3ca   :  { %v959_v45 = vmax.f32 %v885_v39, 0.0  ;;  %v1049_v39 = vld [vmem:[%s4075_s12 + $0x2b8] sm:$0xff]  ;;  %v2474_v40 = vpack.c.bf16 %v1257_v32, %v1256_v31  ;;  %v1078_v32 = vld [vmem:[%s4075_s12 + $0x3a0] sm:$0xff] }
 0x3cb   :  { %2471 = vmatpush3.bf16.msra.mxu0 %v2470_v26  ;;  %v1076_v26 = vld [vmem:[%s4075_s12 + $0x390] sm:$0xff]  ;;  %v1368_v17 = vld [vmem:[%s4079_s16 + $0x60] sm:$0xff] }
 0x3cc   :  { %1166 = vmatprep.mubr.f32.mxu1 %v959_v45  ;;  %v953_v54 = vpop.f32.mrb[8].mxu1  ;;  %2473 = vmatprep.subr.bf16.mxu0 %v2472_v30  ;;  %v1048_v45 = vld [vmem:[%s4075_s12 + $0x2b0] sm:$0xff]  ;;  %v2438_v30 = vpack.c.bf16 %v1076_v26, %v1074_v25  ;;  %v1371_v25 = vld [vmem:[%s4079_s16 + $0x78] sm:$0xff] }
 0x3cd   :  { %1167 = vmatmul.mubr.f32.vlgmr.msra.gmra.mrb[10].mxu1 %v958_v51  ;;  %v3649_v57 = vadd.f32 %v953_v54, %v791_v43  ;;  %v955_v58 = vpop.f32.mrb[9].mxu1  ;;  %v2408_v43 = vpack.c.bf16 %v1049_v39, %v1047_v38  ;;  %v2410_v48 = vpack.c.bf16 %v1048_v45, %v1046_v44  ;;  %v1052_v51 = vld [vmem:[%s4075_s12 + $0x2d0] sm:$0xff]  ;;  %v2444_v38 = vpack.c.bf16 %v1085_v36, %v1083_v35  ;;  %v1082_v39 = vld [vmem:[%s4075_s12 + $0x3c0] sm:$0xff] }
 0x3ce   :  { %2391 = vmatpush1.bf16.msra.mxu1 %v2390_v46  ;;  %v956_v62 = vadd.f32 %v955_v58, %v795_v47  ;;  %v1051_v46 = vld [vmem:[%s4075_s12 + $0x2c8] sm:$0xff]  ;;  %v1053_v47 = vld [vmem:[%s4075_s12 + $0x2d8] sm:$0xff]  ;;  %v2414_v20 = vpack.c.bf16 %v1052_v51, %v1050_v50  ;;  %v1056_v54 = vld [vmem:[%s4075_s12 + $0x2f0] sm:$0xff] }
 0x3cf   :  { %2393 = vmatprep.subr.bf16.mxu1 %v2392_v52  ;;  %2475 = vmatpush3.bf16.msra.mxu0 %v2474_v40  ;;  %v2412_v49 = vpack.c.bf16 %v1053_v47, %v1051_v46  ;;  %v1055_v52 = vld [vmem:[%s4075_s12 + $0x2e8] sm:$0xff]  ;;  %v2418_v58 = vpack.c.bf16 %v1056_v54, %v1054_v53  ;;  %v1084_v40 = vld [vmem:[%s4075_s12 + $0x3d0] sm:$0xff]  ;;  %v1086_v45 = vld [vmem:[%s4075_s12 + $0x3e0] sm:$0xff] }
 0x3d0   :  { %v961_v10 = vmax.f32 %v956_v62, 0.0  ;;  %2477 = vmatprep.subr.bf16.mxu0 %v2476_v42  ;;  %v2416_v24 = vpack.c.bf16 %v1057_v0, %v1055_v52  ;;  %v1063_v62 = vld [vmem:[%s4075_s12 + $0x328] sm:$0xff]  ;;  %v1089_v42 = vld [vmem:[%s4075_s12 + $0x3f8] sm:$0xff]  ;;  %v1088_v46 = vld [vmem:[%s4075_s12 + $0x3f0] sm:$0xff] }
 0x3d1   :  { %v2450_v47 = vpack.c.bf16 %v1088_v46, %v1086_v45  ;;  %v1259_v50 = vld [vmem:[%s4077_s14 + $0x68] sm:$0xff]  ;;  %v1277_v52 = vld [vmem:[%s4077_s14 + $0xf8] sm:$0xff]  ;;  %v1090_v54 = vld [vmem:[%s4076_s13] sm:$0x3] }
 0x3d2   :  { %2395 = vmatpush1.bf16.msra.mxu1 %v2394_v60  ;;  %1237 = vmatprep.mubr.f32.mxu1 %v961_v10  ;;  %v1058_v60 = vld [vmem:[%s4075_s12 + $0x300] sm:$0xff]  ;;  %v1095_v55 = vrot.slane %v1090_v54, %v3034_v21  ;;  %v1099_v56 = vrot.slane %v1090_v54, %v3042_v23  ;;  %v1358_v21 = vld [vmem:[%s4079_s16 + $0x10] sm:$0xff]  ;;  %v1359_v23 = vld [vmem:[%s4079_s16 + $0x18] sm:$0xff] }
 0x3d3   :  { %2397 = vmatprep.subr.bf16.mxu1 %v2396_v2  ;;  %v2422_v1 = vpack.c.bf16 %v1060_v61, %v1058_v60  ;;  %v2424_v2 = vpack.c.bf16 %v1065_v63, %v1063_v62  ;;  %v1066_v10 = vld [vmem:[%s4075_s12 + $0x340] sm:$0xff]  ;;  %v1357_v62 = vld [vmem:[%s4079_s16 + $0x8] sm:$0xff]  ;;  %v2488_v5 = vpack.c.bf16 %v1359_v23, %v1358_v21  ;;  %v1470_v45 = vld [vmem:[%s4082_s19 + $0x38] sm:$0xff] }
 0x3d4   :  { %v2430_v14 = vpack.c.bf16 %v1068_v11, %v1066_v10  ;;  %v1356_v61 = vld [vmem:[%s4079_s16] sm:$0xff]  ;;  %v1363_v10 = vld [vmem:[%s4079_s16 + $0x38] sm:$0xff]  ;;  %v1654_v23 = vld [vmem:[%s4086_s23 + $0x8] sm:$0xff] }
 0x3d5   :  { %v1653_v21 = vld [vmem:[%s4086_s23] sm:$0xff] }
 0x3d6   :  { %2399 = vmatpush1.bf16.msra.mxu1 %v2398_v12  ;;  %v1071_v12 = vld [vmem:[%s4075_s12 + $0x368] sm:$0xff] }
 0x3d7   :  { %2401 = vmatprep.subr.bf16.mxu1 %v2400_v16  ;;  %v2432_v22 = vpack.c.bf16 %v1073_v13, %v1071_v12  ;;  %v1072_v16 = vld [vmem:[%s4075_s12 + $0x370] sm:$0xff]  ;;  %v1364_v12 = vld [vmem:[%s4079_s16 + $0x40] sm:$0xff]  ;;  %v1365_v13 = vld [vmem:[%s4079_s16 + $0x48] sm:$0xff] }
 0x3d8   :  { %v2434_v18 = vpack.c.bf16 %v1072_v16, %v1070_v15  ;;  %v1367_v15 = vld [vmem:[%s4079_s16 + $0x58] sm:$0xff] }
 0x3da   :  { %2403 = vmatpush1.bf16.msra.mxu1 %v2402_v28  ;;  %v1079_v28 = vld [vmem:[%s4075_s12 + $0x3a8] sm:$0xff] }
 0x3db   :  { %2405 = vmatprep.subr.bf16.mxu1 %v2404_v34  ;;  %v2440_v31 = vpack.c.bf16 %v1081_v29, %v1079_v28  ;;  %v1080_v34 = vld [vmem:[%s4075_s12 + $0x3b0] sm:$0xff]  ;;  %v1852_v29 = vld [vmem:[%s4078_s15] ss:$0 sm:$0xff] }
 0x3dc   :  { %v2442_v37 = vpack.c.bf16 %v1080_v34, %v1078_v32  ;;  %v1463_v32 = vld [vmem:[%s4082_s19] sm:$0xff]  ;;  %v1464_v34 = vld [vmem:[%s4082_s19 + $0x8] sm:$0xff] }
 0x3dd   :  { %v2509_v36 = vpack.c.bf16 %v1464_v34, %v1463_v32  ;;  %v1862_v34 = vld [vmem:[%s4089_s26] ss:$0 sm:$0xff] }
 0x3de   :  { %2407 = vmatpush1.bf16.msra.mxu1 %v2406_v41  ;;  %v1087_v41 = vld [vmem:[%s4075_s12 + $0x3e8] sm:$0xff] }
 0x3df   :  { %2409 = vmatprep.subr.bf16.mxu1 %v2408_v43  ;;  %v2446_v43 = vpack.c.bf16 %v1084_v40, %v1082_v39  ;;  %v2448_v44 = vpack.c.bf16 %v1089_v42, %v1087_v41  ;;  %v1466_v39 = vld [vmem:[%s4082_s19 + $0x18] sm:$0xff]  ;;  %v1467_v41 = vld [vmem:[%s4082_s19 + $0x20] sm:$0xff]  ;;  %v1468_v42 = vld [vmem:[%s4082_s19 + $0x28] sm:$0xff] }
 0x3e2   :  { %2411 = vmatpush1.bf16.msra.mxu1 %v2410_v48  ;;  %v960_v48 = vmax.f32 %v3649_v57, 0.0  ;;  %v1276_v57 = vld [vmem:[%s4077_s14 + $0xf0] sm:$0xff] }
 0x3e3   :  { %2413 = vmatprep.subr.bf16.mxu1 %v2412_v49  ;;  %v1258_v49 = vld [vmem:[%s4077_s14 + $0x60] sm:$0xff]  ;;  %v2480_v0 = vpack.c.bf16 %v1277_v52, %v1276_v57 }
 0x3e4   :  { %v2478_v51 = vpack.c.bf16 %v1259_v50, %v1258_v49  ;;  %v1473_v50 = vld [vmem:[%s4082_s19 + $0x50] sm:$0xff]  ;;  %v1563_v52 = vld [vmem:[%s4084_s21] sm:$0xff] }
 0x3e6   :  { %2415 = vmatpush1.bf16.msra.mxu1 %v2414_v20  ;;  %2479 = vmatpush3.bf16.msra.mxu0 %v2478_v51  ;;  %v1260_v20 = vld [vmem:[%s4077_s14 + $0x70] sm:$0xff]  ;;  %v1474_v51 = vld [vmem:[%s4082_s19 + $0x58] sm:$0x3] }
 0x3e7   :  { %2417 = vmatprep.subr.bf16.mxu1 %v2416_v24  ;;  %v1261_v24 = vld [vmem:[%s4077_s14 + $0x78] sm:$0xff]  ;;  %2481 = vmatprep.subr.bf16.mxu0 %v2480_v0  ;;  %v2524_v57 = vpack.c.bf16 %v1474_v51, %v1473_v50  ;;  %v1564_v0 = vld [vmem:[%s4084_s21 + $0x8] sm:$0xff] }
 0x3e8   :  { %v2482_v53 = vpack.c.bf16 %v1261_v24, %v1260_v20  ;;  %v1565_v20 = vld [vmem:[%s4084_s21 + $0x10] sm:$0xff]  ;;  %v2528_v24 = vpack.c.bf16 %v1564_v0, %v1563_v52 }
 0x3ea   :  { %2419 = vmatpush1.bf16.msra.mxu1 %v2418_v58  ;;  %2483 = vmatpush3.bf16.msra.mxu0 %v2482_v53  ;;  %v1566_v53 = vld [vmem:[%s4084_s21 + $0x18] sm:$0xff] }
 0x3eb   :  { %2421 = vmatprep.subr.bf16.mxu1 %v2420_v59  ;;  %2484 = vmatprep.subr.bf16.mxu0 %v2590_v27  ;;  %v2531_v54 = vpack.c.bf16 %v1566_v53, %v1565_v20 }
 0x3ee   :  { %2423 = vmatpush1.bf16.msra.mxu1 %v2422_v1 }
 0x3ef   :  { %2425 = vmatprep.subr.bf16.mxu1 %v2424_v2  ;;  %v2485_v2 = vpack.c.bf16 %v1357_v62, %v1356_v61  ;;  %v1567_v61 = vld [vmem:[%s4084_s21 + $0x20] sm:$0xff]  ;;  %v1568_v62 = vld [vmem:[%s4084_s21 + $0x28] sm:$0xff] }
 0x3f2   :  { %2427 = vmatpush1.bf16.msra.mxu1 %v2426_v8  ;;  %v2491_v8 = vpack.c.bf16 %v1361_v7, %v1360_v6  ;;  %v1854_v6 = vld [vmem:[%s4081_s18] ss:$0 sm:$0xff] }
 0x3f3   :  { %2429 = vmatprep.subr.bf16.mxu1 %v2428_v9  ;;  %v1362_v9 = vld [vmem:[%s4079_s16 + $0x30] sm:$0xff] }
 0x3f4   :  { %v2494_v11 = vpack.c.bf16 %v1363_v10, %v1362_v9  ;;  %v1857_v10 = vld [vmem:[%s4083_s20] ss:$0 sm:$0xff] }
 0x3f6   :  { %2431 = vmatpush1.bf16.msra.mxu1 %v2430_v14  ;;  %v2497_v14 = vpack.c.bf16 %v1365_v13, %v1364_v12 }
 0x3f7   :  { %2433 = vmatprep.subr.bf16.mxu1 %v2432_v22  ;;  %v1366_v22 = vld [vmem:[%s4079_s16 + $0x50] sm:$0xff] }
 0x3f8   :  { %v2500_v16 = vpack.c.bf16 %v1367_v15, %v1366_v22  ;;  %v1656_v22 = vld [vmem:[%s4086_s23 + $0x18] sm:$0xff] }
 0x3fa   :  { %2435 = vmatpush1.bf16.msra.mxu1 %v2434_v18  ;;  %v2503_v18 = vpack.c.bf16 %v1369_v33, %v1368_v17 }
 0x3fb   :  { %2437 = vmatprep.subr.bf16.mxu1 %v2436_v19  ;;  %v1370_v19 = vld [vmem:[%s4079_s16 + $0x70] sm:$0xff] }
 0x3fc   :  { %v2506_v26 = vpack.c.bf16 %v1371_v25, %v1370_v19  ;;  %v1740_v25 = vld [vmem:[%s4088_s25 + $0x8] sm:$0xff] }
 0x3fe   :  { %2439 = vmatpush1.bf16.msra.mxu1 %v2438_v30 }
 0x3ff   :  { %2441 = vmatprep.subr.bf16.mxu1 %v2440_v31 }
 0x402   :  { %2443 = vmatpush1.bf16.msra.mxu1 %v2442_v37 }
 0x403   :  { %2445 = vmatprep.subr.bf16.mxu1 %v2444_v38  ;;  %v1465_v38 = vld [vmem:[%s4082_s19 + $0x10] sm:$0xff] }
 0x404   :  { %v2512_v40 = vpack.c.bf16 %v1466_v39, %v1465_v38 }
 0x406   :  { %2447 = vmatpush1.bf16.msra.mxu1 %v2446_v43  ;;  %v2515_v43 = vpack.c.bf16 %v1468_v42, %v1467_v41 }
 0x407   :  { %2449 = vmatprep.subr.bf16.mxu1 %v2448_v44  ;;  %v1469_v44 = vld [vmem:[%s4082_s19 + $0x30] sm:$0xff] }
 0x408   :  { %v2518_v46 = vpack.c.bf16 %v1470_v45, %v1469_v44 }
 0x40a   :  { %2451 = vmatpush1.bf16.msra.mxu1 %v2450_v47  ;;  %v1471_v47 = vld [vmem:[%s4082_s19 + $0x40] sm:$0xff] }
 0x40b   :  { %2527 = vmatprep.subr.bf16.mxu1 %v2590_v27 }
 0x40d   :  { %1238 = vmatmul.mubr.f32.vlgmr.msra.gmra.mrb[10].mxu1 %v960_v48  ;;  %v1472_v48 = vld [vmem:[%s4082_s19 + $0x48] sm:$0xff] }
 0x40e   :  { %2111 = vmatprep.mubr.msk.f32.mxu1 %vm2591_vm2, %v2589_v4  ;;  %v2521_v49 = vpack.c.bf16 %v1472_v48, %v1471_v47  ;;  %2529 = vmatpush3.bf16.msra.mxu1 %v2528_v24 }
 0x40f   :  { %2530 = vmatprep.subr.bf16.mxu1 %v2590_v27 }
 0x412   :  { %2532 = vmatpush3.bf16.msra.mxu1 %v2531_v54 }
 0x413   :  { %2533 = vmatprep.subr.bf16.mxu1 %v2590_v27 }
 0x444   :  { %v1454_v7 = vpop.permute.xlu0 %1453 }
 0x4e0   :  { %v1239_v58 = vpop.f32.mrb[10].mxu1 }
 0x4e1   :  { %v2550_v59 = vadd.f32 %v1239_v58, %v1095_v55  ;;  %v1241_v60 = vpop.f32.mrb[11].mxu1  ;;  %v1853_v55 = vld [vmem:[%s4080_s17] ss:$0 sm:$0xff]  ;;  %s1830_s17 = sshll.u32 %s2594_s5, 4  ;;  %s1831_s17 = int_to_ptr.vmem [resolvable:$true] %s1830_s17 }
 0x4e2   :  { %v2551_v63 = vadd.f32 %v1241_v60, %v1099_v56  ;;  %p2570_p1 = scmp.lt.s32.totalorder %s1831_s17, %s1831_s17 }
 0x4e3   :  { %v1244_v3 = vmax.f32 %v2550_v59, 0.0 }
 0x4e4   :  { %v1245_v1 = vmax.f32 %v2551_v63, 0.0  ;;  %v2534_v63 = vpack.c.bf16 %v1568_v62, %v1567_v61 }
 0x4e6   :  { %1349 = vmatprep.mubr.f32.mxu0 %v1245_v1  ;;  %2535 = vmatpush3.bf16.msra.mxu1 %v2534_v63  ;;  %v1569_v1 = vld [vmem:[%s4084_s21 + $0x30] sm:$0xff] }
 0x4e7   :  { %1350 = vmatmul.mubr.f32.vlgmr.msra.gmra.mrb[4].mxu0 %v1244_v3  ;;  %2536 = vmatprep.subr.bf16.mxu1 %v2590_v27 }
 0x4e8   :  { %2486 = vmatpush3.bf16.msra.mxu0 %v2485_v2  ;;  %2065 = vmatprep.mubr.msk.f32.mxu0 %vm2591_vm2, %v2589_v4  ;;  %v1570_v2 = vld [vmem:[%s4084_s21 + $0x38] sm:$0xff] }
 0x4e9   :  { %2487 = vmatprep.subr.bf16.mxu0 %v2590_v27  ;;  %v2537_v3 = vpack.c.bf16 %v1570_v2, %v1569_v1 }
 0x4eb   :  { %2538 = vmatpush3.bf16.msra.mxu1 %v2537_v3 }
 0x4ec   :  { %2489 = vmatpush3.bf16.msra.mxu0 %v2488_v5  ;;  %2545 = vmatprep.subr.bf16.mxu1 %v2590_v27  ;;  %v2540_v5 = vpack.c.bf16 %v1654_v23, %v1653_v21 }
 0x4ed   :  { %2490 = vmatprep.subr.bf16.mxu0 %v2590_v27 }
 0x4f0   :  { %2492 = vmatpush3.bf16.msra.mxu0 %v2491_v8  ;;  %v1462_v8 = vmul.f32 %v1854_v6, %v1454_v7 }
 0x4f1   :  { %2493 = vmatprep.subr.bf16.mxu0 %v2590_v27 }
 0x4f4   :  { %2495 = vmatpush3.bf16.msra.mxu0 %v2494_v11 }
 0x4f5   :  { %2496 = vmatprep.subr.bf16.mxu0 %v2590_v27 }
 0x4f8   :  { %2498 = vmatpush3.bf16.msra.mxu0 %v2497_v14 }
 0x4f9   :  { %2499 = vmatprep.subr.bf16.mxu0 %v2590_v27 }
 0x4fc   :  { %2501 = vmatpush3.bf16.msra.mxu0 %v2500_v16  ;;  %v1858_v16 = vld [vmem:[%s4085_s22] ss:$0 sm:$0xff] }
 0x4fd   :  { %2502 = vmatprep.subr.bf16.mxu0 %v2590_v27 }
 0x500   :  { %2504 = vmatpush3.bf16.msra.mxu0 %v2503_v18 }
 0x501   :  { %2505 = vmatprep.subr.bf16.mxu0 %v2590_v27 }
 0x504   :  { %2507 = vmatpush3.bf16.msra.mxu0 %v2506_v26 }
 0x505   :  { %2508 = vmatprep.subr.bf16.mxu0 %v2590_v27 }
 0x5ba   :  { %v1948_v28 = vpop.f32.mrb[4].mxu0 }
 0x5bb   :  { %v1949_v30 = vpop.f32.mrb[5].mxu0 }
 0x5bc   :  { %v1950_v31 = vadd.f32 %v1949_v30, %v1948_v28  ;;  %v1860_v28 = vld [vmem:[%s4087_s24] ss:$0 sm:$0xff] }
 0x5be   :  { %v1352_v35 = vadd.f32 %v1950_v31, %v1852_v29 }
 0x5c0   :  { %v1355_v37 = vmax.f32 %v1352_v35, 0.0 }
 0x5c2   :  { %2066 = vmatmul.mubr.f32.vlgmr.msra.gmra.mrb[6].mxu0 %v1355_v37 }
 0x5c3   :  { %2510 = vmatpush3.bf16.msra.mxu0 %v2509_v36  ;;  %2092 = vmatprep.mubr.msk.f32.mxu0 %vm2591_vm2, %v2589_v4 }
 0x5c4   :  { %2511 = vmatprep.subr.bf16.mxu0 %v2590_v27 }
 0x5c7   :  { %2513 = vmatpush3.bf16.msra.mxu0 %v2512_v40 }
 0x5c8   :  { %2514 = vmatprep.subr.bf16.mxu0 %v2590_v27 }
 0x5cb   :  { %2516 = vmatpush3.bf16.msra.mxu0 %v2515_v43 }
 0x5cc   :  { %2517 = vmatprep.subr.bf16.mxu0 %v2590_v27 }
 0x5cf   :  { %2519 = vmatpush3.bf16.msra.mxu0 %v2518_v46 }
 0x5d0   :  { %2520 = vmatprep.subr.bf16.mxu0 %v2590_v27 }
 0x5d3   :  { %2522 = vmatpush3.bf16.msra.mxu0 %v2521_v49 }
 0x5d4   :  { %2523 = vmatprep.subr.bf16.mxu0 %v2590_v27 }
 0x5d7   :  { %2526 = vmatpush3.bf16.msk.msra.mxu0 %vm2525_vm6, %v2524_v57 }
 0x5d8   :  { %2539 = vmatprep.subr.bf16.mxu0 %v2590_v27 }
 0x695   :  { %v1445_v56 = vpop.f32.mrb[6].mxu0 }
 0x696   :  { %v1446_v58 = vadd.f32 %v1853_v55, %v1445_v56  ;;  %v2067_v59 = vpop.f32.mrb[7].mxu0 }
 0x698   :  { %v1449_v60 = vmax.f32 %v1446_v58, 0.0 }
 0x69a   :  { %2093 = vmatmul.mubr.msk.f32.vlgmr.msra.gmra.mrb[8].mxu0 %vm1475_vm7, %v1449_v60 }
 0x69b   :  { %2122 = vmatprep.mubr.msk.f32.mxu0 %vm2591_vm2, %v2589_v4  ;;  %2541 = vmatpush3.bf16.msra.mxu0 %v2540_v5 }
 0x69c   :  { %2542 = vmatprep.subr.bf16.mxu0 %v2590_v27  ;;  %v1655_v27 = vld [vmem:[%s4086_s23 + $0x10] sm:$0xff] }
 0x69d   :  { %v2543_v15 = vpack.c.bf16 %v1656_v22, %v1655_v27 }
 0x69f   :  { %2544 = vmatpush3.bf16.msra.mxu0 %v2543_v15 }
 0x76d   :  { %v1549_v9 = vpop.f32.mrb[8].mxu0 }
 0x76e   :  { %v1553_v11 = vadd.f32 %v1549_v9, %v1462_v8  ;;  %v2094_v12 = vpop.f32.mrb[9].mxu0 }
 0x770   :  { %v1561_v13 = vadd.f32 %v1857_v10, %v1553_v11 }
 0x772   :  { %v1562_v14 = vmax.f32 %v1561_v13, 0.0 }
 0x774   :  { %2112 = vmatmul.mubr.msk.f32.vlgmr.msra.gmra.mrb[12].mxu1 %vm1578_vm8, %v1562_v14 }
 0x775   :  { %2129 = vmatprep.mubr.msk.f32.mxu1 %vm2591_vm2, %v2589_v4  ;;  %v1739_v4 = vld [vmem:[%s4088_s25] sm:$0xff]  ;;  %s2565_s25 = scalar_lea.vmem %s1831_s17, 32 }
 0x776   :  { %v2546_v26 = vpack.c.bf16 %v1740_v25, %v1739_v4  ;;  %p2566_p0 = scmp.ne.s32.totalorder %s1831_s17, %s2565_s25  ;;  %p2571_p2 = scmp.lt.s32.totalorder %s2565_s25, %s2565_s25 }
 0x778   :  { %2547 = vmatpush3.bf16.msra.mxu1 %v2546_v26  ;;  %p2572_p3 = por %p2571_p2, %p2570_p1 }
 0x77a   :  { %p2573_p4 = pnand %p2572_p3, %p2566_p0 }
 0x847   :  { %v1648_v17 = vpop.f32.mrb[12].mxu1 }
 0x848   :  { %v1649_v33 = vadd.f32 %v1858_v16, %v1648_v17  ;;  %v2113_v18 = vpop.f32.mrb[13].mxu1 }
 0x84a   :  { %v1652_v19 = vmax.f32 %v1649_v33, 0.0 }
 0x84c   :  { %2123 = vmatmul.mubr.msk.f32.vlgmr.msra.gmra.mrb[10].mxu0 %vm1664_vm9, %v1652_v19 }
 0x91f   :  { %v1734_v29 = vpop.f32.mrb[10].mxu0 }
 0x920   :  { %v1735_v30 = vadd.f32 %v1860_v28, %v1734_v29  ;;  %v2124_v31 = vpop.f32.mrb[11].mxu0 }
 0x922   :  { %v1738_v32 = vmax.f32 %v1735_v30, 0.0 }
 0x924   :  { %2130 = vmatmul.mubr.msk.f32.vlgmr.msra.gmra.mrb[14].mxu1 %vm1748_vm10, %v1738_v32 }
 0x9f7   :  { %v1818_v35 = vpop.f32.mrb[14].mxu1 }
 0x9f8   :  { %v1819_v36 = vadd.f32 %v1862_v34, %v1818_v35  ;;  %v2131_v37 = vpop.f32.mrb[15].mxu1 }
 0x9fa   :  { %1823 = vst.msk [vmem:[#allocation3] sm:$0x3] %vm1822_vm11, %v1819_v36 }
 0x9fb   :  { %2576 = shalt.err (!%p2573_p4)
}
 0x9fc   :  { %s2577_s0 = scalar_lea.hbm %s4090_s27, 32 }
 0x9fd   :  { %p2578_p5 = scmp.ne.s32.totalorder %s4090_s27, %s2577_s0  ;;  %p2581_p6 = scmp.lt.u32.totalorder %s2577_s0, %s4090_s27 }
 0x9ff   :  { %p2583_p7 = pnand %p2581_p6, %p2578_p5 }
 0xa01   :  { %2586 = shalt.err (!%p2583_p7)
}
 0xa02   :  { %1833 = dma.vmem_to_hbm [thread:$0]  %s1831_s17, 32, %s4090_s27, [#allocation4]  }
 0xa03   :  { %2587 = dma.done.wait [#allocation4], 32  }
 0xa04   :  { %2588 = vsyncadd [#allocation4], 4294967264 }
 0xa05   :  { %1837 = vsyncpa [#allocation4], 1 }

// kernel: ml_forward.2
= control target key start
LH: loop header
LB: loop body
LE: loop exit
PB: predicated region body
PF: predicated region fallthrough
CT: control target
= control target key end

     0   :  { %s11697_s0 = inlined_call_operand.hbm [shape: f32[2,48,48], index: 0, kind: input, shape index: {}]   ;;  %s11698_s1 = inlined_call_operand.hbm [shape: f32[9,46,368], index: 1, kind: input, shape index: {}]   ;;  %s11699_s2 = inlined_call_operand.hbm [shape: f32[1,368], index: 2, kind: input, shape index: {}]   ;;  %s11700_s3 = inlined_call_operand.hbm [shape: f32[9,168,168], index: 3, kind: input, shape index: {}]   ;;  %s11701_s4 = inlined_call_operand.hbm [shape: f32[1,168], index: 4, kind: input, shape index: {}]   ;;  %s11702_s5 = inlined_call_operand.hbm [shape: f32[9,64,64], index: 5, kind: input, shape index: {}]   ;;  %s11703_s6 = inlined_call_operand.hbm [shape: f32[1,64], index: 6, kind: input, shape index: {}]   ;;  %s11704_s7 = inlined_call_operand.vmem [shape: f32[9,16,2], index: 7, kind: input, shape index: {}]   ;;  %s11705_s8 = inlined_call_operand.hbm [shape: f32[1,2], index: 8, kind: input, shape index: {}]   ;;  %s11706_s9 = inlined_call_operand.hbm [shape: f32[23,45], index: 9, kind: input, shape index: {}]   ;;  %s11707_s10 = inlined_call_operand.vmem [shape: f32[360,184], index: 10, kind: input, shape index: {}]   ;;  %s11708_s11 = inlined_call_operand.hbm [shape: f32[10,20], index: 11, kind: input, shape index: {}]   ;;  %s11709_s12 = inlined_call_operand.hbm [shape: f32[160,80], index: 12, kind: input, shape index: {}]   ;;  %s11710_s13 = inlined_call_operand.hbm [shape: f32[4,7], index: 13, kind: input, shape index: {}]   ;;  %s11711_s14 = inlined_call_operand.vmem [shape: f32[56,32], index: 14, kind: input, shape index: {}]   ;;  %s11712_s15 = inlined_call_operand.vmem [shape: f32[2,2,2], index: 15, kind: output, shape index: {}]  }
   0x1   :  { %11722 = sst [smem:[#allocation30_spill]] %s11697_s0 }
   0x2   :  { %11723 = sst [smem:[#allocation31_spill]] %s11698_s1 }
   0x3   :  { %11724 = sst [smem:[#allocation32_spill]] %s11700_s3 }
   0x4   :  { %11725 = sst [smem:[#allocation33_spill]] %s11704_s7 }
   0x5   :  { %11726 = sst [smem:[#allocation34_spill]] %s11707_s10 }
   0x6   :  { %11727 = sst [smem:[#allocation35_spill]] %s11711_s14 }
   0x7   :  { %11728 = sst [smem:[#allocation36_spill]] %s11712_s15 }
   0x8   :  { %20 = vsyncpa [#allocation3], 0 }
   0x9   :  { %22 = vsyncpa [#allocation3 + $0x1], 0 }
   0xa   :  { %23 = vsyncpa [#allocation5], 0 }
   0xb   :  { %24 = vsyncpa [#allocation8], 0 }
   0xc   :  { %25 = vsyncpa [#allocation11], 0 }
   0xd   :  { %26 = vsyncpa [#allocation14], 0 }
   0xe   :  { %27 = vsyncpa [#allocation17], 0 }
   0xf   :  { %28 = vsyncpa [#allocation20], 0  ;;  %s9942_s18 = smov 0   ;;  %s9944_s19 = smov 0  }
  0x10   :  { %s9946_s20 = smov 0   ;;  %s9948_s21 = smov 0  }
  0x11 LB: > { %s9836_s22 = smov [#allocation4]   ;;  %s9963_s24 = sadd.s32 4294967295, %s9834_s21   ;;  %s9834_s21 = sphi %s9948_s21, %s11767_s21   ;;  %s9830_s20 = sphi %s9946_s20, %s11766_s20   ;;  %s9826_s19 = sphi %s9944_s19, %s11765_s19   ;;  %s9822_s18 = sphi %s9942_s18, %s11764_s18  }
  0x12   : > { %s397_s23 = sshll.u32 %s9836_s22, 4  ;;  %11729 = sst [smem:[#allocation28_spill]] %s9963_s24  ;;  %s9968_s23 = int_to_ptr.vmem [resolvable:$true] %s397_s23 }
  0x13   : > { %p7143_p0 = scmp.ge.s32.totalorder %s9834_s21, 1  ;;  %p11720_p1 = scmp.eq.s32.totalorder %s9963_s24, 0 }
  0x14   : > { %p385_p2 = scmp.lt.s32.totalorder %s9834_s21, 3  ;;  %s9837_s26 = smov [#allocation7]  }
  0x15   : > { %s421_s27 = sshll.u32 %s9837_s26, 4  ;;  %s9838_s29 = smov [#allocation10]   ;;  %s9982_s27 = int_to_ptr.vmem [resolvable:$true] %s421_s27 }
  0x16   : > { %p9970_p3 = pnand %p7143_p0, %p385_p2  ;;  %s9984_s30 = sshll.u32 %s9838_s29, 4  ;;  %s446_s30 = int_to_ptr.vmem [resolvable:$true] %s9984_s30 }
  0x17   : > { %s11733_s1 = sld [smem:[#allocation31_spill]] }
  0x18   : > { %s11730_s25 = scalar_select %p9970_p3, 1, 0 }
  0x19   : > { %p9305_p4 = pneg %p9970_p3 }
  0x1a   : > { %11731 = sst [smem:[#allocation29_spill]] %s11730_s25 }
  0x1b   : > { %p9978_p5 = pnand %p9305_p4, %p11720_p1 }
  0x1d   : > { %s9438_s22 = scalar_lea.hbm %s11733_s1, 20736  ;;  %p9994_p7 = pneg %p9978_p5 }
  0x1e   : > { %p9439_p6 = scmp.ne.s32.totalorder %s11733_s1, %s9438_s22  ;;  %p9445_p10 = scmp.lt.u32.totalorder %s9438_s22, %s11733_s1 }
  0x20   : > { %p9441_p8 = pnand %p9994_p7, %p9439_p6 }
  0x22   : > { %p9442_p9 = pneg %p9441_p8 }
  0x24   : > { %p9447_p11 = pnand %p9445_p10, %p9442_p9 }
  0x26   : > { %9450 = shalt.err (!%p9447_p11)
}
  0x27   : > { %s9451_s7 = scalar_lea.vmem %s9968_s23, 20736  ;;  %p9459_p2 = scmp.lt.s32.totalorder %s9968_s23, %s9968_s23 }
  0x28   : > { %p9452_p12 = scmp.ne.s32.totalorder %s9968_s23, %s9451_s7  ;;  %p9460_p4 = scmp.lt.s32.totalorder %s9451_s7, %s9451_s7 }
  0x2a   : > { %p9454_p13 = pnand %p9452_p12, %p9994_p7  ;;  %p9461_p6 = por %p9460_p4, %p9459_p2 }
  0x2c   : > { %p9455_p0 = pneg %p9454_p13 }
  0x2e   : > { %p9462_p8 = pnand %p9461_p6, %p9455_p0 }
  0x30   : > { %9465 = shalt.err (!%p9462_p8)
}
  0x31   : > { %s9839_s15 = smov 384   ;;  %s9840_s14 = smov 24  }
  0x32   : > { %9308 = dma.hbm_to_vmem [thread:$0]  (!%p9978_p5), %s11733_s1, 20736, %s9968_s23, [#allocation5], %s9839_s15, %s9839_s15, %s9840_s14  }
  0x33   : > { %s11735_s3 = sld [smem:[#allocation32_spill]] }
  0x39   : > { %s9466_s10 = scalar_lea.hbm %s11735_s3, 48384 }
  0x3a   : > { %p9467_p9 = scmp.ne.s32.totalorder %s11735_s3, %s9466_s10  ;;  %p9473_p12 = scmp.lt.u32.totalorder %s9466_s10, %s11735_s3 }
  0x3c   : > { %p9469_p10 = pnand %p9467_p9, %p9994_p7 }
  0x3e   : > { %p9470_p11 = pneg %p9469_p10 }
  0x40   : > { %p9475_p13 = pnand %p9473_p12, %p9470_p11 }
  0x42   : > { %9478 = shalt.err (!%p9475_p13)
}
  0x43   : > { %s9479_s23 = scalar_lea.vmem %s9982_s27, 48384  ;;  %p9487_p6 = scmp.lt.s32.totalorder %s9982_s27, %s9982_s27 }
  0x44   : > { %p9480_p0 = scmp.ne.s32.totalorder %s9982_s27, %s9479_s23  ;;  %p9488_p8 = scmp.lt.s32.totalorder %s9479_s23, %s9479_s23 }
  0x46   : > { %p9482_p2 = pnand %p9480_p0, %p9994_p7  ;;  %p9489_p9 = por %p9488_p8, %p9487_p6 }
  0x48   : > { %p9483_p4 = pneg %p9482_p2 }
  0x4a   : > { %p9490_p10 = pnand %p9489_p9, %p9483_p4 }
  0x4c   : > { %9493 = shalt.err (!%p9490_p10)
}
  0x4d   : > { %s9841_s0 = smov 256   ;;  %s9842_s10 = smov 16  }
  0x4e   : > { %9314 = dma.hbm_to_vmem [thread:$0]  (!%p9978_p5), %s11735_s3, 48384, %s9982_s27, [#allocation8], %s9841_s0, %s9841_s0, %s9842_s10  }
  0x4f   : > { %s9494_s16 = scalar_lea.hbm %s11702_s5, 9216 }
  0x50   : > { %p9495_p11 = scmp.ne.s32.totalorder %s11702_s5, %s9494_s16  ;;  %p9501_p0 = scmp.lt.u32.totalorder %s9494_s16, %s11702_s5 }
  0x52   : > { %p9497_p12 = pnand %p9495_p11, %p9994_p7 }
  0x54   : > { %p9498_p13 = pneg %p9497_p12 }
  0x56   : > { %p9503_p2 = pnand %p9501_p0, %p9498_p13 }
  0x58   : > { %9506 = shalt.err (!%p9503_p2)
}
  0x59   : > { %s9507_s23 = scalar_lea.vmem %s446_s30, 9216  ;;  %p9515_p9 = scmp.lt.s32.totalorder %s446_s30, %s446_s30 }
  0x5a   : > { %p9508_p4 = scmp.ne.s32.totalorder %s446_s30, %s9507_s23  ;;  %p9516_p10 = scmp.lt.s32.totalorder %s9507_s23, %s9507_s23 }
  0x5c   : > { %p9510_p6 = pnand %p9508_p4, %p9994_p7  ;;  %p9517_p1 = por %p9516_p10, %p9515_p9 }
  0x5e   : > { %p9511_p8 = pneg %p9510_p6 }
  0x60   : > { %p9518_p3 = pnand %p9517_p1, %p9511_p8 }
  0x62   : > { %9521 = shalt.err (!%p9518_p3)
}
  0x63   : > { %s9843_s27 = smov 128   ;;  %s9844_s0 = smov 8  }
  0x64   : > { %9320 = dma.hbm_to_vmem [thread:$0]  (!%p9978_p5), %s11702_s5, 9216, %s446_s30, [#allocation11], %s9843_s27, %s9843_s27, %s9844_s0  }
  0x65   : > { %s9845_s25 = smov [#allocation13]   ;;  %s9846_s14 = smov [#allocation16]  }
  0x66   : > { %s473_s15 = sshll.u32 %s9845_s25, 4  ;;  %s499_s16 = sshll.u32 %s9846_s14, 4  ;;  %s474_s15 = int_to_ptr.vmem [resolvable:$true] %s473_s15  ;;  %s500_s16 = int_to_ptr.vmem [resolvable:$true] %s499_s16 }
  0x67   : > { %s9522_s29 = scalar_lea.hbm %s11705_s8, 16 }
  0x68   : > { %p9523_p1 = scmp.ne.s32.totalorder %s11705_s8, %s9522_s29  ;;  %p9529_p12 = scmp.lt.u32.totalorder %s9522_s29, %s11705_s8 }
  0x6a   : > { %p9525_p3 = pnand %p9523_p1, %p9994_p7 }
  0x6c   : > { %p9526_p11 = pneg %p9525_p3 }
  0x6e   : > { %p9531_p13 = pnand %p9529_p12, %p9526_p11 }
  0x70   : > { %9534 = shalt.err (!%p9531_p13)
}
  0x71   : > { %s9535_s30 = scalar_lea.vmem %s474_s15, 16  ;;  %s9542_s10 = scalar_lea.vmem %s474_s15, 32 }
  0x72   : > { %p9536_p0 = scmp.ne.s32.totalorder %s474_s15, %s9535_s30  ;;  %p9543_p6 = scmp.lt.s32.totalorder %s474_s15, %s474_s15 }
  0x73   : > { %p9544_p8 = scmp.lt.s32.totalorder %s9542_s10, %s9535_s30 }
  0x74   : > { %p9538_p2 = pnand %p9536_p0, %p9994_p7 }
  0x75   : > { %p9545_p9 = por %p9544_p8, %p9543_p6 }
  0x76   : > { %p9539_p4 = pneg %p9538_p2 }
  0x78   : > { %p9546_p10 = pnand %p9545_p9, %p9539_p4 }
  0x7a   : > { %9549 = shalt.err (!%p9546_p10)
}
  0x7b   : > { %9326 = dma.hbm_to_vmem [thread:$0]  (!%p9978_p5), %s11705_s8, 16, %s474_s15, [#allocation14]  }
  0x7c   : > { %s9550_s14 = scalar_lea.hbm %s11708_s11, 256 }
  0x7d   : > { %p9551_p1 = scmp.ne.s32.totalorder %s11708_s11, %s9550_s14  ;;  %p9557_p12 = scmp.lt.u32.totalorder %s9550_s14, %s11708_s11 }
  0x7f   : > { %p9553_p3 = pnand %p9551_p1, %p9994_p7 }
  0x81   : > { %p9554_p11 = pneg %p9553_p3 }
  0x83   : > { %p9559_p13 = pnand %p9557_p12, %p9554_p11 }
  0x85   : > { %9562 = shalt.err (!%p9559_p13)
}
  0x86   : > { %s9563_s23 = scalar_lea.vmem %s500_s16, 256  ;;  %p9571_p6 = scmp.lt.s32.totalorder %s500_s16, %s500_s16 }
  0x87   : > { %p9564_p0 = scmp.ne.s32.totalorder %s500_s16, %s9563_s23  ;;  %p9572_p8 = scmp.lt.s32.totalorder %s9563_s23, %s9563_s23 }
  0x89   : > { %p9566_p2 = pnand %p9564_p0, %p9994_p7  ;;  %p9573_p9 = por %p9572_p8, %p9571_p6 }
  0x8b   : > { %p9567_p4 = pneg %p9566_p2 }
  0x8d   : > { %p9574_p10 = pnand %p9573_p9, %p9567_p4 }
  0x8f   : > { %9577 = shalt.err (!%p9574_p10)
}
  0x90   : > { %9332 = dma.hbm_to_vmem [thread:$0]  (!%p9978_p5), %s11708_s11, 256, %s500_s16, [#allocation17], %s9843_s27, %s9843_s27, %s9844_s0  }
  0x91   : > { %s9847_s10 = smov [#allocation6]   ;;  %s9848_s25 = smov [#allocation9]  }
  0x92   : > { %s411_s24 = sshll.u32 %s9847_s10, 4  ;;  %s435_s1 = sshll.u32 %s9848_s25, 4  ;;  %s412_s24 = int_to_ptr.vmem [resolvable:$true] %s411_s24  ;;  %s436_s1 = int_to_ptr.vmem [resolvable:$true] %s435_s1 }
  0x93   : > { %s9578_s17 = scalar_lea.hbm %s11699_s2, 48 }
  0x94   : > { %p9579_p1 = scmp.ne.s32.totalorder %s11699_s2, %s9578_s17  ;;  %p9585_p12 = scmp.lt.u32.totalorder %s9578_s17, %s11699_s2 }
  0x96   : > { %p9581_p3 = pnand %p9579_p1, %p9994_p7 }
  0x98   : > { %p9582_p11 = pneg %p9581_p3 }
  0x9a   : > { %p9587_p13 = pnand %p9585_p12, %p9582_p11 }
  0x9c   : > { %9590 = shalt.err (!%p9587_p13)
}
  0x9d   : > { %s9591_s16 = scalar_lea.vmem %s412_s24, 48  ;;  %s9598_s15 = scalar_lea.vmem %s412_s24, 64 }
  0x9e   : > { %p9592_p0 = scmp.ne.s32.totalorder %s412_s24, %s9591_s16  ;;  %p9599_p6 = scmp.lt.s32.totalorder %s412_s24, %s412_s24 }
  0x9f   : > { %p9600_p8 = scmp.lt.s32.totalorder %s9598_s15, %s9591_s16 }
  0xa0   : > { %p9594_p2 = pnand %p9592_p0, %p9994_p7 }
  0xa1   : > { %p9601_p9 = por %p9600_p8, %p9599_p6 }
  0xa2   : > { %p9595_p4 = pneg %p9594_p2 }
  0xa4   : > { %p9602_p10 = pnand %p9601_p9, %p9595_p4 }
  0xa6   : > { %9605 = shalt.err (!%p9602_p10)
}
  0xa7   : > { %9311 = dma.hbm_to_vmem [thread:$0]  (!%p9978_p5), %s11699_s2, 48, %s412_s24, [#allocation5]  }
  0xa8   : > { %s9606_s14 = scalar_lea.hbm %s11701_s4, 32 }
  0xa9   : > { %p9607_p1 = scmp.ne.s32.totalorder %s11701_s4, %s9606_s14  ;;  %p9613_p12 = scmp.lt.u32.totalorder %s9606_s14, %s11701_s4 }
  0xab   : > { %p9609_p3 = pnand %p9607_p1, %p9994_p7 }
  0xad   : > { %p9610_p11 = pneg %p9609_p3 }
  0xaf   : > { %p9615_p13 = pnand %p9613_p12, %p9610_p11 }
  0xb1   : > { %9618 = shalt.err (!%p9615_p13)
}
  0xb2   : > { %s9619_s23 = scalar_lea.vmem %s436_s1, 32  ;;  %p9627_p6 = scmp.lt.s32.totalorder %s436_s1, %s436_s1 }
  0xb3   : > { %p9620_p0 = scmp.ne.s32.totalorder %s436_s1, %s9619_s23  ;;  %p9628_p8 = scmp.lt.s32.totalorder %s9619_s23, %s9619_s23 }
  0xb5   : > { %p9622_p2 = pnand %p9620_p0, %p9994_p7  ;;  %p9629_p9 = por %p9628_p8, %p9627_p6 }
  0xb7   : > { %p9623_p4 = pneg %p9622_p2 }
  0xb9   : > { %p9630_p10 = pnand %p9629_p9, %p9623_p4 }
  0xbb   : > { %9633 = shalt.err (!%p9630_p10)
}
  0xbc   : > { %9317 = dma.hbm_to_vmem [thread:$0]  (!%p9978_p5), %s11701_s4, 32, %s436_s1, [#allocation8]  }
  0xbd   : > { %s9849_s15 = smov [#allocation12]   ;;  %s9850_s10 = smov [#allocation15]  }
  0xbe   : > { %s459_s30 = sshll.u32 %s9849_s15, 4  ;;  %s483_s25 = sshll.u32 %s9850_s10, 4  ;;  %s460_s30 = int_to_ptr.vmem [resolvable:$true] %s459_s30  ;;  %s484_s25 = int_to_ptr.vmem [resolvable:$true] %s483_s25 }
  0xbf   : > { %s9634_s17 = scalar_lea.hbm %s11703_s6, 16 }
  0xc0   : > { %p9635_p1 = scmp.ne.s32.totalorder %s11703_s6, %s9634_s17  ;;  %p9641_p12 = scmp.lt.u32.totalorder %s9634_s17, %s11703_s6 }
  0xc2   : > { %p9637_p3 = pnand %p9635_p1, %p9994_p7 }
  0xc4   : > { %p9638_p11 = pneg %p9637_p3 }
  0xc6   : > { %p9643_p13 = pnand %p9641_p12, %p9638_p11 }
  0xc8   : > { %9646 = shalt.err (!%p9643_p13)
}
  0xc9   : > { %s9647_s1 = scalar_lea.vmem %s460_s30, 16  ;;  %s9654_s24 = scalar_lea.vmem %s460_s30, 32 }
  0xca   : > { %p9648_p0 = scmp.ne.s32.totalorder %s460_s30, %s9647_s1  ;;  %p9655_p6 = scmp.lt.s32.totalorder %s460_s30, %s460_s30 }
  0xcb   : > { %p9656_p8 = scmp.lt.s32.totalorder %s9654_s24, %s9647_s1 }
  0xcc   : > { %p9650_p2 = pnand %p9648_p0, %p9994_p7 }
  0xcd   : > { %p9657_p9 = por %p9656_p8, %p9655_p6 }
  0xce   : > { %p9651_p4 = pneg %p9650_p2 }
  0xd0   : > { %p9658_p10 = pnand %p9657_p9, %p9651_p4 }
  0xd2   : > { %9661 = shalt.err (!%p9658_p10)
}
  0xd3   : > { %9323 = dma.hbm_to_vmem [thread:$0]  (!%p9978_p5), %s11703_s6, 16, %s460_s30, [#allocation11]  }
  0xd4   : > { %s9662_s14 = scalar_lea.hbm %s11706_s9, 384 }
  0xd5   : > { %p9663_p1 = scmp.ne.s32.totalorder %s11706_s9, %s9662_s14  ;;  %p9669_p12 = scmp.lt.u32.totalorder %s9662_s14, %s11706_s9 }
  0xd7   : > { %p9665_p3 = pnand %p9663_p1, %p9994_p7 }
  0xd9   : > { %p9666_p11 = pneg %p9665_p3 }
  0xdb   : > { %p9671_p13 = pnand %p9669_p12, %p9666_p11 }
  0xdd   : > { %9674 = shalt.err (!%p9671_p13)
}
  0xde   : > { %s9675_s23 = scalar_lea.vmem %s484_s25, 384  ;;  %p9683_p6 = scmp.lt.s32.totalorder %s484_s25, %s484_s25 }
  0xdf   : > { %p9676_p0 = scmp.ne.s32.totalorder %s484_s25, %s9675_s23  ;;  %p9684_p8 = scmp.lt.s32.totalorder %s9675_s23, %s9675_s23 }
  0xe1   : > { %p9678_p2 = pnand %p9676_p0, %p9994_p7  ;;  %p9685_p9 = por %p9684_p8, %p9683_p6 }
  0xe3   : > { %p9679_p4 = pneg %p9678_p2 }
  0xe5   : > { %p9686_p10 = pnand %p9685_p9, %p9679_p4 }
  0xe7   : > { %9689 = shalt.err (!%p9686_p10)
}
  0xe8   : > { %9329 = dma.hbm_to_vmem [thread:$0]  (!%p9978_p5), %s11706_s9, 384, %s484_s25, [#allocation14], %s9843_s27, %s9843_s27, %s9844_s0  }
  0xe9   : > { %s9851_s24 = smov [#allocation18]   ;;  %s9852_s15 = smov [#allocation19]  }
  0xea   : > { %s512_s16 = sshll.u32 %s9851_s24, 4  ;;  %s526_s10 = sshll.u32 %s9852_s15, 4  ;;  %s513_s16 = int_to_ptr.vmem [resolvable:$true] %s512_s16  ;;  %s527_s10 = int_to_ptr.vmem [resolvable:$true] %s526_s10 }
  0xeb   : > { %s9690_s17 = scalar_lea.hbm %s11709_s12, 2560 }
  0xec   : > { %p9691_p1 = scmp.ne.s32.totalorder %s11709_s12, %s9690_s17  ;;  %p9697_p12 = scmp.lt.u32.totalorder %s9690_s17, %s11709_s12 }
  0xee   : > { %p9693_p3 = pnand %p9691_p1, %p9994_p7 }
  0xf0   : > { %p9694_p11 = pneg %p9693_p3 }
  0xf2   : > { %p9699_p13 = pnand %p9697_p12, %p9694_p11 }
  0xf4   : > { %9702 = shalt.err (!%p9699_p13)
}
  0xf5   : > { %s9703_s25 = scalar_lea.vmem %s513_s16, 2560  ;;  %p9711_p6 = scmp.lt.s32.totalorder %s513_s16, %s513_s16 }
  0xf6   : > { %p9704_p0 = scmp.ne.s32.totalorder %s513_s16, %s9703_s25  ;;  %p9712_p8 = scmp.lt.s32.totalorder %s9703_s25, %s9703_s25 }
  0xf8   : > { %p9706_p2 = pnand %p9704_p0, %p9994_p7  ;;  %p9713_p9 = por %p9712_p8, %p9711_p6 }
  0xfa   : > { %p9707_p4 = pneg %p9706_p2 }
  0xfc   : > { %p9714_p10 = pnand %p9713_p9, %p9707_p4 }
  0xfe   : > { %9717 = shalt.err (!%p9714_p10)
}
  0xff   : > { %9335 = dma.hbm_to_vmem [thread:$0]  (!%p9978_p5), %s11709_s12, 2560, %s513_s16, [#allocation17], %s9843_s27, %s9843_s27, %s9844_s0  }
 0x100   : > { %s9718_s3 = scalar_lea.hbm %s11710_s13, 64 }
 0x101   : > { %p9719_p1 = scmp.ne.s32.totalorder %s11710_s13, %s9718_s3  ;;  %p9725_p12 = scmp.lt.u32.totalorder %s9718_s3, %s11710_s13 }
 0x103   : > { %p9721_p3 = pnand %p9719_p1, %p9994_p7 }
 0x105   : > { %p9722_p11 = pneg %p9721_p3 }
 0x107   : > { %p9727_p13 = pnand %p9725_p12, %p9722_p11 }
 0x109   : > { %9730 = shalt.err (!%p9727_p13)
}
 0x10a   : > { %s9731_s7 = scalar_lea.vmem %s527_s10, 64  ;;  %p9739_p6 = scmp.lt.s32.totalorder %s527_s10, %s527_s10 }
 0x10b   : > { %p9732_p0 = scmp.ne.s32.totalorder %s527_s10, %s9731_s7  ;;  %p9740_p8 = scmp.lt.s32.totalorder %s9731_s7, %s9731_s7 }
 0x10d   : > { %p9734_p2 = pnand %p9732_p0, %p9994_p7  ;;  %p9741_p9 = por %p9740_p8, %p9739_p6 }
 0x10f   : > { %p9735_p4 = pneg %p9734_p2 }
 0x111   : > { %p9742_p10 = pnand %p9741_p9, %p9735_p4 }
 0x113   : > { %9745 = shalt.err (!%p9742_p10)
}
 0x114   : > { %s11736_s26 = sld [smem:[#allocation28_spill]]  ;;  %s10214_s25 = sadd.s32 1, %s9834_s21  }
 0x115   : > { %9338 = dma.hbm_to_vmem [thread:$0]  (!%p9978_p5), %s11710_s13, 64, %s527_s10, [#allocation20]  }
 0x116   : > { %s38_s28 = ssub.s32 %s9834_s21, %s10214_s25  ;;  %s41_s30 = sadd.s32 1, %s9830_s20 }
 0x117   : > { %p39_p7 = scmp.eq.s32.totalorder %s38_s28, 0  ;;  %p48_p1 = scmp.ne.s32.totalorder %s9830_s20, %s9826_s19 }
 0x118   : > { %p49_p3 = scmp.eq.s32.totalorder %s9834_s21, 0  ;;  %p54_p11 = scmp.ne.s32.totalorder %s9826_s19, %s9822_s18 }
 0x119   : > { %s10225_s1 = scalar_select %p39_p7, %s9830_s20, %s41_s30  }
 0x11a   : > { %p50_p12 = por %p49_p3, %p48_p1  ;;  %p11737_p13 = scmp.eq.s32.totalorder %s11736_s26, 0 }
 0x11b   : > { %p9354_p2 = scmp.lt.s32.totalorder %s9834_s21, 2  ;;  %s540_s15 = sand.u32 1, %s9830_s20  }
 0x11c   : > { %p10229_p0 = por %p11737_p13, %p54_p11  ;;  %s9256_s10 = smul.u32 48, %s540_s15 }
 0x11d   : > { %s9257_s3 = smul.u32 768, %s9834_s21  ;;  %p10236_p5 = pnand %p9354_p2, %p50_p12 }
 0x11e   : > { %s11740_s29 = sld [smem:[#allocation30_spill]]  ;;  %s544_s7 = scalar_lea.vmem [#allocation2], %s9256_s10 }
 0x11f   : > { %s551_s16 = sshll.u32 %s544_s7, 4  ;;  %s10247_s21 = scalar_lea.sflag [#allocation3], %s540_s15  ;;  %s10245_s16 = int_to_ptr.vmem [resolvable:$true] %s551_s16 }
 0x120   : > { %p9748_p6 = pneg %p10236_p5 }
 0x124   : > { %s10243_s18 = scalar_lea.hbm %s11740_s29, %s9257_s3  ;;  %s9751_s30 = scalar_lea.hbm %s11740_s29, 1536 }
 0x125   : > { %s9746_s23 = scalar_lea.hbm %s10243_s18, 768  ;;  %p9752_p10 = scmp.lt.u32.totalorder %s10243_s18, %s11740_s29 }
 0x126   : > { %p9747_p4 = scmp.ne.s32.totalorder %s10243_s18, %s9746_s23  ;;  %p9753_p7 = scmp.lt.u32.totalorder %s9751_s30, %s9746_s23 }
 0x127   : > { %p9755_p3 = scmp.lt.u32.totalorder %s9746_s23, %s10243_s18 }
 0x128   : > { %p9749_p8 = pnand %p9748_p6, %p9747_p4  ;;  %p9754_p1 = por %p9753_p7, %p9752_p10 }
 0x12a   : > { %p9750_p9 = pneg %p9749_p8  ;;  %p9756_p11 = por %p9755_p3, %p9754_p1 }
 0x12c   : > { %p9757_p12 = pnand %p9756_p11, %p9750_p9 }
 0x12e   : > { %9760 = shalt.err (!%p9757_p12)
}
 0x12f   : > { %s9761_s15 = scalar_lea.vmem %s10245_s16, 768  ;;  %s9853_s10 = smov [#allocation2]  }
 0x130   : > { %p9762_p13 = scmp.ne.s32.totalorder %s10245_s16, %s9761_s15  ;;  %s9766_s22 = sshll.u32 %s9853_s10, 4  ;;  %s9767_s22 = int_to_ptr.vmem [resolvable:$false] %s9766_s22 }
 0x131   : > { %s9768_s7 = scalar_lea.vmem %s9767_s22, 1536  ;;  %p9769_p8 = scmp.lt.s32.totalorder %s10245_s16, %s9767_s22 }
 0x132   : > { %p9764_p2 = pnand %p9762_p13, %p9748_p6  ;;  %p9770_p10 = scmp.lt.s32.totalorder %s9768_s7, %s9761_s15 }
 0x134   : > { %p9765_p4 = pneg %p9764_p2  ;;  %p9771_p7 = por %p9770_p10, %p9769_p8 }
 0x136   : > { %p9772_p1 = pnand %p9771_p7, %p9765_p4 }
 0x138   : > { %9775 = shalt.err (!%p9772_p1)
}
 0x139   : > { %9342 = dma.hbm_to_vmem [thread:$0]  (!%p10236_p5), %s10243_s18, 768, %s10245_s16, %s10247_s21, %s9843_s27, %s9843_s27, %s9844_s0  }
 0x13a   : > { %s11741_s23 = sld [smem:[#allocation29_spill]] }
 0x140   : > { %p11742_p6 = scmp.ne.s32.totalorder %s11741_s23, 0 }
 0x141   : > { %s565_s26 = sand.u32 (!%p11742_p6), 1, %s9826_s19  }
 0x142   : > { %563 = sbr.rel (%p11742_p6) target bundleno = 4038 (0xfc6), region = 80  ;;  %s566_s30 = scalar_lea.sflag (!%p11742_p6), [#allocation3], %s565_s26 }
 0x143   : > { %s9258_s28 = smul.u32 (!%p11742_p6), 48, %s565_s26 }
 0x145   : > { %s10281_s3 = scalar_lea.vmem (!%p11742_p6), [#allocation2], %s9258_s28 }
 0x149   : > { %9793 = dma.done.wait (%p10229_p0), %s566_s30, 768  }
 0x14a   : > { %9795 = vsyncadd (%p10229_p0), %s566_s30, 4294966528  ;;  %s11743_s14 = sld [smem:[#allocation28_spill]] }
 0x150   : > { %p11744_p9 = scmp.eq.s32.totalorder %s11743_s14, 0 }
 0x152   : > { %9797 = dma.done.wait (%p11744_p9), [#allocation5], 20784   ;;  %p11745_p5 = pmov %p11744_p9 }
 0x154   : > { %9799 = vsyncadd (%p11745_p5), [#allocation5], 4294946512  ;;  %p11746_p3 = pmov %p11745_p5 }
 0x156   : > { %9801 = dma.done.wait (%p11746_p3), [#allocation8], 48416   ;;  %p11747_p11 = pmov %p11746_p3 }
 0x157   : > { %p11748_p12 = pmov %p11746_p3 }
 0x158   : > { %9803 = vsyncadd (%p11747_p11), [#allocation8], 4294918880 }
 0x159   : > { %9805 = dma.done.wait (%p11748_p12), [#allocation11], 9232   ;;  %p11749_p13 = pmov %p11746_p3 }
 0x15a   : > { %p11750_p0 = pmov %p11746_p3 }
 0x15b   : > { %9807 = vsyncadd (%p11749_p13), [#allocation11], 4294958064 }
 0x15c   : > { %9809 = dma.done.wait (%p11750_p0), [#allocation14], 400   ;;  %p11751_p2 = pmov %p11750_p0 }
 0x15d   : > { %p11752_p4 = pmov %p11750_p0 }
 0x15e   : > { %9811 = vsyncadd (%p11751_p2), [#allocation14], 4294966896 }
 0x15f   : > { %9813 = dma.done.wait (%p11752_p4), [#allocation17], 2816   ;;  %p11753_p8 = pmov %p11750_p0 }
 0x160   : > { %p11754_p10 = pmov %p11750_p0 }
 0x161   : > { %9815 = vsyncadd (%p11753_p8), [#allocation17], 4294964480 }
 0x162   : > { %9817 = dma.done.wait (%p11754_p10), [#allocation20], 64   ;;  %p11755_p7 = pmov %p11750_p0 }
 0x163   : > { %v9854_v0 = vmov 0.0   ;;  %v10314_v1 = vld [vmem:[%s10281_s3] sm:$0xff]  ;;  %v10317_v2 = vld [vmem:[%s10281_s3 + $0x10] sm:$0xff]  ;;  %s9855_s27 = smov 127   ;;  %v10324_v3 = vld [vmem:[%s10281_s3 + $0x8] sm:$0xff]  ;;  %vm723_vm0 = vcmask 1045504   ;;  %v671_v23 = vlaneseq }
 0x164   : > { %9819 = vsyncadd (%p11755_p7), [#allocation20], 4294967232  ;;  %815 = vmatprep.mubr.f32.mxu1 %v9854_v0  ;;  %797 = vmatprep.mubr.f32.mxu0 %v9854_v0  ;;  %v10327_v4 = vld [vmem:[%s10281_s3 + $0x18] sm:$0xff]  ;;  %v690_v6 = vld [vmem:[#allocation4 + $0x20] sm:$0xff]  ;;  %vm9856_vm1 = vmmov 1   ;;  %s9857_s0 = smov 126  }
 0x165   : > { %966 = vrot.lane.b32.xlu0 %v10314_v1, %s9855_s27  ;;  %970 = vrot.lane.b32.xlu1 %v10317_v2, %s9855_s27  ;;  %v687_v5 = vld [vmem:[#allocation4 + $0x8] sm:$0xff]  ;;  %v686_v7 = vld [vmem:[#allocation4] sm:$0xff]  ;;  %v689_v8 = vld [vmem:[#allocation4 + $0x18] sm:$0xff]  ;;  %vm704_vm3 = vcmask 375808   ;;  %v1499_v36 = vrot.slane %v10314_v1, 1  ;;  %v1500_v37 = vrot.slane %v10324_v3, 1 }
 0x166   : > { %v693_v9 = vld [vmem:[#allocation4 + $0x38] sm:$0xff]  ;;  %v696_v10 = vld [vmem:[#allocation4 + $0x50] sm:$0xff]  ;;  %v8092_v11 = vpack.c.bf16 %v690_v6, %v687_v5  ;;  %v695_v13 = vld [vmem:[#allocation4 + $0x48] sm:$0xff]  ;;  %v8094_v16 = vpack.c.bf16 %v689_v8, %v686_v7  ;;  %v1502_v38 = vrot.slane %v10317_v2, 1  ;;  %vm1498_vm4 = vcmask 1046528   ;;  %s11760_s16 = sld [smem:[#allocation34_spill]] }
 0x167   : > { %v692_v12 = vld [vmem:[#allocation4 + $0x30] sm:$0xff]  ;;  %v10337_v15 = vld [vmem:[%s10281_s3 + $0x28] sm:$0xff]  ;;  %v8096_v17 = vpack.c.bf16 %v696_v10, %v693_v9  ;;  %v702_v19 = vld [vmem:[#allocation4 + $0x80] sm:$0x3f]  ;;  %v1504_v45 = vrot.slane %v10327_v4, 1  ;;  %v10379_v46 = vsel %vm1498_vm4, %v1499_v36, %v1500_v37  ;;  %vm3192_vm5 = vcmask 1044480  }
 0x168   : > { %v10334_v14 = vld [vmem:[%s10281_s3 + $0x20] sm:$0xff]  ;;  %8994 = vmatprep.subr.bf16.mxu1 %v8092_v11  ;;  %v699_v18 = vld [vmem:[#allocation4 + $0x68] sm:$0xff]  ;;  %8093 = vmatprep.subr.bf16.mxu0 %v8092_v11  ;;  %v8098_v20 = vpack.c.bf16 %v695_v13, %v692_v12  ;;  %v701_v22 = vld [vmem:[#allocation4 + $0x78] sm:$0x3f]  ;;  %v10382_v47 = vsel %vm1498_vm4, %v1500_v37, %v1502_v38  ;;  %v10400_v57 = vrot.slane %v10337_v15, 1  ;;  %vm3182_vm7 = vcmask 367616  }
 0x169   : > { %968 = vrot.lane.b32.xlu0 %v10324_v3, %s9855_s27  ;;  %972 = vrot.lane.b32.xlu1 %v10327_v4, %s9855_s27  ;;  %v698_v21 = vld [vmem:[#allocation4 + $0x60] sm:$0xff]  ;;  %vm10345_vm2 = vmpackc.low %vm723_vm0, %vm9856_vm1  ;;  %v8100_v24 = vpack.c.bf16 %v702_v19, %v699_v18  ;;  %v688_v25 = vld [vmem:[#allocation4 + $0x10] sm:$0xff]  ;;  %v1506_v48 = vrot.slane %v10334_v14, 1  ;;  %v10394_v55 = vsel %vm1498_vm4, %v1502_v38, %v1504_v45  ;;  %vm9859_vm8 = vmmov 0   ;;  %s9860_s3 = smov 120   ;;  %s9861_s15 = smov 112  }
 0x16a   : > { %8997 = vmatpush1.bf16.msra.mxu1 %v8094_v16  ;;  %8095 = vmatpush1.bf16.msra.mxu0 %v8094_v16  ;;  %v691_v26 = vld [vmem:[#allocation4 + $0x28] sm:$0xff]  ;;  %v949_v27 = vld [vmem:[#allocation4 + $0x98] sm:$0xff]  ;;  %v952_v28 = vld [vmem:[#allocation4 + $0xb0] sm:$0xff]  ;;  %v8103_v29 = vpack.c.bf16 %v701_v22, %v698_v21  ;;  %v2296_v22 = vrot.slane %v10314_v1, 2  ;;  %vm3392_vm9 = vcmask 982016   ;;  %vm3507_vm10 = vcmask 850944  }
 0x16b   : > { %8995 = vmatprep.subr.bf16.mxu1 %v8096_v17  ;;  %8097 = vmatprep.subr.bf16.mxu0 %v8096_v17  ;;  %v8106_v30 = vpack.c.bf16 %v691_v26, %v688_v25  ;;  %v694_v31 = vld [vmem:[#allocation4 + $0x40] sm:$0xff]  ;;  %v8120_v32 = vpack.c.bf16 %v952_v28, %v949_v27  ;;  %v697_v33 = vld [vmem:[#allocation4 + $0x58] sm:$0xff]  ;;  %v948_v34 = vld [vmem:[#allocation4 + $0x90] sm:$0xff]  ;;  %v10397_v56 = vsel %vm1498_vm4, %v1504_v45, %v1506_v48  ;;  %v2299_v25 = vrot.slane %v10317_v2, 2  ;;  %s11761_s7 = sld [smem:[#allocation35_spill]]  ;;  %s11762_s28 = sld [smem:[#allocation33_spill]] }
 0x16c   : > { %v951_v35 = vld [vmem:[#allocation4 + $0xa8] sm:$0xff]  ;;  %v8110_v39 = vpack.c.bf16 %v697_v33, %v694_v31  ;;  %v700_v41 = vld [vmem:[#allocation4 + $0x70] sm:$0xff]  ;;  %v958_v44 = vld [vmem:[#allocation4 + $0xe0] sm:$0xff]  ;;  %v10418_v7 = vsel %vm1498_vm4, %v1506_v48, %v10400_v57  ;;  %v2301_v28 = vrot.slane %v10327_v4, 2  ;;  %vm3737_vm11 = vcmask 326656   ;;  %p659_p1 = scmp.lt.s32.totalorder %s11743_s14, 1 }
 0x16d   : > { %974 = vrot.lane.b32.xlu0 %v10334_v14, %s9855_s27  ;;  %976 = vrot.lane.b32.xlu1 %v10337_v15, %s9855_s27  ;;  %v8122_v40 = vpack.c.bf16 %v951_v35, %v948_v34  ;;  %v703_v42 = vld [vmem:[#allocation4 + $0x88] sm:$0x3f]  ;;  %v950_v50 = vld [vmem:[#allocation4 + $0xa0] sm:$0xff]  ;;  %v953_v52 = vld [vmem:[#allocation4 + $0xb8] sm:$0xff]  ;;  %vm4050_vm12 = vcmask 916480   ;;  %vm5121_vm13 = vcmask 1043456  }
 0x16e   : > { %8998 = vmatpush1.bf16.msra.mxu1 %v8098_v20  ;;  %8099 = vmatpush1.bf16.msra.mxu0 %v8098_v20  ;;  %v955_v43 = vld [vmem:[#allocation4 + $0xc8] sm:$0xff]  ;;  %v8114_v49 = vpack.c.bf16 %v703_v42, %v700_v41  ;;  %v954_v53 = vld [vmem:[#allocation4 + $0xc0] sm:$0xff]  ;;  %v957_v54 = vld [vmem:[#allocation4 + $0xd8] sm:$0xff]  ;;  %v8134_v58 = vpack.c.bf16 %v953_v52, %v950_v50  ;;  %vm5114_vm14 = vcmask 162816   ;;  %vm5247_vm15 = vcmask 261120   ;;  %s11769_s14 = smov (!%p659_p1, %s11743_s14), 1 }
 0x16f   : > { %8996 = vmatprep.subr.msk.bf16.mxu1 %vm10345_vm2, %v8100_v24  ;;  %8102 = vmatprep.subr.msk.bf16.mxu0 %vm10345_vm2, %v8100_v24  ;;  %v8124_v51 = vpack.c.bf16 %v958_v44, %v955_v43  ;;  %v8126_v59 = vpack.c.bf16 %v957_v54, %v954_v53  ;;  %v961_v60 = vld [vmem:[#allocation4 + $0xf8] sm:$0xff]  ;;  %v964_v61 = vld [vmem:[#allocation4 + $0x110] sm:$0x3f]  ;;  %v959_v63 = vld [vmem:[#allocation4 + $0xe8] sm:$0xff]  ;;  %v2297_v24 = vrot.slane %v10324_v3, 2  ;;  %s7169_s22 = sshll.u32 %s11769_s14, 1 }
 0x170   : > { %v956_v62 = vld [vmem:[#allocation4 + $0xd0] sm:$0xff]  ;;  %v963_v6 = vld [vmem:[#allocation4 + $0x108] sm:$0x3f]  ;;  %v8128_v8 = vpack.c.bf16 %v964_v61, %v961_v60  ;;  %v962_v11 = vld [vmem:[#allocation4 + $0x100] sm:$0xff] }
 0x171   : > { %1232 = vrot.lane.b32.xlu0 %v10314_v1, %s9857_s0  ;;  %1234 = vrot.lane.b32.xlu1 %v10324_v3, %s9857_s0  ;;  %v960_v5 = vld [vmem:[#allocation4 + $0xf0] sm:$0xff]  ;;  %v8138_v9 = vpack.c.bf16 %v959_v63, %v956_v62  ;;  %v965_v12 = vld [vmem:[#allocation4 + $0x118] sm:$0x3f]  ;;  %v1215_v13 = vld [vmem:[#allocation4 + $0x128] sm:$0xff]  ;;  %v10462_v26 = vsel %vm723_vm0, %v2296_v22, %v2297_v24  ;;  %v10465_v27 = vsel %vm723_vm0, %v2297_v24, %v2299_v25 }
 0x172   : > { %8999 = vmatpush1.bf16.msk.msra.mxu1 %vm10345_vm2, %v8103_v29  ;;  %8105 = vmatpush1.bf16.msk.msra.mxu0 %vm10345_vm2, %v8103_v29  ;;  %v8131_v10 = vpack.c.bf16 %v963_v6, %v960_v5  ;;  %v1218_v16 = vld [vmem:[#allocation4 + $0x140] sm:$0xff]  ;;  %v8142_v17 = vpack.c.bf16 %v965_v12, %v962_v11  ;;  %v1216_v18 = vld [vmem:[#allocation4 + $0x130] sm:$0xff]  ;;  %v1219_v19 = vld [vmem:[#allocation4 + $0x148] sm:$0xff]  ;;  %v10480_v29 = vrot.slane %v10337_v15, 2 }
 0x173   : > { %8107 = vmatprep.subr.bf16.mxu1 %v8106_v30  ;;  %8121 = vmatprep.subr.bf16.mxu0 %v8120_v32  ;;  %v8148_v20 = vpack.c.bf16 %v1218_v16, %v1215_v13  ;;  %v8162_v21 = vpack.c.bf16 %v1219_v19, %v1216_v18  ;;  %v1224_v31 = vld [vmem:[#allocation4 + $0x170] sm:$0xff]  ;;  %v1222_v36 = vld [vmem:[#allocation4 + $0x160] sm:$0xff]  ;;  %v1225_v37 = vld [vmem:[#allocation4 + $0x178] sm:$0xff] }
 0x174   : > { %v1220_v38 = vld [vmem:[#allocation4 + $0x150] sm:$0xff]  ;;  %v1231_v44 = vld [vmem:[#allocation4 + $0x1a8] sm:$0x3f]  ;;  %v1482_v53 = vld [vmem:[#allocation4 + $0x1c0] sm:$0xff] }
 0x175   : > { %1236 = vrot.lane.b32.xlu0 %v10317_v2, %s9857_s0  ;;  %1238 = vrot.lane.b32.xlu1 %v10327_v4, %s9857_s0  ;;  %v1228_v43 = vld [vmem:[#allocation4 + $0x190] sm:$0xff]  ;;  %v1227_v48 = vld [vmem:[#allocation4 + $0x188] sm:$0xff]  ;;  %v1485_v54 = vld [vmem:[#allocation4 + $0x1d8] sm:$0xff] }
 0x176   : > { %7175 = vmatmul.mubr.msk.f32.vlgmr.msra.gmra.mrb[0].mxu1 %vm704_vm3, %v10327_v4  ;;  %7172 = vmatmul.mubr.msk.f32.vlgmr.msra.gmra.mrb[0].mxu0 %vm704_vm3, %v10314_v1  ;;  %v8170_v50 = vpack.c.bf16 %v1231_v44, %v1228_v43  ;;  %v1229_v60 = vld [vmem:[#allocation4 + $0x198] sm:$0x3f]  ;;  %v8190_v61 = vpack.c.bf16 %v1485_v54, %v1482_v53  ;;  %v1488_v5 = vld [vmem:[#allocation4 + $0x1f0] sm:$0xff]  ;;  %v1491_v6 = vld [vmem:[#allocation4 + $0x208] sm:$0xff] }
 0x177   : > { %8109 = vmatpush3.bf16.msra.mxu1 %v8106_v30  ;;  %821 = vmatprep.mubr.f32.mxu1 %v9854_v0  ;;  %v1221_v30 = vld [vmem:[#allocation4 + $0x158] sm:$0xff]  ;;  %v8194_v11 = vpack.c.bf16 %v1491_v6, %v1488_v5  ;;  %v1494_v16 = vld [vmem:[#allocation4 + $0x220] sm:$0xff]  ;;  %v1751_v22 = vld [vmem:[#allocation4 + $0x268] sm:$0xff] }
 0x178   : > { %8111 = vmatprep.subr.bf16.mxu1 %v8110_v39  ;;  %8123 = vmatpush1.bf16.msra.mxu0 %v8122_v40  ;;  %v8152_v33 = vpack.c.bf16 %v1224_v31, %v1221_v30  ;;  %v8166_v40 = vpack.c.bf16 %v1225_v37, %v1222_v36  ;;  %v1480_v24 = vld [vmem:[#allocation4 + $0x1b0] sm:$0xff]  ;;  %v1757_v30 = vld [vmem:[#allocation4 + $0x298] sm:$0xff]  ;;  %v1487_v31 = vld [vmem:[#allocation4 + $0x1e8] sm:$0xff] }
 0x179   : > { %1240 = vrot.lane.b32.xlu0 %v10334_v14, %s9857_s0  ;;  %1242 = vrot.lane.b32.xlu1 %v10337_v15, %s9857_s0  ;;  %v1763_v36 = vld [vmem:[#allocation4 + $0x2c8] sm:$0x3f]  ;;  %v2014_v43 = vld [vmem:[#allocation4 + $0x2e0] sm:$0xff]  ;;  %v2017_v44 = vld [vmem:[#allocation4 + $0x2f8] sm:$0xff] }
 0x17a   : > { %7176 = vmatmul.mubr.msk.f32.gmra.mrb[2].mxu1 %vm704_vm3, %v10334_v14  ;;  %803 = vmatprep.mubr.f32.mxu0 %v9854_v0  ;;  %v2020_v53 = vld [vmem:[#allocation4 + $0x310] sm:$0xff]  ;;  %v2023_v54 = vld [vmem:[#allocation4 + $0x328] sm:$0xff]  ;;  %v2026_v5 = vld [vmem:[#allocation4 + $0x340] sm:$0xff] }
 0x17b   : > { %8113 = vmatpush3.bf16.msra.mxu1 %v8110_v39  ;;  %827 = vmatprep.mubr.f32.mxu1 %v9854_v0  ;;  %v1223_v39 = vld [vmem:[#allocation4 + $0x168] sm:$0xff]  ;;  %v2029_v6 = vld [vmem:[#allocation4 + $0x358] sm:$0x3f]  ;;  %vm10899_vm6 = vmpackc.low %vm3192_vm5, %vm9856_vm1  ;;  %vm5344_vm1 = vcmask 523264  }
 0x17c   : > { %8116 = vmatprep.subr.msk.bf16.mxu1 %vm10345_vm2, %v8114_v49  ;;  %7173 = vmatmul.mubr.msk.f32.gmra.mrb[2].mxu0 %vm704_vm3, %v10324_v3  ;;  %v8154_v45 = vpack.c.bf16 %v1223_v39, %v1220_v38  ;;  %v1486_v39 = vld [vmem:[#allocation4 + $0x1e0] sm:$0xff] }
 0x17d   : > { %1764 = vrot.lane.b32.xlu0 %v10379_v46, %s9855_s27  ;;  %1766 = vrot.lane.b32.xlu1 %v10382_v47, %s9855_s27 }
 0x17e   : > { %7177 = vmatmul.mubr.msk.f32.gmra.mrb[4].mxu1 %vm704_vm3, %v10337_v15  ;;  %8125 = vmatprep.subr.bf16.mxu0 %v8124_v51 }
 0x17f   : > { %8119 = vmatpush3.bf16.msk.msra.mxu1 %vm10345_vm2, %v8114_v49  ;;  %7638 = vmatprep.mubr.msk.f32.mxu1 %vm704_vm3, %v10314_v1  ;;  %v2303_v1 = vrot.slane %v10334_v14, 2  ;;  %v1230_v49 = vld [vmem:[#allocation4 + $0x1a0] sm:$0x3f] }
 0x180   : > { %8135 = vmatprep.subr.bf16.mxu1 %v8134_v58  ;;  %8127 = vmatpush1.bf16.msra.mxu0 %v8126_v59  ;;  %v1226_v59 = vld [vmem:[#allocation4 + $0x180] sm:$0xff] }
 0x181   : > { %1768 = vrot.lane.b32.xlu0 %v10394_v55, %s9855_s27  ;;  %1770 = vrot.lane.b32.xlu1 %v10397_v56, %s9855_s27 }
 0x182   : > { %7639 = vmatmul.mubr.msk.f32.vlgmr.msra.gmra.mrb[6].mxu1 %vm704_vm3, %v10324_v3  ;;  %809 = vmatprep.mubr.f32.mxu0 %v9854_v0  ;;  %v10477_v3 = vsel %vm723_vm0, %v2301_v28, %v2303_v1 }
 0x183   : > { %8137 = vmatpush3.bf16.msra.mxu1 %v8134_v58  ;;  %7641 = vmatprep.mubr.msk.f32.mxu1 %vm704_vm3, %v10317_v2  ;;  %v8156_v58 = vpack.c.bf16 %v1230_v49, %v1227_v48  ;;  %v1493_v48 = vld [vmem:[#allocation4 + $0x218] sm:$0xff]  ;;  %v1496_v49 = vld [vmem:[#allocation4 + $0x230] sm:$0x3f] }
 0x184   : > { %7174 = vmatmul.mubr.msk.f32.gmra.mrb[4].mxu0 %vm704_vm3, %v10317_v2  ;;  %8130 = vmatprep.subr.msk.bf16.mxu0 %vm10345_vm2, %v8128_v8  ;;  %v10474_v2 = vsel %vm723_vm0, %v2299_v25, %v2301_v28  ;;  %v8159_v8 = vpack.c.bf16 %v1229_v60, %v1226_v59  ;;  %v1483_v25 = vld [vmem:[#allocation4 + $0x1c8] sm:$0xff] }
 0x185   : > { %1772 = vrot.lane.b32.xlu0 %v10418_v7, %s9855_s27  ;;  %1774 = vrot.lane.b32.xlu1 %v10400_v57, %s9855_s27  ;;  %v1495_v59 = vld [vmem:[#allocation4 + $0x228] sm:$0x3f] }
 0x186   : > { %7642 = vmatmul.mubr.msk.f32.gmra.mrb[8].mxu1 %vm704_vm3, %v10327_v4  ;;  %8139 = vmatprep.subr.bf16.mxu1 %v8138_v9  ;;  %v10488_v4 = vsel %vm723_vm0, %v2303_v1, %v10480_v29 }
 0x187   : > { %8133 = vmatpush1.bf16.msk.msra.mxu0 %vm10345_vm2, %v8131_v10  ;;  %8141 = vmatpush3.bf16.msra.mxu1 %v8138_v9  ;;  %v1481_v9 = vld [vmem:[#allocation4 + $0x1b8] sm:$0xff]  ;;  %v1484_v10 = vld [vmem:[#allocation4 + $0x1d0] sm:$0xff] }
 0x188   : > { %7644 = vmatprep.mubr.msk.f32.mxu1 %vm704_vm3, %v10334_v14  ;;  %1063 = vmatprep.mubr.f32.mxu0 %v9854_v0  ;;  %v1214_v14 = vld [vmem:[#allocation4 + $0x120] sm:$0xff]  ;;  %v8176_v18 = vpack.c.bf16 %v1484_v10, %v1481_v9  ;;  %v8254_v10 = vpack.c.bf16 %v2029_v6, %v2026_v5 }
 0x189   : > { %2030 = vrot.lane.b32.xlu0 %v10379_v46, %s9857_s0  ;;  %2032 = vrot.lane.b32.xlu1 %v10382_v47, %s9857_s0  ;;  %v1750_v9 = vld [vmem:[#allocation4 + $0x260] sm:$0xff] }
 0x18a   : > { %7645 = vmatmul.mubr.msk.f32.gmra.mrb[10].mxu1 %vm704_vm3, %v10337_v15  ;;  %8144 = vmatprep.subr.msk.bf16.mxu1 %vm10345_vm2, %v8142_v17  ;;  %v1217_v15 = vld [vmem:[#allocation4 + $0x138] sm:$0xff] }
 0x18b   : > { %8147 = vmatpush3.bf16.msk.msra.mxu1 %vm10345_vm2, %v8142_v17  ;;  %8149 = vmatprep.subr.bf16.mxu0 %v8148_v20  ;;  %v8150_v32 = vpack.c.bf16 %v1217_v15, %v1214_v14  ;;  %v1497_v17 = vld [vmem:[#allocation4 + $0x238] sm:$0x3f]  ;;  %v8178_v14 = vpack.c.bf16 %v1483_v25, %v1480_v24  ;;  %v1754_v15 = vld [vmem:[#allocation4 + $0x280] sm:$0xff] }
 0x18c   : > { %8163 = vmatprep.subr.bf16.mxu1 %v8162_v21  ;;  %v8198_v19 = vpack.c.bf16 %v1497_v17, %v1494_v16  ;;  %v1746_v17 = vld [vmem:[#allocation4 + $0x240] sm:$0xff]  ;;  %v2289_v24 = vld [vmem:[#allocation4 + $0x3b8] sm:$0xff] }
 0x18d   : > { %2034 = vrot.lane.b32.xlu0 %v10394_v55, %s9857_s0  ;;  %2036 = vrot.lane.b32.xlu1 %v10397_v56, %s9857_s0  ;;  %v1753_v25 = vld [vmem:[#allocation4 + $0x278] sm:$0xff] }
 0x191   : > { %2038 = vrot.lane.b32.xlu0 %v10418_v7, %s9857_s0  ;;  %2040 = vrot.lane.b32.xlu1 %v10400_v57, %s9857_s0 }
 0x195   : > { %2561 = vrot.lane.b32.xlu0 %v10462_v26, %s9855_s27  ;;  %2563 = vrot.lane.b32.xlu1 %v10465_v27, %s9855_s27 }
 0x199   : > { %2565 = vrot.lane.b32.xlu0 %v10474_v2, %s9855_s27  ;;  %2567 = vrot.lane.b32.xlu1 %v10477_v3, %s9855_s27 }
 0x19d   : > { %2569 = vrot.lane.b32.xlu0 %v10488_v4, %s9855_s27  ;;  %2571 = vrot.lane.b32.xlu1 %v10480_v29, %s9855_s27 }
 0x1a1   : > { %2827 = vrot.lane.b32.xlu0 %v10462_v26, %s9857_s0  ;;  %2829 = vrot.lane.b32.xlu1 %v10465_v27, %s9857_s0 }
 0x1a5   : > { %2831 = vrot.lane.b32.xlu0 %v10474_v2, %s9857_s0  ;;  %2833 = vrot.lane.b32.xlu1 %v10477_v3, %s9857_s0 }
 0x1a9   : > { %2835 = vrot.lane.b32.xlu0 %v10488_v4, %s9857_s0  ;;  %2837 = vrot.lane.b32.xlu1 %v10480_v29, %s9857_s0 }
 0x1d7   : > { %v967_v34 = vpop.permute.xlu0 %966  ;;  %v971_v35 = vpop.permute.xlu1 %970 }
 0x1d8   : > { %7187 = vmatmul.mubr.msk.f32.vlgmr.msra.gmra.mrb[0].mxu0 %vm704_vm3, %v967_v34  ;;  %7659 = vmatprep.mubr.msk.f32.mxu1 %vm704_vm3, %v967_v34  ;;  %v8222_v34 = vpack.c.bf16 %v1757_v30, %v1754_v15  ;;  %v2295_v30 = vld [vmem:[#allocation4 + $0x3e8] sm:$0x3f] }
 0x1d9   : > { %1069 = vmatprep.mubr.f32.mxu0 %v9854_v0  ;;  %8151 = vmatpush1.bf16.msra.mxu0 %v8150_v32  ;;  %v1490_v32 = vld [vmem:[#allocation4 + $0x200] sm:$0xff] }
 0x1da   : > { %8153 = vmatprep.subr.bf16.mxu0 %v8152_v33  ;;  %v8180_v37 = vpack.c.bf16 %v1490_v32, %v1487_v31  ;;  %v1752_v32 = vld [vmem:[#allocation4 + $0x270] sm:$0xff] }
 0x1db   : > { %v969_v41 = vpop.permute.xlu0 %968  ;;  %v973_v42 = vpop.permute.xlu1 %972 }
 0x1dc   : > { %7188 = vmatmul.mubr.msk.f32.gmra.mrb[2].mxu0 %vm704_vm3, %v969_v41  ;;  %7660 = vmatmul.mubr.msk.f32.vlgmr.msra.gmra.mrb[6].mxu1 %vm704_vm3, %v969_v41 }
 0x1dd   : > { %8165 = vmatpush3.bf16.msra.mxu1 %v8162_v21  ;;  %1075 = vmatprep.mubr.f32.mxu0 %v9854_v0  ;;  %v1748_v21 = vld [vmem:[#allocation4 + $0x250] sm:$0xff] }
 0x1de   : > { %7662 = vmatprep.mubr.msk.f32.mxu1 %vm704_vm3, %v971_v35  ;;  %8167 = vmatprep.subr.bf16.mxu1 %v8166_v40  ;;  %v8218_v1 = vpack.c.bf16 %v1751_v22, %v1748_v21  ;;  %v2286_v22 = vld [vmem:[#allocation4 + $0x3a0] sm:$0xff] }
 0x1df   : > { %v975_v51 = vpop.permute.xlu0 %974  ;;  %v977_v52 = vpop.permute.xlu1 %976  ;;  %8155 = vmatpush1.bf16.msra.mxu0 %v8154_v45 }
 0x1e0   : > { %7189 = vmatmul.mubr.msk.f32.gmra.mrb[4].mxu0 %vm704_vm3, %v971_v35  ;;  %7663 = vmatmul.mubr.msk.f32.gmra.mrb[8].mxu1 %vm704_vm3, %v973_v42  ;;  %v1760_v35 = vld [vmem:[#allocation4 + $0x2b0] sm:$0xff] }
 0x1e1   : > { %8169 = vmatpush3.bf16.msra.mxu1 %v8166_v40  ;;  %1081 = vmatprep.mubr.f32.mxu0 %v9854_v0  ;;  %v1489_v40 = vld [vmem:[#allocation4 + $0x1f8] sm:$0xff]  ;;  %v8226_v41 = vpack.c.bf16 %v1763_v36, %v1760_v35 }
 0x1e2   : > { %7665 = vmatprep.mubr.msk.f32.mxu1 %vm704_vm3, %v975_v51  ;;  %8172 = vmatprep.subr.msk.bf16.mxu1 %vm10345_vm2, %v8170_v50 }
 0x1e3   : > { %v1233_v62 = vpop.permute.xlu0 %1232  ;;  %v1235_v63 = vpop.permute.xlu1 %1234  ;;  %8158 = vmatprep.subr.msk.bf16.mxu0 %vm10345_vm2, %v8156_v58  ;;  %v1492_v58 = vld [vmem:[#allocation4 + $0x210] sm:$0xff] }
 0x1e4   : > { %7190 = vmatmul.mubr.msk.f32.gmra.mrb[6].mxu0 %vm704_vm3, %v973_v42  ;;  %7666 = vmatmul.mubr.msk.f32.gmra.mrb[10].mxu1 %vm704_vm3, %v977_v52  ;;  %v8182_v42 = vpack.c.bf16 %v1489_v40, %v1486_v39  ;;  %v2545_v39 = vld [vmem:[#allocation4 + $0x400] sm:$0xff]  ;;  %v2548_v40 = vld [vmem:[#allocation4 + $0x418] sm:$0xff] }
 0x1e5   : > { %8175 = vmatpush3.bf16.msk.msra.mxu1 %vm10345_vm2, %v8170_v50  ;;  %1087 = vmatprep.mubr.f32.mxu0 %v9854_v0 }
 0x1e6   : > { %7680 = vmatprep.mubr.msk.f32.mxu1 %vm704_vm3, %v1233_v62  ;;  %8191 = vmatprep.subr.bf16.mxu1 %v8190_v61 }
 0x1e7   : > { %v1237_v12 = vpop.permute.xlu0 %1236  ;;  %v10527_v13 = vpop.permute.xlu1 %1238  ;;  %8161 = vmatpush1.bf16.msk.msra.mxu0 %vm10345_vm2, %v8159_v8  ;;  %v1747_v8 = vld [vmem:[#allocation4 + $0x248] sm:$0xff] }
 0x1e8   : > { %7191 = vmatmul.mubr.msk.f32.gmra.mrb[8].mxu0 %vm704_vm3, %v975_v51  ;;  %7681 = vmatmul.mubr.msk.f32.vlgmr.msra.gmra.mrb[6].mxu1 %vm704_vm3, %v1235_v63  ;;  %v8246_v51 = vpack.c.bf16 %v2017_v44, %v2014_v43  ;;  %v8204_v16 = vpack.c.bf16 %v1750_v9, %v1747_v8  ;;  %v8302_v43 = vpack.c.bf16 %v2548_v40, %v2545_v39  ;;  %v2811_v8 = vld [vmem:[#allocation4 + $0x490] sm:$0xff]  ;;  %v2027_v39 = vld [vmem:[#allocation4 + $0x348] sm:$0x3f] }
 0x1e9   : > { %8193 = vmatpush3.bf16.msra.mxu1 %v8190_v61  ;;  %1093 = vmatprep.mubr.f32.mxu0 %v9854_v0  ;;  %v8250_v61 = vpack.c.bf16 %v2023_v54, %v2020_v53  ;;  %v2557_v54 = vld [vmem:[#allocation4 + $0x460] sm:$0xff] }
 0x1ea   : > { %7683 = vmatprep.mubr.msk.f32.mxu1 %vm704_vm3, %v1237_v12  ;;  %8195 = vmatprep.subr.bf16.mxu1 %v8194_v11 }
 0x1eb   : > { %v10535_v20 = vpop.permute.xlu0 %1240  ;;  %8177 = vmatprep.subr.bf16.mxu0 %v8176_v18  ;;  %v10540_v28 = vpop.permute.xlu1 %1242  ;;  %v1749_v18 = vld [vmem:[#allocation4 + $0x258] sm:$0xff] }
 0x1ec   : > { %7192 = vmatmul.mubr.msk.f32.gmra.mrb[10].mxu0 %vm704_vm3, %v977_v52  ;;  %7684 = vmatmul.mubr.msk.f32.gmra.mrb[8].mxu1 %vm704_vm3, %v10527_v13  ;;  %v8184_v52 = vpack.c.bf16 %v1496_v49, %v1493_v48  ;;  %v8206_v21 = vpack.c.bf16 %v1749_v18, %v1746_v17  ;;  %v2554_v48 = vld [vmem:[#allocation4 + $0x448] sm:$0xff]  ;;  %v1758_v49 = vld [vmem:[#allocation4 + $0x2a0] sm:$0xff]  ;;  %v2820_v18 = vld [vmem:[#allocation4 + $0x4d8] sm:$0xff] }
 0x1ed   : > { %8197 = vmatpush3.bf16.msra.mxu1 %v8194_v11  ;;  %1329 = vmatprep.mubr.f32.mxu0 %v9854_v0 }
 0x1ee   : > { %7686 = vmatprep.mubr.msk.f32.mxu1 %vm704_vm3, %v10535_v20  ;;  %8200 = vmatprep.subr.msk.bf16.mxu1 %vm10345_vm2, %v8198_v19 }
 0x1ef   : > { %v10553_v33 = vpop.permute.xlu0 %1764  ;;  %v10557_v38 = vpop.permute.xlu1 %1766 }
 0x1f0   : > { %7202 = vmatmul.mubr.msk.f32.vlgmr.msra.gmra.mrb[0].mxu0 %vm704_vm3, %v1233_v62  ;;  %7687 = vmatmul.mubr.msk.f32.gmra.mrb[10].mxu1 %vm704_vm3, %v10540_v28  ;;  %v8187_v62 = vpack.c.bf16 %v1495_v59, %v1492_v58  ;;  %v2560_v58 = vld [vmem:[#allocation4 + $0x478] sm:$0x3f] }
 0x1f1   : > { %8203 = vmatpush3.bf16.msk.msra.mxu1 %vm10345_vm2, %v8198_v19  ;;  %1335 = vmatprep.mubr.f32.mxu0 %v9854_v0  ;;  %v8310_v5 = vpack.c.bf16 %v2560_v58, %v2557_v54 }
 0x1f2   : > { %7701 = vmatprep.mubr.msk.f32.mxu1 %vm704_vm3, %v10379_v46  ;;  %8219 = vmatprep.subr.bf16.mxu1 %v8218_v1 }
 0x1f3   : > { %8179 = vmatpush1.bf16.msra.mxu0 %v8178_v14  ;;  %v10565_v45 = vpop.permute.xlu0 %1768  ;;  %v10571_v50 = vpop.permute.xlu1 %1770  ;;  %v8278_v14 = vpack.c.bf16 %v2289_v24, %v2286_v22  ;;  %v2022_v22 = vld [vmem:[#allocation4 + $0x320] sm:$0xff] }
 0x1f4   : > { %7203 = vmatmul.mubr.msk.f32.gmra.mrb[2].mxu0 %vm704_vm3, %v1235_v63  ;;  %7702 = vmatmul.mubr.msk.f32.vlgmr.msra.gmra.mrb[6].mxu1 %vm704_vm3, %v10382_v47 }
 0x1f5   : > { %8221 = vmatpush3.bf16.msra.mxu1 %v8218_v1  ;;  %1341 = vmatprep.mubr.f32.mxu0 %v9854_v0 }
 0x1f6   : > { %7704 = vmatprep.mubr.msk.f32.mxu1 %vm704_vm3, %v10394_v55  ;;  %8223 = vmatprep.subr.bf16.mxu1 %v8222_v34 }
 0x1f7   : > { %8181 = vmatprep.subr.bf16.mxu0 %v8180_v37  ;;  %v10584_v60 = vpop.permute.xlu0 %1772  ;;  %v10590_v63 = vpop.permute.xlu1 %1774 }
 0x1f8   : > { %7204 = vmatmul.mubr.msk.f32.gmra.mrb[4].mxu0 %vm704_vm3, %v1237_v12  ;;  %7705 = vmatmul.mubr.msk.f32.gmra.mrb[8].mxu1 %vm704_vm3, %v10397_v56  ;;  %v2280_v12 = vld [vmem:[#allocation4 + $0x370] sm:$0xff] }
 0x1f9   : > { %8225 = vmatpush3.bf16.msra.mxu1 %v8222_v34  ;;  %1347 = vmatprep.mubr.f32.mxu0 %v9854_v0  ;;  %v1755_v34 = vld [vmem:[#allocation4 + $0x288] sm:$0xff] }
 0x1fa   : > { %7707 = vmatprep.mubr.msk.f32.mxu1 %vm704_vm3, %v10418_v7  ;;  %8228 = vmatprep.subr.msk.bf16.mxu1 %vm10345_vm2, %v8226_v41  ;;  %v8210_v37 = vpack.c.bf16 %v1755_v34, %v1752_v32 }
 0x1fb   : > { %8183 = vmatpush1.bf16.msra.mxu0 %v8182_v42  ;;  %v10601_v11 = vpop.permute.xlu0 %2030  ;;  %v10608_v19 = vpop.permute.xlu1 %2032 }
 0x1fc   : > { %7205 = vmatmul.mubr.msk.f32.gmra.mrb[6].mxu0 %vm704_vm3, %v10527_v13  ;;  %7708 = vmatmul.mubr.msk.f32.gmra.mrb[10].mxu1 %vm704_vm3, %v10400_v57  ;;  %v2283_v13 = vld [vmem:[#allocation4 + $0x388] sm:$0xff] }
 0x1fd   : > { %8231 = vmatpush3.bf16.msk.msra.mxu1 %vm10345_vm2, %v8226_v41  ;;  %1353 = vmatprep.mubr.f32.mxu0 %v9854_v0  ;;  %v1762_v41 = vld [vmem:[#allocation4 + $0x2c0] sm:$0x3f] }
 0x1fe   : > { %7722 = vmatprep.mubr.msk.f32.mxu1 %vm704_vm3, %v10553_v33  ;;  %8247 = vmatprep.subr.bf16.mxu1 %v8246_v51 }
 0x1ff   : > { %8186 = vmatprep.subr.msk.bf16.mxu0 %vm10345_vm2, %v8184_v52  ;;  %v10621_v1 = vpop.permute.xlu0 %2034  ;;  %v10625_v15 = vpop.permute.xlu1 %2036 }
 0x200   : > { %7206 = vmatmul.mubr.msk.f32.gmra.mrb[8].mxu0 %vm704_vm3, %v10535_v20  ;;  %7723 = vmatmul.mubr.msk.f32.vlgmr.msra.gmra.mrb[6].mxu1 %vm704_vm3, %v10557_v38  ;;  %v8274_v20 = vpack.c.bf16 %v2283_v13, %v2280_v12  ;;  %v2015_v12 = vld [vmem:[#allocation4 + $0x2e8] sm:$0xff] }
 0x201   : > { %8249 = vmatpush3.bf16.msra.mxu1 %v8246_v51  ;;  %1359 = vmatprep.mubr.f32.mxu0 %v9854_v0  ;;  %v1761_v51 = vld [vmem:[#allocation4 + $0x2b8] sm:$0x3f] }
 0x202   : > { %7725 = vmatprep.mubr.msk.f32.mxu1 %vm704_vm3, %v10565_v45  ;;  %8251 = vmatprep.subr.bf16.mxu1 %v8250_v61 }
 0x203   : > { %8189 = vmatpush1.bf16.msk.msra.mxu0 %vm10345_vm2, %v8187_v62  ;;  %v10634_v36 = vpop.permute.xlu0 %2038  ;;  %v10640_v42 = vpop.permute.xlu1 %2040  ;;  %v2016_v62 = vld [vmem:[#allocation4 + $0x2f0] sm:$0xff] }
 0x204   : > { %7207 = vmatmul.mubr.msk.f32.gmra.mrb[10].mxu0 %vm704_vm3, %v10540_v28  ;;  %7726 = vmatmul.mubr.msk.f32.gmra.mrb[8].mxu1 %vm704_vm3, %v10571_v50  ;;  %v1756_v28 = vld [vmem:[#allocation4 + $0x290] sm:$0xff] }
 0x205   : > { %8253 = vmatpush3.bf16.msra.mxu1 %v8250_v61  ;;  %1595 = vmatprep.mubr.f32.mxu0 %v9854_v0  ;;  %v8208_v31 = vpack.c.bf16 %v1756_v28, %v1753_v25  ;;  %v2013_v61 = vld [vmem:[#allocation4 + $0x2d8] sm:$0xff]  ;;  %v2826_v28 = vld [vmem:[#allocation4 + $0x508] sm:$0x3f] }
 0x206   : > { %7728 = vmatprep.mubr.msk.f32.mxu1 %vm704_vm3, %v10584_v60  ;;  %8256 = vmatprep.subr.msk.bf16.mxu1 %vm10345_vm2, %v8254_v10  ;;  %v8232_v9 = vpack.c.bf16 %v2016_v62, %v2013_v61  ;;  %v2284_v61 = vld [vmem:[#allocation4 + $0x390] sm:$0xff]  ;;  %v2287_v62 = vld [vmem:[#allocation4 + $0x3a8] sm:$0xff] }
 0x207   : > { %8205 = vmatprep.subr.bf16.mxu0 %v8204_v16  ;;  %v10651_v52 = vpop.permute.xlu0 %2561  ;;  %v10660_v59 = vpop.permute.xlu1 %2563 }
 0x208   : > { %7217 = vmatmul.mubr.msk.f32.vlgmr.msra.gmra.mrb[0].mxu0 %vm704_vm3, %v10379_v46  ;;  %7729 = vmatmul.mubr.msk.f32.gmra.mrb[10].mxu1 %vm704_vm3, %v10590_v63  ;;  %v2292_v46 = vld [vmem:[#allocation4 + $0x3d0] sm:$0xff] }
 0x209   : > { %8259 = vmatpush3.bf16.msk.msra.mxu1 %vm10345_vm2, %v8254_v10  ;;  %1601 = vmatprep.mubr.f32.mxu0 %v9854_v0  ;;  %v8282_v35 = vpack.c.bf16 %v2295_v30, %v2292_v46  ;;  %v2012_v10 = vld [vmem:[#allocation4 + $0x2d0] sm:$0xff]  ;;  %v2018_v46 = vld [vmem:[#allocation4 + $0x300] sm:$0xff]  ;;  %v2021_v30 = vld [vmem:[#allocation4 + $0x318] sm:$0xff] }
 0x20a   : > { %7743 = vmatprep.mubr.msk.f32.mxu1 %vm704_vm3, %v10601_v11  ;;  %8275 = vmatprep.subr.bf16.mxu1 %v8274_v20  ;;  %v8234_v17 = vpack.c.bf16 %v2015_v12, %v2012_v10  ;;  %v8238_v34 = vpack.c.bf16 %v2021_v30, %v2018_v46  ;;  %v2293_v10 = vld [vmem:[#allocation4 + $0x3d8] sm:$0x3f]  ;;  %v2559_v46 = vld [vmem:[#allocation4 + $0x470] sm:$0x3f] }
 0x20b   : > { %8207 = vmatpush1.bf16.msra.mxu0 %v8206_v21  ;;  %v10669_v6 = vpop.permute.xlu0 %2565  ;;  %v10678_v13 = vpop.permute.xlu1 %2567  ;;  %v2019_v21 = vld [vmem:[#allocation4 + $0x308] sm:$0xff]  ;;  %v2544_v12 = vld [vmem:[#allocation4 + $0x3f8] sm:$0xff] }
 0x20c   : > { %7218 = vmatmul.mubr.msk.f32.gmra.mrb[2].mxu0 %vm704_vm3, %v10382_v47  ;;  %7744 = vmatmul.mubr.msk.f32.vlgmr.msra.gmra.mrb[6].mxu1 %vm704_vm3, %v10608_v19  ;;  %v1759_v47 = vld [vmem:[#allocation4 + $0x2a8] sm:$0xff] }
 0x20d   : > { %8277 = vmatpush3.bf16.msra.mxu1 %v8274_v20  ;;  %1607 = vmatprep.mubr.f32.mxu0 %v9854_v0  ;;  %v8212_v44 = vpack.c.bf16 %v1762_v41, %v1759_v47 }
 0x20e   : > { %7746 = vmatprep.mubr.msk.f32.mxu1 %vm704_vm3, %v10621_v1  ;;  %8279 = vmatprep.subr.bf16.mxu1 %v8278_v14 }
 0x20f   : > { %8209 = vmatprep.subr.bf16.mxu0 %v8208_v31  ;;  %v10688_v20 = vpop.permute.xlu0 %2569  ;;  %v10695_v25 = vpop.permute.xlu1 %2571 }
 0x210   : > { %7219 = vmatmul.mubr.msk.f32.gmra.mrb[4].mxu0 %vm704_vm3, %v10394_v55  ;;  %7747 = vmatmul.mubr.msk.f32.gmra.mrb[8].mxu1 %vm704_vm3, %v10625_v15  ;;  %v2551_v55 = vld [vmem:[#allocation4 + $0x430] sm:$0xff] }
 0x211   : > { %8281 = vmatpush3.bf16.msra.mxu1 %v8278_v14  ;;  %1613 = vmatprep.mubr.f32.mxu0 %v9854_v0  ;;  %v8306_v53 = vpack.c.bf16 %v2554_v48, %v2551_v55  ;;  %v8236_v14 = vpack.c.bf16 %v2022_v22, %v2019_v21  ;;  %v2553_v21 = vld [vmem:[#allocation4 + $0x440] sm:$0xff] }
 0x212   : > { %7749 = vmatprep.mubr.msk.f32.mxu1 %vm704_vm3, %v10634_v36  ;;  %8284 = vmatprep.subr.msk.bf16.mxu1 %vm10345_vm2, %v8282_v35 }
 0x213   : > { %8211 = vmatpush1.bf16.msra.mxu0 %v8210_v37  ;;  %v10704_v32 = vpop.permute.xlu0 %2827  ;;  %v2028_v37 = vld [vmem:[#allocation4 + $0x350] sm:$0x3f]  ;;  %v10711_v40 = vpop.permute.xlu1 %2829 }
 0x214   : > { %7220 = vmatmul.mubr.msk.f32.gmra.mrb[6].mxu0 %vm704_vm3, %v10397_v56  ;;  %7750 = vmatmul.mubr.msk.f32.gmra.mrb[10].mxu1 %vm704_vm3, %v10640_v42  ;;  %v8215_v56 = vpack.c.bf16 %v1761_v51, %v1758_v49  ;;  %v2278_v49 = vld [vmem:[#allocation4 + $0x360] sm:$0xff]  ;;  %v2281_v51 = vld [vmem:[#allocation4 + $0x378] sm:$0xff] }
 0x215   : > { %8287 = vmatpush3.bf16.msk.msra.mxu1 %vm10345_vm2, %v8282_v35  ;;  %1619 = vmatprep.mubr.f32.mxu0 %v9854_v0  ;;  %v2025_v35 = vld [vmem:[#allocation4 + $0x338] sm:$0xff]  ;;  %v8262_v54 = vpack.c.bf16 %v2281_v51, %v2278_v49  ;;  %v2815_v51 = vld [vmem:[#allocation4 + $0x4b0] sm:$0xff] }
 0x216   : > { %7764 = vmatprep.mubr.msk.f32.mxu1 %vm704_vm3, %v10462_v26  ;;  %8303 = vmatprep.subr.bf16.mxu1 %v8302_v43  ;;  %v8240_v47 = vpack.c.bf16 %v2028_v37, %v2025_v35  ;;  %v2558_v35 = vld [vmem:[#allocation4 + $0x468] sm:$0x3f] }
 0x217   : > { %8214 = vmatprep.subr.msk.bf16.mxu0 %vm10345_vm2, %v8212_v44  ;;  %v10721_v44 = vpop.permute.xlu0 %2831  ;;  %v10730_v48 = vpop.permute.xlu1 %2833 }
 0x218   : > { %7221 = vmatmul.mubr.msk.f32.gmra.mrb[8].mxu0 %vm704_vm3, %v10418_v7  ;;  %7765 = vmatmul.mubr.msk.f32.vlgmr.msra.gmra.mrb[6].mxu1 %vm704_vm3, %v10465_v27  ;;  %v2814_v7 = vld [vmem:[#allocation4 + $0x4a8] sm:$0xff] }
 0x219   : > { %8305 = vmatpush3.bf16.msra.mxu1 %v8302_v43  ;;  %1625 = vmatprep.mubr.f32.mxu0 %v9854_v0  ;;  %v8330_v16 = vpack.c.bf16 %v2814_v7, %v2811_v8  ;;  %v2282_v43 = vld [vmem:[#allocation4 + $0x380] sm:$0xff] }
 0x21a   : > { %7767 = vmatprep.mubr.msk.f32.mxu1 %vm704_vm3, %v10474_v2  ;;  %8307 = vmatprep.subr.bf16.mxu1 %v8306_v53  ;;  %v2294_v8 = vld [vmem:[#allocation4 + $0x3e0] sm:$0x3f] }
 0x21b   : > { %8217 = vmatpush1.bf16.msk.msra.mxu0 %vm10345_vm2, %v8215_v56  ;;  %v2288_v56 = vld [vmem:[#allocation4 + $0x3b0] sm:$0xff] }
 0x21c   : > { %7222 = vmatmul.mubr.msk.f32.gmra.mrb[10].mxu0 %vm704_vm3, %v10400_v57  ;;  %7768 = vmatmul.mubr.msk.f32.gmra.mrb[8].mxu1 %vm704_vm3, %v10477_v3  ;;  %v2817_v57 = vld [vmem:[#allocation4 + $0x4c0] sm:$0xff] }
 0x21d   : > { %8309 = vmatpush3.bf16.msra.mxu1 %v8306_v53  ;;  %1861 = vmatprep.mubr.f32.mxu0 %v9854_v0  ;;  %v8334_v24 = vpack.c.bf16 %v2820_v18, %v2817_v57  ;;  %v2285_v53 = vld [vmem:[#allocation4 + $0x398] sm:$0xff]  ;;  %v2546_v57 = vld [vmem:[#allocation4 + $0x408] sm:$0xff] }
 0x21e   : > { %7770 = vmatprep.mubr.msk.f32.mxu1 %vm704_vm3, %v10488_v4  ;;  %8312 = vmatprep.subr.msk.bf16.mxu1 %vm10345_vm2, %v8310_v5  ;;  %v8264_v58 = vpack.c.bf16 %v2288_v56, %v2285_v53  ;;  %v2822_v53 = vld [vmem:[#allocation4 + $0x4e8] sm:$0xff]  ;;  %v2825_v56 = vld [vmem:[#allocation4 + $0x500] sm:$0x3f] }
 0x21f   : > { %8233 = vmatprep.subr.bf16.mxu0 %v8232_v9  ;;  %v2290_v9 = vld [vmem:[#allocation4 + $0x3c0] sm:$0xff] }
 0x220   : > { %7232 = vmatmul.mubr.msk.f32.vlgmr.msra.gmra.mrb[0].mxu0 %vm704_vm3, %v10553_v33  ;;  %7771 = vmatmul.mubr.msk.f32.gmra.mrb[10].mxu1 %vm704_vm3, %v10480_v29  ;;  %v2823_v33 = vld [vmem:[#allocation4 + $0x4f0] sm:$0xff] }
 0x221   : > { %8315 = vmatpush3.bf16.msk.msra.mxu1 %vm10345_vm2, %v8310_v5  ;;  %1867 = vmatprep.mubr.f32.mxu0 %v9854_v0  ;;  %v8338_v31 = vpack.c.bf16 %v2826_v28, %v2823_v33  ;;  %v2291_v5 = vld [vmem:[#allocation4 + $0x3c8] sm:$0xff]  ;;  %v2549_v33 = vld [vmem:[#allocation4 + $0x420] sm:$0xff]  ;;  %v2552_v28 = vld [vmem:[#allocation4 + $0x438] sm:$0xff] }
 0x222   : > { %7785 = vmatprep.mubr.msk.f32.mxu1 %vm704_vm3, %v10651_v52  ;;  %8331 = vmatprep.subr.bf16.mxu1 %v8330_v16  ;;  %v8268_v7 = vpack.c.bf16 %v2294_v8, %v2291_v5 }
 0x223   : > { %8235 = vmatpush1.bf16.msra.mxu0 %v8234_v17 }
 0x224   : > { %7233 = vmatmul.mubr.msk.f32.gmra.mrb[2].mxu0 %vm704_vm3, %v10557_v38  ;;  %7786 = vmatmul.mubr.msk.f32.vlgmr.msra.gmra.mrb[6].mxu1 %vm704_vm3, %v10660_v59  ;;  %v2024_v38 = vld [vmem:[#allocation4 + $0x330] sm:$0xff] }
 0x225   : > { %8333 = vmatpush3.bf16.msra.mxu1 %v8330_v16  ;;  %1873 = vmatprep.mubr.f32.mxu0 %v9854_v0  ;;  %v8243_v41 = vpack.c.bf16 %v2027_v39, %v2024_v38  ;;  %v2547_v16 = vld [vmem:[#allocation4 + $0x410] sm:$0xff]  ;;  %v2810_v38 = vld [vmem:[#allocation4 + $0x488] sm:$0xff]  ;;  %v2813_v39 = vld [vmem:[#allocation4 + $0x4a0] sm:$0xff] }
 0x226   : > { %7788 = vmatprep.mubr.msk.f32.mxu1 %vm704_vm3, %v10669_v6  ;;  %8335 = vmatprep.subr.bf16.mxu1 %v8334_v24  ;;  %v8288_v17 = vpack.c.bf16 %v2547_v16, %v2544_v12 }
 0x227   : > { %8237 = vmatprep.subr.bf16.mxu0 %v8236_v14  ;;  %v2556_v14 = vld [vmem:[#allocation4 + $0x458] sm:$0xff] }
 0x228   : > { %7234 = vmatmul.mubr.msk.f32.gmra.mrb[4].mxu0 %vm704_vm3, %v10565_v45  ;;  %7789 = vmatmul.mubr.msk.f32.gmra.mrb[8].mxu1 %vm704_vm3, %v10678_v13  ;;  %v2279_v45 = vld [vmem:[#allocation4 + $0x368] sm:$0xff] }
 0x229   : > { %8337 = vmatpush3.bf16.msra.mxu1 %v8334_v24  ;;  %1879 = vmatprep.mubr.f32.mxu0 %v9854_v0  ;;  %v8260_v55 = vpack.c.bf16 %v2282_v43, %v2279_v45  ;;  %v2812_v45 = vld [vmem:[#allocation4 + $0x498] sm:$0xff] }
 0x22a   : > { %7791 = vmatprep.mubr.msk.f32.mxu1 %vm704_vm3, %v10688_v20  ;;  %8340 = vmatprep.subr.msk.bf16.mxu1 %vm10345_vm2, %v8338_v31  ;;  %v2816_v43 = vld [vmem:[#allocation4 + $0x4b8] sm:$0xff] }
 0x22b   : > { %8239 = vmatpush1.bf16.msra.mxu0 %v8238_v34  ;;  %v2555_v34 = vld [vmem:[#allocation4 + $0x450] sm:$0xff] }
 0x22c   : > { %7235 = vmatmul.mubr.msk.f32.gmra.mrb[6].mxu0 %vm704_vm3, %v10571_v50  ;;  %7792 = vmatmul.mubr.msk.f32.gmra.mrb[10].mxu1 %vm704_vm3, %v10695_v25  ;;  %v10741_v50 = vpop.permute.xlu0 %2835 }
 0x22d   : > { %8343 = vmatpush3.bf16.msk.msra.mxu1 %vm10345_vm2, %v8338_v31  ;;  %1885 = vmatprep.mubr.f32.mxu0 %v9854_v0  ;;  %v8294_v31 = vpack.c.bf16 %v2552_v28, %v2549_v33 }
 0x22e   : > { %7806 = vmatprep.mubr.msk.f32.mxu1 %vm704_vm3, %v10704_v32  ;;  %8242 = vmatprep.subr.msk.bf16.mxu0 %vm10345_vm2, %v8240_v47 }
 0x22f   : > { %8245 = vmatpush1.bf16.msk.msra.mxu0 %vm10345_vm2, %v8243_v41  ;;  %v8316_v41 = vpack.c.bf16 %v2813_v39, %v2810_v38 }
 0x230   : > { %7236 = vmatmul.mubr.msk.f32.gmra.mrb[8].mxu0 %vm704_vm3, %v10584_v60  ;;  %7807 = vmatmul.mubr.msk.f32.vlgmr.msra.gmra.mrb[6].mxu1 %vm704_vm3, %v10711_v40  ;;  %v10747_v60 = vpop.permute.xlu1 %2837 }
 0x231   : > { %1891 = vmatprep.mubr.f32.mxu0 %v9854_v0  ;;  %7809 = vmatprep.mubr.msk.f32.mxu1 %vm704_vm3, %v10721_v44 }
 0x232   : > { %8261 = vmatprep.subr.bf16.mxu0 %v8260_v55 }
 0x234   : > { %7237 = vmatmul.mubr.msk.f32.gmra.mrb[10].mxu0 %vm704_vm3, %v10590_v63  ;;  %7810 = vmatmul.mubr.msk.f32.gmra.mrb[8].mxu1 %vm704_vm3, %v10730_v48  ;;  %v8266_v63 = vpack.c.bf16 %v2287_v62, %v2284_v61  ;;  %v2824_v61 = vld [vmem:[#allocation4 + $0x4f8] sm:$0x3f] }
 0x235   : > { %2127 = vmatprep.mubr.f32.mxu0 %v9854_v0  ;;  %7812 = vmatprep.mubr.msk.f32.mxu1 %vm704_vm3, %v10741_v50 }
 0x238   : > { %7247 = vmatmul.mubr.msk.f32.vlgmr.msra.gmra.mrb[0].mxu0 %vm704_vm3, %v10601_v11  ;;  %7813 = vmatmul.mubr.msk.f32.gmra.mrb[10].mxu1 %vm704_vm3, %v10747_v60  ;;  %v8271_v11 = vpack.c.bf16 %v2293_v10, %v2290_v9 }
 0x239   : > { %2133 = vmatprep.mubr.f32.mxu0 %v9854_v0  ;;  %8263 = vmatpush1.bf16.msra.mxu0 %v8262_v54  ;;  %v8324_v54 = vpack.c.bf16 %v2825_v56, %v2822_v53 }
 0x23a   : > { %8265 = vmatprep.subr.bf16.mxu0 %v8264_v58  ;;  %3266 = vmatprep.mubr.f32.mxu1 %v9854_v0  ;;  %v2821_v58 = vld [vmem:[#allocation4 + $0x4e0] sm:$0xff] }
 0x23c   : > { %7248 = vmatmul.mubr.msk.f32.gmra.mrb[2].mxu0 %vm704_vm3, %v10608_v19  ;;  %v2543_v19 = vld [vmem:[#allocation4 + $0x3f0] sm:$0xff] }
 0x23d   : > { %2139 = vmatprep.mubr.f32.mxu0 %v9854_v0  ;;  %8267 = vmatpush1.bf16.msra.mxu0 %v8266_v63 }
 0x23e   : > { %8270 = vmatprep.subr.msk.bf16.mxu0 %vm10345_vm2, %v8268_v7 }
 0x240   : > { %7249 = vmatmul.mubr.msk.f32.gmra.mrb[4].mxu0 %vm704_vm3, %v10621_v1  ;;  %v2550_v1 = vld [vmem:[#allocation4 + $0x428] sm:$0xff] }
 0x241   : > { %2145 = vmatprep.mubr.f32.mxu0 %v9854_v0  ;;  %8273 = vmatpush1.bf16.msk.msra.mxu0 %vm10345_vm2, %v8271_v11  ;;  %v8292_v24 = vpack.c.bf16 %v2553_v21, %v2550_v1 }
 0x242   : > { %8289 = vmatprep.subr.bf16.mxu0 %v8288_v17 }
 0x244   : > { %7250 = vmatmul.mubr.msk.f32.gmra.mrb[6].mxu0 %vm704_vm3, %v10625_v15  ;;  %v8290_v15 = vpack.c.bf16 %v2546_v57, %v2543_v19 }
 0x245   : > { %2151 = vmatprep.mubr.f32.mxu0 %v9854_v0 }
 0x248   : > { %7251 = vmatmul.mubr.msk.f32.gmra.mrb[8].mxu0 %vm704_vm3, %v10634_v36 }
 0x249   : > { %2157 = vmatprep.mubr.f32.mxu0 %v9854_v0  ;;  %v10774_v18 = vpop.f32.mrb[0].mxu1 }
 0x24a   : > { %v10776_v22 = vpop.f32.mrb[1].mxu1 }
 0x24c   : > { %7252 = vmatmul.mubr.msk.f32.gmra.mrb[10].mxu0 %vm704_vm3, %v10640_v42  ;;  %v8296_v42 = vpack.c.bf16 %v2559_v46, %v2556_v14 }
 0x24d   : > { %2392 = vmatprep.mubr.f32.mxu0 %v9854_v0  ;;  %v10781_v36 = vpop.f32.mrb[2].mxu1 }
 0x24e   : > { %v10783_v30 = vpop.f32.mrb[3].mxu1 }
 0x250   : > { %7262 = vmatmul.mubr.msk.f32.vlgmr.msra.gmra.mrb[0].mxu0 %vm704_vm3, %v10462_v26  ;;  %v8299_v26 = vpack.c.bf16 %v2558_v35, %v2555_v34 }
 0x251   : > { %2398 = vmatprep.mubr.f32.mxu0 %v9854_v0  ;;  %8291 = vmatpush1.bf16.msra.mxu0 %v8290_v15  ;;  %v10788_v37 = vpop.f32.mrb[4].mxu1 }
 0x252   : > { %8293 = vmatprep.subr.bf16.mxu0 %v8292_v24  ;;  %v10790_v47 = vpop.f32.mrb[5].mxu1 }
 0x254   : > { %7263 = vmatmul.mubr.msk.f32.gmra.mrb[2].mxu0 %vm704_vm3, %v10465_v27  ;;  %v2809_v27 = vld [vmem:[#allocation4 + $0x480] sm:$0xff] }
 0x255   : > { %2404 = vmatprep.mubr.f32.mxu0 %v9854_v0  ;;  %8295 = vmatpush1.bf16.msra.mxu0 %v8294_v31  ;;  %v8318_v55 = vpack.c.bf16 %v2812_v45, %v2809_v27 }
 0x256   : > { %8298 = vmatprep.subr.msk.bf16.mxu0 %vm10345_vm2, %v8296_v42 }
 0x258   : > { %7264 = vmatmul.mubr.msk.f32.gmra.mrb[4].mxu0 %vm704_vm3, %v10474_v2  ;;  %v2819_v2 = vld [vmem:[#allocation4 + $0x4d0] sm:$0xff] }
 0x259   : > { %2410 = vmatprep.mubr.f32.mxu0 %v9854_v0  ;;  %8301 = vmatpush1.bf16.msk.msra.mxu0 %vm10345_vm2, %v8299_v26  ;;  %v8320_v49 = vpack.c.bf16 %v2819_v2, %v2816_v43 }
 0x25a   : > { %8317 = vmatprep.subr.bf16.mxu0 %v8316_v41 }
 0x25c   : > { %7265 = vmatmul.mubr.msk.f32.gmra.mrb[6].mxu0 %vm704_vm3, %v10477_v3  ;;  %v2818_v3 = vld [vmem:[#allocation4 + $0x4c8] sm:$0xff] }
 0x25d   : > { %2416 = vmatprep.mubr.f32.mxu0 %v9854_v0 }
 0x260   : > { %7266 = vmatmul.mubr.msk.f32.gmra.mrb[8].mxu0 %vm704_vm3, %v10488_v4  ;;  %v8322_v4 = vpack.c.bf16 %v2818_v3, %v2815_v51 }
 0x261   : > { %2422 = vmatprep.mubr.f32.mxu0 %v9854_v0 }
 0x264   : > { %7267 = vmatmul.mubr.msk.f32.gmra.mrb[10].mxu0 %vm704_vm3, %v10480_v29  ;;  %v8327_v29 = vpack.c.bf16 %v2824_v61, %v2821_v58 }
 0x265   : > { %2658 = vmatprep.mubr.f32.mxu0 %v9854_v0 }
 0x268   : > { %7277 = vmatmul.mubr.msk.f32.vlgmr.msra.gmra.mrb[0].mxu0 %vm704_vm3, %v10651_v52  ;;  %v10850_v52 = vshrl.u32 %v671_v23, 7 }
 0x269   : > { %2664 = vmatprep.mubr.f32.mxu0 %v9854_v0  ;;  %8319 = vmatpush1.bf16.msra.mxu0 %v8318_v55 }
 0x26a   : > { %8321 = vmatprep.subr.bf16.mxu0 %v8320_v49  ;;  %v673_v45 = vsub.s32 0, %v10850_v52  ;;  %v677_v43 = vsub.s32 1, %v10850_v52 }
 0x26c   : > { %7278 = vmatmul.mubr.msk.f32.gmra.mrb[2].mxu0 %vm704_vm3, %v10660_v59  ;;  %v681_v59 = vsub.s32 2, %v10850_v52 }
 0x26d   : > { %2670 = vmatprep.mubr.f32.mxu0 %v9854_v0  ;;  %8323 = vmatpush1.bf16.msra.mxu0 %v8322_v4 }
 0x26e   : > { %8326 = vmatprep.subr.msk.bf16.mxu0 %vm10345_vm2, %v8324_v54 }
 0x270   : > { %7279 = vmatmul.mubr.msk.f32.gmra.mrb[4].mxu0 %vm704_vm3, %v10669_v6  ;;  %v669_v6 = vld [vmem:[#allocation6] sm:$0x7] }
 0x271   : > { %2676 = vmatprep.mubr.f32.mxu0 %v9854_v0  ;;  %8329 = vmatpush1.bf16.msk.msra.mxu0 %vm10345_vm2, %v8327_v29  ;;  %v674_v2 = vrot.slane %v669_v6, %v673_v45  ;;  %v678_v55 = vrot.slane %v669_v6, %v677_v43  ;;  %vm6189_vm2 = vcmask 457728  }
 0x274   : > { %7280 = vmatmul.mubr.msk.f32.gmra.mrb[6].mxu0 %vm704_vm3, %v10678_v13  ;;  %v682_v13 = vrot.slane %v669_v6, %v681_v59 }
 0x275   : > { %2682 = vmatprep.mubr.f32.mxu0 %v9854_v0 }
 0x278   : > { %7281 = vmatmul.mubr.msk.f32.gmra.mrb[8].mxu0 %vm704_vm3, %v10688_v20 }
 0x279   : > { %2688 = vmatprep.mubr.f32.mxu0 %v9854_v0 }
 0x27c   : > { %7282 = vmatmul.mubr.msk.f32.gmra.mrb[10].mxu0 %vm704_vm3, %v10695_v25 }
 0x27d   : > { %2924 = vmatprep.mubr.f32.mxu0 %v9854_v0 }
 0x280   : > { %7292 = vmatmul.mubr.msk.f32.vlgmr.msra.gmra.mrb[0].mxu0 %vm704_vm3, %v10704_v32 }
 0x281   : > { %2930 = vmatprep.mubr.f32.mxu0 %v9854_v0 }
 0x284   : > { %7293 = vmatmul.mubr.msk.f32.gmra.mrb[2].mxu0 %vm704_vm3, %v10711_v40 }
 0x285   : > { %2936 = vmatprep.mubr.f32.mxu0 %v9854_v0 }
 0x288   : > { %7294 = vmatmul.mubr.msk.f32.gmra.mrb[4].mxu0 %vm704_vm3, %v10721_v44 }
 0x289   : > { %2942 = vmatprep.mubr.f32.mxu0 %v9854_v0 }
 0x28c   : > { %7295 = vmatmul.mubr.msk.f32.gmra.mrb[6].mxu0 %vm704_vm3, %v10730_v48 }
 0x28d   : > { %2948 = vmatprep.mubr.f32.mxu0 %v9854_v0 }
 0x290   : > { %7296 = vmatmul.mubr.msk.f32.gmra.mrb[8].mxu0 %vm704_vm3, %v10741_v50 }
 0x291   : > { %2954 = vmatprep.mubr.f32.mxu0 %v9854_v0 }
 0x294   : > { %7297 = vmatmul.mubr.msk.f32.gmra.mrb[10].mxu0 %vm704_vm3, %v10747_v60  ;;  %vm6272_vm3 = vcmask 130048  }
 0x303   : > { %v7808_v20 = vpop.f32.mrb[6].mxu1 }
 0x304   : > { %v9018_v25 = vadd.f32 %v7808_v20, %v682_v13  ;;  %v3027_v32 = vpop.f32.mrb[7].mxu1 }
 0x305   : > { %v9019_v40 = vadd.f32 %v3027_v32, %v682_v13 }
 0x306   : > { %v3079_v44 = vmax.f32 %v9018_v25, 0.0 }
 0x307   : > { %v3076_v48 = vmax.f32 %v9019_v40, 0.0  ;;  %v7811_v62 = vpop.f32.mrb[8].mxu1 }
 0x308   : > { %v3117_v50 = vrot.slane %v3079_v44, 1  ;;  %v9020_v5 = vadd.f32 %v7811_v62, %v682_v13  ;;  %v3037_v8 = vpop.f32.mrb[9].mxu1  ;;  %v938_v62 = vadd.f32 %v10774_v18, %v674_v2 }
 0x309   : > { %v3116_v63 = vrot.slane %v3076_v48, 1  ;;  %v9021_v7 = vadd.f32 %v3037_v8, %v682_v13  ;;  %v939_v8 = vadd.f32 %v10776_v22, %v678_v55 }
 0x30a   : > { %v3085_v60 = vmax.f32 %v9020_v5, 0.0 }
 0x30b   : > { %v3118_v9 = vsel %vm1498_vm4, %v3116_v63, %v3117_v50  ;;  %v3082_v10 = vmax.f32 %v9021_v7, 0.0  ;;  %v7814_v12 = vpop.f32.mrb[10].mxu1 }
 0x30c   : > { %v10854_v16 = vmax.f32 %v3076_v48, %v3118_v9  ;;  %v3129_v11 = vrot.slane %v3085_v60, 1  ;;  %v9022_v17 = vadd.f32 %v7814_v12, %v682_v13  ;;  %v3047_v19 = vpop.f32.mrb[11].mxu1 }
 0x30d   : > { %v3123_v57 = vrot.slane %v3082_v10, 1  ;;  %v9023_v1 = vadd.f32 %v3047_v19, %v682_v13 }
 0x30e   : > { %v3091_v21 = vmax.f32 %v9022_v17, 0.0 }
 0x30f   : > { %v3124_v15 = vsel %vm1498_vm4, %v3117_v50, %v3123_v57  ;;  %v3130_v24 = vsel %vm1498_vm4, %v3123_v57, %v3129_v11  ;;  %v3088_v33 = vmax.f32 %v9023_v1, 0.0  ;;  %v941_v1 = vadd.f32 %v10781_v36, %v674_v2 }
 0x310   : > { %v10858_v28 = vmax.f32 %v3079_v44, %v3124_v15  ;;  %v10860_v14 = vmax.f32 %v3082_v10, %v3130_v24  ;;  %v3141_v46 = vrot.slane %v3091_v21, 1  ;;  %v942_v15 = vadd.f32 %v10783_v30, %v678_v55 }
 0x311   : > { %v3135_v31 = vrot.slane %v3088_v33, 1  ;;  %v945_v30 = vadd.f32 %v10790_v47, %v678_v55 }
 0x312   : > { %v8359_v42 = vpack.c.bf16 %v10858_v28, %v10854_v16  ;;  %v10866_v38 = vmax.f32 %v3091_v21, %v3141_v46  ;;  %v3418_v16 = vld [vmem:[%s11760_s16 + $0x8] sm:$0xff]  ;;  %v3420_v28 = vld [vmem:[%s11760_s16 + $0x18] sm:$0xff] }
 0x313   : > { %v3136_v34 = vsel %vm1498_vm4, %v3129_v11, %v3135_v31  ;;  %v3142_v35 = vsel %vm1498_vm4, %v3135_v31, %v3141_v46 }
 0x314   : > { %v10868_v39 = vmax.f32 %v3085_v60, %v3136_v34  ;;  %v10870_v26 = vmax.f32 %v3088_v33, %v3142_v35 }
 0x316   : > { %v8365_v41 = vpack.c.bf16 %v10866_v38, %v10870_v26  ;;  %v8362_v27 = vpack.c.bf16 %v10868_v39, %v10860_v14  ;;  %v3417_v14 = vld [vmem:[%s11760_s16] sm:$0xff]  ;;  %v3419_v38 = vld [vmem:[%s11760_s16 + $0x10] sm:$0xff]  ;;  %v3422_v39 = vld [vmem:[%s11760_s16 + $0x28] sm:$0xff] }
 0x317   : > { %v3424_v26 = vld [vmem:[%s11760_s16 + $0x38] sm:$0xff] }
 0x353   : > { %v2926_v49 = vpop.f32.mrb[0].mxu0 }
 0x354   : > { %v9000_v51 = vadd.f32 %v2926_v49, %v674_v2  ;;  %v2928_v3 = vpop.f32.mrb[1].mxu0 }
 0x355   : > { %v9001_v53 = vadd.f32 %v2928_v3, %v678_v55 }
 0x356   : > { %v3074_v4 = vmax.f32 %v9000_v51, 0.0 }
 0x357   : > { %v2932_v56 = vpop.f32.mrb[2].mxu0  ;;  %v3075_v61 = vmax.f32 %v9001_v53, 0.0 }
 0x358   : > { %v9002_v54 = vadd.f32 %v2932_v56, %v674_v2  ;;  %v2934_v58 = vpop.f32.mrb[3].mxu0  ;;  %v3110_v20 = vrot.slane %v3074_v4, 1  ;;  %v944_v56 = vadd.f32 %v10788_v37, %v674_v2 }
 0x359   : > { %v9003_v29 = vadd.f32 %v2934_v58, %v678_v55  ;;  %v3113_v44 = vrot.slane %v3075_v61, 1 }
 0x35a   : > { %v3077_v23 = vmax.f32 %v9002_v54, 0.0 }
 0x35b   : > { %v3078_v59 = vmax.f32 %v9003_v29, 0.0  ;;  %v2938_v13 = vpop.f32.mrb[4].mxu0 }
 0x35c   : > { %v3111_v25 = vrot.slane %v3077_v23, 1  ;;  %v9004_v32 = vadd.f32 %v2938_v13, %v674_v2  ;;  %v2940_v40 = vpop.f32.mrb[5].mxu0 }
 0x35d   : > { %v3114_v48 = vrot.slane %v3078_v59, 1  ;;  %v9005_v6 = vadd.f32 %v2940_v40, %v678_v55 }
 0x35e   : > { %v3112_v50 = vsel %vm1498_vm4, %v3110_v20, %v3111_v25  ;;  %v3080_v5 = vmax.f32 %v9004_v32, 0.0 }
 0x35f   : > { %v3161_v63 = vmax.f32 %v3074_v4, %v3112_v50  ;;  %v3081_v7 = vmax.f32 %v9005_v6, 0.0  ;;  %v2944_v60 = vpop.f32.mrb[6].mxu0  ;;  %v3115_v9 = vsel %vm1498_vm4, %v3113_v44, %v3114_v48 }
 0x360   : > { %v3119_v10 = vrot.slane %v3080_v5, 1  ;;  %v9007_v12 = vadd.f32 %v2944_v60, %v938_v62  ;;  %v2946_v11 = vpop.f32.mrb[7].mxu0  ;;  %v3162_v17 = vmax.f32 %v3075_v61, %v3115_v9 }
 0x361   : > { %v3121_v19 = vrot.slane %v3081_v7, 1  ;;  %v9009_v57 = vadd.f32 %v2946_v11, %v939_v8  ;;  %v3456_v11 = vld [vmem:[%s11760_s16 + $0x138] sm:$0xff] }
 0x362   : > { %v3120_v18 = vsel %vm1498_vm4, %v3111_v25, %v3119_v10  ;;  %v3083_v21 = vmax.f32 %v9007_v12, 0.0 }
 0x363   : > { %v3164_v24 = vmax.f32 %v3077_v23, %v3120_v18  ;;  %v3084_v22 = vmax.f32 %v9009_v57, 0.0  ;;  %v2950_v33 = vpop.f32.mrb[8].mxu0  ;;  %v3122_v46 = vsel %vm1498_vm4, %v3114_v48, %v3121_v19  ;;  %v9858_v57 = vmov 0.0|0.0   ;;  %v3181_v18 = vld [vmem:[#allocation15 + $0x10] sm:$0x7f] }
 0x364   : > { %v3125_v31 = vrot.slane %v3083_v21, 1  ;;  %v9011_v34 = vadd.f32 %v2950_v33, %v941_v1  ;;  %v2952_v35 = vpop.f32.mrb[9].mxu0  ;;  %v3165_v49 = vmax.f32 %v3078_v59, %v3122_v46  ;;  %v3180_v1 = vld [vmem:[#allocation15 + $0x8] sm:$0xff] }
 0x365   : > { %v3127_v51 = vrot.slane %v3084_v22, 1  ;;  %v9013_v3 = vadd.f32 %v2952_v35, %v942_v15  ;;  %v8346_v53 = vpack.c.bf16 %v3164_v24, %v3161_v63  ;;  %v3423_v15 = vld [vmem:[%s11760_s16 + $0x30] sm:$0xff]  ;;  %v3426_v24 = vld [vmem:[%s11760_s16 + $0x48] sm:$0xff] }
 0x366   : > { %v3126_v36 = vsel %vm1498_vm4, %v3119_v10, %v3125_v31  ;;  %v3086_v4 = vmax.f32 %v9011_v34, 0.0  ;;  %v8344_v54 = vpack.c.bf16 %v3165_v49, %v3162_v17  ;;  %v3427_v34 = vld [vmem:[%s11760_s16 + $0x50] sm:$0xff]  ;;  %v3430_v35 = vld [vmem:[%s11760_s16 + $0x68] sm:$0xff]  ;;  %v3432_v49 = vld [vmem:[%s11760_s16 + $0x78] sm:$0xff] }
 0x367   : > { %v3167_v58 = vmax.f32 %v3080_v5, %v3126_v36  ;;  %v3087_v61 = vmax.f32 %v9013_v3, 0.0  ;;  %v2956_v29 = vpop.f32.mrb[10].mxu0  ;;  %v3128_v23 = vsel %vm1498_vm4, %v3121_v19, %v3127_v51  ;;  %v3179_v19 = vld [vmem:[#allocation15] sm:$0xff]  ;;  %v8380_v3 = vpack.c.bf16 %v3432_v49, %v3430_v35 }
 0x368   : > { %v3131_v13 = vrot.slane %v3086_v4, 1  ;;  %v9015_v20 = vadd.f32 %v2956_v29, %v944_v56  ;;  %v2958_v25 = vpop.f32.mrb[11].mxu0  ;;  %8345 = vmatprep.subr.bf16.mxu1 %v8344_v54  ;;  %v3168_v59 = vmax.f32 %v3081_v7, %v3128_v23  ;;  %v3431_v56 = vld [vmem:[%s11760_s16 + $0x70] sm:$0xff]  ;;  %v3434_v36 = vld [vmem:[%s11760_s16 + $0x88] sm:$0xff]  ;;  %v3440_v23 = vld [vmem:[%s11760_s16 + $0xb8] sm:$0xff] }
 0x369   : > { %v3133_v32 = vrot.slane %v3087_v61, 1  ;;  %v9017_v40 = vadd.f32 %v2958_v25, %v945_v30  ;;  %8347 = vmatpush1.bf16.msra.mxu1 %v8346_v53  ;;  %v3429_v53 = vld [vmem:[%s11760_s16 + $0x60] sm:$0xff]  ;;  %v3438_v29 = vld [vmem:[%s11760_s16 + $0xa8] sm:$0xff]  ;;  %v3467_v35 = vld [vmem:[%s11760_s16 + $0x190] sm:$0xff] }
 0x36a   : > { %v3132_v37 = vsel %vm1498_vm4, %v3125_v31, %v3131_v13  ;;  %v3089_v2 = vmax.f32 %v9015_v20, 0.0  ;;  %v3425_v31 = vld [vmem:[%s11760_s16 + $0x40] sm:$0xff]  ;;  %v8382_v54 = vpack.c.bf16 %v3431_v56, %v3429_v53  ;;  %v8388_v20 = vpack.c.bf16 %v3440_v23, %v3438_v29  ;;  %v3475_v29 = vld [vmem:[%s11760_s16 + $0x1d0] sm:$0xff] }
 0x36b   : > { %v3170_v44 = vmax.f32 %v3083_v21, %v3132_v37  ;;  %v3090_v48 = vmax.f32 %v9017_v40, 0.0  ;;  %v3134_v47 = vsel %vm1498_vm4, %v3127_v51, %v3133_v32  ;;  %v3421_v21 = vld [vmem:[%s11760_s16 + $0x20] sm:$0xff]  ;;  %v8378_v51 = vpack.c.bf16 %v3427_v34, %v3425_v31  ;;  %v3444_v40 = vld [vmem:[%s11760_s16 + $0xd8] sm:$0xff] }
 0x36c   : > { %v3137_v55 = vrot.slane %v3089_v2, 1  ;;  %v3171_v6 = vmax.f32 %v3084_v22, %v3134_v47  ;;  %v3428_v22 = vld [vmem:[%s11760_s16 + $0x58] sm:$0xff]  ;;  %v8374_v33 = vpack.c.bf16 %v3423_v15, %v3421_v21  ;;  %v3437_v25 = vld [vmem:[%s11760_s16 + $0xa0] sm:$0xff]  ;;  %v3446_v47 = vld [vmem:[%s11760_s16 + $0xe8] sm:$0xff] }
 0x36d   : > { %v3139_v62 = vrot.slane %v3090_v48, 1  ;;  %v8350_v50 = vpack.c.bf16 %v3170_v44, %v3167_v58  ;;  %v8376_v46 = vpack.c.bf16 %v3428_v22, %v3426_v24  ;;  %v3433_v58 = vld [vmem:[%s11760_s16 + $0x80] sm:$0xff]  ;;  %v3463_v24 = vld [vmem:[%s11760_s16 + $0x170] sm:$0xff]  ;;  %v3466_v22 = vld [vmem:[%s11760_s16 + $0x188] sm:$0xff] }
 0x36e   : > { %v3138_v5 = vsel %vm1498_vm4, %v3131_v13, %v3137_v55  ;;  %v3176_v8 = vmax.f32 %v3089_v2, %v3137_v55  ;;  %v8348_v63 = vpack.c.bf16 %v3171_v6, %v3168_v59  ;;  %v3439_v59 = vld [vmem:[%s11760_s16 + $0xb0] sm:$0xff]  ;;  %v3441_v44 = vld [vmem:[%s11760_s16 + $0xc0] sm:$0xff]  ;;  %v3448_v55 = vld [vmem:[%s11760_s16 + $0xf8] sm:$0xff] }
 0x36f   : > { %v3173_v7 = vmax.f32 %v3086_v4, %v3138_v5  ;;  %v3140_v60 = vsel %vm1498_vm4, %v3133_v32, %v3139_v62  ;;  %v3177_v9 = vmax.f32 %v3090_v48, %v3139_v62  ;;  %v3436_v4 = vld [vmem:[%s11760_s16 + $0x98] sm:$0xff]  ;;  %v3442_v32 = vld [vmem:[%s11760_s16 + $0xc8] sm:$0xff]  ;;  %v8390_v37 = vpack.c.bf16 %v3439_v59, %v3437_v25  ;;  %v3443_v48 = vld [vmem:[%s11760_s16 + $0xd0] sm:$0xff] }
 0x370   : > { %v3174_v10 = vmax.f32 %v3087_v61, %v3140_v60  ;;  %8349 = vmatprep.subr.bf16.mxu1 %v8348_v63  ;;  %v8384_v30 = vpack.c.bf16 %v3436_v4, %v3434_v36  ;;  %v3435_v61 = vld [vmem:[%s11760_s16 + $0x90] sm:$0xff]  ;;  %v8392_v2 = vpack.c.bf16 %v3444_v40, %v3442_v32  ;;  %v8394_v6 = vpack.c.bf16 %v3443_v48, %v3441_v44  ;;  %v3452_v63 = vld [vmem:[%s11760_s16 + $0x118] sm:$0xff]  ;;  %v3461_v15 = vld [vmem:[%s11760_s16 + $0x160] sm:$0xff] }
 0x371   : > { %v8355_v12 = vpack.c.bf16 %v3176_v8, %v3173_v7  ;;  %8351 = vmatpush1.bf16.msra.mxu1 %v8350_v50  ;;  %v8386_v13 = vpack.c.bf16 %v3435_v61, %v3433_v58  ;;  %v8396_v62 = vpack.c.bf16 %v3448_v55, %v3446_v47  ;;  %v3445_v50 = vld [vmem:[%s11760_s16 + $0xe0] sm:$0xff]  ;;  %v3447_v5 = vld [vmem:[%s11760_s16 + $0xf0] sm:$0xff]  ;;  %v3450_v8 = vld [vmem:[%s11760_s16 + $0x108] sm:$0xff] }
 0x372   : > { %v8352_v17 = vpack.c.bf16 %v3177_v9, %v3174_v10  ;;  %v8398_v7 = vpack.c.bf16 %v3447_v5, %v3445_v50  ;;  %v8400_v60 = vpack.c.bf16 %v3452_v63, %v3450_v8  ;;  %v3449_v9 = vld [vmem:[%s11760_s16 + $0x100] sm:$0xff]  ;;  %v3451_v10 = vld [vmem:[%s11760_s16 + $0x110] sm:$0xff]  ;;  %v3484_v44 = vld [vmem:[%s11760_s16 + $0x218] sm:$0xff] }
 0x373   : > { %v3465_v34 = vld [vmem:[%s11760_s16 + $0x180] sm:$0xff]  ;;  %v3471_v36 = vld [vmem:[%s11760_s16 + $0x1b0] sm:$0xff] }
 0x374   : > { %8354 = vmatprep.subr.msk.bf16.mxu1 %vm10899_vm6, %v8352_v17  ;;  %v8402_v17 = vpack.c.bf16 %v3451_v10, %v3449_v9  ;;  %v8418_v49 = vpack.c.bf16 %v3467_v35, %v3465_v34  ;;  %v3469_v56 = vld [vmem:[%s11760_s16 + $0x1a0] sm:$0xff]  ;;  %v3479_v32 = vld [vmem:[%s11760_s16 + $0x1f0] sm:$0xff] }
 0x375   : > { %8357 = vmatpush1.bf16.msk.msra.mxu1 %vm10899_vm6, %v8355_v12  ;;  %v3454_v12 = vld [vmem:[%s11760_s16 + $0x128] sm:$0xff]  ;;  %v8422_v4 = vpack.c.bf16 %v3471_v36, %v3469_v56  ;;  %v3473_v61 = vld [vmem:[%s11760_s16 + $0x1c0] sm:$0xff] }
 0x376   : > { %8358 = vmatprep.subr.bf16.mxu1 %v9858_v57  ;;  %v8426_v23 = vpack.c.bf16 %v3475_v29, %v3473_v61  ;;  %v3477_v59 = vld [vmem:[%s11760_s16 + $0x1e0] sm:$0xff]  ;;  %v3491_v61 = vld [vmem:[%s11760_s16 + $0x250] sm:$0xff] }
 0x377   : > { %v8430_v40 = vpack.c.bf16 %v3479_v32, %v3477_v59 }
 0x378   : > { %7307 = vmatmul.mubr.msk.f32.vlgmr.msra.gmra.mrb[12].mxu1 %vm3182_vm7, %v3179_v19 }
 0x379   : > { %8360 = vmatpush3.bf16.msra.mxu1 %v8359_v42  ;;  %3272 = vmatprep.mubr.f32.mxu1 %v9854_v0  ;;  %v8368_v42 = vpack.c.bf16 %v3420_v28, %v3418_v16  ;;  %v3458_v16 = vld [vmem:[%s11760_s16 + $0x148] sm:$0xff]  ;;  %v3460_v28 = vld [vmem:[%s11760_s16 + $0x158] sm:$0xff] }
 0x37a   : > { %8361 = vmatprep.subr.bf16.mxu1 %v9858_v57 }
 0x37c   : > { %7308 = vmatmul.mubr.msk.f32.gmra.mrb[14].mxu1 %vm3182_vm7, %v3180_v1 }
 0x37d   : > { %8363 = vmatpush3.bf16.msra.mxu1 %v8362_v27  ;;  %3278 = vmatprep.mubr.f32.mxu1 %v9854_v0  ;;  %v8372_v27 = vpack.c.bf16 %v3424_v26, %v3422_v39  ;;  %v3459_v39 = vld [vmem:[%s11760_s16 + $0x150] sm:$0xff]  ;;  %v3462_v26 = vld [vmem:[%s11760_s16 + $0x168] sm:$0xff] }
 0x37e   : > { %8364 = vmatprep.subr.bf16.mxu1 %v9858_v57 }
 0x380   : > { %7309 = vmatmul.mubr.msk.f32.gmra.mrb[16].mxu1 %vm3182_vm7, %v3181_v18 }
 0x381   : > { %8367 = vmatpush3.bf16.msk.msra.mxu1 %vm10899_vm6, %v8365_v41  ;;  %7827 = vmatprep.mubr.msk.f32.mxu1 %vm9859_vm8, %v9854_v0  ;;  %v8370_v41 = vpack.c.bf16 %v3419_v38, %v3417_v14  ;;  %v3457_v38 = vld [vmem:[%s11760_s16 + $0x140] sm:$0xff] }
 0x382   : > { %8369 = vmatprep.subr.bf16.mxu1 %v8368_v42  ;;  %v8408_v42 = vpack.c.bf16 %v3460_v28, %v3458_v16  ;;  %v3481_v16 = vld [vmem:[%s11760_s16 + $0x200] sm:$0xff]  ;;  %v3483_v28 = vld [vmem:[%s11760_s16 + $0x210] sm:$0xff] }
 0x384   : > { %7828 = vmatmul.mubr.msk.f32.vlgmr.msra.gmra.mrb[18].mxu1 %vm3182_vm7, %v3179_v19  ;;  %v8404_v19 = vpack.c.bf16 %v3456_v11, %v3454_v12 }
 0x385   : > { %7830 = vmatprep.mubr.msk.f32.mxu1 %vm9859_vm8, %v9854_v0  ;;  %8371 = vmatpush1.bf16.msra.mxu1 %v8370_v41  ;;  %v3464_v41 = vld [vmem:[%s11760_s16 + $0x178] sm:$0xff] }
 0x386   : > { %8373 = vmatprep.subr.bf16.mxu1 %v8372_v27  ;;  %v8410_v27 = vpack.c.bf16 %v3459_v39, %v3457_v38  ;;  %v8412_v21 = vpack.c.bf16 %v3464_v41, %v3462_v26  ;;  %v3486_v26 = vld [vmem:[%s11760_s16 + $0x228] sm:$0xff]  ;;  %v3488_v41 = vld [vmem:[%s11760_s16 + $0x238] sm:$0xff] }
 0x388   : > { %7831 = vmatmul.mubr.msk.f32.gmra.mrb[20].mxu1 %vm3182_vm7, %v3180_v1  ;;  %v3453_v1 = vld [vmem:[%s11760_s16 + $0x120] sm:$0xff] }
 0x389   : > { %7833 = vmatprep.mubr.msk.f32.mxu1 %vm9859_vm8, %v9854_v0  ;;  %8375 = vmatpush1.bf16.msra.mxu1 %v8374_v33  ;;  %v3468_v33 = vld [vmem:[%s11760_s16 + $0x198] sm:$0xff] }
 0x38a   : > { %8377 = vmatprep.subr.bf16.mxu1 %v8376_v46  ;;  %v8414_v46 = vpack.c.bf16 %v3463_v24, %v3461_v15  ;;  %v8416_v31 = vpack.c.bf16 %v3468_v33, %v3466_v22  ;;  %v8434_v24 = vpack.c.bf16 %v3483_v28, %v3481_v16  ;;  %v8436_v33 = vpack.c.bf16 %v3488_v41, %v3486_v26  ;;  %v3695_v16 = vld [vmem:[#allocation7] sm:$0xff]  ;;  %v3697_v28 = vld [vmem:[#allocation7 + $0x10] sm:$0xff] }
 0x38b   : > { %v8458_v41 = vpack.c.bf16 %v3697_v28, %v3695_v16  ;;  %v3731_v16 = vld [vmem:[#allocation7 + $0x120] sm:$0xff]  ;;  %v3733_v28 = vld [vmem:[#allocation7 + $0x130] sm:$0xff] }
 0x38c   : > { %7834 = vmatmul.mubr.msk.f32.gmra.mrb[22].mxu1 %vm3182_vm7, %v3181_v18  ;;  %v3455_v18 = vld [vmem:[%s11760_s16 + $0x130] sm:$0xff] }
 0x38d   : > { %8379 = vmatpush1.bf16.msra.mxu1 %v8378_v51  ;;  %v8406_v14 = vpack.c.bf16 %v3455_v18, %v3453_v1  ;;  %v3470_v51 = vld [vmem:[%s11760_s16 + $0x1a8] sm:$0xff] }
 0x38e   : > { %8381 = vmatprep.subr.bf16.mxu1 %v8380_v3  ;;  %v3472_v3 = vld [vmem:[%s11760_s16 + $0x1b8] sm:$0xff] }
 0x38f   : > { %v8420_v53 = vpack.c.bf16 %v3472_v3, %v3470_v51  ;;  %v3490_v3 = vld [vmem:[%s11760_s16 + $0x248] sm:$0xff] }
 0x391   : > { %8383 = vmatpush1.bf16.msra.mxu1 %v8382_v54  ;;  %v3474_v54 = vld [vmem:[%s11760_s16 + $0x1c8] sm:$0xff] }
 0x392   : > { %8385 = vmatprep.subr.bf16.mxu1 %v8384_v30  ;;  %v3476_v30 = vld [vmem:[%s11760_s16 + $0x1d8] sm:$0xff] }
 0x393   : > { %v8424_v58 = vpack.c.bf16 %v3476_v30, %v3474_v54 }
 0x395   : > { %8387 = vmatpush1.bf16.msra.mxu1 %v8386_v13  ;;  %v3478_v13 = vld [vmem:[%s11760_s16 + $0x1e8] sm:$0xff] }
 0x396   : > { %8389 = vmatprep.subr.bf16.mxu1 %v8388_v20  ;;  %v3480_v20 = vld [vmem:[%s11760_s16 + $0x1f8] sm:$0xff] }
 0x397   : > { %v8428_v25 = vpack.c.bf16 %v3480_v20, %v3478_v13  ;;  %v3494_v13 = vld [vmem:[%s11760_s16 + $0x268] sm:$0xff]  ;;  %v3496_v20 = vld [vmem:[%s11760_s16 + $0x278] sm:$0xff] }
 0x399   : > { %8391 = vmatpush1.bf16.msra.mxu1 %v8390_v37 }
 0x39a   : > { %8393 = vmatprep.subr.bf16.mxu1 %v8392_v2  ;;  %v3482_v2 = vld [vmem:[%s11760_s16 + $0x208] sm:$0xff] }
 0x39b   : > { %v8432_v47 = vpack.c.bf16 %v3484_v44, %v3482_v2  ;;  %v3493_v2 = vld [vmem:[%s11760_s16 + $0x260] sm:$0xff]  ;;  %v3495_v44 = vld [vmem:[%s11760_s16 + $0x270] sm:$0xff] }
 0x39d   : > { %8395 = vmatpush1.bf16.msra.mxu1 %v8394_v6 }
 0x39e   : > { %8397 = vmatprep.subr.bf16.mxu1 %v8396_v62 }
 0x3a1   : > { %8399 = vmatpush1.bf16.msra.mxu1 %v8398_v7 }
 0x3a2   : > { %8401 = vmatprep.subr.bf16.mxu1 %v8400_v60 }
 0x3a5   : > { %8403 = vmatpush1.bf16.msra.mxu1 %v8402_v17 }
 0x3a6   : > { %8405 = vmatprep.subr.bf16.mxu1 %v8404_v19 }
 0x3a9   : > { %8407 = vmatpush1.bf16.msra.mxu1 %v8406_v14 }
 0x3aa   : > { %8409 = vmatprep.subr.bf16.mxu1 %v8408_v42 }
 0x3ad   : > { %8411 = vmatpush1.bf16.msra.mxu1 %v8410_v27 }
 0x3ae   : > { %8413 = vmatprep.subr.bf16.mxu1 %v8412_v21 }
 0x3b1   : > { %8415 = vmatpush1.bf16.msra.mxu1 %v8414_v46  ;;  %v3485_v46 = vld [vmem:[%s11760_s16 + $0x220] sm:$0xff] }
 0x3b2   : > { %8417 = vmatprep.subr.bf16.mxu1 %v8416_v31  ;;  %v3487_v31 = vld [vmem:[%s11760_s16 + $0x230] sm:$0xff] }
 0x3b5   : > { %8419 = vmatpush1.bf16.msra.mxu1 %v8418_v49 }
 0x3b6   : > { %8421 = vmatprep.subr.bf16.mxu1 %v8420_v53  ;;  %v3492_v53 = vld [vmem:[%s11760_s16 + $0x258] sm:$0xff] }
 0x3b7   : > { %v8440_v30 = vpack.c.bf16 %v3492_v53, %v3490_v3 }
 0x3b9   : > { %8423 = vmatpush1.bf16.msra.mxu1 %v8422_v4  ;;  %v8438_v4 = vpack.c.bf16 %v3487_v31, %v3485_v46 }
 0x3ba   : > { %8425 = vmatprep.subr.bf16.mxu1 %v8424_v58  ;;  %v3489_v58 = vld [vmem:[%s11760_s16 + $0x240] sm:$0xff] }
 0x3bb   : > { %v8442_v32 = vpack.c.bf16 %v3491_v61, %v3489_v58  ;;  %v3711_v58 = vld [vmem:[#allocation7 + $0x80] sm:$0xff]  ;;  %v3713_v61 = vld [vmem:[#allocation7 + $0x90] sm:$0xff] }
 0x3bd   : > { %8427 = vmatpush1.bf16.msra.mxu1 %v8426_v23 }
 0x3be   : > { %8429 = vmatprep.subr.bf16.mxu1 %v8428_v25 }
 0x3c1   : > { %8431 = vmatpush1.bf16.msra.mxu1 %v8430_v40 }
 0x3c2   : > { %8433 = vmatprep.subr.bf16.mxu1 %v8432_v47  ;;  %v3500_v47 = vld [vmem:[%s11760_s16 + $0x298] sm:$0xff] }
 0x44b   : > { %v3268_v37 = vpop.f32.mrb[12].mxu1 }
 0x44c   : > { %v3270_v48 = vpop.f32.mrb[13].mxu1 }
 0x44d   : > { %v9423_v55 = vpack.i.bf16 %v3268_v37, %v3270_v48 }
 0x44f   : > { %9424 = vrot.lane.b32.xlu0 %v9423_v55, %s9860_s3  ;;  %v3274_v6 = vpop.f32.mrb[14].mxu1  ;;  %v8446_v55 = vpack.c.bf16 %v3495_v44, %v3493_v2  ;;  %v3719_v2 = vld [vmem:[#allocation7 + $0xc0] sm:$0xff]  ;;  %v3721_v44 = vld [vmem:[#allocation7 + $0xd0] sm:$0xff] }
 0x450   : > { %v3276_v62 = vpop.f32.mrb[15].mxu1 }
 0x451   : > { %v9428_v50 = vpack.i.bf16 %v3274_v6, %v3276_v62 }
 0x453   : > { %9429 = vrot.lane.b32.xlu0 %v9428_v50, %s9860_s3  ;;  %v11135_v5 = vpop.f32.mrb[16].mxu1  ;;  %v3499_v50 = vld [vmem:[%s11760_s16 + $0x290] sm:$0xff] }
 0x454   : > { %v11137_v8 = vpop.f32.mrb[17].mxu1 }
 0x455   : > { %v9433_v63 = vpack.i.bf16 %v11135_v5, %v11137_v8 }
 0x457   : > { %9434 = vrot.lane.b32.xlu0 %v9433_v63, %s9860_s3  ;;  %v11142_v7 = vpop.f32.mrb[18].mxu1 }
 0x458   : > { %3378 = vrot.lane.b32.xlu1 %v11142_v7, %s9860_s3  ;;  %v7829_v60 = vpop.f32.mrb[19].mxu1 }
 0x45b   : > { %v11146_v9 = vpop.f32.mrb[20].mxu1 }
 0x45c   : > { %3384 = vrot.lane.b32.xlu1 %v11146_v9, %s9860_s3  ;;  %v7832_v10 = vpop.f32.mrb[21].mxu1 }
 0x45d   : > { %v3501_v10 = vld [vmem:[%s11760_s16 + $0x2a0] sm:$0xff] }
 0x45f   : > { %v11150_v12 = vpop.f32.mrb[22].mxu1 }
 0x460   : > { %3390 = vrot.lane.b32.xlu1 %v11150_v12, %s9860_s3  ;;  %v7835_v11 = vpop.f32.mrb[23].mxu1 }
 0x461   : > { %v3503_v11 = vld [vmem:[%s11760_s16 + $0x2b0] sm:$0xff] }
 0x4c1   : > { %v9425_v17 = vpop.permute.xlu0 %9424 }
 0x4c2   : > { %v9427_v1 = vunpack.i.h.bf16 %v9425_v17  ;;  %v9426_v18 = vunpack.i.l.bf16 %v9425_v17  ;;  %v8454_v17 = vpack.c.bf16 %v3503_v11, %v3501_v10  ;;  %v3727_v10 = vld [vmem:[#allocation7 + $0x100] sm:$0xff]  ;;  %v3729_v11 = vld [vmem:[#allocation7 + $0x110] sm:$0xff] }
 0x4c4   : > { %v3393_v14 = vsel %vm3392_vm9, %v9427_v1, %v9426_v18  ;;  %v3696_v1 = vld [vmem:[#allocation7 + $0x8] sm:$0xff] }
 0x4c5   : > { %v9430_v19 = vpop.permute.xlu0 %9429  ;;  %v3408_v22 = vmax.f32 %v3268_v37, %v3393_v14  ;;  %v8444_v37 = vpack.c.bf16 %v3496_v20, %v3494_v13  ;;  %v3700_v14 = vld [vmem:[#allocation7 + $0x28] sm:$0xff]  ;;  %v3718_v13 = vld [vmem:[#allocation7 + $0xb8] sm:$0xff]  ;;  %v8474_v20 = vpack.c.bf16 %v3713_v61, %v3711_v58 }
 0x4c6   : > { %v9432_v42 = vunpack.i.h.bf16 %v9430_v19  ;;  %v9431_v38 = vunpack.i.l.bf16 %v9430_v19  ;;  %v3506_v19 = vld [vmem:[%s11760_s16 + $0x2c8] sm:$0xff]  ;;  %v3856_v58 = vld [vmem:[#allocation7 + $0x1e8] sm:$0xff] }
 0x4c8   : > { %v3395_v51 = vsel %vm3392_vm9, %v9432_v42, %v9431_v38  ;;  %v3702_v42 = vld [vmem:[#allocation7 + $0x38] sm:$0xff] }
 0x4c9   : > { %v9435_v27 = vpop.permute.xlu0 %9434  ;;  %v3411_v54 = vmax.f32 %v3274_v6, %v3395_v51  ;;  %v3710_v51 = vld [vmem:[#allocation7 + $0x78] sm:$0xff] }
 0x4ca   : > { %v11161_v39 = vpop.permute.xlu1 %3378  ;;  %v9437_v34 = vunpack.i.h.bf16 %v9435_v27  ;;  %v9436_v35 = vunpack.i.l.bf16 %v9435_v27 }
 0x4cb   : > { %v3394_v21 = vsel %vm3392_vm9, %v9426_v18, %v11161_v39  ;;  %v3698_v18 = vld [vmem:[#allocation7 + $0x18] sm:$0xff]  ;;  %v3410_v27 = vmax.f32 %v11142_v7, %v11161_v39  ;;  %v3705_v7 = vld [vmem:[#allocation7 + $0x50] sm:$0xff]  ;;  %v3708_v39 = vld [vmem:[#allocation7 + $0x68] sm:$0xff] }
 0x4cc   : > { %v3409_v15 = vmax.f32 %v3270_v48, %v3394_v21  ;;  %v3397_v23 = vsel %vm3392_vm9, %v9437_v34, %v9436_v35  ;;  %v3498_v48 = vld [vmem:[%s11760_s16 + $0x288] sm:$0xff]  ;;  %v8456_v26 = vpack.c.bf16 %v3698_v18, %v3696_v1  ;;  %v8460_v21 = vpack.c.bf16 %v3702_v42, %v3700_v14  ;;  %v3736_v42 = vld [vmem:[#allocation7 + $0x148] sm:$0xff] }
 0x4cd   : > { %v3414_v40 = vmax.f32 %v11135_v5, %v3397_v23  ;;  %v8448_v6 = vpack.c.bf16 %v3500_v47, %v3498_v48  ;;  %v3502_v5 = vld [vmem:[%s11760_s16 + $0x2a8] sm:$0xff]  ;;  %v3716_v23 = vld [vmem:[#allocation7 + $0xa8] sm:$0xff]  ;;  %v8490_v1 = vpack.c.bf16 %v3729_v11, %v3727_v10  ;;  %v8494_v14 = vpack.c.bf16 %v3733_v28, %v3731_v16 }
 0x4ce   : > { %3581 = vmatprep.mubr.f32.mxu1 %v3409_v15  ;;  %v11177_v49 = vpop.permute.xlu1 %3384  ;;  %v3699_v15 = vld [vmem:[#allocation7 + $0x20] sm:$0xff]  ;;  %v3724_v48 = vld [vmem:[#allocation7 + $0xe8] sm:$0xff]  ;;  %v3726_v47 = vld [vmem:[#allocation7 + $0xf8] sm:$0xff] }
 0x4cf   : > { %v3396_v56 = vsel %vm3392_vm9, %v9431_v38, %v11177_v49  ;;  %3582 = vmatmul.mubr.f32.vlgmr.msra.gmra.mrb[24].mxu1 %v3408_v22  ;;  %v3505_v38 = vld [vmem:[%s11760_s16 + $0x2c0] sm:$0xff]  ;;  %v3413_v31 = vmax.f32 %v11146_v9, %v11177_v49  ;;  %v3714_v49 = vld [vmem:[#allocation7 + $0x98] sm:$0xff] }
 0x4d0   : > { %v3412_v36 = vmax.f32 %v3276_v62, %v3396_v56  ;;  %8435 = vmatpush1.bf16.msra.mxu1 %v8434_v24  ;;  %v3497_v62 = vld [vmem:[%s11760_s16 + $0x280] sm:$0xff]  ;;  %v8468_v56 = vpack.c.bf16 %v3710_v51, %v3708_v39 }
 0x4d1   : > { %8437 = vmatprep.subr.bf16.mxu1 %v8436_v33  ;;  %v8450_v63 = vpack.c.bf16 %v3499_v50, %v3497_v62  ;;  %v3701_v24 = vld [vmem:[#allocation7 + $0x30] sm:$0xff]  ;;  %v3704_v22 = vld [vmem:[#allocation7 + $0x48] sm:$0xff]  ;;  %v3706_v33 = vld [vmem:[#allocation7 + $0x58] sm:$0xff] }
 0x4d2   : > { %3587 = vmatprep.mubr.f32.mxu1 %v3412_v36  ;;  %v11194_v29 = vpop.permute.xlu1 %3390  ;;  %v8462_v46 = vpack.c.bf16 %v3701_v24, %v3699_v15  ;;  %v8464_v34 = vpack.c.bf16 %v3706_v33, %v3704_v22  ;;  %v3707_v36 = vld [vmem:[#allocation7 + $0x60] sm:$0xff]  ;;  %v3712_v9 = vld [vmem:[#allocation7 + $0x88] sm:$0xff]  ;;  %v3725_v50 = vld [vmem:[#allocation7 + $0xf0] sm:$0xff] }
 0x4d3   : > { %v3398_v25 = vsel %vm3392_vm9, %v9436_v35, %v11194_v29  ;;  %3588 = vmatmul.mubr.f32.gmra.mrb[26].mxu1 %v3411_v54  ;;  %v3703_v35 = vld [vmem:[#allocation7 + $0x40] sm:$0xff]  ;;  %v3416_v53 = vmax.f32 %v11150_v12, %v11194_v29  ;;  %v8476_v12 = vpack.c.bf16 %v3718_v13, %v3716_v23  ;;  %v3842_v24 = vld [vmem:[#allocation7 + $0x178] sm:$0xff]  ;;  %v3844_v22 = vld [vmem:[#allocation7 + $0x188] sm:$0xff] }
 0x4d4   : > { %v3415_v59 = vmax.f32 %v11137_v8, %v3398_v25  ;;  %8439 = vmatpush1.bf16.msra.mxu1 %v8438_v4  ;;  %v3504_v8 = vld [vmem:[%s11760_s16 + $0x2b8] sm:$0xff]  ;;  %v8466_v3 = vpack.c.bf16 %v3705_v7, %v3703_v35  ;;  %v3709_v4 = vld [vmem:[#allocation7 + $0x70] sm:$0xff]  ;;  %v3846_v35 = vld [vmem:[#allocation7 + $0x198] sm:$0xff] }
 0x4d5   : > { %8441 = vmatprep.subr.bf16.mxu1 %v8440_v30  ;;  %v8452_v60 = vpack.c.bf16 %v3504_v8, %v3502_v5  ;;  %v8470_v54 = vpack.c.bf16 %v3709_v4, %v3707_v36  ;;  %v8472_v30 = vpack.c.bf16 %v3714_v49, %v3712_v9  ;;  %v3715_v29 = vld [vmem:[#allocation7 + $0xa0] sm:$0xff]  ;;  %v3717_v25 = vld [vmem:[#allocation7 + $0xb0] sm:$0xff]  ;;  %v3728_v5 = vld [vmem:[#allocation7 + $0x108] sm:$0xff] }
 0x4d6   : > { %3593 = vmatprep.mubr.f32.mxu1 %v3415_v59  ;;  %v3720_v59 = vld [vmem:[#allocation7 + $0xc8] sm:$0xff]  ;;  %v3723_v62 = vld [vmem:[#allocation7 + $0xe0] sm:$0xff]  ;;  %v3730_v8 = vld [vmem:[#allocation7 + $0x118] sm:$0xff] }
 0x4d7   : > { %3594 = vmatmul.mubr.f32.gmra.mrb[28].mxu1 %v3414_v40  ;;  %v8478_v40 = vpack.c.bf16 %v3717_v25, %v3715_v29  ;;  %v3839_v15 = vld [vmem:[#allocation7 + $0x160] sm:$0xff]  ;;  %v3848_v7 = vld [vmem:[#allocation7 + $0x1a8] sm:$0xff]  ;;  %v3849_v49 = vld [vmem:[#allocation7 + $0x1b0] sm:$0xff] }
 0x4d8   : > { %8443 = vmatpush1.bf16.msra.mxu1 %v8442_v32  ;;  %3664 = vmatprep.mubr.f32.mxu1 %v9854_v0  ;;  %v3722_v32 = vld [vmem:[#allocation7 + $0xd8] sm:$0xff]  ;;  %v8504_v51 = vpack.c.bf16 %v3848_v7, %v3846_v35  ;;  %v3852_v36 = vld [vmem:[#allocation7 + $0x1c8] sm:$0xff]  ;;  %v3853_v13 = vld [vmem:[#allocation7 + $0x1d0] sm:$0xff] }
 0x4d9   : > { %8445 = vmatprep.subr.bf16.mxu1 %v8444_v37  ;;  %v8480_v37 = vpack.c.bf16 %v3722_v32, %v3720_v59  ;;  %v3860_v29 = vld [vmem:[#allocation7 + $0x208] sm:$0xff]  ;;  %v3857_v32 = vld [vmem:[#allocation7 + $0x1f0] sm:$0xff] }
 0x4da   : > { %v3872_v10 = vld [vmem:[#allocation7 + $0x268] sm:$0xff] }
 0x4db   : > { %v3876_v16 = vld [vmem:[#allocation7 + $0x288] sm:$0xff] }
 0x4dc   : > { %8447 = vmatpush1.bf16.msra.mxu1 %v8446_v55  ;;  %v8482_v55 = vpack.c.bf16 %v3721_v44, %v3719_v2  ;;  %v3864_v2 = vld [vmem:[#allocation7 + $0x228] sm:$0xff] }
 0x4dd   : > { %8449 = vmatprep.subr.bf16.mxu1 %v8448_v6  ;;  %v8484_v6 = vpack.c.bf16 %v3726_v47, %v3724_v48  ;;  %v3861_v47 = vld [vmem:[#allocation7 + $0x210] sm:$0xff] }
 0x4e0   : > { %8451 = vmatpush1.bf16.msra.mxu1 %v8450_v63  ;;  %v8486_v63 = vpack.c.bf16 %v3725_v50, %v3723_v62  ;;  %v3868_v62 = vld [vmem:[#allocation7 + $0x248] sm:$0xff] }
 0x4e1   : > { %8453 = vmatprep.subr.bf16.mxu1 %v8452_v60  ;;  %v8488_v60 = vpack.c.bf16 %v3730_v8, %v3728_v5  ;;  %v3865_v8 = vld [vmem:[#allocation7 + $0x230] sm:$0xff] }
 0x4e4   : > { %8455 = vmatpush1.bf16.msra.mxu1 %v8454_v17  ;;  %v3732_v17 = vld [vmem:[#allocation7 + $0x128] sm:$0xff] }
 0x4e5   : > { %3624 = vmatprep.subr.mxu1 %v3506_v19  ;;  %v3734_v19 = vld [vmem:[#allocation7 + $0x138] sm:$0xff] }
 0x4e6   : > { %v8492_v18 = vpack.c.bf16 %v3734_v19, %v3732_v17  ;;  %v3869_v19 = vld [vmem:[#allocation7 + $0x250] sm:$0xff] }
 0x4e8   : > { %3625 = vmatpush1.msra.mxu1 %v3505_v38  ;;  %v3735_v38 = vld [vmem:[#allocation7 + $0x140] sm:$0xff] }
 0x4e9   : > { %7314 = vmatmul.mubr.msk.f32.vlgmr.msra.gmra.mrb[24].mxu1 %vm3507_vm10, %v3410_v27  ;;  %8457 = vmatprep.subr.bf16.mxu1 %v8456_v26  ;;  %v3838_v26 = vld [vmem:[#allocation7 + $0x158] sm:$0xff]  ;;  %v3837_v27 = vld [vmem:[#allocation7 + $0x150] sm:$0xff] }
 0x4ea   : > { %3670 = vmatprep.mubr.f32.mxu1 %v9854_v0  ;;  %8459 = vmatpush1.bf16.msra.mxu1 %v8458_v41  ;;  %v3840_v41 = vld [vmem:[#allocation7 + $0x168] sm:$0xff]  ;;  %v8498_v33 = vpack.c.bf16 %v3839_v15, %v3837_v27  ;;  %v3877_v15 = vld [vmem:[#allocation7 + $0x290] sm:$0xff] }
 0x4eb   : > { %8461 = vmatprep.subr.bf16.mxu1 %v8460_v21  ;;  %v8496_v21 = vpack.c.bf16 %v3840_v41, %v3838_v26  ;;  %v3878_v41 = vld [vmem:[#allocation7 + $0x298] sm:$0xff]  ;;  %v3997_v27 = vld [vmem:[#allocation7 + $0x2a8] sm:$0xff] }
 0x4ed   : > { %7315 = vmatmul.mubr.msk.f32.gmra.mrb[26].mxu1 %vm3507_vm10, %v3413_v31  ;;  %v3841_v31 = vld [vmem:[#allocation7 + $0x170] sm:$0xff]  ;;  %8497 = vmatprep.subr.bf16.mxu0 %v8496_v21  ;;  %v3999_v21 = vld [vmem:[#allocation7 + $0x2b8] sm:$0xff] }
 0x4ee   : > { %3676 = vmatprep.mubr.f32.mxu1 %v9854_v0  ;;  %8463 = vmatpush1.bf16.msra.mxu1 %v8462_v46  ;;  %v8500_v46 = vpack.c.bf16 %v3844_v22, %v3842_v24  ;;  %v8536_v24 = vpack.c.bf16 %v3999_v21, %v3997_v27  ;;  %v4013_v27 = vld [vmem:[#allocation7 + $0x328] sm:$0xff]  ;;  %v4015_v21 = vld [vmem:[#allocation7 + $0x338] sm:$0xff] }
 0x4ef   : > { %8465 = vmatprep.subr.bf16.mxu1 %v8464_v34  ;;  %v3843_v34 = vld [vmem:[#allocation7 + $0x180] sm:$0xff]  ;;  %8499 = vmatpush1.bf16.msra.mxu0 %v8498_v33 }
 0x4f0   : > { %v8502_v39 = vpack.c.bf16 %v3843_v34, %v3841_v31  ;;  %8501 = vmatprep.subr.bf16.mxu0 %v8500_v46 }
 0x4f1   : > { %7316 = vmatmul.mubr.msk.f32.gmra.mrb[28].mxu1 %vm3507_vm10, %v3416_v53  ;;  %v3847_v53 = vld [vmem:[#allocation7 + $0x1a0] sm:$0xff] }
 0x4f2   : > { %8467 = vmatpush1.bf16.msra.mxu1 %v8466_v3  ;;  %v3845_v3 = vld [vmem:[#allocation7 + $0x190] sm:$0xff] }
 0x4f3   : > { %8469 = vmatprep.subr.bf16.mxu1 %v8468_v56  ;;  %v3850_v56 = vld [vmem:[#allocation7 + $0x1b8] sm:$0xff]  ;;  %8503 = vmatpush1.bf16.msra.mxu0 %v8502_v39  ;;  %v8506_v4 = vpack.c.bf16 %v3847_v53, %v3845_v3 }
 0x4f4   : > { %8505 = vmatprep.subr.bf16.mxu0 %v8504_v51  ;;  %v8508_v9 = vpack.c.bf16 %v3852_v36, %v3850_v56 }
 0x4f6   : > { %8471 = vmatpush1.bf16.msra.mxu1 %v8470_v54  ;;  %v3851_v54 = vld [vmem:[#allocation7 + $0x1c0] sm:$0xff] }
 0x4f7   : > { %8473 = vmatprep.subr.bf16.mxu1 %v8472_v30  ;;  %v3854_v30 = vld [vmem:[#allocation7 + $0x1d8] sm:$0xff]  ;;  %8507 = vmatpush1.bf16.msra.mxu0 %v8506_v4  ;;  %v8510_v61 = vpack.c.bf16 %v3851_v54, %v3849_v49 }
 0x4f8   : > { %8509 = vmatprep.subr.bf16.mxu0 %v8508_v9  ;;  %v8512_v23 = vpack.c.bf16 %v3856_v58, %v3854_v30 }
 0x4fa   : > { %8475 = vmatpush1.bf16.msra.mxu1 %v8474_v20  ;;  %v3855_v20 = vld [vmem:[#allocation7 + $0x1e0] sm:$0xff] }
 0x4fb   : > { %8477 = vmatprep.subr.bf16.mxu1 %v8476_v12  ;;  %v3858_v12 = vld [vmem:[#allocation7 + $0x1f8] sm:$0xff]  ;;  %8511 = vmatpush1.bf16.msra.mxu0 %v8510_v61  ;;  %v8514_v25 = vpack.c.bf16 %v3855_v20, %v3853_v13 }
 0x4fc   : > { %8513 = vmatprep.subr.bf16.mxu0 %v8512_v23  ;;  %v8516_v59 = vpack.c.bf16 %v3860_v29, %v3858_v12 }
 0x4fe   : > { %8479 = vmatpush1.bf16.msra.mxu1 %v8478_v40  ;;  %v3859_v40 = vld [vmem:[#allocation7 + $0x200] sm:$0xff] }
 0x4ff   : > { %8481 = vmatprep.subr.bf16.mxu1 %v8480_v37  ;;  %v3862_v37 = vld [vmem:[#allocation7 + $0x218] sm:$0xff]  ;;  %8515 = vmatpush1.bf16.msra.mxu0 %v8514_v25  ;;  %v8518_v44 = vpack.c.bf16 %v3859_v40, %v3857_v32  ;;  %v3998_v32 = vld [vmem:[#allocation7 + $0x2b0] sm:$0xff]  ;;  %v4001_v40 = vld [vmem:[#allocation7 + $0x2c8] sm:$0xff] }
 0x500   : > { %8517 = vmatprep.subr.bf16.mxu0 %v8516_v59  ;;  %v8520_v48 = vpack.c.bf16 %v3864_v2, %v3862_v37  ;;  %v3996_v59 = vld [vmem:[#allocation7 + $0x2a0] sm:$0xff]  ;;  %v4003_v37 = vld [vmem:[#allocation7 + $0x2d8] sm:$0xff] }
 0x502   : > { %8483 = vmatpush1.bf16.msra.mxu1 %v8482_v55  ;;  %v3863_v55 = vld [vmem:[#allocation7 + $0x220] sm:$0xff] }
 0x503   : > { %8485 = vmatprep.subr.bf16.mxu1 %v8484_v6  ;;  %v3866_v6 = vld [vmem:[#allocation7 + $0x238] sm:$0xff]  ;;  %8519 = vmatpush1.bf16.msra.mxu0 %v8518_v44  ;;  %v8522_v50 = vpack.c.bf16 %v3863_v55, %v3861_v47  ;;  %v8538_v44 = vpack.c.bf16 %v3998_v32, %v3996_v59  ;;  %v8540_v47 = vpack.c.bf16 %v4003_v37, %v4001_v40  ;;  %v4000_v55 = vld [vmem:[#allocation7 + $0x2c0] sm:$0xff]  ;;  %v4022_v59 = vld [vmem:[#allocation7 + $0x370] sm:$0xff] }
 0x504   : > { %8521 = vmatprep.subr.bf16.mxu0 %v8520_v48  ;;  %v8524_v5 = vpack.c.bf16 %v3868_v62, %v3866_v6  ;;  %v4002_v6 = vld [vmem:[#allocation7 + $0x2d0] sm:$0xff]  ;;  %v4025_v32 = vld [vmem:[#allocation7 + $0x388] sm:$0xff]  ;;  %v4027_v40 = vld [vmem:[#allocation7 + $0x398] sm:$0xff] }
 0x506   : > { %8487 = vmatpush1.bf16.msra.mxu1 %v8486_v63  ;;  %v3867_v63 = vld [vmem:[#allocation7 + $0x240] sm:$0xff] }
 0x507   : > { %8489 = vmatprep.subr.bf16.mxu1 %v8488_v60  ;;  %v3870_v60 = vld [vmem:[#allocation7 + $0x258] sm:$0xff]  ;;  %8523 = vmatpush1.bf16.msra.mxu0 %v8522_v50  ;;  %v8526_v11 = vpack.c.bf16 %v3867_v63, %v3865_v8  ;;  %v4005_v50 = vld [vmem:[#allocation7 + $0x2e8] sm:$0xff]  ;;  %v8542_v63 = vpack.c.bf16 %v4002_v6, %v4000_v55 }
 0x508   : > { %8525 = vmatprep.subr.bf16.mxu0 %v8524_v5  ;;  %v8528_v17 = vpack.c.bf16 %v3872_v10, %v3870_v60  ;;  %v4007_v5 = vld [vmem:[#allocation7 + $0x2f8] sm:$0xff] }
 0x509   : > { %v8544_v10 = vpack.c.bf16 %v4007_v5, %v4005_v50  ;;  %v4031_v55 = vld [vmem:[#allocation7 + $0x3b8] sm:$0xff]  ;;  %v4028_v50 = vld [vmem:[#allocation7 + $0x3a0] sm:$0xff]  ;;  %v4030_v5 = vld [vmem:[#allocation7 + $0x3b0] sm:$0xff] }
 0x50a   : > { %8491 = vmatpush1.bf16.msra.mxu1 %v8490_v1  ;;  %v3871_v1 = vld [vmem:[#allocation7 + $0x260] sm:$0xff] }
 0x50b   : > { %8493 = vmatprep.subr.bf16.mxu1 %v8492_v18  ;;  %v3874_v18 = vld [vmem:[#allocation7 + $0x278] sm:$0xff]  ;;  %8527 = vmatpush1.bf16.msra.mxu0 %v8526_v11  ;;  %v8530_v28 = vpack.c.bf16 %v3871_v1, %v3869_v19  ;;  %v4004_v11 = vld [vmem:[#allocation7 + $0x2e0] sm:$0xff]  ;;  %v4009_v1 = vld [vmem:[#allocation7 + $0x308] sm:$0xff] }
 0x50c   : > { %8529 = vmatprep.subr.bf16.mxu0 %v8528_v17  ;;  %v4006_v17 = vld [vmem:[#allocation7 + $0x2f0] sm:$0xff] }
 0x50e   : > { %8495 = vmatpush1.bf16.msra.mxu1 %v8494_v14  ;;  %v8532_v14 = vpack.c.bf16 %v3876_v16, %v3874_v18  ;;  %v4011_v18 = vld [vmem:[#allocation7 + $0x318] sm:$0xff] }
 0x50f   : > { %3787 = vmatprep.subr.mxu1 %v3736_v42  ;;  %v3873_v42 = vld [vmem:[#allocation7 + $0x270] sm:$0xff]  ;;  %8531 = vmatpush1.bf16.msra.mxu0 %v8530_v28  ;;  %v8546_v28 = vpack.c.bf16 %v4006_v17, %v4004_v11  ;;  %v4032_v11 = vld [vmem:[#allocation7 + $0x3c0] sm:$0xff] }
 0x510   : > { %8533 = vmatprep.subr.bf16.mxu0 %v8532_v14  ;;  %v4034_v17 = vld [vmem:[#allocation7 + $0x3d0] sm:$0xff] }
 0x512   : > { %3788 = vmatpush1.msra.mxu1 %v3735_v38  ;;  %v3875_v38 = vld [vmem:[#allocation7 + $0x280] sm:$0xff] }
 0x513   : > { %v8534_v26 = vpack.c.bf16 %v3875_v38, %v3873_v42  ;;  %v8548_v42 = vpack.c.bf16 %v4011_v18, %v4009_v1  ;;  %v4008_v38 = vld [vmem:[#allocation7 + $0x300] sm:$0xff]  ;;  %v4037_v18 = vld [vmem:[#allocation7 + $0x3e8] sm:$0xff] }
 0x515   : > { %8535 = vmatpush1.bf16.msra.mxu0 %v8534_v26  ;;  %v4010_v26 = vld [vmem:[#allocation7 + $0x310] sm:$0xff] }
 0x516   : > { %3946 = vmatprep.subr.mxu0 %v3878_v41 }
 0x519   : > { %3947 = vmatpush1.msra.mxu0 %v3877_v15  ;;  %v8550_v15 = vpack.c.bf16 %v4010_v26, %v4008_v38  ;;  %v4158_v38 = vld [vmem:[#allocation7 + $0x418] sm:$0xff]  ;;  %v4160_v26 = vld [vmem:[#allocation7 + $0x428] sm:$0xff] }
 0x51a   : > { %8537 = vmatprep.subr.bf16.mxu0 %v8536_v24 }
 0x5bc   : > { %v3666_v22 = vpop.f32.mrb[24].mxu1 }
 0x5bd   : > { %3882 = vrot.lane.b32.xlu0 %v3666_v22, %s9860_s3  ;;  %v3668_v33 = vpop.f32.mrb[25].mxu1  ;;  %v4195_v34 = vrot.slane %v3666_v22, 1  ;;  %v4658_v7 = vrot.slane %v3666_v22, 2 }
 0x5be   : > { %3884 = vrot.lane.b32.xlu1 %v3668_v33, %s9860_s3  ;;  %7317 = vmatprep.mubr.msk.f32.mxu1 %vm3737_vm11, %v3668_v33  ;;  %v4198_v51 = vrot.slane %v3668_v33, 1  ;;  %v4661_v53 = vrot.slane %v3668_v33, 2 }
 0x5bf   : > { %3812 = vmatmul.mubr.f32.vlgmr.msra.gmra.mrb[30].mxu1 %v3666_v22 }
 0x5c0   : > { %v3672_v46 = vpop.f32.mrb[26].mxu1 }
 0x5c1   : > { %3886 = vrot.lane.b32.xlu0 %v3672_v46, %s9860_s3  ;;  %v3674_v31 = vpop.f32.mrb[27].mxu1  ;;  %v4196_v35 = vrot.slane %v3672_v46, 1  ;;  %v4659_v39 = vrot.slane %v3672_v46, 2 }
 0x5c2   : > { %3888 = vrot.lane.b32.xlu1 %v3674_v31, %s9860_s3  ;;  %7318 = vmatprep.mubr.msk.f32.mxu1 %vm3737_vm11, %v3674_v31  ;;  %v4199_v3 = vrot.slane %v3674_v31, 1  ;;  %v4662_v56 = vrot.slane %v3674_v31, 2 }
 0x5c3   : > { %3818 = vmatmul.mubr.f32.gmra.mrb[32].mxu1 %v3672_v46  ;;  %v11262_v36 = vsel %vm1498_vm4, %v4195_v34, %v4196_v35  ;;  %v11265_v4 = vsel %vm723_vm0, %v4658_v7, %v4659_v39  ;;  %v4019_v34 = vld [vmem:[#allocation7 + $0x358] sm:$0xff] }
 0x5c4   : > { %v3678_v9 = vpop.f32.mrb[28].mxu1  ;;  %v11268_v49 = vsel %vm1498_vm4, %v4198_v51, %v4199_v3  ;;  %v11271_v54 = vsel %vm723_vm0, %v4661_v53, %v4662_v56  ;;  %v4018_v51 = vld [vmem:[#allocation7 + $0x350] sm:$0xff]  ;;  %v4023_v53 = vld [vmem:[#allocation7 + $0x378] sm:$0xff] }
 0x5c5   : > { %3890 = vrot.lane.b32.xlu0 %v3678_v9, %s9860_s3  ;;  %v3680_v30 = vpop.f32.mrb[29].mxu1  ;;  %v11283_v58 = vrot.slane %v3678_v9, 1  ;;  %v11319_v20 = vrot.slane %v3678_v9, 2 }
 0x5c6   : > { %3892 = vrot.lane.b32.xlu1 %v3680_v30, %s9860_s3  ;;  %7319 = vmatprep.mubr.msk.f32.mxu1 %vm3737_vm11, %v3680_v30  ;;  %v11285_v61 = vrot.slane %v3680_v30, 1  ;;  %v11321_v12 = vrot.slane %v3680_v30, 2 }
 0x5c7   : > { %3824 = vmatmul.mubr.f32.gmra.mrb[34].mxu1 %v3678_v9  ;;  %v11293_v23 = vsel %vm1498_vm4, %v4196_v35, %v11283_v58  ;;  %v11329_v29 = vsel %vm723_vm0, %v4659_v39, %v11319_v20  ;;  %v4016_v39 = vld [vmem:[#allocation7 + $0x340] sm:$0xff] }
 0x5c8   : > { %5192 = vmatprep.mubr.f32.mxu1 %v9854_v0  ;;  %v11299_v13 = vsel %vm1498_vm4, %v4199_v3, %v11285_v61  ;;  %v11335_v25 = vsel %vm723_vm0, %v4662_v56, %v11321_v12  ;;  %v4021_v3 = vld [vmem:[#allocation7 + $0x368] sm:$0xff]  ;;  %v8558_v56 = vpack.c.bf16 %v4018_v51, %v4016_v39 }
 0x5c9   : > { %4038 = vrot.lane.b32.xlu0 %v3666_v22, %s9861_s15  ;;  %v8552_v22 = vpack.c.bf16 %v4015_v21, %v4013_v27 }
 0x5ca   : > { %4040 = vrot.lane.b32.xlu1 %v3668_v33, %s9861_s15  ;;  %v4012_v33 = vld [vmem:[#allocation7 + $0x320] sm:$0xff] }
 0x5cd   : > { %4042 = vrot.lane.b32.xlu0 %v3672_v46, %s9861_s15  ;;  %v4014_v46 = vld [vmem:[#allocation7 + $0x330] sm:$0xff] }
 0x5ce   : > { %4044 = vrot.lane.b32.xlu1 %v3674_v31, %s9861_s15  ;;  %v4017_v31 = vld [vmem:[#allocation7 + $0x348] sm:$0xff]  ;;  %v8554_v35 = vpack.c.bf16 %v4014_v46, %v4012_v33  ;;  %v8580_v33 = vpack.c.bf16 %v4160_v26, %v4158_v38  ;;  %v4157_v46 = vld [vmem:[#allocation7 + $0x410] sm:$0xff] }
 0x5cf   : > { %v8556_v7 = vpack.c.bf16 %v4019_v34, %v4017_v31  ;;  %v4159_v31 = vld [vmem:[#allocation7 + $0x420] sm:$0xff]  ;;  %v4181_v26 = vld [vmem:[#allocation7 + $0x4d0] sm:$0xff] }
 0x5d0   : > { %v8582_v39 = vpack.c.bf16 %v4159_v31, %v4157_v46  ;;  %v4187_v46 = vld [vmem:[#allocation7 + $0x500] sm:$0xff]  ;;  %v4190_v31 = vld [vmem:[#allocation7 + $0x518] sm:$0xff] }
 0x5d1   : > { %4046 = vrot.lane.b32.xlu0 %v3678_v9, %s9861_s15  ;;  %v8560_v9 = vpack.c.bf16 %v4023_v53, %v4021_v3  ;;  %v4161_v3 = vld [vmem:[#allocation7 + $0x430] sm:$0xff]  ;;  %v4163_v53 = vld [vmem:[#allocation7 + $0x440] sm:$0xff] }
 0x5d2   : > { %4048 = vrot.lane.b32.xlu1 %v3680_v30, %s9861_s15  ;;  %v4020_v30 = vld [vmem:[#allocation7 + $0x360] sm:$0xff] }
 0x5d3   : > { %v8562_v37 = vpack.c.bf16 %v4022_v59, %v4020_v30  ;;  %v4168_v30 = vld [vmem:[#allocation7 + $0x468] sm:$0xff] }
 0x5d5   : > { %4346 = vrot.lane.b32.xlu0 %v11262_v36, %s9860_s3 }
 0x5d6   : > { %4348 = vrot.lane.b32.xlu1 %v11268_v49, %s9860_s3 }
 0x5d9   : > { %4350 = vrot.lane.b32.xlu0 %v11293_v23, %s9860_s3 }
 0x5da   : > { %4352 = vrot.lane.b32.xlu1 %v11299_v13, %s9860_s3 }
 0x5dd   : > { %4354 = vrot.lane.b32.xlu0 %v11283_v58, %s9860_s3 }
 0x5de   : > { %4356 = vrot.lane.b32.xlu1 %v11285_v61, %s9860_s3 }
 0x5e1   : > { %4502 = vrot.lane.b32.xlu0 %v11262_v36, %s9861_s15 }
 0x5e2   : > { %4504 = vrot.lane.b32.xlu1 %v11268_v49, %s9861_s15 }
 0x5e5   : > { %4506 = vrot.lane.b32.xlu0 %v11293_v23, %s9861_s15 }
 0x5e6   : > { %4508 = vrot.lane.b32.xlu1 %v11299_v13, %s9861_s15 }
 0x5e9   : > { %4510 = vrot.lane.b32.xlu0 %v11283_v58, %s9861_s15 }
 0x5ea   : > { %4512 = vrot.lane.b32.xlu1 %v11285_v61, %s9861_s15 }
 0x5ed   : > { %4809 = vrot.lane.b32.xlu0 %v11265_v4, %s9860_s3 }
 0x5ee   : > { %4811 = vrot.lane.b32.xlu1 %v11271_v54, %s9860_s3 }
 0x5f1   : > { %4813 = vrot.lane.b32.xlu0 %v11329_v29, %s9860_s3 }
 0x5f2   : > { %4815 = vrot.lane.b32.xlu1 %v11335_v25, %s9860_s3 }
 0x5f5   : > { %4817 = vrot.lane.b32.xlu0 %v11319_v20, %s9860_s3 }
 0x5f6   : > { %4819 = vrot.lane.b32.xlu1 %v11321_v12, %s9860_s3 }
 0x5f9   : > { %4965 = vrot.lane.b32.xlu0 %v11265_v4, %s9861_s15 }
 0x5fa   : > { %4967 = vrot.lane.b32.xlu1 %v11271_v54, %s9861_s15 }
 0x5fd   : > { %4969 = vrot.lane.b32.xlu0 %v11329_v29, %s9861_s15 }
 0x5fe   : > { %4971 = vrot.lane.b32.xlu1 %v11335_v25, %s9861_s15 }
 0x601   : > { %4973 = vrot.lane.b32.xlu0 %v11319_v20, %s9861_s15 }
 0x602   : > { %4975 = vrot.lane.b32.xlu1 %v11321_v12, %s9861_s15 }
 0x62f   : > { %v3883_v2 = vpop.permute.xlu0 %3882 }
 0x630   : > { %v3885_v48 = vpop.permute.xlu1 %3884 }
 0x631   : > { %v3894_v62 = vsel %vm3392_vm9, %v3883_v2, %v3885_v48  ;;  %7320 = vmatprep.mubr.msk.f32.mxu0 %vm3737_vm11, %v3885_v48  ;;  %v8564_v2 = vpack.c.bf16 %v4027_v40, %v4025_v32  ;;  %v4026_v48 = vld [vmem:[#allocation7 + $0x390] sm:$0xff] }
 0x632   : > { %3971 = vmatmul.mubr.f32.vlgmr.msra.gmra.mrb[12].mxu0 %v3894_v62 }
 0x633   : > { %8539 = vmatpush1.bf16.msra.mxu0 %v8538_v44  ;;  %v3887_v8 = vpop.permute.xlu0 %3886  ;;  %v4024_v44 = vld [vmem:[#allocation7 + $0x380] sm:$0xff] }
 0x634   : > { %v3889_v60 = vpop.permute.xlu1 %3888  ;;  %8541 = vmatprep.subr.bf16.mxu0 %v8540_v47  ;;  %v4029_v47 = vld [vmem:[#allocation7 + $0x3a8] sm:$0xff]  ;;  %v8566_v6 = vpack.c.bf16 %v4026_v48, %v4024_v44  ;;  %v4170_v48 = vld [vmem:[#allocation7 + $0x478] sm:$0xff] }
 0x635   : > { %7321 = vmatprep.mubr.msk.f32.mxu0 %vm3737_vm11, %v3889_v60  ;;  %v3895_v19 = vsel %vm3392_vm9, %v3887_v8, %v3889_v60  ;;  %v8568_v62 = vpack.c.bf16 %v4031_v55, %v4029_v47  ;;  %v4033_v8 = vld [vmem:[#allocation7 + $0x3c8] sm:$0xff]  ;;  %v8570_v60 = vpack.c.bf16 %v4030_v5, %v4028_v50  ;;  %v4171_v50 = vld [vmem:[#allocation7 + $0x480] sm:$0xff]  ;;  %v4174_v5 = vld [vmem:[#allocation7 + $0x498] sm:$0xff] }
 0x636   : > { %3977 = vmatmul.mubr.f32.gmra.mrb[14].mxu0 %v3895_v19  ;;  %v8574_v19 = vpack.c.bf16 %v4034_v17, %v4032_v11  ;;  %v4172_v47 = vld [vmem:[#allocation7 + $0x488] sm:$0xff]  ;;  %v4175_v11 = vld [vmem:[#allocation7 + $0x4a0] sm:$0xff]  ;;  %v4178_v17 = vld [vmem:[#allocation7 + $0x4b8] sm:$0xff] }
 0x637   : > { %8543 = vmatpush1.bf16.msra.mxu0 %v8542_v63  ;;  %v3891_v16 = vpop.permute.xlu0 %3890  ;;  %v4035_v63 = vld [vmem:[#allocation7 + $0x3d8] sm:$0xff] }
 0x638   : > { %v3893_v14 = vpop.permute.xlu1 %3892  ;;  %8545 = vmatprep.subr.bf16.mxu0 %v8544_v10  ;;  %v8572_v10 = vpack.c.bf16 %v4035_v63, %v4033_v8  ;;  %v4176_v8 = vld [vmem:[#allocation7 + $0x4a8] sm:$0xff] }
 0x639   : > { %7322 = vmatprep.mubr.msk.f32.mxu0 %vm3737_vm11, %v3893_v14  ;;  %v3896_v41 = vsel %vm3392_vm9, %v3891_v16, %v3893_v14  ;;  %v4154_v16 = vld [vmem:[#allocation7 + $0x3f8] sm:$0xff]  ;;  %v4153_v14 = vld [vmem:[#allocation7 + $0x3f0] sm:$0xff] }
 0x63a   : > { %3983 = vmatmul.mubr.f32.gmra.mrb[16].mxu0 %v3896_v41  ;;  %v4036_v41 = vld [vmem:[#allocation7 + $0x3e0] sm:$0xff] }
 0x63b   : > { %8547 = vmatpush1.bf16.msra.mxu0 %v8546_v28  ;;  %v4039_v1 = vpop.permute.xlu0 %4038  ;;  %v4156_v28 = vld [vmem:[#allocation7 + $0x408] sm:$0xff] }
 0x63c   : > { %v11361_v24 = vpop.permute.xlu1 %4040  ;;  %8549 = vmatprep.subr.bf16.mxu0 %v8548_v42  ;;  %v4155_v42 = vld [vmem:[#allocation7 + $0x400] sm:$0xff]  ;;  %v8576_v27 = vpack.c.bf16 %v4156_v28, %v4154_v16  ;;  %v4182_v28 = vld [vmem:[#allocation7 + $0x4d8] sm:$0xff] }
 0x63d   : > { %7323 = vmatprep.mubr.msk.f32.mxu0 %vm3737_vm11, %v11361_v24  ;;  %v8578_v21 = vpack.c.bf16 %v4155_v42, %v4153_v14  ;;  %v4051_v34 = vsel %vm4050_vm12, %v4039_v1, %v11361_v24  ;;  %v8586_v24 = vpack.c.bf16 %v4163_v53, %v4161_v3  ;;  %v4179_v16 = vld [vmem:[#allocation7 + $0x4c0] sm:$0xff]  ;;  %v4184_v14 = vld [vmem:[#allocation7 + $0x4e8] sm:$0xff]  ;;  %v4194_v53 = vld [vmem:[#allocation7 + $0x538] sm:$0xff] }
 0x63e   : > { %v8604_v38 = vpack.c.bf16 %v4184_v14, %v4182_v28  ;;  %v4327_v28 = vld [vmem:[#allocation7 + $0x5f8] sm:$0xff] }
 0x63f   : > { %8551 = vmatpush1.bf16.msra.mxu0 %v8550_v15  ;;  %v4043_v15 = vpop.permute.xlu0 %4042 }
 0x640   : > { %8553 = vmatprep.subr.bf16.mxu0 %v8552_v22  ;;  %v4045_v22 = vpop.permute.xlu1 %4044 }
 0x643   : > { %8555 = vmatpush1.bf16.msra.mxu0 %v8554_v35  ;;  %v4162_v35 = vld [vmem:[#allocation7 + $0x438] sm:$0xff]  ;;  %v4047_v59 = vpop.permute.xlu0 %4046 }
 0x644   : > { %8557 = vmatprep.subr.bf16.mxu0 %v8556_v7  ;;  %v4164_v7 = vld [vmem:[#allocation7 + $0x448] sm:$0xff]  ;;  %v4049_v32 = vpop.permute.xlu1 %4048 }
 0x645   : > { %v8584_v51 = vpack.c.bf16 %v4164_v7, %v4162_v35  ;;  %v4053_v44 = vsel %vm4050_vm12, %v4047_v59, %v4049_v32  ;;  %v4306_v59 = vld [vmem:[#allocation7 + $0x550] sm:$0xff] }
 0x647   : > { %8559 = vmatpush1.bf16.msra.mxu0 %v8558_v56  ;;  %v4052_v56 = vsel %vm4050_vm12, %v4043_v15, %v4045_v22 }
 0x648   : > { %8561 = vmatprep.subr.bf16.mxu0 %v8560_v9  ;;  %v4166_v9 = vld [vmem:[#allocation7 + $0x458] sm:$0xff] }
 0x649   : > { %v8588_v40 = vpack.c.bf16 %v4168_v30, %v4166_v9  ;;  %v4307_v9 = vld [vmem:[#allocation7 + $0x558] sm:$0xff]  ;;  %v4304_v30 = vld [vmem:[#allocation7 + $0x540] sm:$0xff] }
 0x64b   : > { %8563 = vmatpush1.bf16.msra.mxu0 %v8562_v37  ;;  %v4165_v37 = vld [vmem:[#allocation7 + $0x450] sm:$0xff] }
 0x64c   : > { %8565 = vmatprep.subr.bf16.mxu0 %v8564_v2  ;;  %v4167_v2 = vld [vmem:[#allocation7 + $0x460] sm:$0xff] }
 0x64d   : > { %v8590_v55 = vpack.c.bf16 %v4167_v2, %v4165_v37  ;;  %v8618_v2 = vpack.c.bf16 %v4306_v59, %v4304_v30  ;;  %v4337_v30 = vld [vmem:[#allocation7 + $0x648] sm:$0xff]  ;;  %v4339_v59 = vld [vmem:[#allocation7 + $0x658] sm:$0xff] }
 0x64f   : > { %8567 = vmatpush1.bf16.msra.mxu0 %v8566_v6  ;;  %v8592_v6 = vpack.c.bf16 %v4172_v47, %v4170_v48  ;;  %v4308_v48 = vld [vmem:[#allocation7 + $0x560] sm:$0xff]  ;;  %v4310_v47 = vld [vmem:[#allocation7 + $0x570] sm:$0xff] }
 0x650   : > { %8569 = vmatprep.subr.bf16.mxu0 %v8568_v62  ;;  %v4169_v62 = vld [vmem:[#allocation7 + $0x470] sm:$0xff] }
 0x651   : > { %v8594_v63 = vpack.c.bf16 %v4171_v50, %v4169_v62  ;;  %v8622_v62 = vpack.c.bf16 %v4310_v47, %v4308_v48 }
 0x653   : > { %8571 = vmatpush1.bf16.msra.mxu0 %v8570_v60  ;;  %v8596_v60 = vpack.c.bf16 %v4176_v8, %v4174_v5  ;;  %v4312_v5 = vld [vmem:[#allocation7 + $0x580] sm:$0xff]  ;;  %v4314_v8 = vld [vmem:[#allocation7 + $0x590] sm:$0xff] }
 0x654   : > { %8573 = vmatprep.subr.bf16.mxu0 %v8572_v10  ;;  %v4173_v10 = vld [vmem:[#allocation7 + $0x490] sm:$0xff] }
 0x655   : > { %v8598_v1 = vpack.c.bf16 %v4175_v11, %v4173_v10  ;;  %v8626_v10 = vpack.c.bf16 %v4314_v8, %v4312_v5  ;;  %v4316_v11 = vld [vmem:[#allocation7 + $0x5a0] sm:$0xff]  ;;  %v4345_v5 = vld [vmem:[#allocation7 + $0x688] sm:$0xff]  ;;  %v4461_v8 = vld [vmem:[#allocation7 + $0x698] sm:$0xff] }
 0x657   : > { %8575 = vmatpush1.bf16.msra.mxu0 %v8574_v19  ;;  %v4180_v19 = vld [vmem:[#allocation7 + $0x4c8] sm:$0xff] }
 0x658   : > { %4103 = vmatprep.subr.mxu0 %v4037_v18  ;;  %v8600_v18 = vpack.c.bf16 %v4180_v19, %v4178_v17  ;;  %v4318_v17 = vld [vmem:[#allocation7 + $0x5b0] sm:$0xff]  ;;  %v4323_v19 = vld [vmem:[#allocation7 + $0x5d8] sm:$0xff] }
 0x65b   : > { %4104 = vmatpush1.msra.mxu0 %v4036_v41  ;;  %v4183_v41 = vld [vmem:[#allocation7 + $0x4e0] sm:$0xff] }
 0x65c   : > { %8577 = vmatprep.subr.bf16.mxu0 %v8576_v27  ;;  %4128 = vmatmul.mubr.f32.vlgmr.msra.gmra.mrb[12].mxu0 %v4051_v34  ;;  %v4186_v27 = vld [vmem:[#allocation7 + $0x4f8] sm:$0xff]  ;;  %v8606_v15 = vpack.c.bf16 %v4183_v41, %v4181_v26  ;;  %v4192_v34 = vld [vmem:[#allocation7 + $0x528] sm:$0xff]  ;;  %v4326_v41 = vld [vmem:[#allocation7 + $0x5f0] sm:$0xff] }
 0x65d   : > { %7324 = vmatprep.mubr.msk.f32.mxu0 %vm3737_vm11, %v4045_v22  ;;  %8579 = vmatpush1.bf16.msra.mxu0 %v8578_v21  ;;  %v4188_v21 = vld [vmem:[#allocation7 + $0x508] sm:$0xff]  ;;  %v8612_v7 = vpack.c.bf16 %v4192_v34, %v4190_v31  ;;  %v4328_v31 = vld [vmem:[#allocation7 + $0x600] sm:$0xff]  ;;  %v4330_v34 = vld [vmem:[#allocation7 + $0x610] sm:$0xff] }
 0x65e   : > { %8581 = vmatprep.subr.bf16.mxu0 %v8580_v33  ;;  %v8608_v22 = vpack.c.bf16 %v4188_v21, %v4186_v27  ;;  %v4185_v33 = vld [vmem:[#allocation7 + $0x4f0] sm:$0xff]  ;;  %v4329_v27 = vld [vmem:[#allocation7 + $0x608] sm:$0xff]  ;;  %v4331_v21 = vld [vmem:[#allocation7 + $0x618] sm:$0xff] }
 0x65f   : > { %v8610_v35 = vpack.c.bf16 %v4187_v46, %v4185_v33  ;;  %v8640_v46 = vpack.c.bf16 %v4331_v21, %v4329_v27  ;;  %v4468_v21 = vld [vmem:[#allocation7 + $0x6d0] sm:$0xff] }
 0x660   : > { %4134 = vmatmul.mubr.f32.gmra.mrb[14].mxu0 %v4052_v56  ;;  %v4305_v56 = vld [vmem:[#allocation7 + $0x548] sm:$0xff] }
 0x661   : > { %7325 = vmatprep.mubr.msk.f32.mxu0 %vm3737_vm11, %v4049_v32  ;;  %8583 = vmatpush1.bf16.msra.mxu0 %v8582_v39  ;;  %v4189_v39 = vld [vmem:[#allocation7 + $0x510] sm:$0xff]  ;;  %v4309_v32 = vld [vmem:[#allocation7 + $0x568] sm:$0xff]  ;;  %v8616_v37 = vpack.c.bf16 %v4307_v9, %v4305_v56  ;;  %v4332_v56 = vld [vmem:[#allocation7 + $0x620] sm:$0xff] }
 0x662   : > { %8585 = vmatprep.subr.bf16.mxu0 %v8584_v51  ;;  %v4191_v51 = vld [vmem:[#allocation7 + $0x520] sm:$0xff]  ;;  %v4334_v9 = vld [vmem:[#allocation7 + $0x630] sm:$0xff] }
 0x663   : > { %v8614_v3 = vpack.c.bf16 %v4191_v51, %v4189_v39 }
 0x664   : > { %4140 = vmatmul.mubr.f32.gmra.mrb[16].mxu0 %v4053_v44 }
 0x665   : > { %8587 = vmatpush1.bf16.msra.mxu0 %v8586_v24  ;;  %7326 = vmatprep.mubr.msk.f32.mxu0 %vm3737_vm11, %v11268_v49  ;;  %v4177_v49 = vld [vmem:[#allocation7 + $0x4b0] sm:$0xff]  ;;  %v4311_v24 = vld [vmem:[#allocation7 + $0x578] sm:$0xff] }
 0x666   : > { %8589 = vmatprep.subr.bf16.mxu0 %v8588_v40  ;;  %v8602_v42 = vpack.c.bf16 %v4179_v16, %v4177_v49  ;;  %v4193_v40 = vld [vmem:[#allocation7 + $0x530] sm:$0xff]  ;;  %v8620_v44 = vpack.c.bf16 %v4311_v24, %v4309_v32  ;;  %v4325_v16 = vld [vmem:[#allocation7 + $0x5e8] sm:$0xff]  ;;  %v8646_v32 = vpack.c.bf16 %v4334_v9, %v4332_v56  ;;  %v8648_v24 = vpack.c.bf16 %v4339_v59, %v4337_v30  ;;  %v4477_v9 = vld [vmem:[#allocation7 + $0x718] sm:$0xff] }
 0x667   : > { %v4322_v49 = vld [vmem:[#allocation7 + $0x5d0] sm:$0xff]  ;;  %v8636_v26 = vpack.c.bf16 %v4327_v28, %v4325_v16  ;;  %v4466_v16 = vld [vmem:[#allocation7 + $0x6c0] sm:$0xff]  ;;  %v4479_v30 = vld [vmem:[#allocation7 + $0x728] sm:$0xff] }
 0x669   : > { %8591 = vmatpush1.bf16.msra.mxu0 %v8590_v55  ;;  %v4313_v55 = vld [vmem:[#allocation7 + $0x588] sm:$0xff] }
 0x66a   : > { %8593 = vmatprep.subr.bf16.mxu0 %v8592_v6  ;;  %v4315_v6 = vld [vmem:[#allocation7 + $0x598] sm:$0xff] }
 0x66b   : > { %v8624_v50 = vpack.c.bf16 %v4315_v6, %v4313_v55  ;;  %v4340_v55 = vld [vmem:[#allocation7 + $0x660] sm:$0xff]  ;;  %v4342_v6 = vld [vmem:[#allocation7 + $0x670] sm:$0xff] }
 0x66d   : > { %8595 = vmatpush1.bf16.msra.mxu0 %v8594_v63  ;;  %v4317_v63 = vld [vmem:[#allocation7 + $0x5a8] sm:$0xff] }
 0x66e   : > { %8597 = vmatprep.subr.bf16.mxu0 %v8596_v60  ;;  %v4319_v60 = vld [vmem:[#allocation7 + $0x5b8] sm:$0xff] }
 0x671   : > { %8599 = vmatpush1.bf16.msra.mxu0 %v8598_v1  ;;  %v11379_v1 = vpop.permute.xlu1 %4348 }
 0x672   : > { %8601 = vmatprep.subr.bf16.mxu0 %v8600_v18 }
 0x675   : > { %8603 = vmatpush1.bf16.msra.mxu0 %v8602_v42 }
 0x676   : > { %8605 = vmatprep.subr.bf16.mxu0 %v8604_v38 }
 0x679   : > { %8607 = vmatpush1.bf16.msra.mxu0 %v8606_v15 }
 0x67a   : > { %8609 = vmatprep.subr.bf16.mxu0 %v8608_v22 }
 0x67d   : > { %8611 = vmatpush1.bf16.msra.mxu0 %v8610_v35  ;;  %v4333_v35 = vld [vmem:[#allocation7 + $0x628] sm:$0xff] }
 0x67e   : > { %8613 = vmatprep.subr.bf16.mxu0 %v8612_v7  ;;  %v4335_v7 = vld [vmem:[#allocation7 + $0x638] sm:$0xff] }
 0x681   : > { %8615 = vmatpush1.bf16.msra.mxu0 %v8614_v3  ;;  %v8642_v3 = vpack.c.bf16 %v4330_v34, %v4328_v31  ;;  %v4473_v31 = vld [vmem:[#allocation7 + $0x6f8] sm:$0xff]  ;;  %v4475_v34 = vld [vmem:[#allocation7 + $0x708] sm:$0xff] }
 0x682   : > { %4254 = vmatprep.subr.mxu0 %v4194_v53  ;;  %v8644_v53 = vpack.c.bf16 %v4335_v7, %v4333_v35  ;;  %v8668_v7 = vpack.c.bf16 %v4475_v34, %v4473_v31  ;;  %v4501_v31 = vld [vmem:[#allocation7 + $0x7d8] sm:$0xff]  ;;  %v4617_v34 = vld [vmem:[#allocation7 + $0x7e8] sm:$0xff] }
 0x685   : > { %4255 = vmatpush1.msra.mxu0 %v4193_v40  ;;  %v4336_v40 = vld [vmem:[#allocation7 + $0x640] sm:$0xff] }
 0x686   : > { %4279 = vmatmul.mubr.f32.vlgmr.msra.gmra.mrb[12].mxu0 %v11262_v36  ;;  %8617 = vmatprep.subr.bf16.mxu0 %v8616_v37  ;;  %v8628_v36 = vpack.c.bf16 %v4319_v60, %v4317_v63  ;;  %v4338_v37 = vld [vmem:[#allocation7 + $0x650] sm:$0xff]  ;;  %v4463_v63 = vld [vmem:[#allocation7 + $0x6a8] sm:$0xff] }
 0x687   : > { %7327 = vmatprep.mubr.msk.f32.mxu0 %vm3737_vm11, %v11299_v13  ;;  %8619 = vmatpush1.bf16.msra.mxu0 %v8618_v2  ;;  %v4321_v13 = vld [vmem:[#allocation7 + $0x5c8] sm:$0xff]  ;;  %v8650_v48 = vpack.c.bf16 %v4338_v37, %v4336_v40  ;;  %v4460_v60 = vld [vmem:[#allocation7 + $0x690] sm:$0xff]  ;;  %v4478_v37 = vld [vmem:[#allocation7 + $0x720] sm:$0xff] }
 0x688   : > { %8621 = vmatprep.subr.bf16.mxu0 %v8620_v44  ;;  %v8632_v18 = vpack.c.bf16 %v4323_v19, %v4321_v13  ;;  %v4341_v2 = vld [vmem:[#allocation7 + $0x668] sm:$0xff]  ;;  %v4343_v44 = vld [vmem:[#allocation7 + $0x678] sm:$0xff]  ;;  %v4344_v13 = vld [vmem:[#allocation7 + $0x680] sm:$0xff]  ;;  %v8656_v19 = vpack.c.bf16 %v4463_v63, %v4461_v8 }
 0x689   : > { %v8652_v47 = vpack.c.bf16 %v4343_v44, %v4341_v2  ;;  %v4476_v40 = vld [vmem:[#allocation7 + $0x710] sm:$0xff]  ;;  %v4481_v2 = vld [vmem:[#allocation7 + $0x738] sm:$0xff]  ;;  %v4483_v44 = vld [vmem:[#allocation7 + $0x748] sm:$0xff] }
 0x68a   : > { %4285 = vmatmul.mubr.f32.gmra.mrb[14].mxu0 %v11293_v23  ;;  %v8630_v23 = vpack.c.bf16 %v4318_v17, %v4316_v11  ;;  %v4467_v11 = vld [vmem:[#allocation7 + $0x6c8] sm:$0xff]  ;;  %v4353_v17 = vpop.permute.xlu1 %4352  ;;  %v4484_v63 = vld [vmem:[#allocation7 + $0x750] sm:$0xff] }
 0x68b   : > { %7328 = vmatprep.mubr.msk.f32.mxu0 %vm3737_vm11, %v11285_v61  ;;  %8623 = vmatpush1.bf16.msra.mxu0 %v8622_v62  ;;  %v4320_v61 = vld [vmem:[#allocation7 + $0x5c0] sm:$0xff]  ;;  %v8654_v62 = vpack.c.bf16 %v4342_v6, %v4340_v55  ;;  %v4480_v55 = vld [vmem:[#allocation7 + $0x730] sm:$0xff] }
 0x68c   : > { %8625 = vmatprep.subr.bf16.mxu0 %v8624_v50  ;;  %v8634_v38 = vpack.c.bf16 %v4322_v49, %v4320_v61  ;;  %v4347_v50 = vpop.permute.xlu0 %4346  ;;  %v4464_v49 = vld [vmem:[#allocation7 + $0x6b0] sm:$0xff]  ;;  %v4482_v6 = vld [vmem:[#allocation7 + $0x740] sm:$0xff] }
 0x68d   : > { %v4358_v28 = vsel %vm3392_vm9, %v4347_v50, %v11379_v1  ;;  %v4487_v50 = vld [vmem:[#allocation7 + $0x768] sm:$0xff] }
 0x68e   : > { %4291 = vmatmul.mubr.f32.gmra.mrb[16].mxu0 %v11283_v58  ;;  %v4324_v58 = vld [vmem:[#allocation7 + $0x5e0] sm:$0xff] }
 0x68f   : > { %8627 = vmatpush1.bf16.msra.mxu0 %v8626_v10  ;;  %7329 = vmatprep.mubr.msk.f32.mxu0 %vm3737_vm11, %v11379_v1  ;;  %v8638_v33 = vpack.c.bf16 %v4326_v41, %v4324_v58  ;;  %v4462_v10 = vld [vmem:[#allocation7 + $0x6a0] sm:$0xff]  ;;  %v8662_v58 = vpack.c.bf16 %v4466_v16, %v4464_v49  ;;  %v4357_v41 = vpop.permute.xlu1 %4356  ;;  %v4492_v16 = vld [vmem:[#allocation7 + $0x790] sm:$0xff] }
 0x690   : > { %8629 = vmatprep.subr.bf16.mxu0 %v8628_v36  ;;  %v4465_v36 = vld [vmem:[#allocation7 + $0x6b8] sm:$0xff] }
 0x691   : > { %v8660_v61 = vpack.c.bf16 %v4467_v11, %v4465_v36  ;;  %v4491_v36 = vld [vmem:[#allocation7 + $0x788] sm:$0xff] }
 0x692   : > { %v11384_v14 = vpop.f32.mrb[30].mxu1 }
 0x693   : > { %8631 = vmatpush1.bf16.msra.mxu0 %v8630_v23  ;;  %v11386_v42 = vpop.f32.mrb[31].mxu1  ;;  %v8658_v23 = vpack.c.bf16 %v4462_v10, %v4460_v60  ;;  %v11402_v59 = vpop.permute.xlu1 %4504  ;;  %v4486_v60 = vld [vmem:[#allocation7 + $0x760] sm:$0xff]  ;;  %v4489_v10 = vld [vmem:[#allocation7 + $0x778] sm:$0xff] }
 0x694   : > { %8633 = vmatprep.subr.bf16.mxu0 %v8632_v18  ;;  %v4351_v18 = vpop.permute.xlu0 %4350  ;;  %v8682_v11 = vpack.c.bf16 %v4486_v60, %v4484_v63  ;;  %v4631_v63 = vld [vmem:[#allocation7 + $0x858] sm:$0xff] }
 0x696   : > { %v11388_v15 = vpop.f32.mrb[32].mxu1 }
 0x697   : > { %8635 = vmatpush1.bf16.msra.mxu0 %v8634_v38  ;;  %v11390_v22 = vpop.f32.mrb[33].mxu1  ;;  %v4469_v38 = vld [vmem:[#allocation7 + $0x6d8] sm:$0xff] }
 0x698   : > { %8637 = vmatprep.subr.bf16.mxu0 %v8636_v26  ;;  %v4471_v26 = vld [vmem:[#allocation7 + $0x6e8] sm:$0xff]  ;;  %v4355_v35 = vpop.permute.xlu0 %4354 }
 0x699   : > { %v8664_v27 = vpack.c.bf16 %v4471_v26, %v4469_v38  ;;  %v4360_v56 = vsel %vm3392_vm9, %v4355_v35, %v4357_v41  ;;  %v4497_v38 = vld [vmem:[#allocation7 + $0x7b8] sm:$0xff]  ;;  %v4499_v26 = vld [vmem:[#allocation7 + $0x7c8] sm:$0xff] }
 0x69a   : > { %v11392_v39 = vpop.f32.mrb[34].mxu1  ;;  %v4619_v35 = vld [vmem:[#allocation7 + $0x7f8] sm:$0xff] }
 0x69b   : > { %8639 = vmatpush1.bf16.msra.mxu0 %v8638_v33  ;;  %v11394_v51 = vpop.f32.mrb[35].mxu1  ;;  %v4470_v33 = vld [vmem:[#allocation7 + $0x6e0] sm:$0xff] }
 0x69c   : > { %8641 = vmatprep.subr.bf16.mxu0 %v8640_v46  ;;  %v4359_v46 = vsel %vm3392_vm9, %v4351_v18, %v4353_v17  ;;  %v8666_v1 = vpack.c.bf16 %v4470_v33, %v4468_v21  ;;  %v4495_v18 = vld [vmem:[#allocation7 + $0x7a8] sm:$0xff]  ;;  %v4498_v21 = vld [vmem:[#allocation7 + $0x7c0] sm:$0xff] }
 0x69f   : > { %8643 = vmatpush1.bf16.msra.mxu0 %v8642_v3  ;;  %v4472_v3 = vld [vmem:[#allocation7 + $0x6f0] sm:$0xff] }
 0x6a0   : > { %8645 = vmatprep.subr.bf16.mxu0 %v8644_v53  ;;  %v4474_v53 = vld [vmem:[#allocation7 + $0x700] sm:$0xff] }
 0x6a3   : > { %8647 = vmatpush1.bf16.msra.mxu0 %v8646_v32  ;;  %v8670_v32 = vpack.c.bf16 %v4474_v53, %v4472_v3  ;;  %v4621_v3 = vld [vmem:[#allocation7 + $0x808] sm:$0xff]  ;;  %v4623_v53 = vld [vmem:[#allocation7 + $0x818] sm:$0xff] }
 0x6a4   : > { %8649 = vmatprep.subr.bf16.mxu0 %v8648_v24  ;;  %v8672_v24 = vpack.c.bf16 %v4479_v30, %v4477_v9  ;;  %v8696_v9 = vpack.c.bf16 %v4619_v35, %v4617_v34  ;;  %v4642_v34 = vld [vmem:[#allocation7 + $0x8b0] sm:$0xff]  ;;  %v4645_v35 = vld [vmem:[#allocation7 + $0x8c8] sm:$0xff] }
 0x6a7   : > { %8651 = vmatpush1.bf16.msra.mxu0 %v8650_v48  ;;  %v8674_v48 = vpack.c.bf16 %v4478_v37, %v4476_v40  ;;  %v8700_v40 = vpack.c.bf16 %v4623_v53, %v4621_v3  ;;  %v4620_v37 = vld [vmem:[#allocation7 + $0x800] sm:$0xff] }
 0x6a8   : > { %8653 = vmatprep.subr.bf16.mxu0 %v8652_v47  ;;  %v8676_v47 = vpack.c.bf16 %v4483_v44, %v4481_v2  ;;  %v4622_v2 = vld [vmem:[#allocation7 + $0x810] sm:$0xff]  ;;  %v4644_v53 = vld [vmem:[#allocation7 + $0x8c0] sm:$0xff] }
 0x6ab   : > { %8655 = vmatpush1.bf16.msra.mxu0 %v8654_v62  ;;  %v4485_v62 = vld [vmem:[#allocation7 + $0x758] sm:$0xff] }
 0x6ac   : > { %4410 = vmatprep.subr.mxu0 %v4345_v5  ;;  %v8678_v5 = vpack.c.bf16 %v4482_v6, %v4480_v55  ;;  %v8680_v8 = vpack.c.bf16 %v4487_v50, %v4485_v62  ;;  %v8702_v55 = vpack.c.bf16 %v4622_v2, %v4620_v37  ;;  %v4624_v62 = vld [vmem:[#allocation7 + $0x820] sm:$0xff]  ;;  %v4626_v50 = vld [vmem:[#allocation7 + $0x830] sm:$0xff]  ;;  %v4653_v2 = vld [vmem:[#allocation7 + $0x908] sm:$0xff] }
 0x6ad   : > { %v4650_v37 = vld [vmem:[#allocation7 + $0x8f0] sm:$0xff] }
 0x6af   : > { %4411 = vmatpush1.msra.mxu0 %v4344_v13  ;;  %v4488_v13 = vld [vmem:[#allocation7 + $0x770] sm:$0xff] }
 0x6b0   : > { %4435 = vmatmul.mubr.f32.vlgmr.msra.gmra.mrb[12].mxu0 %v4358_v28  ;;  %8657 = vmatprep.subr.bf16.mxu0 %v8656_v19  ;;  %v4490_v19 = vld [vmem:[#allocation7 + $0x780] sm:$0xff] }
 0x6b1   : > { %7330 = vmatprep.mubr.msk.f32.mxu0 %vm3737_vm11, %v4353_v17  ;;  %8659 = vmatpush1.bf16.msra.mxu0 %v8658_v23  ;;  %v8684_v17 = vpack.c.bf16 %v4491_v36, %v4489_v10  ;;  %v4493_v23 = vld [vmem:[#allocation7 + $0x798] sm:$0xff]  ;;  %v4494_v28 = vld [vmem:[#allocation7 + $0x7a0] sm:$0xff] }
 0x6b2   : > { %8661 = vmatprep.subr.bf16.mxu0 %v8660_v61  ;;  %v8686_v61 = vpack.c.bf16 %v4490_v19, %v4488_v13  ;;  %v8688_v49 = vpack.c.bf16 %v4495_v18, %v4493_v23  ;;  %v4633_v19 = vld [vmem:[#allocation7 + $0x868] sm:$0xff]  ;;  %v4635_v23 = vld [vmem:[#allocation7 + $0x878] sm:$0xff] }
 0x6b4   : > { %4441 = vmatmul.mubr.f32.gmra.mrb[14].mxu0 %v4359_v46  ;;  %v4503_v46 = vpop.permute.xlu0 %4502 }
 0x6b5   : > { %7331 = vmatprep.mubr.msk.f32.mxu0 %vm3737_vm11, %v4357_v41  ;;  %8663 = vmatpush1.bf16.msra.mxu0 %v8662_v58  ;;  %v8690_v58 = vpack.c.bf16 %v4494_v28, %v4492_v16  ;;  %v8692_v41 = vpack.c.bf16 %v4499_v26, %v4497_v38  ;;  %v4514_v44 = vsel %vm4050_vm12, %v4503_v46, %v11402_v59  ;;  %v4634_v16 = vld [vmem:[#allocation7 + $0x870] sm:$0xff]  ;;  %v4637_v28 = vld [vmem:[#allocation7 + $0x888] sm:$0xff]  ;;  %v4639_v38 = vld [vmem:[#allocation7 + $0x898] sm:$0xff] }
 0x6b6   : > { %8665 = vmatprep.subr.bf16.mxu0 %v8664_v27  ;;  %v4496_v27 = vld [vmem:[#allocation7 + $0x7b0] sm:$0xff] }
 0x6b7   : > { %v8694_v33 = vpack.c.bf16 %v4498_v21, %v4496_v27  ;;  %v4638_v27 = vld [vmem:[#allocation7 + $0x890] sm:$0xff]  ;;  %v4641_v21 = vld [vmem:[#allocation7 + $0x8a8] sm:$0xff] }
 0x6b8   : > { %4447 = vmatmul.mubr.f32.gmra.mrb[16].mxu0 %v4360_v56  ;;  %v4500_v56 = vld [vmem:[#allocation7 + $0x7d0] sm:$0xff] }
 0x6b9   : > { %8667 = vmatpush1.bf16.msra.mxu0 %v8666_v1  ;;  %7332 = vmatprep.mubr.msk.f32.mxu0 %vm3737_vm11, %v11402_v59  ;;  %v4616_v1 = vld [vmem:[#allocation7 + $0x7e0] sm:$0xff]  ;;  %v8706_v59 = vpack.c.bf16 %v4626_v50, %v4624_v62  ;;  %v4657_v50 = vld [vmem:[#allocation7 + $0x928] sm:$0xff] }
 0x6ba   : > { %8669 = vmatprep.subr.bf16.mxu0 %v8668_v7  ;;  %v4618_v7 = vld [vmem:[#allocation7 + $0x7f0] sm:$0xff] }
 0x6bb   : > { %v8698_v30 = vpack.c.bf16 %v4618_v7, %v4616_v1  ;;  %v4647_v1 = vld [vmem:[#allocation7 + $0x8d8] sm:$0xff] }
 0x6bc   : > { %v8724_v3 = vpack.c.bf16 %v4647_v1, %v4645_v35  ;;  %v4790_v35 = vld [vmem:[#allocation7 + $0x9e8] sm:$0xff] }
 0x6bd   : > { %8671 = vmatpush1.bf16.msra.mxu0 %v8670_v32  ;;  %v4507_v32 = vpop.permute.xlu0 %4506 }
 0x6be   : > { %8673 = vmatprep.subr.bf16.mxu0 %v8672_v24  ;;  %v4509_v24 = vpop.permute.xlu1 %4508 }
 0x6c1   : > { %8675 = vmatpush1.bf16.msra.mxu0 %v8674_v48  ;;  %v4625_v48 = vld [vmem:[#allocation7 + $0x828] sm:$0xff]  ;;  %v4511_v60 = vpop.permute.xlu0 %4510 }
 0x6c2   : > { %8677 = vmatprep.subr.bf16.mxu0 %v8676_v47  ;;  %v4627_v47 = vld [vmem:[#allocation7 + $0x838] sm:$0xff]  ;;  %v4513_v10 = vpop.permute.xlu1 %4512 }
 0x6c3   : > { %v8704_v6 = vpack.c.bf16 %v4627_v47, %v4625_v48  ;;  %v4516_v13 = vsel %vm4050_vm12, %v4511_v60, %v4513_v10  ;;  %v4769_v60 = vld [vmem:[#allocation7 + $0x940] sm:$0xff] }
 0x6c5   : > { %8679 = vmatpush1.bf16.msra.mxu0 %v8678_v5  ;;  %v4515_v5 = vsel %vm4050_vm12, %v4507_v32, %v4509_v24 }
 0x6c6   : > { %8681 = vmatprep.subr.bf16.mxu0 %v8680_v8  ;;  %v4629_v8 = vld [vmem:[#allocation7 + $0x848] sm:$0xff] }
 0x6c7   : > { %v8708_v36 = vpack.c.bf16 %v4631_v63, %v4629_v8  ;;  %v4770_v8 = vld [vmem:[#allocation7 + $0x948] sm:$0xff]  ;;  %v4767_v63 = vld [vmem:[#allocation7 + $0x930] sm:$0xff] }
 0x6c9   : > { %8683 = vmatpush1.bf16.msra.mxu0 %v8682_v11  ;;  %v4628_v11 = vld [vmem:[#allocation7 + $0x840] sm:$0xff] }
 0x6ca   : > { %8685 = vmatprep.subr.bf16.mxu0 %v8684_v17  ;;  %v4630_v17 = vld [vmem:[#allocation7 + $0x850] sm:$0xff] }
 0x6cb   : > { %v8710_v18 = vpack.c.bf16 %v4630_v17, %v4628_v11  ;;  %v8738_v17 = vpack.c.bf16 %v4769_v60, %v4767_v63  ;;  %v4804_v63 = vld [vmem:[#allocation7 + $0xa58] sm:$0xff]  ;;  %v4806_v60 = vld [vmem:[#allocation7 + $0xa68] sm:$0xff] }
 0x6cd   : > { %8687 = vmatpush1.bf16.msra.mxu0 %v8686_v61  ;;  %v8712_v61 = vpack.c.bf16 %v4635_v23, %v4633_v19  ;;  %v4771_v19 = vld [vmem:[#allocation7 + $0x950] sm:$0xff]  ;;  %v4773_v23 = vld [vmem:[#allocation7 + $0x960] sm:$0xff] }
 0x6ce   : > { %8689 = vmatprep.subr.bf16.mxu0 %v8688_v49  ;;  %v4632_v49 = vld [vmem:[#allocation7 + $0x860] sm:$0xff] }
 0x6cf   : > { %v8714_v26 = vpack.c.bf16 %v4634_v16, %v4632_v49  ;;  %v8742_v49 = vpack.c.bf16 %v4773_v23, %v4771_v19  ;;  %v4808_v19 = vld [vmem:[#allocation7 + $0xa78] sm:$0xff]  ;;  %v4924_v23 = vld [vmem:[#allocation7 + $0xa88] sm:$0xff] }
 0x6d1   : > { %8691 = vmatpush1.bf16.msra.mxu0 %v8690_v58  ;;  %v8716_v58 = vpack.c.bf16 %v4639_v38, %v4637_v28  ;;  %v4775_v28 = vld [vmem:[#allocation7 + $0x970] sm:$0xff]  ;;  %v4777_v38 = vld [vmem:[#allocation7 + $0x980] sm:$0xff] }
 0x6d2   : > { %8693 = vmatprep.subr.bf16.mxu0 %v8692_v41  ;;  %v4636_v41 = vld [vmem:[#allocation7 + $0x880] sm:$0xff] }
 0x6d3   : > { %v8718_v46 = vpack.c.bf16 %v4638_v27, %v4636_v41  ;;  %v8746_v41 = vpack.c.bf16 %v4777_v38, %v4775_v28  ;;  %v4779_v27 = vld [vmem:[#allocation7 + $0x990] sm:$0xff]  ;;  %v4930_v28 = vld [vmem:[#allocation7 + $0xab8] sm:$0xff] }
 0x6d5   : > { %8695 = vmatpush1.bf16.msra.mxu0 %v8694_v33  ;;  %v4643_v33 = vld [vmem:[#allocation7 + $0x8b8] sm:$0xff] }
 0x6d6   : > { %4566 = vmatprep.subr.mxu0 %v4501_v31  ;;  %v8720_v31 = vpack.c.bf16 %v4643_v33, %v4641_v21  ;;  %v4781_v21 = vld [vmem:[#allocation7 + $0x9a0] sm:$0xff]  ;;  %v4786_v33 = vld [vmem:[#allocation7 + $0x9c8] sm:$0xff] }
 0x6d9   : > { %4567 = vmatpush1.msra.mxu0 %v4500_v56  ;;  %v4646_v56 = vld [vmem:[#allocation7 + $0x8d0] sm:$0xff] }
 0x6da   : > { %4591 = vmatmul.mubr.f32.vlgmr.msra.gmra.mrb[12].mxu0 %v4514_v44  ;;  %8697 = vmatprep.subr.bf16.mxu0 %v8696_v9  ;;  %v4649_v9 = vld [vmem:[#allocation7 + $0x8e8] sm:$0xff]  ;;  %v8726_v32 = vpack.c.bf16 %v4646_v56, %v4644_v53  ;;  %v4655_v44 = vld [vmem:[#allocation7 + $0x918] sm:$0xff]  ;;  %v4789_v53 = vld [vmem:[#allocation7 + $0x9e0] sm:$0xff] }
 0x6db   : > { %7333 = vmatprep.mubr.msk.f32.mxu0 %vm3737_vm11, %v4509_v24  ;;  %8699 = vmatpush1.bf16.msra.mxu0 %v8698_v30  ;;  %v4651_v30 = vld [vmem:[#allocation7 + $0x8f8] sm:$0xff]  ;;  %v8732_v47 = vpack.c.bf16 %v4655_v44, %v4653_v2 }
 0x6dc   : > { %8701 = vmatprep.subr.bf16.mxu0 %v8700_v40  ;;  %v8728_v24 = vpack.c.bf16 %v4651_v30, %v4649_v9  ;;  %v4648_v40 = vld [vmem:[#allocation7 + $0x8e0] sm:$0xff]  ;;  %v4792_v56 = vld [vmem:[#allocation7 + $0x9f8] sm:$0xff]  ;;  %v4794_v9 = vld [vmem:[#allocation7 + $0xa08] sm:$0xff] }
 0x6dd   : > { %v8730_v48 = vpack.c.bf16 %v4650_v37, %v4648_v40  ;;  %v8760_v30 = vpack.c.bf16 %v4794_v9, %v4792_v56  ;;  %v4796_v40 = vld [vmem:[#allocation7 + $0xa18] sm:$0xff]  ;;  %v4798_v37 = vld [vmem:[#allocation7 + $0xa28] sm:$0xff] }
 0x6de   : > { %4597 = vmatmul.mubr.f32.gmra.mrb[14].mxu0 %v4515_v5  ;;  %v4768_v5 = vld [vmem:[#allocation7 + $0x938] sm:$0xff]  ;;  %v8764_v44 = vpack.c.bf16 %v4798_v37, %v4796_v40 }
 0x6df   : > { %7334 = vmatprep.mubr.msk.f32.mxu0 %vm3737_vm11, %v4513_v10  ;;  %8703 = vmatpush1.bf16.msra.mxu0 %v8702_v55  ;;  %v4652_v55 = vld [vmem:[#allocation7 + $0x900] sm:$0xff]  ;;  %v4772_v10 = vld [vmem:[#allocation7 + $0x958] sm:$0xff]  ;;  %v8736_v11 = vpack.c.bf16 %v4770_v8, %v4768_v5  ;;  %v4799_v5 = vld [vmem:[#allocation7 + $0xa30] sm:$0xff] }
 0x6e0   : > { %8705 = vmatprep.subr.bf16.mxu0 %v8704_v6  ;;  %v4654_v6 = vld [vmem:[#allocation7 + $0x910] sm:$0xff]  ;;  %v4801_v8 = vld [vmem:[#allocation7 + $0xa40] sm:$0xff]  ;;  %v4942_v40 = vld [vmem:[#allocation7 + $0xb18] sm:$0xff] }
 0x6e1   : > { %v8734_v62 = vpack.c.bf16 %v4654_v6, %v4652_v55  ;;  %v4800_v55 = vld [vmem:[#allocation7 + $0xa38] sm:$0xff]  ;;  %v4802_v6 = vld [vmem:[#allocation7 + $0xa48] sm:$0xff] }
 0x6e2   : > { %4603 = vmatmul.mubr.f32.gmra.mrb[16].mxu0 %v4516_v13 }
 0x6e3   : > { %8707 = vmatpush1.bf16.msra.mxu0 %v8706_v59  ;;  %7335 = vmatprep.mubr.msk.f32.mxu0 %vm3737_vm11, %v11271_v54  ;;  %v4640_v54 = vld [vmem:[#allocation7 + $0x8a0] sm:$0xff]  ;;  %v4774_v59 = vld [vmem:[#allocation7 + $0x968] sm:$0xff] }
 0x6e4   : > { %8709 = vmatprep.subr.bf16.mxu0 %v8708_v36  ;;  %v8722_v7 = vpack.c.bf16 %v4642_v34, %v4640_v54  ;;  %v4656_v36 = vld [vmem:[#allocation7 + $0x920] sm:$0xff]  ;;  %v8740_v13 = vpack.c.bf16 %v4774_v59, %v4772_v10  ;;  %v4788_v34 = vld [vmem:[#allocation7 + $0x9d8] sm:$0xff]  ;;  %v8770_v10 = vpack.c.bf16 %v4801_v8, %v4799_v5  ;;  %v8772_v59 = vpack.c.bf16 %v4806_v60, %v4804_v63  ;;  %v4945_v8 = vld [vmem:[#allocation7 + $0xb30] sm:$0xff] }
 0x6e5   : > { %v4785_v54 = vld [vmem:[#allocation7 + $0x9c0] sm:$0xff]  ;;  %v4948_v63 = vld [vmem:[#allocation7 + $0xb48] sm:$0xff]  ;;  %v4950_v60 = vld [vmem:[#allocation7 + $0xb58] sm:$0xff] }
 0x6e6   : > { %v4943_v5 = vld [vmem:[#allocation7 + $0xb20] sm:$0xff] }
 0x6e7   : > { %8711 = vmatpush1.bf16.msra.mxu0 %v8710_v18  ;;  %v4776_v18 = vld [vmem:[#allocation7 + $0x978] sm:$0xff] }
 0x6e8   : > { %8713 = vmatprep.subr.bf16.mxu0 %v8712_v61  ;;  %v4778_v61 = vld [vmem:[#allocation7 + $0x988] sm:$0xff] }
 0x6e9   : > { %v8744_v16 = vpack.c.bf16 %v4778_v61, %v4776_v18  ;;  %v4926_v18 = vld [vmem:[#allocation7 + $0xa98] sm:$0xff]  ;;  %v4923_v61 = vld [vmem:[#allocation7 + $0xa80] sm:$0xff] }
 0x6eb   : > { %8715 = vmatpush1.bf16.msra.mxu0 %v8714_v26  ;;  %v4780_v26 = vld [vmem:[#allocation7 + $0x998] sm:$0xff] }
 0x6ec   : > { %8717 = vmatprep.subr.bf16.mxu0 %v8716_v58  ;;  %v4782_v58 = vld [vmem:[#allocation7 + $0x9a8] sm:$0xff] }
 0x6ef   : > { %8719 = vmatpush1.bf16.msra.mxu0 %v8718_v46  ;;  %v11420_v46 = vpop.permute.xlu1 %4811 }
 0x6f0   : > { %8721 = vmatprep.subr.bf16.mxu0 %v8720_v31 }
 0x6f3   : > { %8723 = vmatpush1.bf16.msra.mxu0 %v8722_v7  ;;  %v8756_v7 = vpack.c.bf16 %v4790_v35, %v4788_v34  ;;  %v4816_v38 = vpop.permute.xlu1 %4815  ;;  %v4931_v35 = vld [vmem:[#allocation7 + $0xac0] sm:$0xff] }
 0x6f4   : > { %8725 = vmatprep.subr.bf16.mxu0 %v8724_v3  ;;  %v4787_v3 = vld [vmem:[#allocation7 + $0x9d0] sm:$0xff] }
 0x6f7   : > { %8727 = vmatpush1.bf16.msra.mxu0 %v8726_v32  ;;  %v4791_v32 = vld [vmem:[#allocation7 + $0x9f0] sm:$0xff] }
 0x6f8   : > { %8729 = vmatprep.subr.bf16.mxu0 %v8728_v24  ;;  %v4793_v24 = vld [vmem:[#allocation7 + $0xa00] sm:$0xff] }
 0x6f9   : > { %v8762_v2 = vpack.c.bf16 %v4793_v24, %v4791_v32  ;;  %v4940_v24 = vld [vmem:[#allocation7 + $0xb08] sm:$0xff] }
 0x6fb   : > { %8731 = vmatpush1.bf16.msra.mxu0 %v8730_v48  ;;  %v4795_v48 = vld [vmem:[#allocation7 + $0xa10] sm:$0xff] }
 0x6fc   : > { %8733 = vmatprep.subr.bf16.mxu0 %v8732_v47  ;;  %v4797_v47 = vld [vmem:[#allocation7 + $0xa20] sm:$0xff] }
 0x6ff   : > { %8735 = vmatpush1.bf16.msra.mxu0 %v8734_v62  ;;  %v8766_v62 = vpack.c.bf16 %v4797_v47, %v4795_v48  ;;  %v4939_v48 = vld [vmem:[#allocation7 + $0xb00] sm:$0xff]  ;;  %v4941_v47 = vld [vmem:[#allocation7 + $0xb10] sm:$0xff] }
 0x700   : > { %4717 = vmatprep.subr.mxu0 %v4657_v50  ;;  %v8768_v50 = vpack.c.bf16 %v4802_v6, %v4800_v55  ;;  %v4944_v55 = vld [vmem:[#allocation7 + $0xb28] sm:$0xff]  ;;  %v4946_v6 = vld [vmem:[#allocation7 + $0xb38] sm:$0xff] }
 0x703   : > { %4718 = vmatpush1.msra.mxu0 %v4656_v36  ;;  %v4803_v36 = vld [vmem:[#allocation7 + $0xa50] sm:$0xff] }
 0x704   : > { %4742 = vmatmul.mubr.f32.vlgmr.msra.gmra.mrb[12].mxu0 %v11265_v4  ;;  %8737 = vmatprep.subr.bf16.mxu0 %v8736_v11  ;;  %v8748_v4 = vpack.c.bf16 %v4782_v58, %v4780_v26  ;;  %v4805_v11 = vld [vmem:[#allocation7 + $0xa60] sm:$0xff]  ;;  %v4807_v26 = vld [vmem:[#allocation7 + $0xa70] sm:$0xff]  ;;  %v8776_v58 = vpack.c.bf16 %v4926_v18, %v4924_v23 }
 0x705   : > { %7336 = vmatprep.mubr.msk.f32.mxu0 %vm3737_vm11, %v11335_v25  ;;  %8739 = vmatpush1.bf16.msra.mxu0 %v8738_v17  ;;  %v4784_v25 = vld [vmem:[#allocation7 + $0x9b8] sm:$0xff]  ;;  %v8774_v17 = vpack.c.bf16 %v4805_v11, %v4803_v36  ;;  %v4947_v36 = vld [vmem:[#allocation7 + $0xb40] sm:$0xff]  ;;  %v4949_v11 = vld [vmem:[#allocation7 + $0xb50] sm:$0xff] }
 0x706   : > { %8741 = vmatprep.subr.bf16.mxu0 %v8740_v13  ;;  %v8752_v31 = vpack.c.bf16 %v4786_v33, %v4784_v25  ;;  %v4810_v13 = vpop.permute.xlu0 %4809  ;;  %v4929_v25 = vld [vmem:[#allocation7 + $0xab0] sm:$0xff]  ;;  %v4951_v18 = vld [vmem:[#allocation7 + $0xb60] sm:$0xff] }
 0x707   : > { %v4821_v33 = vsel %vm3392_vm9, %v4810_v13, %v11420_v46  ;;  %v4954_v13 = vld [vmem:[#allocation7 + $0xb78] sm:$0xff] }
 0x708   : > { %4748 = vmatmul.mubr.f32.gmra.mrb[14].mxu0 %v11329_v29  ;;  %v8750_v29 = vpack.c.bf16 %v4781_v21, %v4779_v27  ;;  %v4927_v21 = vld [vmem:[#allocation7 + $0xaa0] sm:$0xff] }
 0x709   : > { %7337 = vmatprep.mubr.msk.f32.mxu0 %vm3737_vm11, %v11321_v12  ;;  %8743 = vmatpush1.bf16.msra.mxu0 %v8742_v49  ;;  %v4783_v12 = vld [vmem:[#allocation7 + $0x9b0] sm:$0xff] }
 0x70a   : > { %8745 = vmatprep.subr.bf16.mxu0 %v8744_v16  ;;  %v8754_v1 = vpack.c.bf16 %v4785_v54, %v4783_v12  ;;  %v4925_v49 = vld [vmem:[#allocation7 + $0xa90] sm:$0xff]  ;;  %v4928_v16 = vld [vmem:[#allocation7 + $0xaa8] sm:$0xff]  ;;  %v8782_v12 = vpack.c.bf16 %v4929_v25, %v4927_v21  ;;  %v4820_v54 = vpop.permute.xlu1 %4819  ;;  %v4959_v25 = vld [vmem:[#allocation7 + $0xba0] sm:$0xff] }
 0x70b   : > { %v8780_v27 = vpack.c.bf16 %v4930_v28, %v4928_v16  ;;  %v4958_v16 = vld [vmem:[#allocation7 + $0xb98] sm:$0xff] }
 0x70c   : > { %4754 = vmatmul.mubr.f32.gmra.mrb[16].mxu0 %v11319_v20  ;;  %v8758_v20 = vpack.c.bf16 %v4789_v53, %v4787_v3  ;;  %v4936_v3 = vld [vmem:[#allocation7 + $0xae8] sm:$0xff]  ;;  %v4938_v53 = vld [vmem:[#allocation7 + $0xaf8] sm:$0xff] }
 0x70d   : > { %8747 = vmatpush1.bf16.msra.mxu0 %v8746_v41  ;;  %7338 = vmatprep.mubr.msk.f32.mxu0 %vm3737_vm11, %v11420_v46  ;;  %v8778_v41 = vpack.c.bf16 %v4925_v49, %v4923_v61  ;;  %v8788_v9 = vpack.c.bf16 %v4938_v53, %v4936_v3  ;;  %v4953_v61 = vld [vmem:[#allocation7 + $0xb70] sm:$0xff]  ;;  %v4956_v49 = vld [vmem:[#allocation7 + $0xb88] sm:$0xff] }
 0x70e   : > { %8749 = vmatprep.subr.bf16.mxu0 %v8748_v4  ;;  %v4814_v4 = vpop.permute.xlu0 %4813  ;;  %v4968_v37 = vpop.permute.xlu1 %4967  ;;  %v8806_v28 = vpack.c.bf16 %v4953_v61, %v4951_v18 }
 0x711   : > { %8751 = vmatpush1.bf16.msra.mxu0 %v8750_v29  ;;  %v4932_v29 = vld [vmem:[#allocation7 + $0xac8] sm:$0xff] }
 0x712   : > { %8753 = vmatprep.subr.bf16.mxu0 %v8752_v31  ;;  %v4934_v31 = vld [vmem:[#allocation7 + $0xad8] sm:$0xff]  ;;  %v4818_v56 = vpop.permute.xlu0 %4817 }
 0x713   : > { %v8784_v34 = vpack.c.bf16 %v4934_v31, %v4932_v29  ;;  %v4823_v32 = vsel %vm3392_vm9, %v4818_v56, %v4820_v54 }
 0x715   : > { %8755 = vmatpush1.bf16.msra.mxu0 %v8754_v1  ;;  %v4933_v1 = vld [vmem:[#allocation7 + $0xad0] sm:$0xff] }
 0x716   : > { %8757 = vmatprep.subr.bf16.mxu0 %v8756_v7  ;;  %v4822_v7 = vsel %vm3392_vm9, %v4814_v4, %v4816_v38  ;;  %v8786_v46 = vpack.c.bf16 %v4933_v1, %v4931_v35  ;;  %v4962_v4 = vld [vmem:[#allocation7 + $0xbb8] sm:$0xff]  ;;  %v4966_v31 = vpop.permute.xlu0 %4965  ;;  %v4972_v35 = vpop.permute.xlu1 %4971 }
 0x717   : > { %v4977_v1 = vsel %vm4050_vm12, %v4966_v31, %v4968_v37 }
 0x719   : > { %8759 = vmatpush1.bf16.msra.mxu0 %v8758_v20  ;;  %v4935_v20 = vld [vmem:[#allocation7 + $0xae0] sm:$0xff] }
 0x71a   : > { %8761 = vmatprep.subr.bf16.mxu0 %v8760_v30  ;;  %v4937_v30 = vld [vmem:[#allocation7 + $0xaf0] sm:$0xff]  ;;  %v4976_v53 = vpop.permute.xlu1 %4975 }
 0x71d   : > { %8763 = vmatpush1.bf16.msra.mxu0 %v8762_v2  ;;  %v8790_v2 = vpack.c.bf16 %v4937_v30, %v4935_v20 }
 0x71e   : > { %8765 = vmatprep.subr.bf16.mxu0 %v8764_v44  ;;  %v8792_v44 = vpack.c.bf16 %v4942_v40, %v4940_v24 }
 0x721   : > { %8767 = vmatpush1.bf16.msra.mxu0 %v8766_v62  ;;  %v8794_v62 = vpack.c.bf16 %v4941_v47, %v4939_v48 }
 0x722   : > { %8769 = vmatprep.subr.bf16.mxu0 %v8768_v50  ;;  %v8796_v50 = vpack.c.bf16 %v4946_v6, %v4944_v55 }
 0x725   : > { %8771 = vmatpush1.bf16.msra.mxu0 %v8770_v10  ;;  %v8798_v10 = vpack.c.bf16 %v4945_v8, %v4943_v5 }
 0x726   : > { %8773 = vmatprep.subr.bf16.mxu0 %v8772_v59  ;;  %v8800_v59 = vpack.c.bf16 %v4950_v60, %v4948_v63 }
 0x729   : > { %8775 = vmatpush1.bf16.msra.mxu0 %v8774_v17  ;;  %v4952_v17 = vld [vmem:[#allocation7 + $0xb68] sm:$0xff] }
 0x72a   : > { %4873 = vmatprep.subr.mxu0 %v4808_v19  ;;  %v8802_v19 = vpack.c.bf16 %v4949_v11, %v4947_v36  ;;  %v8804_v23 = vpack.c.bf16 %v4954_v13, %v4952_v17 }
 0x72d   : > { %4874 = vmatpush1.msra.mxu0 %v4807_v26  ;;  %v4955_v26 = vld [vmem:[#allocation7 + $0xb80] sm:$0xff] }
 0x72e   : > { %4898 = vmatmul.mubr.f32.vlgmr.msra.gmra.mrb[12].mxu0 %v4821_v33  ;;  %8777 = vmatprep.subr.bf16.mxu0 %v8776_v58  ;;  %v4957_v58 = vld [vmem:[#allocation7 + $0xb90] sm:$0xff] }
 0x72f   : > { %7339 = vmatprep.mubr.msk.f32.mxu0 %vm3737_vm11, %v4816_v38  ;;  %8779 = vmatpush1.bf16.msra.mxu0 %v8778_v41  ;;  %v8808_v38 = vpack.c.bf16 %v4958_v16, %v4956_v49  ;;  %v4960_v41 = vld [vmem:[#allocation7 + $0xba8] sm:$0xff]  ;;  %v4961_v33 = vld [vmem:[#allocation7 + $0xbb0] sm:$0xff] }
 0x730   : > { %8781 = vmatprep.subr.bf16.mxu0 %v8780_v27  ;;  %v8810_v27 = vpack.c.bf16 %v4957_v58, %v4955_v26  ;;  %v8812_v21 = vpack.c.bf16 %v4962_v4, %v4960_v41  ;;  %v8814_v29 = vpack.c.bf16 %v4961_v33, %v4959_v25  ;;  %v5112_v41 = vld [vmem:[#allocation16] sm:$0xff]  ;;  %v5113_v4 = vld [vmem:[#allocation16 + $0x8] sm:$0x3] }
 0x731   : > { %v5229_v25 = vld [vmem:[#allocation18 + $0x10] sm:$0xff] }
 0x732   : > { %4904 = vmatmul.mubr.f32.gmra.mrb[14].mxu0 %v4822_v7 }
 0x733   : > { %7340 = vmatprep.mubr.msk.f32.mxu0 %vm3737_vm11, %v4820_v54  ;;  %8783 = vmatpush1.bf16.msra.mxu0 %v8782_v12  ;;  %v4964_v12 = vld [vmem:[#allocation7 + $0xbc8] sm:$0xff]  ;;  %v4963_v54 = vld [vmem:[#allocation7 + $0xbc0] sm:$0xff] }
 0x734   : > { %8785 = vmatprep.subr.bf16.mxu0 %v8784_v34  ;;  %v4970_v34 = vpop.permute.xlu0 %4969 }
 0x735   : > { %v4978_v7 = vsel %vm4050_vm12, %v4970_v34, %v4972_v35 }
 0x736   : > { %4910 = vmatmul.mubr.f32.gmra.mrb[16].mxu0 %v4823_v32 }
 0x737   : > { %8787 = vmatpush1.bf16.msra.mxu0 %v8786_v46  ;;  %7341 = vmatprep.mubr.msk.f32.mxu0 %vm3737_vm11, %v4968_v37  ;;  %v3683_v46 = vld [vmem:[#allocation9] sm:$0x3] }
 0x738   : > { %8789 = vmatprep.subr.bf16.mxu0 %v8788_v9  ;;  %v4974_v3 = vpop.permute.xlu0 %4973  ;;  %v3688_v9 = vrot.slane %v3683_v46, %v673_v45  ;;  %v3692_v20 = vrot.slane %v3683_v46, %v677_v43  ;;  %v5237_v46 = vld [vmem:[#allocation18 + $0x50] sm:$0xff] }
 0x739   : > { %v4979_v56 = vsel %vm4050_vm12, %v4974_v3, %v4976_v53  ;;  %v5235_v3 = vld [vmem:[#allocation18 + $0x40] sm:$0xff] }
 0x73a   : > { %v3830_v30 = vadd.f32 %v11384_v14, %v3688_v9  ;;  %v3831_v32 = vadd.f32 %v11386_v42, %v3692_v20  ;;  %v3833_v48 = vadd.f32 %v11390_v22, %v3692_v20  ;;  %v3834_v52 = vadd.f32 %v11392_v39, %v3688_v9 }
 0x73b   : > { %8791 = vmatpush1.bf16.msra.mxu0 %v8790_v2  ;;  %v3835_v14 = vadd.f32 %v11394_v51, %v3692_v20 }
 0x73c   : > { %8793 = vmatprep.subr.bf16.mxu0 %v8792_v44  ;;  %v3832_v44 = vadd.f32 %v11388_v15, %v3688_v9  ;;  %v5238_v9 = vld [vmem:[#allocation18 + $0x58] sm:$0xff] }
 0x73d   : > { %v8836_v20 = vpack.c.bf16 %v5238_v9, %v5237_v46  ;;  %v5504_v9 = vld [vmem:[#allocation10 + $0x80] sm:$0xff] }
 0x73f   : > { %8795 = vmatpush1.bf16.msra.mxu0 %v8794_v62 }
 0x740   : > { %8797 = vmatprep.subr.bf16.mxu0 %v8796_v50 }
 0x743   : > { %8799 = vmatpush1.bf16.msra.mxu0 %v8798_v10 }
 0x744   : > { %8801 = vmatprep.subr.bf16.mxu0 %v8800_v59 }
 0x747   : > { %8803 = vmatpush1.bf16.msra.mxu0 %v8802_v19 }
 0x748   : > { %8805 = vmatprep.subr.bf16.mxu0 %v8804_v23 }
 0x74b   : > { %8807 = vmatpush1.bf16.msra.mxu0 %v8806_v28 }
 0x74c   : > { %8809 = vmatprep.subr.bf16.mxu0 %v8808_v38 }
 0x74f   : > { %8811 = vmatpush1.bf16.msra.mxu0 %v8810_v27  ;;  %v5227_v27 = vld [vmem:[#allocation18] sm:$0xff] }
 0x750   : > { %8813 = vmatprep.subr.bf16.mxu0 %v8812_v21  ;;  %v5228_v21 = vld [vmem:[#allocation18 + $0x8] sm:$0xff] }
 0x751   : > { %v8821_v33 = vpack.c.bf16 %v5228_v21, %v5227_v27 }
 0x753   : > { %8815 = vmatpush1.bf16.msra.mxu0 %v8814_v29  ;;  %v5230_v29 = vld [vmem:[#allocation18 + $0x18] sm:$0xff] }
 0x754   : > { %5029 = vmatprep.subr.mxu0 %v4964_v12  ;;  %v8824_v31 = vpack.c.bf16 %v5230_v29, %v5229_v25  ;;  %v5231_v12 = vld [vmem:[#allocation18 + $0x20] sm:$0xff] }
 0x755   : > { %v5425_v29 = vld [vmem:[#allocation10 + $0x68] sm:$0xff] }
 0x757   : > { %5030 = vmatpush1.msra.mxu0 %v4963_v54  ;;  %v5232_v54 = vld [vmem:[#allocation18 + $0x28] sm:$0xff] }
 0x758   : > { %5054 = vmatmul.mubr.f32.vlgmr.msra.gmra.mrb[12].mxu0 %v4977_v1  ;;  %v8827_v34 = vpack.c.bf16 %v5232_v54, %v5231_v12  ;;  %v5234_v1 = vld [vmem:[#allocation18 + $0x38] sm:$0xff] }
 0x759   : > { %7342 = vmatprep.mubr.msk.f32.mxu0 %vm3737_vm11, %v4972_v35  ;;  %v5233_v35 = vld [vmem:[#allocation18 + $0x30] sm:$0xff] }
 0x75c   : > { %5060 = vmatmul.mubr.f32.gmra.mrb[14].mxu0 %v4978_v7  ;;  %v8830_v7 = vpack.c.bf16 %v5234_v1, %v5233_v35 }
 0x75d   : > { %7343 = vmatprep.mubr.msk.f32.mxu0 %vm3737_vm11, %v4976_v53  ;;  %v5236_v53 = vld [vmem:[#allocation18 + $0x48] sm:$0xff] }
 0x760   : > { %5066 = vmatmul.mubr.f32.gmra.mrb[16].mxu0 %v4979_v56  ;;  %v8833_v56 = vpack.c.bf16 %v5236_v53, %v5235_v3  ;;  %v5426_v53 = vld [vmem:[#allocation10 + $0x70] sm:$0xff] }
 0x82b   : > { %v5055_v24 = vpop.f32.mrb[12].mxu0 }
 0x82c   : > { %v9025_v40 = vadd.f32 %v5055_v24, %v3830_v30  ;;  %v5057_v37 = vpop.f32.mrb[13].mxu0  ;;  %v5239_v30 = vld [vmem:[#allocation18 + $0x60] sm:$0xff] }
 0x82d   : > { %v9027_v2 = vadd.f32 %v5057_v37, %v3831_v32  ;;  %v5240_v32 = vld [vmem:[#allocation18 + $0x68] sm:$0xff]  ;;  %v5242_v37 = vld [vmem:[#allocation18 + $0x78] sm:$0xff] }
 0x82e   : > { %v5078_v55 = vmax.f32 %v9025_v40, 0.0  ;;  %v8839_v24 = vpack.c.bf16 %v5240_v32, %v5239_v30  ;;  %v5241_v40 = vld [vmem:[#allocation18 + $0x70] sm:$0xff]  ;;  %v5506_v32 = vld [vmem:[#allocation10 + $0x90] sm:$0xff] }
 0x82f   : > { %v5061_v47 = vpop.f32.mrb[14].mxu0  ;;  %v5079_v45 = vmax.f32 %v9027_v2, 0.0  ;;  %v8842_v2 = vpack.c.bf16 %v5242_v37, %v5241_v40 }
 0x830   : > { %v9029_v6 = vadd.f32 %v5061_v47, %v3832_v44  ;;  %v5063_v62 = vpop.f32.mrb[15].mxu0  ;;  %v5090_v8 = vrot.slane %v5078_v55, 1  ;;  %v5243_v44 = vld [vmem:[#allocation18 + $0x80] sm:$0xff] }
 0x831   : > { %v9031_v50 = vadd.f32 %v5063_v62, %v3833_v48  ;;  %v5093_v15 = vrot.slane %v5079_v45, 1  ;;  %v5244_v48 = vld [vmem:[#allocation18 + $0x88] sm:$0xff] }
 0x832   : > { %v5080_v43 = vmax.f32 %v9029_v6, 0.0  ;;  %v8845_v47 = vpack.c.bf16 %v5244_v48, %v5243_v44  ;;  %v5246_v6 = vld [vmem:[#allocation18 + $0x98] sm:$0xff] }
 0x833   : > { %v5081_v42 = vmax.f32 %v9031_v50, 0.0  ;;  %v5067_v5 = vpop.f32.mrb[16].mxu0  ;;  %v5509_v44 = vld [vmem:[#allocation10 + $0xa8] sm:$0xff] }
 0x834   : > { %v5091_v63 = vrot.slane %v5080_v43, 1  ;;  %v9033_v60 = vadd.f32 %v5067_v5, %v3834_v52  ;;  %v5069_v10 = vpop.f32.mrb[17].mxu0 }
 0x835   : > { %v5094_v59 = vrot.slane %v5081_v42, 1  ;;  %v9035_v22 = vadd.f32 %v5069_v10, %v3835_v14  ;;  %v5336_v14 = vld [vmem:[#allocation10] sm:$0xff] }
 0x836   : > { %v5092_v36 = vsel %vm1498_vm4, %v5090_v8, %v5091_v63  ;;  %v5082_v11 = vmax.f32 %v9033_v60, 0.0 }
 0x837   : > { %v5106_v17 = vmax.f32 %v5078_v55, %v5092_v36  ;;  %v5083_v13 = vmax.f32 %v9035_v22, 0.0  ;;  %v5095_v19 = vsel %vm1498_vm4, %v5093_v15, %v5094_v59  ;;  %v5245_v55 = vld [vmem:[#allocation18 + $0x90] sm:$0xff] }
 0x838   : > { %v5096_v39 = vrot.slane %v5082_v11, 1  ;;  %v5107_v23 = vmax.f32 %v5079_v45, %v5095_v19  ;;  %v8848_v62 = vpack.c.bf16 %v5246_v6, %v5245_v55  ;;  %v5339_v22 = vld [vmem:[#allocation10 + $0x18] sm:$0xff] }
 0x839   : > { %v5098_v18 = vrot.slane %v5083_v13, 1  ;;  %v5511_v55 = vld [vmem:[#allocation10 + $0xb8] sm:$0xff] }
 0x83a   : > { %v5097_v51 = vsel %vm1498_vm4, %v5091_v63, %v5096_v39  ;;  %v5110_v58 = vmax.f32 %v5082_v11, %v5096_v39 }
 0x83b   : > { %v5108_v61 = vmax.f32 %v5080_v43, %v5097_v51  ;;  %v5099_v49 = vsel %vm1498_vm4, %v5094_v59, %v5098_v18  ;;  %v5111_v26 = vmax.f32 %v5083_v13, %v5098_v18  ;;  %v5338_v59 = vld [vmem:[#allocation10 + $0x10] sm:$0xff]  ;;  %v5341_v18 = vld [vmem:[#allocation10 + $0x28] sm:$0xff] }
 0x83c   : > { %v5109_v16 = vmax.f32 %v5081_v42, %v5099_v49  ;;  %v5337_v42 = vld [vmem:[#allocation10 + $0x8] sm:$0xff]  ;;  %v8854_v19 = vpack.c.bf16 %v5339_v22, %v5338_v59  ;;  %v5343_v49 = vld [vmem:[#allocation10 + $0x38] sm:$0xff]  ;;  %v5674_v59 = vld [vmem:[#allocation10 + $0x100] sm:$0xff] }
 0x83d   : > { %v8818_v28 = vpack.c.bf16 %v5108_v61, %v5106_v17  ;;  %v8851_v10 = vpack.c.bf16 %v5337_v42, %v5336_v14  ;;  %v5342_v61 = vld [vmem:[#allocation10 + $0x30] sm:$0xff]  ;;  %v5675_v22 = vld [vmem:[#allocation10 + $0x108] sm:$0xff] }
 0x83e   : > { %v8816_v38 = vpack.c.bf16 %v5109_v16, %v5107_v23  ;;  %v5340_v23 = vld [vmem:[#allocation10 + $0x20] sm:$0xff]  ;;  %v8860_v16 = vpack.c.bf16 %v5343_v49, %v5342_v61 }
 0x83f   : > { %v8857_v51 = vpack.c.bf16 %v5341_v18, %v5340_v23  ;;  %v5680_v18 = vld [vmem:[#allocation10 + $0x130] sm:$0xff]  ;;  %v5758_v49 = vld [vmem:[#allocation10 + $0x140] sm:$0xff] }
 0x840   : > { %8817 = vmatprep.subr.bf16.mxu1 %v8816_v38  ;;  %v5421_v38 = vld [vmem:[#allocation10 + $0x48] sm:$0xff] }
 0x841   : > { %8819 = vmatpush1.bf16.msra.mxu1 %v8818_v28  ;;  %v5420_v28 = vld [vmem:[#allocation10 + $0x40] sm:$0xff] }
 0x842   : > { %7344 = vmatprep.subr.msk.mxu1 %vm5121_vm13, %v5111_v26  ;;  %v8863_v26 = vpack.c.bf16 %v5421_v38, %v5420_v28  ;;  %v5760_v38 = vld [vmem:[#allocation10 + $0x150] sm:$0xff] }
 0x845   : > { %7345 = vmatpush1.msk.msra.mxu1 %vm5121_vm13, %v5110_v58 }
 0x846   : > { %7346 = vmatmul.mubr.msk.f32.vlgmr.msra.gmra.mrb[36].mxu1 %vm5114_vm14, %v5112_v41  ;;  %8820 = vmatprep.subr.bf16.mxu1 %v9858_v57  ;;  %v5422_v41 = vld [vmem:[#allocation10 + $0x50] sm:$0xff] }
 0x847   : > { %5198 = vmatprep.mubr.f32.mxu1 %v9854_v0  ;;  %8822 = vmatpush1.bf16.msra.mxu1 %v8821_v33  ;;  %v5424_v33 = vld [vmem:[#allocation10 + $0x60] sm:$0xff] }
 0x848   : > { %8823 = vmatprep.subr.bf16.mxu1 %v9858_v57  ;;  %v8869_v3 = vpack.c.bf16 %v5425_v29, %v5424_v33  ;;  %v5765_v33 = vld [vmem:[#allocation10 + $0x178] sm:$0xff] }
 0x84a   : > { %7347 = vmatmul.mubr.msk.f32.gmra.mrb[38].mxu1 %vm5114_vm14, %v5113_v4  ;;  %v5423_v4 = vld [vmem:[#allocation10 + $0x58] sm:$0xff] }
 0x84b   : > { %8825 = vmatpush1.bf16.msra.mxu1 %v8824_v31  ;;  %v8866_v21 = vpack.c.bf16 %v5423_v4, %v5422_v41  ;;  %v5762_v4 = vld [vmem:[#allocation10 + $0x160] sm:$0xff] }
 0x84c   : > { %8826 = vmatprep.subr.bf16.mxu1 %v9858_v57 }
 0x84f   : > { %8828 = vmatpush1.bf16.msra.mxu1 %v8827_v34 }
 0x850   : > { %8829 = vmatprep.subr.bf16.mxu1 %v9858_v57 }
 0x853   : > { %8831 = vmatpush1.bf16.msra.mxu1 %v8830_v7 }
 0x854   : > { %8832 = vmatprep.subr.bf16.mxu1 %v9858_v57 }
 0x857   : > { %8834 = vmatpush1.bf16.msra.mxu1 %v8833_v56  ;;  %v5427_v56 = vld [vmem:[#allocation10 + $0x78] sm:$0xff] }
 0x858   : > { %8835 = vmatprep.subr.bf16.mxu1 %v9858_v57  ;;  %v8872_v46 = vpack.c.bf16 %v5427_v56, %v5426_v53  ;;  %v5846_v53 = vld [vmem:[#allocation10 + $0x1a0] sm:$0xff]  ;;  %v5847_v56 = vld [vmem:[#allocation10 + $0x1a8] sm:$0xff] }
 0x85b   : > { %8837 = vmatpush1.bf16.msra.mxu1 %v8836_v20  ;;  %v5505_v20 = vld [vmem:[#allocation10 + $0x88] sm:$0xff] }
 0x85c   : > { %8838 = vmatprep.subr.bf16.mxu1 %v9858_v57  ;;  %v8875_v30 = vpack.c.bf16 %v5505_v20, %v5504_v9  ;;  %v5848_v9 = vld [vmem:[#allocation10 + $0x1b0] sm:$0xff]  ;;  %v5849_v20 = vld [vmem:[#allocation10 + $0x1b8] sm:$0xff] }
 0x85f   : > { %8840 = vmatpush1.bf16.msra.mxu1 %v8839_v24  ;;  %v5507_v24 = vld [vmem:[#allocation10 + $0x98] sm:$0xff] }
 0x860   : > { %8841 = vmatprep.subr.bf16.mxu1 %v9858_v57  ;;  %v8878_v37 = vpack.c.bf16 %v5507_v24, %v5506_v32  ;;  %v5927_v32 = vld [vmem:[#allocation10 + $0x1c0] sm:$0xff]  ;;  %v5928_v24 = vld [vmem:[#allocation10 + $0x1c8] sm:$0xff] }
 0x863   : > { %8843 = vmatpush1.bf16.msra.mxu1 %v8842_v2  ;;  %v5508_v2 = vld [vmem:[#allocation10 + $0xa0] sm:$0xff] }
 0x864   : > { %8844 = vmatprep.subr.bf16.mxu1 %v9858_v57  ;;  %v8881_v48 = vpack.c.bf16 %v5509_v44, %v5508_v2  ;;  %v5930_v2 = vld [vmem:[#allocation10 + $0x1d8] sm:$0xff] }
 0x867   : > { %8846 = vmatpush1.bf16.msra.mxu1 %v8845_v47  ;;  %v5510_v47 = vld [vmem:[#allocation10 + $0xb0] sm:$0xff] }
 0x868   : > { %8847 = vmatprep.subr.bf16.mxu1 %v9858_v57  ;;  %v8884_v6 = vpack.c.bf16 %v5511_v55, %v5510_v47  ;;  %v5932_v47 = vld [vmem:[#allocation10 + $0x1e8] sm:$0xff] }
 0x86b   : > { %8849 = vmatpush1.bf16.msra.mxu1 %v8848_v62  ;;  %v5588_v62 = vld [vmem:[#allocation10 + $0xc0] sm:$0xff] }
 0x86c   : > { %8850 = vmatprep.subr.bf16.mxu1 %v9858_v57 }
 0x919   : > { %v5194_v45 = vpop.f32.mrb[36].mxu1 }
 0x91a   : > { %v5196_v50 = vpop.f32.mrb[37].mxu1  ;;  %5209 = vrot.lane.b32.xlu0 %v5194_v45, %s9860_s3 }
 0x91b   : > { %5211 = vrot.lane.b32.xlu1 %v5196_v50, %s9860_s3 }
 0x91d   : > { %v5200_v52 = vpop.f32.mrb[38].mxu1 }
 0x91e   : > { %v5202_v43 = vpop.f32.mrb[39].mxu1  ;;  %5213 = vrot.lane.b32.xlu0 %v5200_v52, %s9860_s3 }
 0x91f   : > { %5215 = vrot.lane.b32.xlu1 %v5202_v43, %s9860_s3 }
 0x98c   : > { %v5210_v5 = vpop.permute.xlu0 %5209 }
 0x98d   : > { %v5212_v8 = vpop.permute.xlu1 %5211 }
 0x98e   : > { %v5217_v63 = vsel %vm3392_vm9, %v5210_v5, %v5212_v8  ;;  %v5224_v60 = vmax.f32 %v5196_v50, %v5212_v8  ;;  %v5592_v5 = vld [vmem:[#allocation10 + $0xe0] sm:$0xff]  ;;  %v5593_v8 = vld [vmem:[#allocation10 + $0xe8] sm:$0xff] }
 0x98f   : > { %v5223_v15 = vmax.f32 %v5194_v45, %v5217_v63  ;;  %v5589_v45 = vld [vmem:[#allocation10 + $0xc8] sm:$0xff]  ;;  %v8893_v63 = vpack.c.bf16 %v5593_v8, %v5592_v5  ;;  %v6015_v8 = vld [vmem:[#allocation10 + $0x220] sm:$0xff] }
 0x990   : > { %7348 = vmatprep.mubr.msk.f32.mxu1 %vm5247_vm15, %v5224_v60  ;;  %v5214_v36 = vpop.permute.xlu0 %5213  ;;  %v8887_v50 = vpack.c.bf16 %v5589_v45, %v5588_v62  ;;  %v5594_v60 = vld [vmem:[#allocation10 + $0xf0] sm:$0xff]  ;;  %v5934_v62 = vld [vmem:[#allocation10 + $0x1f8] sm:$0xff] }
 0x991   : > { %5319 = vmatmul.mubr.f32.vlgmr.msra.gmra.mrb[40].mxu1 %v5223_v15  ;;  %v5216_v11 = vpop.permute.xlu1 %5215 }
 0x992   : > { %v5218_v17 = vsel %vm3392_vm9, %v5214_v36, %v5216_v11  ;;  %v5226_v13 = vmax.f32 %v5202_v43, %v5216_v11  ;;  %8852 = vmatpush3.bf16.msra.mxu1 %v8851_v10  ;;  %v5591_v43 = vld [vmem:[#allocation10 + $0xd8] sm:$0xff]  ;;  %v8899_v36 = vpack.c.bf16 %v5675_v22, %v5674_v59  ;;  %v5676_v11 = vld [vmem:[#allocation10 + $0x110] sm:$0xff] }
 0x993   : > { %v5225_v39 = vmax.f32 %v5200_v52, %v5218_v17  ;;  %8853 = vmatprep.subr.bf16.mxu1 %v9858_v57  ;;  %v5590_v52 = vld [vmem:[#allocation10 + $0xd0] sm:$0xff]  ;;  %v5595_v10 = vld [vmem:[#allocation10 + $0xf8] sm:$0xff] }
 0x994   : > { %7349 = vmatprep.mubr.msk.f32.mxu1 %vm5247_vm15, %v5226_v13  ;;  %v8890_v42 = vpack.c.bf16 %v5591_v43, %v5590_v52  ;;  %v8896_v15 = vpack.c.bf16 %v5595_v10, %v5594_v60  ;;  %v5677_v17 = vld [vmem:[#allocation10 + $0x118] sm:$0xff]  ;;  %v6013_v43 = vld [vmem:[#allocation10 + $0x210] sm:$0xff] }
 0x995   : > { %5324 = vmatmul.mubr.f32.gmra.mrb[42].mxu1 %v5225_v39  ;;  %v8902_v13 = vpack.c.bf16 %v5677_v17, %v5676_v11  ;;  %v5679_v39 = vld [vmem:[#allocation10 + $0x128] sm:$0xff]  ;;  %v6017_v10 = vld [vmem:[#allocation10 + $0x230] sm:$0xff] }
 0x996   : > { %8855 = vmatpush3.bf16.msra.mxu1 %v8854_v19  ;;  %7852 = vmatprep.mubr.msk.f32.mxu1 %vm9859_vm8, %v9854_v0  ;;  %v5678_v19 = vld [vmem:[#allocation10 + $0x120] sm:$0xff] }
 0x997   : > { %8856 = vmatprep.subr.bf16.mxu1 %v9858_v57  ;;  %v8905_v23 = vpack.c.bf16 %v5679_v39, %v5678_v19 }
 0x99a   : > { %8858 = vmatpush3.bf16.msra.mxu1 %v8857_v51  ;;  %v5681_v51 = vld [vmem:[#allocation10 + $0x138] sm:$0xff] }
 0x99b   : > { %8859 = vmatprep.subr.bf16.mxu1 %v9858_v57  ;;  %v8908_v61 = vpack.c.bf16 %v5681_v51, %v5680_v18  ;;  %v6099_v18 = vld [vmem:[#allocation19] sm:$0xf]  ;;  %v6182_v51 = vld [vmem:[%s11761_s7] sm:$0xff] }
 0x99e   : > { %8861 = vmatpush3.bf16.msra.mxu1 %v8860_v16  ;;  %v5759_v16 = vld [vmem:[#allocation10 + $0x148] sm:$0xff] }
 0x99f   : > { %8862 = vmatprep.subr.bf16.mxu1 %v9858_v57  ;;  %v8911_v28 = vpack.c.bf16 %v5759_v16, %v5758_v49  ;;  %v6184_v49 = vld [vmem:[%s11761_s7 + $0x10] sm:$0xff] }
 0xa64   : > { %v5320_v58 = vpop.f32.mrb[40].mxu1 }
 0xa65   : > { %5512 = vrot.lane.b32.xlu1 %v5320_v58, %s9861_s15  ;;  %5428 = vrot.lane.b32.xlu0 %v5320_v58, %s9860_s3  ;;  %v5322_v27 = vpop.f32.mrb[41].mxu1  ;;  %v5597_v34 = vrot.slane %v5320_v58, 1  ;;  %v5850_v35 = vrot.slane %v5320_v58, 2 }
 0xa66   : > { %7853 = vmatmul.mubr.msk.f32.vlgmr.msra.gmra.mrb[44].mxu1 %vm5344_vm1, %v5320_v58  ;;  %v5763_v27 = vld [vmem:[#allocation10 + $0x168] sm:$0xff] }
 0xa67   : > { %8864 = vmatpush3.bf16.msra.mxu1 %v8863_v26  ;;  %7871 = vmatprep.mubr.msk.f32.mxu1 %vm9859_vm8, %v9854_v0  ;;  %v5761_v26 = vld [vmem:[#allocation10 + $0x158] sm:$0xff] }
 0xa68   : > { %v5325_v25 = vpop.f32.mrb[42].mxu1  ;;  %8865 = vmatprep.subr.bf16.mxu1 %v9858_v57  ;;  %v8914_v41 = vpack.c.bf16 %v5761_v26, %v5760_v38  ;;  %v6186_v26 = vld [vmem:[%s11761_s7 + $0x20] sm:$0xff] }
 0xa69   : > { %v5598_v31 = vrot.slane %v5325_v25, 1  ;;  %v5851_v12 = vrot.slane %v5325_v25, 2  ;;  %v5327_v54 = vpop.f32.mrb[43].mxu1  ;;  %v5764_v25 = vld [vmem:[#allocation10 + $0x170] sm:$0xff] }
 0xa6a   : > { %v8920_v29 = vpack.c.bf16 %v5765_v33, %v5764_v25  ;;  %v6270_v25 = vld [vmem:[%s11762_s28] sm:$0xff]  ;;  %v6271_v33 = vld [vmem:[%s11762_s28 + $0x8] sm:$0xff] }
 0xa6b   : > { %v11484_v1 = vsel %vm1498_vm4, %v5597_v34, %v5598_v31  ;;  %v11487_v7 = vsel %vm723_vm0, %v5850_v35, %v5851_v12  ;;  %8867 = vmatpush3.bf16.msra.mxu1 %v8866_v21  ;;  %v8917_v21 = vpack.c.bf16 %v5763_v27, %v5762_v4  ;;  %v5842_v31 = vld [vmem:[#allocation10 + $0x180] sm:$0xff]  ;;  %v5843_v12 = vld [vmem:[#allocation10 + $0x188] sm:$0xff]  ;;  %v5844_v34 = vld [vmem:[#allocation10 + $0x190] sm:$0xff]  ;;  %vm6100_vm0 = vcmask 56320  }
 0xa6c   : > { %5766 = vrot.lane.b32.xlu1 %v11484_v1, %s9861_s15  ;;  %5682 = vrot.lane.b32.xlu0 %v11484_v1, %s9860_s3  ;;  %v8923_v54 = vpack.c.bf16 %v5843_v12, %v5842_v31  ;;  %v5845_v35 = vld [vmem:[#allocation10 + $0x198] sm:$0xff]  ;;  %v6188_v4 = vld [vmem:[%s11761_s7 + $0x30] sm:$0xff]  ;;  %v8968_v31 = vpack.c.bf16 %v6271_v33, %v6270_v25 }
 0xa6d   : > { %8868 = vmatprep.subr.bf16.mxu1 %v9858_v57 }
 0xa6f   : > { %8870 = vmatpush3.bf16.msra.mxu1 %v8869_v3  ;;  %v8926_v3 = vpack.c.bf16 %v5845_v35, %v5844_v34  ;;  %v7366_v34 = vld [vmem:[%s11762_s28 + $0x18] sm:$0xff] }
 0xa70   : > { %6019 = vrot.lane.b32.xlu1 %v11487_v7, %s9861_s15  ;;  %5935 = vrot.lane.b32.xlu0 %v11487_v7, %s9860_s3 }
 0xa71   : > { %8871 = vmatprep.subr.bf16.mxu1 %v9858_v57 }
 0xa73   : > { %8873 = vmatpush3.bf16.msra.mxu1 %v8872_v46  ;;  %v8929_v46 = vpack.c.bf16 %v5847_v56, %v5846_v53 }
 0xa74   : > { %8874 = vmatprep.subr.bf16.mxu1 %v9858_v57 }
 0xad7   : > { %v5429_v40 = vpop.permute.xlu0 %5428  ;;  %v5513_v14 = vpop.permute.xlu1 %5512 }
 0xad8   : > { %7872 = vmatmul.mubr.msk.f32.vlgmr.msra.gmra.mrb[44].mxu1 %vm5344_vm1, %v5429_v40  ;;  %v8935_v40 = vpack.c.bf16 %v5928_v24, %v5927_v32  ;;  %v7371_v32 = vld [vmem:[%s11762_s28 + $0x30] sm:$0xff]  ;;  %v7372_v24 = vld [vmem:[%s11762_s28 + $0x38] sm:$0xff] }
 0xad9   : > { %8876 = vmatpush3.bf16.msra.mxu1 %v8875_v30  ;;  %7890 = vmatprep.mubr.msk.f32.mxu1 %vm9859_vm8, %v9854_v0  ;;  %v8932_v30 = vpack.c.bf16 %v5849_v20, %v5848_v9  ;;  %v7369_v9 = vld [vmem:[%s11762_s28 + $0x28] sm:$0xff] }
 0xada   : > { %8877 = vmatprep.subr.bf16.mxu1 %v9858_v57 }
 0xadd   : > { %8879 = vmatpush3.bf16.msra.mxu1 %v8878_v37  ;;  %v5929_v37 = vld [vmem:[#allocation10 + $0x1d0] sm:$0xff] }
 0xade   : > { %8880 = vmatprep.subr.bf16.mxu1 %v9858_v57  ;;  %v5683_v58 = vpop.permute.xlu0 %5682  ;;  %v8938_v44 = vpack.c.bf16 %v5930_v2, %v5929_v37  ;;  %v7374_v2 = vld [vmem:[%s11762_s28 + $0x40] sm:$0xff] }
 0xae1   : > { %8882 = vmatpush3.bf16.msra.mxu1 %v8881_v48  ;;  %v5931_v48 = vld [vmem:[#allocation10 + $0x1e0] sm:$0xff] }
 0xae2   : > { %8883 = vmatprep.subr.bf16.mxu1 %v9858_v57  ;;  %v8941_v55 = vpack.c.bf16 %v5932_v47, %v5931_v48  ;;  %v7377_v47 = vld [vmem:[%s11762_s28 + $0x50] sm:$0xff] }
 0xae5   : > { %8885 = vmatpush3.bf16.msra.mxu1 %v8884_v6  ;;  %v5933_v6 = vld [vmem:[#allocation10 + $0x1f0] sm:$0xff] }
 0xae6   : > { %8886 = vmatprep.subr.bf16.mxu1 %v9858_v57  ;;  %v8944_v45 = vpack.c.bf16 %v5934_v62, %v5933_v6 }
 0xae8   : > { %7891 = vmatmul.mubr.msk.f32.vlgmr.msra.gmra.mrb[44].mxu1 %vm5344_vm1, %v5513_v14  ;;  %v6014_v14 = vld [vmem:[#allocation10 + $0x218] sm:$0xff] }
 0xae9   : > { %8888 = vmatpush3.bf16.msra.mxu1 %v8887_v50  ;;  %7909 = vmatprep.mubr.msk.f32.mxu1 %vm9859_vm8, %v9854_v0  ;;  %v6012_v50 = vld [vmem:[#allocation10 + $0x208] sm:$0xff]  ;;  %v8950_v5 = vpack.c.bf16 %v6014_v14, %v6013_v43  ;;  %v7384_v14 = vld [vmem:[%s11762_s28 + $0x78] sm:$0xff] }
 0xaea   : > { %8889 = vmatprep.subr.bf16.mxu1 %v9858_v57  ;;  %v7383_v43 = vld [vmem:[%s11762_s28 + $0x70] sm:$0xff] }
 0xaed   : > { %8891 = vmatpush3.bf16.msra.mxu1 %v8890_v42  ;;  %v5936_v42 = vpop.permute.xlu0 %5935 }
 0xaee   : > { %8892 = vmatprep.subr.bf16.mxu1 %v9858_v57 }
 0xaf1   : > { %8894 = vmatpush3.bf16.msra.mxu1 %v8893_v63  ;;  %v6016_v63 = vld [vmem:[#allocation10 + $0x228] sm:$0xff] }
 0xaf2   : > { %8895 = vmatprep.subr.bf16.mxu1 %v9858_v57  ;;  %v8953_v60 = vpack.c.bf16 %v6016_v63, %v6015_v8  ;;  %v7387_v8 = vld [vmem:[%s11762_s28 + $0x88] sm:$0xff] }
 0xaf5   : > { %8897 = vmatpush3.bf16.msra.mxu1 %v8896_v15  ;;  %v6018_v15 = vld [vmem:[#allocation10 + $0x238] sm:$0xff] }
 0xaf6   : > { %8898 = vmatprep.subr.bf16.mxu1 %v9858_v57  ;;  %v8956_v59 = vpack.c.bf16 %v6018_v15, %v6017_v10 }
 0xaf8   : > { %7910 = vmatmul.mubr.msk.f32.vlgmr.msra.gmra.mrb[44].mxu1 %vm5344_vm1, %v11484_v1  ;;  %v5767_v1 = vpop.permute.xlu1 %5766 }
 0xaf9   : > { %8900 = vmatpush3.bf16.msra.mxu1 %v8899_v36  ;;  %7928 = vmatprep.mubr.msk.f32.mxu1 %vm9859_vm8, %v9854_v0  ;;  %v7350_v36 = vld [vmem:[#allocation12] ss:$0 sm:$0xff] }
 0xafa   : > { %8901 = vmatprep.subr.bf16.mxu1 %v9858_v57 }
 0xafc   : > { %v6020_v22 = vpop.permute.xlu1 %6019 }
 0xafd   : > { %8903 = vmatpush3.bf16.msra.mxu1 %v8902_v13 }
 0xafe   : > { %8904 = vmatprep.subr.bf16.mxu1 %v9858_v57 }
 0xb01   : > { %8906 = vmatpush3.bf16.msra.mxu1 %v8905_v23 }
 0xb02   : > { %8907 = vmatprep.subr.bf16.mxu1 %v9858_v57 }
 0xb05   : > { %8909 = vmatpush3.bf16.msra.mxu1 %v8908_v61  ;;  %v6183_v61 = vld [vmem:[%s11761_s7 + $0x8] sm:$0xff] }
 0xb06   : > { %8910 = vmatprep.subr.bf16.mxu1 %v9858_v57  ;;  %v8959_v16 = vpack.c.bf16 %v6183_v61, %v6182_v51 }
 0xb08   : > { %7929 = vmatmul.mubr.msk.f32.vlgmr.msra.gmra.mrb[44].mxu1 %vm5344_vm1, %v5683_v58  ;;  %v6187_v58 = vld [vmem:[%s11761_s7 + $0x28] sm:$0xff] }
 0xb09   : > { %8912 = vmatpush3.bf16.msra.mxu1 %v8911_v28  ;;  %7947 = vmatprep.mubr.msk.f32.mxu1 %vm9859_vm8, %v9854_v0  ;;  %v6185_v28 = vld [vmem:[%s11761_s7 + $0x18] sm:$0xff] }
 0xb0a   : > { %8913 = vmatprep.subr.bf16.mxu1 %v9858_v57  ;;  %v8962_v38 = vpack.c.bf16 %v6185_v28, %v6184_v49 }
 0xb0d   : > { %8915 = vmatpush3.bf16.msra.mxu1 %v8914_v41  ;;  %v8965_v41 = vpack.c.bf16 %v6187_v58, %v6186_v26 }
 0xb0e   : > { %8916 = vmatprep.subr.bf16.mxu1 %v9858_v57 }
 0xb11   : > { %8918 = vmatpush3.bf16.msra.mxu1 %v8917_v21 }
 0xb12   : > { %8919 = vmatprep.subr.bf16.mxu1 %v9858_v57 }
 0xb15   : > { %8921 = vmatpush3.bf16.msra.mxu1 %v8920_v29 }
 0xb16   : > { %8922 = vmatprep.subr.bf16.mxu1 %v9858_v57 }
 0xb18   : > { %7948 = vmatmul.mubr.msk.f32.vlgmr.msra.gmra.mrb[44].mxu1 %vm5344_vm1, %v5767_v1 }
 0xb19   : > { %8924 = vmatpush3.bf16.msra.mxu1 %v8923_v54  ;;  %7966 = vmatprep.mubr.msk.f32.mxu1 %vm9859_vm8, %v9854_v0  ;;  %v7365_v54 = vld [vmem:[%s11762_s28 + $0x10] sm:$0xff] }
 0xb1a   : > { %8925 = vmatprep.subr.bf16.mxu1 %v9858_v57  ;;  %v8971_v35 = vpack.c.bf16 %v7366_v34, %v7365_v54 }
 0xb1d   : > { %8927 = vmatpush3.bf16.msra.mxu1 %v8926_v3 }
 0xb1e   : > { %8928 = vmatprep.subr.bf16.mxu1 %v9858_v57 }
 0xb21   : > { %8930 = vmatpush3.bf16.msra.mxu1 %v8929_v46  ;;  %v7368_v46 = vld [vmem:[%s11762_s28 + $0x20] sm:$0xff] }
 0xb22   : > { %8931 = vmatprep.subr.bf16.mxu1 %v9858_v57  ;;  %v8974_v20 = vpack.c.bf16 %v7369_v9, %v7368_v46 }
 0xb25   : > { %8933 = vmatpush3.bf16.msra.mxu1 %v8932_v30 }
 0xb26   : > { %8934 = vmatprep.subr.bf16.mxu1 %v9858_v57 }
 0xb28   : > { %7967 = vmatmul.mubr.msk.f32.vlgmr.msra.gmra.mrb[44].mxu1 %vm5344_vm1, %v11487_v7  ;;  %v6011_v7 = vld [vmem:[#allocation10 + $0x200] sm:$0xff] }
 0xb29   : > { %8936 = vmatpush3.bf16.msra.mxu1 %v8935_v40  ;;  %7985 = vmatprep.mubr.msk.f32.mxu1 %vm9859_vm8, %v9854_v0  ;;  %v8947_v52 = vpack.c.bf16 %v6012_v50, %v6011_v7  ;;  %v8977_v40 = vpack.c.bf16 %v7372_v24, %v7371_v32  ;;  %v7381_v7 = vld [vmem:[%s11762_s28 + $0x68] sm:$0xff] }
 0xb2a   : > { %8937 = vmatprep.subr.bf16.mxu1 %v9858_v57 }
 0xb2d   : > { %8939 = vmatpush3.bf16.msra.mxu1 %v8938_v44  ;;  %v7375_v44 = vld [vmem:[%s11762_s28 + $0x48] sm:$0xff] }
 0xb2e   : > { %8940 = vmatprep.subr.bf16.mxu1 %v9858_v57  ;;  %v8980_v48 = vpack.c.bf16 %v7375_v44, %v7374_v2 }
 0xb31   : > { %8942 = vmatpush3.bf16.msra.mxu1 %v8941_v55  ;;  %v7378_v55 = vld [vmem:[%s11762_s28 + $0x58] sm:$0xff] }
 0xb32   : > { %8943 = vmatprep.subr.bf16.mxu1 %v9858_v57  ;;  %v8983_v6 = vpack.c.bf16 %v7378_v55, %v7377_v47 }
 0xb35   : > { %8945 = vmatpush3.bf16.msra.mxu1 %v8944_v45  ;;  %v7380_v45 = vld [vmem:[%s11762_s28 + $0x60] sm:$0xff] }
 0xb36   : > { %8946 = vmatprep.subr.bf16.mxu1 %v9858_v57  ;;  %v8986_v50 = vpack.c.bf16 %v7381_v7, %v7380_v45 }
 0xb38   : > { %7986 = vmatmul.mubr.msk.f32.vlgmr.msra.gmra.mrb[44].mxu1 %vm5344_vm1, %v5936_v42  ;;  %v8989_v42 = vpack.c.bf16 %v7384_v14, %v7383_v43 }
 0xb39   : > { %8948 = vmatpush3.bf16.msra.mxu1 %v8947_v52  ;;  %8004 = vmatprep.mubr.msk.f32.mxu1 %vm9859_vm8, %v9854_v0 }
 0xb3a   : > { %8949 = vmatprep.subr.bf16.mxu1 %v9858_v57 }
 0xb3d   : > { %8951 = vmatpush3.bf16.msra.mxu1 %v8950_v5  ;;  %v7386_v5 = vld [vmem:[%s11762_s28 + $0x80] sm:$0xff] }
 0xb3e   : > { %8952 = vmatprep.subr.bf16.mxu1 %v9858_v57  ;;  %v8992_v63 = vpack.c.bf16 %v7387_v8, %v7386_v5 }
 0xb41   : > { %8954 = vmatpush3.bf16.msra.mxu1 %v8953_v60 }
 0xb42   : > { %8955 = vmatprep.subr.bf16.mxu1 %v9858_v57 }
 0xb45   : > { %8957 = vmatpush3.bf16.msra.mxu1 %v8956_v59 }
 0xb46   : > { %8007 = vmatprep.subr.mxu1 %v9854_v0 }
 0xb48   : > { %8005 = vmatmul.mubr.msk.f32.vlgmr.msra.gmra.mrb[44].mxu1 %vm5344_vm1, %v6020_v22 }
 0xb49   : > { %8009 = vmatprep.mubr.msk.f32.mxu1 %vm9859_vm8, %v9854_v0 }
 0xc1b   : > { %v6089_v11 = vpop.f32.mrb[44].mxu1 }
 0xc1c   : > { %v9036_v17 = vadd.f32 %v7350_v36, %v6089_v11  ;;  %v8006_v13 = vpop.f32.mrb[45].mxu1 }
 0xc1e   : > { %v6094_v19 = vmax.f32 %v9036_v17, 0.0 }
 0xc20   : > { %v6096_v39 = vrot.slane %v6094_v19, 1 }
 0xc22   : > { %v6098_v23 = vmax.f32 %v6094_v19, %v6096_v39 }
 0xc24   : > { %8008 = vmatpush3.msk.msra.mxu1 %vm1498_vm4, %v6098_v23  ;;  %vm6970_vm4 = vcmask 9216  }
 0xc25   : > { %8010 = vmatmul.mubr.msk.f32.vlgmr.msra.gmra.mrb[46].mxu1 %vm6100_vm0, %v6099_v18  ;;  %8958 = vmatprep.subr.bf16.mxu1 %v9858_v57 }
 0xc26   : > { %8026 = vmatprep.mubr.msk.f32.mxu1 %vm9859_vm8, %v9854_v0  ;;  %8960 = vmatpush3.bf16.msra.mxu1 %v8959_v16 }
 0xc27   : > { %8961 = vmatprep.subr.bf16.mxu1 %v9858_v57 }
 0xc2a   : > { %8963 = vmatpush3.bf16.msra.mxu1 %v8962_v38 }
 0xc2b   : > { %8964 = vmatprep.subr.bf16.mxu1 %v9858_v57 }
 0xc2e   : > { %8966 = vmatpush3.bf16.msra.mxu1 %v8965_v41 }
 0xc2f   : > { %8024 = vmatprep.subr.mxu1 %v9854_v0 }
 0xc32   : > { %8025 = vmatpush3.msra.mxu1 %v6188_v4 }
 0xc33   : > { %8967 = vmatprep.subr.bf16.mxu1 %v9858_v57 }
 0xcf8   : > { %v6173_v27 = vpop.f32.mrb[46].mxu1 }
 0xcf9   : > { %6178 = vrot.lane.b32.xlu0 %v6173_v27, %s9860_s3  ;;  %v8011_v21 = vpop.f32.mrb[47].mxu1 }
 0xd6b   : > { %v6179_v29 = vpop.permute.xlu0 %6178 }
 0xd6c   : > { %v6181_v12 = vmax.f32 %v6173_v27, %v6179_v29 }
 0xd6e   : > { %8027 = vmatmul.mubr.msk.f32.vlgmr.msra.gmra.mrb[48].mxu1 %vm6189_vm2, %v6181_v12 }
 0xd6f   : > { %8969 = vmatpush3.bf16.msra.mxu1 %v8968_v31  ;;  %8033 = vmatprep.mubr.msk.f32.mxu1 %vm9859_vm8, %v9854_v0 }
 0xd70   : > { %8970 = vmatprep.subr.bf16.mxu1 %v9858_v57 }
 0xe41   : > { %v6259_v1 = vpop.f32.mrb[48].mxu1 }
 0xe42   : > { %6428 = vrot.lane.b32.xlu0 %v6259_v1, %s9861_s15  ;;  %6350 = vrot.lane.b32.xlu1 %v6259_v1, %s9860_s3  ;;  %v8028_v3 = vpop.f32.mrb[49].mxu1  ;;  %v6506_v53 = vrot.slane %v6259_v1, 1  ;;  %v6739_v56 = vrot.slane %v6259_v1, 2 }
 0xe43   : > { %8034 = vmatmul.mubr.msk.f32.vlgmr.msra.gmra.mrb[50].mxu1 %vm6272_vm3, %v6259_v1 }
 0xe44   : > { %8972 = vmatpush3.bf16.msra.mxu1 %v8971_v35  ;;  %8040 = vmatprep.mubr.msk.f32.mxu1 %vm9859_vm8, %v9854_v0 }
 0xe45   : > { %8973 = vmatprep.subr.bf16.mxu1 %v9858_v57 }
 0xe46   : > { %6661 = vrot.lane.b32.xlu0 %v6506_v53, %s9861_s15  ;;  %6583 = vrot.lane.b32.xlu1 %v6506_v53, %s9860_s3 }
 0xe4a   : > { %6894 = vrot.lane.b32.xlu0 %v6739_v56, %s9861_s15  ;;  %6816 = vrot.lane.b32.xlu1 %v6739_v56, %s9860_s3  ;;  %s11763_s3 = sld [smem:[#allocation36_spill]] }
 0xe50   : > { %s662_s26 = scalar_lea.vmem %s11763_s3, %s7169_s22 }
 0xeb4   : > { %v6351_v30 = vpop.permute.xlu1 %6350  ;;  %v6429_v37 = vpop.permute.xlu0 %6428 }
 0xeb5   : > { %8041 = vmatmul.mubr.msk.f32.vlgmr.msra.gmra.mrb[50].mxu1 %vm6272_vm3, %v6351_v30 }
 0xeb6   : > { %8975 = vmatpush3.bf16.msra.mxu1 %v8974_v20  ;;  %8047 = vmatprep.mubr.msk.f32.mxu1 %vm9859_vm8, %v9854_v0 }
 0xeb7   : > { %8976 = vmatprep.subr.bf16.mxu1 %v9858_v57 }
 0xeb8   : > { %v6584_v62 = vpop.permute.xlu1 %6583  ;;  %v6662_v52 = vpop.permute.xlu0 %6661 }
 0xebc   : > { %v6817_v60 = vpop.permute.xlu1 %6816  ;;  %v6895_v10 = vpop.permute.xlu0 %6894 }
 0xebd   : > { %8048 = vmatmul.mubr.msk.f32.vlgmr.msra.gmra.mrb[50].mxu1 %vm6272_vm3, %v6429_v37 }
 0xebe   : > { %8978 = vmatpush3.bf16.msra.mxu1 %v8977_v40  ;;  %8054 = vmatprep.mubr.msk.f32.mxu1 %vm9859_vm8, %v9854_v0 }
 0xebf   : > { %8979 = vmatprep.subr.bf16.mxu1 %v9858_v57 }
 0xec5   : > { %8055 = vmatmul.mubr.msk.f32.vlgmr.msra.gmra.mrb[50].mxu1 %vm6272_vm3, %v6506_v53 }
 0xec6   : > { %8981 = vmatpush3.bf16.msra.mxu1 %v8980_v48  ;;  %8061 = vmatprep.mubr.msk.f32.mxu1 %vm9859_vm8, %v9854_v0 }
 0xec7   : > { %8982 = vmatprep.subr.bf16.mxu1 %v9858_v57 }
 0xecd   : > { %8062 = vmatmul.mubr.msk.f32.vlgmr.msra.gmra.mrb[50].mxu1 %vm6272_vm3, %v6584_v62 }
 0xece   : > { %8984 = vmatpush3.bf16.msra.mxu1 %v8983_v6  ;;  %8068 = vmatprep.mubr.msk.f32.mxu1 %vm9859_vm8, %v9854_v0 }
 0xecf   : > { %8985 = vmatprep.subr.bf16.mxu1 %v9858_v57 }
 0xed5   : > { %8069 = vmatmul.mubr.msk.f32.vlgmr.msra.gmra.mrb[50].mxu1 %vm6272_vm3, %v6662_v52 }
 0xed6   : > { %8987 = vmatpush3.bf16.msra.mxu1 %v8986_v50  ;;  %8075 = vmatprep.mubr.msk.f32.mxu1 %vm9859_vm8, %v9854_v0 }
 0xed7   : > { %8988 = vmatprep.subr.bf16.mxu1 %v9858_v57 }
 0xedd   : > { %8076 = vmatmul.mubr.msk.f32.vlgmr.msra.gmra.mrb[50].mxu1 %vm6272_vm3, %v6739_v56 }
 0xede   : > { %8990 = vmatpush3.bf16.msra.mxu1 %v8989_v42  ;;  %8082 = vmatprep.mubr.msk.f32.mxu1 %vm9859_vm8, %v9854_v0 }
 0xedf   : > { %8991 = vmatprep.subr.bf16.mxu1 %v9858_v57  ;;  %v7363_v57 = vld [vmem:[#allocation13] ss:$0 sm:$0xff] }
 0xee5   : > { %8083 = vmatmul.mubr.msk.f32.vlgmr.msra.gmra.mrb[50].mxu1 %vm6272_vm3, %v6817_v60 }
 0xee6   : > { %8993 = vmatpush3.bf16.msra.mxu1 %v8992_v63  ;;  %8089 = vmatprep.mubr.msk.f32.mxu1 %vm9859_vm8, %v9854_v0 }
 0xeed   : > { %8090 = vmatmul.mubr.msk.f32.vlgmr.msra.gmra.mrb[50].mxu1 %vm6272_vm3, %v6895_v10 }
 0xfc0   : > { %v6964_v15 = vpop.f32.mrb[50].mxu1 }
 0xfc1   : > { %v9037_v59 = vadd.f32 %v7363_v57, %v6964_v15  ;;  %v8091_v22 = vpop.f32.mrb[51].mxu1 }
 0xfc3   : > { %v6969_v36 = vmax.f32 %v9037_v59, 0.0 }
 0xfc5   : > { %6971 = vst.msk [vmem:[%s662_s26] sm:$0x3] %vm6970_vm4, %v6969_v36 }
 0xfc6 PF: > { %p31_p6 = scmp.ge.s32.totalorder %s10214_s25, 4   ;;  %s11764_s18 = smov %s9826_s19 }
 0xfc7   : > { %s11765_s19 = smov %s9830_s20  ;;  %s11766_s20 = smov %s10225_s1 }
 0xfc8   : > { %s11767_s21 = smov %s10214_s25  ;;  %33 = sbr.rel (!%p31_p6) target bundleno = 17 (0x11), region = 196 }
 0xfcf   :  { %6991 = vsyncpa [#allocation3], 1 }
 0xfd0   :  { %6993 = vsyncpa [#allocation3 + $0x1], 1 }
 0xfd1   :  { %6994 = vsyncpa [#allocation5], 1 }
 0xfd2   :  { %6995 = vsyncpa [#allocation8], 1 }
 0xfd3   :  { %6996 = vsyncpa [#allocation11], 1 }
 0xfd4   :  { %6997 = vsyncpa [#allocation14], 1 }
 0xfd5   :  { %6998 = vsyncpa [#allocation17], 1 }
 0xfd6   :  { %6999 = vsyncpa [#allocation20], 1 }

</bundles_post_ra>
